<compile_context>
chip_gen: v7x
topology: tpu7x:2x2x1
jax: 0.10.0
libtpu: 0.0.40
codegen_flags: <defaults>
</compile_context>

<pallas_src>
import functools

import jax
import jax.numpy as jnp
from jax.experimental import pallas as pl
from jax.experimental.pallas import tpu as pltpu


# ----------------------------------------------------------------------------
# Pallas kernels
# ----------------------------------------------------------------------------
def _mm_fused_kernel(*refs, relu, bn, residual):
    """One N-tile of out = epilogue(A @ B).  A/B bf16, accumulate f32 on MXU.

    Epilogue (all f32):
      bn:        per-column (channel) batch-stats BatchNorm with gamma/beta
      relu:      max(., 0)
      residual:  + residual tile  (applied last: matches `x + block(x)`)
    """
    i = 0
    a_ref = refs[i]; i += 1
    b_ref = refs[i]; i += 1
    if bn:
        g_ref = refs[i]; beta_ref = refs[i + 1]; i += 2
    if residual:
        r_ref = refs[i]; i += 1
    o_ref = refs[i]

    acc = jnp.dot(a_ref[...], b_ref[...], preferred_element_type=jnp.float32)

    if bn:
        # BatchNorm2d training-mode statistics: per channel over all rows
        # (rows = every (n, h, w) position, visible because the whole M extent
        # is a single block).  Biased variance, eps = 1e-5.
        mean = jnp.mean(acc, axis=0, keepdims=True)
        var = jnp.mean((acc - mean) * (acc - mean), axis=0, keepdims=True)
        acc = (acc - mean) * jax.lax.rsqrt(var + 1e-5) * g_ref[...] + beta_ref[...]
    if relu:
        acc = jnp.maximum(acc, 0.0)
    if residual:
        acc = acc + r_ref[...]
    o_ref[...] = acc.astype(o_ref.dtype)


def _bn_kernel(x_ref, g_ref, b_ref, o_ref, *, relu):
    """Standalone BatchNorm (training-mode batch stats) + optional ReLU."""
    x = x_ref[...]
    mean = jnp.mean(x, axis=0, keepdims=True)
    var = jnp.mean((x - mean) * (x - mean), axis=0, keepdims=True)
    y = (x - mean) * jax.lax.rsqrt(var + 1e-5) * g_ref[...] + b_ref[...]
    if relu:
        y = jnp.maximum(y, 0.0)
    o_ref[...] = y.astype(o_ref.dtype)


# ----------------------------------------------------------------------------
# Pallas wrappers
# ----------------------------------------------------------------------------
def _round_up(x, m):
    return ((x + m - 1) // m) * m


def pallas_matmul_fused(a, b, *, gamma=None, beta=None, residual=None, relu=False):
    """(M, K) @ (K, N) with optional fused BN / ReLU / residual epilogue.

    * operands cast to bf16, f32 accumulation on the MXU,
    * whole M and whole K in VMEM (single K step -> no grid-step overhead),
    * N split into 128-wide tiles on a "parallel" grid axis (v7x megacore),
    * K / N zero-padded to a multiple of 128 only when misaligned (only the
      tiny final deconv layer; everything else runs pad-free).
    """
    M, K = a.shape
    K2, N = b.shape
    assert K == K2
    bn = gamma is not None
    res = residual is not None

    Kp, Np = _round_up(K, 128), _round_up(N, 128)
    a_bf = a.astype(jnp.bfloat16)
    b_bf = b.astype(jnp.bfloat16)
    if Kp != K:
        a_bf = jnp.pad(a_bf, ((0, 0), (0, Kp - K)))
        b_bf = jnp.pad(b_bf, ((0, Kp - K), (0, 0)))
    if Np != N:
        b_bf = jnp.pad(b_bf, ((0, 0), (0, Np - N)))

    tn = 128                      # >= 2 parallel N tiles whenever N >= 256
    nt = Np // tn

    in_specs = [pl.BlockSpec((M, Kp), lambda j: (0, 0)),
                pl.BlockSpec((Kp, tn), lambda j: (0, j))]
    inputs = [a_bf, b_bf]
    if bn:
        g = gamma.reshape(1, N).astype(jnp.float32)
        bt = beta.reshape(1, N).astype(jnp.float32)
        if Np != N:
            g = jnp.pad(g, ((0, 0), (0, Np - N)))
            bt = jnp.pad(bt, ((0, 0), (0, Np - N)))
        in_specs += [pl.BlockSpec((1, tn), lambda j: (0, j)),
                     pl.BlockSpec((1, tn), lambda j: (0, j))]
        inputs += [g, bt]
    if res:
        r = residual.astype(jnp.float32)
        if Np != N:
            r = jnp.pad(r, ((0, 0), (0, Np - N)))
        in_specs += [pl.BlockSpec((M, tn), lambda j: (0, j))]
        inputs += [r]

    out = pl.pallas_call(
        functools.partial(_mm_fused_kernel, relu=relu, bn=bn, residual=res),
        out_shape=jax.ShapeDtypeStruct((M, Np), jnp.float32),
        grid_spec=pltpu.PrefetchScalarGridSpec(
            num_scalar_prefetch=0,
            grid=(nt,),
            in_specs=in_specs,
            out_specs=pl.BlockSpec((M, tn), lambda j: (0, j))),
        compiler_params=pltpu.CompilerParams(
            dimension_semantics=("parallel",)),
    )(*inputs)
    return out if Np == N else out[:, :N]


def pallas_batchnorm(x_nhwc, gamma, beta, *, relu=False):
    """BatchNorm2d (training-mode batch stats) + optional ReLU.

    Explicitly tiled over C (full M per block); assumes the full M extent fits
    VMEM, which is true for the small decoder activations here.
    """
    n, h, w, c = x_nhwc.shape
    m = n * h * w
    xm = x_nhwc.reshape(m, c)
    g = gamma.reshape(1, c).astype(jnp.float32)
    b = beta.reshape(1, c).astype(jnp.float32)
    ct = 128 if c % 128 == 0 else c
    out = pl.pallas_call(
        functools.partial(_bn_kernel, relu=relu),
        out_shape=jax.ShapeDtypeStruct((m, c), jnp.float32),
        grid_spec=pltpu.PrefetchScalarGridSpec(
            num_scalar_prefetch=0,
            grid=(c // ct,),
            in_specs=[pl.BlockSpec((m, ct), lambda j: (0, j)),
                      pl.BlockSpec((1, ct), lambda j: (0, j)),
                      pl.BlockSpec((1, ct), lambda j: (0, j))],
            out_specs=pl.BlockSpec((m, ct), lambda j: (0, j))),
        compiler_params=pltpu.CompilerParams(
            dimension_semantics=("parallel",)),
    )(xm, g, b)
    return out.reshape(n, h, w, c)


# ----------------------------------------------------------------------------
# Convolution glue (im2col / weight layout / depth-to-space in JAX)
# ----------------------------------------------------------------------------
def _im2col(x_nhwc, kh, kw, pad):
    n, h, w, c = x_nhwc.shape
    xp = jnp.pad(x_nhwc, ((0, 0), (pad, pad), (pad, pad), (0, 0)))
    ho = h + 2 * pad - kh + 1
    wo = w + 2 * pad - kw + 1
    patches = []
    for dy in range(kh):
        for dx in range(kw):
            patches.append(xp[:, dy:dy + ho, dx:dx + wo, :])
    p = jnp.concatenate(patches, axis=-1)              # (n, ho, wo, kh*kw*c)
    return p.reshape(n * ho * wo, kh * kw * c), (n, ho, wo)


def _conv_weight_matrix(w_oihw):
    """PyTorch Conv2d weight (Cout, Cin, kh, kw) -> (kh*kw*Cin, Cout) matrix
    whose row order (ky, kx, cin) matches the im2col patch order."""
    co, ci, kh, kw = w_oihw.shape
    return jnp.transpose(w_oihw, (2, 3, 1, 0)).reshape(kh * kw * ci, co)


def _deconv_phase_weight(w_iohw):
    """ConvTranspose2d(k=4, s=2, p=1) weight -> phase-fused conv weight matrix.

    Returns (9*Cin, 4*Cout): rows ordered (dy, dx, cin) to match a 3x3/pad=1
    im2col of the *input*; columns ordered (ry, rx, cout), where (ry, rx) is
    the output-pixel parity (subpixel phase).  Output pixel (2q+ry, 2p+rx)
    receives kernel tap ky = 3 - 2*dy + ry (likewise kx) iff 0 <= ky < 4, so
    only 4 of the 16 taps feed each phase and no zero-dilated input is needed.
    """
    ci, co, kh, kw = w_iohw.shape
    assert (kh, kw) == (4, 4)
    zero = jnp.zeros((ci, co), w_iohw.dtype)
    row_blocks = []
    for dy in range(3):
        for dx in range(3):
            cols = []
            for ry in range(2):
                for rx in range(2):
                    ky = 3 - 2 * dy + ry
                    kx = 3 - 2 * dx + rx
                    if 0 <= ky < 4 and 0 <= kx < 4:
                        cols.append(w_iohw[:, :, ky, kx])
                    else:
                        cols.append(zero)
            row_blocks.append(jnp.concatenate(cols, axis=1))   # (Cin, 4*Cout)
    return jnp.concatenate(row_blocks, axis=0)                 # (9*Cin, 4*Cout)


def _depth_to_space(y_mat, n, h, w, c):
    """(n*h*w, 4*c) phase-major matmul output -> (n, 2h, 2w, c)."""
    y = y_mat.reshape(n, h, w, 2, 2, c)
    y = jnp.transpose(y, (0, 1, 3, 2, 4, 5))
    return y.reshape(n, 2 * h, 2 * w, c)


# ----------------------------------------------------------------------------
# Decoder forward
# ----------------------------------------------------------------------------
def init_decoder_params(key, num_res_blocks, out_channel):
    params = {"res_blocks": []}
    for _ in range(num_res_blocks):
        key, k1, k2 = jax.random.split(key, 3)
        params["res_blocks"].append({
            "w1": jax.random.normal(k1, (256, 256, 3, 3), jnp.float32) * 0.02,
            "g1": jnp.ones((256,), jnp.float32),
            "b1": jnp.zeros((256,), jnp.float32),
            "w2": jax.random.normal(k2, (256, 256, 1, 1), jnp.float32) * 0.02,
            "g2": jnp.ones((256,), jnp.float32),
            "b2": jnp.zeros((256,), jnp.float32),
        })
    key, k1, k2 = jax.random.split(key, 3)
    params["wt1"] = jax.random.normal(k1, (256, 64, 4, 4), jnp.float32) * 0.02
    params["g_d1"] = jnp.ones((64,), jnp.float32)
    params["b_d1"] = jnp.zeros((64,), jnp.float32)
    params["wt2"] = jax.random.normal(k2, (64, out_channel, 4, 4), jnp.float32) * 0.02
    return params


def decoder_forward(params, x_nchw):
    # NCHW (PyTorch) -> NHWC for the kernels; back at the end.
    x = jnp.transpose(x_nchw, (0, 2, 3, 1)).astype(jnp.float32)
    n, h, w, c = x.shape

    # res_blocks: x + BN(Conv1x1(ReLU(BN(Conv3x3(x)))))
    #   conv + BN + ReLU (+ residual) fused into the matmul epilogue:
    #   2 Pallas launches per res block.
    for rb in params["res_blocks"]:
        a, _ = _im2col(x, 3, 3, 1)                              # (M, 9*256)
        y = pallas_matmul_fused(a, _conv_weight_matrix(rb["w1"]),
                                gamma=rb["g1"], beta=rb["b1"], relu=True)
        xm = x.reshape(n * h * w, c)
        xm = pallas_matmul_fused(y, _conv_weight_matrix(rb["w2"]),
                                 gamma=rb["g2"], beta=rb["b2"],
                                 relu=False, residual=xm)
        x = xm.reshape(n, h, w, c)

    # deconv_1: ConvTranspose2d(256->64, 4, s2, p1) -> BN -> ReLU
    #   subpixel phase decomposition: one matmul, N = 4 phases * 64 ch = 256
    #   (lane-dense), then depth-to-space and a small fused BN+ReLU kernel.
    a, _ = _im2col(x, 3, 3, 1)                                  # (M, 9*256)
    y = pallas_matmul_fused(a, _deconv_phase_weight(params["wt1"]))
    x = _depth_to_space(y, n, h, w, 64)                         # (n, 2h, 2w, 64)
    x = pallas_batchnorm(x, params["g_d1"], params["b_d1"], relu=True)
    n, h, w, c = x.shape

    # deconv_2: ConvTranspose2d(64->out, 4, s2, p1) -> ReLU (fused in epilogue)
    #   N = 4*out_channel is tiny (12); total output is only ~24 KB so the
    #   lane-masked store is negligible at this size.
    a, _ = _im2col(x, 3, 3, 1)                                  # (M, 9*64)
    out_ch = params["wt2"].shape[1]
    y = pallas_matmul_fused(a, _deconv_phase_weight(params["wt2"]), relu=True)
    x = _depth_to_space(y, n, h, w, out_ch)                     # (n, 4h, 4w, out)

    return jnp.transpose(x, (0, 3, 1, 2))                       # back to NCHW


if __name__ == "__main__":
    num_res_blocks = 2
    out_channel = 3

    key = jax.random.PRNGKey(0)
    key, pkey, xkey = jax.random.split(key, 3)
    params = init_decoder_params(pkey, num_res_blocks, out_channel)

    # Decoder expects 256 input channels (per deconv_1); small spatial size.
    x = jax.random.normal(xkey, (2, 256, 8, 8), jnp.float32)

    out = jax.jit(decoder_forward)(params, x)
    out = jax.block_until_ready(out)

    assert out.shape == (2, out_channel, 32, 32), out.shape
    assert out.dtype == jnp.float32
    assert bool(jnp.all(jnp.isfinite(out)))
    assert bool(jnp.all(out >= 0.0))  # final ReLU

    print("KERNEL_OK")
</pallas_src>

<mosaic_0001>
module attributes {stable_mosaic.version = 11 : i64} {
  func.func @_mm_fused_kernel(%arg0: i32, %arg1: memref<128x2304xbf16, #tpu.memory_space<vmem>>, %arg2: memref<2304x128xbf16, #tpu.memory_space<vmem>>, %arg3: memref<1x128xf32, #tpu.memory_space<vmem>>, %arg4: memref<1x128xf32, #tpu.memory_space<vmem>>, %arg5: memref<128x128xf32, #tpu.memory_space<vmem>>) attributes {dimension_semantics = [#tpu.dimension_semantics<parallel>], iteration_bounds = array<i64: 2>, scalar_prefetch = 0 : i64, scratch_operands = 0 : i64, tpu.core_type = #tpu.core_type<tc>, window_params = [{pipeline_mode = #tpu.pipeline_mode<synchronous>, transform_indices = @transform_0, window_bounds = array<i64: 128, 2304>}, {transform_indices = @transform_1, window_bounds = array<i64: 2304, 128>}, {transform_indices = @transform_2, window_bounds = array<i64: 1, 128>}, {transform_indices = @transform_3, window_bounds = array<i64: 1, 128>}, {transform_indices = @transform_4, window_bounds = array<i64: 128, 128>}]} {
    %c0 = arith.constant 0 : index
    %c0_0 = arith.constant 0 : index
    %0 = vector.load %arg1[%c0, %c0_0] : memref<128x2304xbf16, #tpu.memory_space<vmem>>, vector<128x2304xbf16>
    %c0_1 = arith.constant 0 : index
    %c0_2 = arith.constant 0 : index
    %1 = vector.load %arg2[%c0_1, %c0_2] : memref<2304x128xbf16, #tpu.memory_space<vmem>>, vector<2304x128xbf16>
    %cst = arith.constant dense<0.000000e+00> : vector<128x128xf32>
    %2 = tpu.matmul %0, %1, %cst {dimension_numbers = #tpu.dot_dimension_numbers<[1], [0], [0], [1], [0, 0, 1, 1], [], []>} : vector<128x2304xbf16>, vector<2304x128xbf16>, vector<128x128xf32> -> vector<128x128xf32>
    %cst_3 = arith.constant dense<0.000000e+00> : vector<128xf32>
    %3 = vector.multi_reduction <add>, %2, %cst_3 [0] : vector<128x128xf32> to vector<128xf32>
    %4 = vector.shape_cast %3 : vector<128xf32> to vector<1x128xf32>
    %cst_4 = arith.constant 1.280000e+02 : f32
    %5 = vector.broadcast %cst_4 : f32 to vector<1x128xf32>
    %6 = arith.divf %4, %5 : vector<1x128xf32>
    %7 = vector.broadcast %6 : vector<1x128xf32> to vector<128x128xf32>
    %8 = arith.subf %2, %7 : vector<128x128xf32>
    %9 = vector.broadcast %6 : vector<1x128xf32> to vector<128x128xf32>
    %10 = arith.subf %2, %9 : vector<128x128xf32>
    %11 = arith.mulf %8, %10 : vector<128x128xf32>
    %cst_5 = arith.constant dense<0.000000e+00> : vector<128xf32>
    %12 = vector.multi_reduction <add>, %11, %cst_5 [0] : vector<128x128xf32> to vector<128xf32>
    %13 = vector.shape_cast %12 : vector<128xf32> to vector<1x128xf32>
    %cst_6 = arith.constant 1.280000e+02 : f32
    %14 = vector.broadcast %cst_6 : f32 to vector<1x128xf32>
    %15 = arith.divf %13, %14 : vector<1x128xf32>
    %16 = vector.broadcast %6 : vector<1x128xf32> to vector<128x128xf32>
    %17 = arith.subf %2, %16 : vector<128x128xf32>
    %cst_7 = arith.constant 9.99999974E-6 : f32
    %18 = vector.broadcast %cst_7 : f32 to vector<1x128xf32>
    %19 = arith.addf %15, %18 : vector<1x128xf32>
    %20 = math.rsqrt %19 : vector<1x128xf32>
    %21 = vector.broadcast %20 : vector<1x128xf32> to vector<128x128xf32>
    %22 = arith.mulf %17, %21 : vector<128x128xf32>
    %c0_8 = arith.constant 0 : index
    %c0_9 = arith.constant 0 : index
    %23 = vector.load %arg3[%c0_8, %c0_9] : memref<1x128xf32, #tpu.memory_space<vmem>>, vector<1x128xf32>
    %24 = vector.broadcast %23 : vector<1x128xf32> to vector<128x128xf32>
    %25 = arith.mulf %22, %24 : vector<128x128xf32>
    %c0_10 = arith.constant 0 : index
    %c0_11 = arith.constant 0 : index
    %26 = vector.load %arg4[%c0_10, %c0_11] : memref<1x128xf32, #tpu.memory_space<vmem>>, vector<1x128xf32>
    %27 = vector.broadcast %26 : vector<1x128xf32> to vector<128x128xf32>
    %28 = arith.addf %25, %27 : vector<128x128xf32>
    %cst_12 = arith.constant 0.000000e+00 : f32
    %29 = vector.broadcast %cst_12 : f32 to vector<128x128xf32>
    %30 = arith.maximumf %28, %29 : vector<128x128xf32>
    %c0_13 = arith.constant 0 : index
    %c0_14 = arith.constant 0 : index
    %31 = vector.load %arg5[%c0_13, %c0_14] : memref<128x128xf32, #tpu.memory_space<vmem>>, vector<128x128xf32>
    tpu.vector_store %arg5[%c0_13, %c0_14], %30 {strides = array<i32>} : memref<128x128xf32, #tpu.memory_space<vmem>>, vector<128x128xf32>,
    return
  }
  func.func @transform_0(%arg0: i32) -> (i32, i32) {
    %c0_i32 = arith.constant 0 : i32
    %c0_i32_0 = arith.constant 0 : i32
    %c0_i32_1 = arith.constant 0 : i32
    return %c0_i32, %c0_i32_0 : i32, i32
  }
  func.func @transform_1(%arg0: i32) -> (i32, i32) {
    %c0_i32 = arith.constant 0 : i32
    %c0_i32_0 = arith.constant 0 : i32
    return %c0_i32, %arg0 : i32, i32
  }
  func.func @transform_2(%arg0: i32) -> (i32, i32) {
    %c0_i32 = arith.constant 0 : i32
    %c0_i32_0 = arith.constant 0 : i32
    return %c0_i32, %arg0 : i32, i32
  }
  func.func @transform_3(%arg0: i32) -> (i32, i32) {
    %c0_i32 = arith.constant 0 : i32
    %c0_i32_0 = arith.constant 0 : i32
    return %c0_i32, %arg0 : i32, i32
  }
  func.func @transform_4(%arg0: i32) -> (i32, i32) {
    %c0_i32 = arith.constant 0 : i32
    %c0_i32_0 = arith.constant 0 : i32
    return %c0_i32, %arg0 : i32, i32
  }
}

module attributes {stable_mosaic.version = 11 : i64} {
  func.func @_mm_fused_kernel(%arg0: i32, %arg1: memref<128x256xbf16, #tpu.memory_space<vmem>>, %arg2: memref<256x128xbf16, #tpu.memory_space<vmem>>, %arg3: memref<1x128xf32, #tpu.memory_space<vmem>>, %arg4: memref<1x128xf32, #tpu.memory_space<vmem>>, %arg5: memref<128x128xf32, #tpu.memory_space<vmem>>, %arg6: memref<128x128xf32, #tpu.memory_space<vmem>>) attributes {dimension_semantics = [#tpu.dimension_semantics<parallel>], iteration_bounds = array<i64: 2>, scalar_prefetch = 0 : i64, scratch_operands = 0 : i64, tpu.core_type = #tpu.core_type<tc>, window_params = [{pipeline_mode = #tpu.pipeline_mode<synchronous>, transform_indices = @transform_0, window_bounds = array<i64: 128, 256>}, {transform_indices = @transform_1, window_bounds = array<i64: 256, 128>}, {transform_indices = @transform_2, window_bounds = array<i64: 1, 128>}, {transform_indices = @transform_3, window_bounds = array<i64: 1, 128>}, {transform_indices = @transform_4, window_bounds = array<i64: 128, 128>}, {transform_indices = @transform_5, window_bounds = array<i64: 128, 128>}]} {
    %c0 = arith.constant 0 : index
    %c0_0 = arith.constant 0 : index
    %0 = vector.load %arg1[%c0, %c0_0] : memref<128x256xbf16, #tpu.memory_space<vmem>>, vector<128x256xbf16>
    %c0_1 = arith.constant 0 : index
    %c0_2 = arith.constant 0 : index
    %1 = vector.load %arg2[%c0_1, %c0_2] : memref<256x128xbf16, #tpu.memory_space<vmem>>, vector<256x128xbf16>
    %cst = arith.constant dense<0.000000e+00> : vector<128x128xf32>
    %2 = tpu.matmul %0, %1, %cst {dimension_numbers = #tpu.dot_dimension_numbers<[1], [0], [0], [1], [0, 0, 1, 1], [], []>} : vector<128x256xbf16>, vector<256x128xbf16>, vector<128x128xf32> -> vector<128x128xf32>
    %cst_3 = arith.constant dense<0.000000e+00> : vector<128xf32>
    %3 = vector.multi_reduction <add>, %2, %cst_3 [0] : vector<128x128xf32> to vector<128xf32>
    %4 = vector.shape_cast %3 : vector<128xf32> to vector<1x128xf32>
    %cst_4 = arith.constant 1.280000e+02 : f32
    %5 = vector.broadcast %cst_4 : f32 to vector<1x128xf32>
    %6 = arith.divf %4, %5 : vector<1x128xf32>
    %7 = vector.broadcast %6 : vector<1x128xf32> to vector<128x128xf32>
    %8 = arith.subf %2, %7 : vector<128x128xf32>
    %9 = vector.broadcast %6 : vector<1x128xf32> to vector<128x128xf32>
    %10 = arith.subf %2, %9 : vector<128x128xf32>
    %11 = arith.mulf %8, %10 : vector<128x128xf32>
    %cst_5 = arith.constant dense<0.000000e+00> : vector<128xf32>
    %12 = vector.multi_reduction <add>, %11, %cst_5 [0] : vector<128x128xf32> to vector<128xf32>
    %13 = vector.shape_cast %12 : vector<128xf32> to vector<1x128xf32>
    %cst_6 = arith.constant 1.280000e+02 : f32
    %14 = vector.broadcast %cst_6 : f32 to vector<1x128xf32>
    %15 = arith.divf %13, %14 : vector<1x128xf32>
    %16 = vector.broadcast %6 : vector<1x128xf32> to vector<128x128xf32>
    %17 = arith.subf %2, %16 : vector<128x128xf32>
    %cst_7 = arith.constant 9.99999974E-6 : f32
    %18 = vector.broadcast %cst_7 : f32 to vector<1x128xf32>
    %19 = arith.addf %15, %18 : vector<1x128xf32>
    %20 = math.rsqrt %19 : vector<1x128xf32>
    %21 = vector.broadcast %20 : vector<1x128xf32> to vector<128x128xf32>
    %22 = arith.mulf %17, %21 : vector<128x128xf32>
    %c0_8 = arith.constant 0 : index
    %c0_9 = arith.constant 0 : index
    %23 = vector.load %arg3[%c0_8, %c0_9] : memref<1x128xf32, #tpu.memory_space<vmem>>, vector<1x128xf32>
    %24 = vector.broadcast %23 : vector<1x128xf32> to vector<128x128xf32>
    %25 = arith.mulf %22, %24 : vector<128x128xf32>
    %c0_10 = arith.constant 0 : index
    %c0_11 = arith.constant 0 : index
    %26 = vector.load %arg4[%c0_10, %c0_11] : memref<1x128xf32, #tpu.memory_space<vmem>>, vector<1x128xf32>
    %27 = vector.broadcast %26 : vector<1x128xf32> to vector<128x128xf32>
    %28 = arith.addf %25, %27 : vector<128x128xf32>
    %c0_12 = arith.constant 0 : index
    %c0_13 = arith.constant 0 : index
    %29 = vector.load %arg5[%c0_12, %c0_13] : memref<128x128xf32, #tpu.memory_space<vmem>>, vector<128x128xf32>
    %30 = arith.addf %28, %29 : vector<128x128xf32>
    %c0_14 = arith.constant 0 : index
    %c0_15 = arith.constant 0 : index
    %31 = vector.load %arg6[%c0_14, %c0_15] : memref<128x128xf32, #tpu.memory_space<vmem>>, vector<128x128xf32>
    tpu.vector_store %arg6[%c0_14, %c0_15], %30 {strides = array<i32>} : memref<128x128xf32, #tpu.memory_space<vmem>>, vector<128x128xf32>,
    return
  }
  func.func @transform_0(%arg0: i32) -> (i32, i32) {
    %c0_i32 = arith.constant 0 : i32
    %c0_i32_0 = arith.constant 0 : i32
    %c0_i32_1 = arith.constant 0 : i32
    return %c0_i32, %c0_i32_0 : i32, i32
  }
  func.func @transform_1(%arg0: i32) -> (i32, i32) {
    %c0_i32 = arith.constant 0 : i32
    %c0_i32_0 = arith.constant 0 : i32
    return %c0_i32, %arg0 : i32, i32
  }
  func.func @transform_2(%arg0: i32) -> (i32, i32) {
    %c0_i32 = arith.constant 0 : i32
    %c0_i32_0 = arith.constant 0 : i32
    return %c0_i32, %arg0 : i32, i32
  }
  func.func @transform_3(%arg0: i32) -> (i32, i32) {
    %c0_i32 = arith.constant 0 : i32
    %c0_i32_0 = arith.constant 0 : i32
    return %c0_i32, %arg0 : i32, i32
  }
  func.func @transform_4(%arg0: i32) -> (i32, i32) {
    %c0_i32 = arith.constant 0 : i32
    %c0_i32_0 = arith.constant 0 : i32
    return %c0_i32, %arg0 : i32, i32
  }
  func.func @transform_5(%arg0: i32) -> (i32, i32) {
    %c0_i32 = arith.constant 0 : i32
    %c0_i32_0 = arith.constant 0 : i32
    return %c0_i32, %arg0 : i32, i32
  }
}

module attributes {stable_mosaic.version = 11 : i64} {
  func.func @_mm_fused_kernel(%arg0: i32, %arg1: memref<128x2304xbf16, #tpu.memory_space<vmem>>, %arg2: memref<2304x128xbf16, #tpu.memory_space<vmem>>, %arg3: memref<128x128xf32, #tpu.memory_space<vmem>>) attributes {dimension_semantics = [#tpu.dimension_semantics<parallel>], iteration_bounds = array<i64: 2>, scalar_prefetch = 0 : i64, scratch_operands = 0 : i64, tpu.core_type = #tpu.core_type<tc>, window_params = [{pipeline_mode = #tpu.pipeline_mode<synchronous>, transform_indices = @transform_0, window_bounds = array<i64: 128, 2304>}, {transform_indices = @transform_1, window_bounds = array<i64: 2304, 128>}, {transform_indices = @transform_2, window_bounds = array<i64: 128, 128>}]} {
    %c0 = arith.constant 0 : index
    %c0_0 = arith.constant 0 : index
    %0 = vector.load %arg1[%c0, %c0_0] : memref<128x2304xbf16, #tpu.memory_space<vmem>>, vector<128x2304xbf16>
    %c0_1 = arith.constant 0 : index
    %c0_2 = arith.constant 0 : index
    %1 = vector.load %arg2[%c0_1, %c0_2] : memref<2304x128xbf16, #tpu.memory_space<vmem>>, vector<2304x128xbf16>
    %cst = arith.constant dense<0.000000e+00> : vector<128x128xf32>
    %2 = tpu.matmul %0, %1, %cst {dimension_numbers = #tpu.dot_dimension_numbers<[1], [0], [0], [1], [0, 0, 1, 1], [], []>} : vector<128x2304xbf16>, vector<2304x128xbf16>, vector<128x128xf32> -> vector<128x128xf32>
    %c0_3 = arith.constant 0 : index
    %c0_4 = arith.constant 0 : index
    %3 = vector.load %arg3[%c0_3, %c0_4] : memref<128x128xf32, #tpu.memory_space<vmem>>, vector<128x128xf32>
    tpu.vector_store %arg3[%c0_3, %c0_4], %2 {strides = array<i32>} : memref<128x128xf32, #tpu.memory_space<vmem>>, vector<128x128xf32>,
    return
  }
  func.func @transform_0(%arg0: i32) -> (i32, i32) {
    %c0_i32 = arith.constant 0 : i32
    %c0_i32_0 = arith.constant 0 : i32
    %c0_i32_1 = arith.constant 0 : i32
    return %c0_i32, %c0_i32_0 : i32, i32
  }
  func.func @transform_1(%arg0: i32) -> (i32, i32) {
    %c0_i32 = arith.constant 0 : i32
    %c0_i32_0 = arith.constant 0 : i32
    return %c0_i32, %arg0 : i32, i32
  }
  func.func @transform_2(%arg0: i32) -> (i32, i32) {
    %c0_i32 = arith.constant 0 : i32
    %c0_i32_0 = arith.constant 0 : i32
    return %c0_i32, %arg0 : i32, i32
  }
}

module attributes {stable_mosaic.version = 11 : i64} {
  func.func @_bn_kernel(%arg0: i32, %arg1: memref<512x64xf32, #tpu.memory_space<vmem>>, %arg2: memref<1x64xf32, #tpu.memory_space<vmem>>, %arg3: memref<1x64xf32, #tpu.memory_space<vmem>>, %arg4: memref<512x64xf32, #tpu.memory_space<vmem>>) attributes {dimension_semantics = [#tpu.dimension_semantics<parallel>], iteration_bounds = array<i64: 1>, scalar_prefetch = 0 : i64, scratch_operands = 0 : i64, tpu.core_type = #tpu.core_type<tc>, window_params = [{transform_indices = @transform_0, window_bounds = array<i64: 512, 64>}, {transform_indices = @transform_1, window_bounds = array<i64: 1, 64>}, {transform_indices = @transform_2, window_bounds = array<i64: 1, 64>}, {transform_indices = @transform_3, window_bounds = array<i64: 512, 64>}]} {
    %c0 = arith.constant 0 : index
    %c0_0 = arith.constant 0 : index
    %0 = vector.load %arg1[%c0, %c0_0] : memref<512x64xf32, #tpu.memory_space<vmem>>, vector<512x64xf32>
    %cst = arith.constant dense<0.000000e+00> : vector<64xf32>
    %1 = vector.multi_reduction <add>, %0, %cst [0] : vector<512x64xf32> to vector<64xf32>
    %2 = vector.shape_cast %1 : vector<64xf32> to vector<1x64xf32>
    %cst_1 = arith.constant 5.120000e+02 : f32
    %3 = vector.broadcast %cst_1 : f32 to vector<1x64xf32>
    %4 = arith.divf %2, %3 : vector<1x64xf32>
    %5 = vector.broadcast %4 : vector<1x64xf32> to vector<512x64xf32>
    %6 = arith.subf %0, %5 : vector<512x64xf32>
    %7 = vector.broadcast %4 : vector<1x64xf32> to vector<512x64xf32>
    %8 = arith.subf %0, %7 : vector<512x64xf32>
    %9 = arith.mulf %6, %8 : vector<512x64xf32>
    %cst_2 = arith.constant dense<0.000000e+00> : vector<64xf32>
    %10 = vector.multi_reduction <add>, %9, %cst_2 [0] : vector<512x64xf32> to vector<64xf32>
    %11 = vector.shape_cast %10 : vector<64xf32> to vector<1x64xf32>
    %cst_3 = arith.constant 5.120000e+02 : f32
    %12 = vector.broadcast %cst_3 : f32 to vector<1x64xf32>
    %13 = arith.divf %11, %12 : vector<1x64xf32>
    %14 = vector.broadcast %4 : vector<1x64xf32> to vector<512x64xf32>
    %15 = arith.subf %0, %14 : vector<512x64xf32>
    %cst_4 = arith.constant 9.99999974E-6 : f32
    %16 = vector.broadcast %cst_4 : f32 to vector<1x64xf32>
    %17 = arith.addf %13, %16 : vector<1x64xf32>
    %18 = math.rsqrt %17 : vector<1x64xf32>
    %19 = vector.broadcast %18 : vector<1x64xf32> to vector<512x64xf32>
    %20 = arith.mulf %15, %19 : vector<512x64xf32>
    %c0_5 = arith.constant 0 : index
    %c0_6 = arith.constant 0 : index
    %21 = vector.load %arg2[%c0_5, %c0_6] : memref<1x64xf32, #tpu.memory_space<vmem>>, vector<1x64xf32>
    %22 = vector.broadcast %21 : vector<1x64xf32> to vector<512x64xf32>
    %23 = arith.mulf %20, %22 : vector<512x64xf32>
    %c0_7 = arith.constant 0 : index
    %c0_8 = arith.constant 0 : index
    %24 = vector.load %arg3[%c0_7, %c0_8] : memref<1x64xf32, #tpu.memory_space<vmem>>, vector<1x64xf32>
    %25 = vector.broadcast %24 : vector<1x64xf32> to vector<512x64xf32>
    %26 = arith.addf %23, %25 : vector<512x64xf32>
    %cst_9 = arith.constant 0.000000e+00 : f32
    %27 = vector.broadcast %cst_9 : f32 to vector<512x64xf32>
    %28 = arith.maximumf %26, %27 : vector<512x64xf32>
    %c0_10 = arith.constant 0 : index
    %c0_11 = arith.constant 0 : index
    %29 = vector.load %arg4[%c0_10, %c0_11] : memref<512x64xf32, #tpu.memory_space<vmem>>, vector<512x64xf32>
    tpu.vector_store %arg4[%c0_10, %c0_11], %28 {strides = array<i32>} : memref<512x64xf32, #tpu.memory_space<vmem>>, vector<512x64xf32>,
    return
  }
  func.func @transform_0(%arg0: i32) -> (i32, i32) {
    %c0_i32 = arith.constant 0 : i32
    %c0_i32_0 = arith.constant 0 : i32
    return %c0_i32, %arg0 : i32, i32
  }
  func.func @transform_1(%arg0: i32) -> (i32, i32) {
    %c0_i32 = arith.constant 0 : i32
    %c0_i32_0 = arith.constant 0 : i32
    return %c0_i32, %arg0 : i32, i32
  }
  func.func @transform_2(%arg0: i32) -> (i32, i32) {
    %c0_i32 = arith.constant 0 : i32
    %c0_i32_0 = arith.constant 0 : i32
    return %c0_i32, %arg0 : i32, i32
  }
  func.func @transform_3(%arg0: i32) -> (i32, i32) {
    %c0_i32 = arith.constant 0 : i32
    %c0_i32_0 = arith.constant 0 : i32
    return %c0_i32, %arg0 : i32, i32
  }
}

module attributes {stable_mosaic.version = 11 : i64} {
  func.func @_mm_fused_kernel(%arg0: i32, %arg1: memref<512x640xbf16, #tpu.memory_space<vmem>>, %arg2: memref<640x128xbf16, #tpu.memory_space<vmem>>, %arg3: memref<512x128xf32, #tpu.memory_space<vmem>>) attributes {dimension_semantics = [#tpu.dimension_semantics<parallel>], iteration_bounds = array<i64: 1>, scalar_prefetch = 0 : i64, scratch_operands = 0 : i64, tpu.core_type = #tpu.core_type<tc>, window_params = [{pipeline_mode = #tpu.pipeline_mode<synchronous>, transform_indices = @transform_0, window_bounds = array<i64: 512, 640>}, {transform_indices = @transform_1, window_bounds = array<i64: 640, 128>}, {transform_indices = @transform_2, window_bounds = array<i64: 512, 128>}]} {
    %c0 = arith.constant 0 : index
    %c0_0 = arith.constant 0 : index
    %0 = vector.load %arg1[%c0, %c0_0] : memref<512x640xbf16, #tpu.memory_space<vmem>>, vector<512x640xbf16>
    %c0_1 = arith.constant 0 : index
    %c0_2 = arith.constant 0 : index
    %1 = vector.load %arg2[%c0_1, %c0_2] : memref<640x128xbf16, #tpu.memory_space<vmem>>, vector<640x128xbf16>
    %cst = arith.constant dense<0.000000e+00> : vector<512x128xf32>
    %2 = tpu.matmul %0, %1, %cst {dimension_numbers = #tpu.dot_dimension_numbers<[1], [0], [0], [1], [0, 0, 1, 1], [], []>} : vector<512x640xbf16>, vector<640x128xbf16>, vector<512x128xf32> -> vector<512x128xf32>
    %cst_3 = arith.constant 0.000000e+00 : f32
    %3 = vector.broadcast %cst_3 : f32 to vector<512x128xf32>
    %4 = arith.maximumf %2, %3 : vector<512x128xf32>
    %c0_4 = arith.constant 0 : index
    %c0_5 = arith.constant 0 : index
    %5 = vector.load %arg3[%c0_4, %c0_5] : memref<512x128xf32, #tpu.memory_space<vmem>>, vector<512x128xf32>
    tpu.vector_store %arg3[%c0_4, %c0_5], %4 {strides = array<i32>} : memref<512x128xf32, #tpu.memory_space<vmem>>, vector<512x128xf32>,
    return
  }
  func.func @transform_0(%arg0: i32) -> (i32, i32) {
    %c0_i32 = arith.constant 0 : i32
    %c0_i32_0 = arith.constant 0 : i32
    %c0_i32_1 = arith.constant 0 : i32
    return %c0_i32, %c0_i32_0 : i32, i32
  }
  func.func @transform_1(%arg0: i32) -> (i32, i32) {
    %c0_i32 = arith.constant 0 : i32
    %c0_i32_0 = arith.constant 0 : i32
    return %c0_i32, %arg0 : i32, i32
  }
  func.func @transform_2(%arg0: i32) -> (i32, i32) {
    %c0_i32 = arith.constant 0 : i32
    %c0_i32_0 = arith.constant 0 : i32
    return %c0_i32, %arg0 : i32, i32
  }
}

</mosaic_0001>

<bundles_post_ra>
// kernel: decoder_forward.8
= control target key start
LH: loop header
LB: loop body
LE: loop exit
PB: predicated region body
PF: predicated region fallthrough
CT: control target
= control target key end

     0   :  { %s1480_s18 = smov 0   ;;  %s1482_s19 = smov 0   ;;  %s1786_s0 = inlined_call_operand.vmem [shape: bf16[128,256], index: 0, kind: input, shape index: {}]   ;;  %s1787_s1 = inlined_call_operand.vmem [shape: bf16[256,256], index: 1, kind: input, shape index: {}]   ;;  %s1788_s2 = inlined_call_operand.vmem [shape: f32[1,256], index: 2, kind: input, shape index: {}]   ;;  %s1789_s3 = inlined_call_operand.vmem [shape: f32[1,256], index: 3, kind: input, shape index: {}]   ;;  %s1790_s4 = inlined_call_operand.vmem [shape: f32[128,256], index: 4, kind: input, shape index: {}]   ;;  %s1791_s5 = inlined_call_operand.vmem [shape: f32[128,256], index: 5, kind: output, shape index: {}]  }
   0x1   :  { %s1484_s20 = smov 0  }
   0x2 LB: > { %s1496_s21 = sadd.s32 4294967295, %s1448_s20   ;;  %s1499_s22 = sadd.s32 1, %s1448_s20   ;;  %s1448_s20 = sphi %s1484_s20, %s1796_s20   ;;  %s1444_s19 = sphi %s1482_s19, %s1795_s19   ;;  %s1440_s18 = sphi %s1480_s18, %s1794_s18  }
   0x3   : > { %s40_s23 = ssub.s32 %s1448_s20, %s1499_s22  ;;  %s43_s24 = sadd.s32 1, %s1444_s19 }
   0x4   : > { %p41_p0 = scmp.eq.s32.totalorder %s40_s23, 0  ;;  %p50_p1 = scmp.ne.s32.totalorder %s1444_s19, %s1440_s18 }
   0x5   : > { %p51_p2 = scmp.eq.s32.totalorder %s1448_s20, 0  ;;  %p158_p3 = scmp.eq.s32.totalorder %s1496_s21, 1 }
   0x6   : > { %s1509_s25 = scalar_select %p41_p0, %s1444_s19, %s43_s24  }
   0x7   : > { %p1511_p4 = por %p51_p2, %p50_p1  ;;  %p1515_p5 = por %p158_p3, %p50_p1 }
   0x8   : > { %p1233_p6 = scmp.ge.s32.totalorder %s1448_s20, 2 }
   0xa   : > { %183 = sbr.rel (%p1233_p6) target bundleno = 54 (0x36), region = 20 }
  0x11   : > { %186 = sbr.rel (!%p1511_p4) target bundleno = 42 (0x2a), region = 24  ;;  %s188_s28 = sand.u32 (%p1511_p4), 1, %s1444_s19  }
  0x12   : > { %s1235_s29 = sshll.u32 (%p1511_p4), %s1448_s20, 2  ;;  %s1234_s30 = sshll.u32 (%p1511_p4), %s188_s28, 7 }
  0x13   : > { %s1527_s8 = scalar_lea.vmem (%p1511_p4), %s1787_s1, %s1235_s29  ;;  %s1531_s9 = scalar_lea.vmem (%p1511_p4), [#allocation2], %s1234_s30 }
  0x14   : > { %v208_v0 = vld [vmem:[%s1527_s8] sm:$0xf] (%p1511_p4)  ;;  %v210_v1 = vld [vmem:[%s1527_s8 + $0x8] sm:$0xf] (%p1511_p4)  ;;  %v212_v2 = vld [vmem:[%s1527_s8 + $0x10] sm:$0xf] (%p1511_p4) }
  0x15   : > { %209 = vst [vmem:[%s1531_s9] sm:$0xf] (%p1511_p4), %v208_v0  ;;  %211 = vst [vmem:[%s1531_s9 + $0x4] sm:$0xf] (%p1511_p4), %v210_v1  ;;  %v214_v3 = vld [vmem:[%s1527_s8 + $0x18] sm:$0xf] (%p1511_p4) }
  0x16   : > { %v216_v4 = vld [vmem:[%s1527_s8 + $0x20] sm:$0xf] (%p1511_p4)  ;;  %213 = vst [vmem:[%s1531_s9 + $0x8] sm:$0xf] (%p1511_p4), %v212_v2  ;;  %215 = vst [vmem:[%s1531_s9 + $0xc] sm:$0xf] (%p1511_p4), %v214_v3 }
  0x17   : > { %217 = vst [vmem:[%s1531_s9 + $0x10] sm:$0xf] (%p1511_p4), %v216_v4  ;;  %v218_v5 = vld [vmem:[%s1527_s8 + $0x28] sm:$0xf] (%p1511_p4)  ;;  %v220_v6 = vld [vmem:[%s1527_s8 + $0x30] sm:$0xf] (%p1511_p4) }
  0x18   : > { %v222_v7 = vld [vmem:[%s1527_s8 + $0x38] sm:$0xf]  ;;  %219 = vst [vmem:[%s1531_s9 + $0x14] sm:$0xf] %v218_v5  ;;  %221 = vst [vmem:[%s1531_s9 + $0x18] sm:$0xf] %v220_v6 }
  0x19   : > { %223 = vst [vmem:[%s1531_s9 + $0x1c] sm:$0xf] %v222_v7  ;;  %v224_v8 = vld [vmem:[%s1527_s8 + $0x40] sm:$0xf]  ;;  %v226_v9 = vld [vmem:[%s1527_s8 + $0x48] sm:$0xf] }
  0x1a   : > { %v228_v10 = vld [vmem:[%s1527_s8 + $0x50] sm:$0xf]  ;;  %225 = vst [vmem:[%s1531_s9 + $0x20] sm:$0xf] %v224_v8  ;;  %227 = vst [vmem:[%s1531_s9 + $0x24] sm:$0xf] %v226_v9 }
  0x1b   : > { %229 = vst [vmem:[%s1531_s9 + $0x28] sm:$0xf] %v228_v10  ;;  %v230_v11 = vld [vmem:[%s1527_s8 + $0x58] sm:$0xf]  ;;  %v232_v12 = vld [vmem:[%s1527_s8 + $0x60] sm:$0xf] }
  0x1c   : > { %v234_v13 = vld [vmem:[%s1527_s8 + $0x68] sm:$0xf]  ;;  %231 = vst [vmem:[%s1531_s9 + $0x2c] sm:$0xf] %v230_v11  ;;  %233 = vst [vmem:[%s1531_s9 + $0x30] sm:$0xf] %v232_v12 }
  0x1d   : > { %235 = vst [vmem:[%s1531_s9 + $0x34] sm:$0xf] %v234_v13  ;;  %v236_v14 = vld [vmem:[%s1527_s8 + $0x70] sm:$0xf]  ;;  %v238_v15 = vld [vmem:[%s1527_s8 + $0x78] sm:$0xf] }
  0x1e   : > { %v240_v16 = vld [vmem:[%s1527_s8 + $0x80] sm:$0xf]  ;;  %237 = vst [vmem:[%s1531_s9 + $0x38] sm:$0xf] %v236_v14  ;;  %239 = vst [vmem:[%s1531_s9 + $0x3c] sm:$0xf] %v238_v15 }
  0x1f   : > { %241 = vst [vmem:[%s1531_s9 + $0x40] sm:$0xf] %v240_v16  ;;  %v242_v17 = vld [vmem:[%s1527_s8 + $0x88] sm:$0xf]  ;;  %v244_v18 = vld [vmem:[%s1527_s8 + $0x90] sm:$0xf] }
  0x20   : > { %v246_v19 = vld [vmem:[%s1527_s8 + $0x98] sm:$0xf]  ;;  %243 = vst [vmem:[%s1531_s9 + $0x44] sm:$0xf] %v242_v17  ;;  %245 = vst [vmem:[%s1531_s9 + $0x48] sm:$0xf] %v244_v18 }
  0x21   : > { %247 = vst [vmem:[%s1531_s9 + $0x4c] sm:$0xf] %v246_v19  ;;  %v248_v20 = vld [vmem:[%s1527_s8 + $0xa0] sm:$0xf]  ;;  %v250_v21 = vld [vmem:[%s1527_s8 + $0xa8] sm:$0xf] }
  0x22   : > { %v252_v22 = vld [vmem:[%s1527_s8 + $0xb0] sm:$0xf]  ;;  %249 = vst [vmem:[%s1531_s9 + $0x50] sm:$0xf] %v248_v20  ;;  %251 = vst [vmem:[%s1531_s9 + $0x54] sm:$0xf] %v250_v21 }
  0x23   : > { %253 = vst [vmem:[%s1531_s9 + $0x58] sm:$0xf] %v252_v22  ;;  %v254_v23 = vld [vmem:[%s1527_s8 + $0xb8] sm:$0xf]  ;;  %v256_v24 = vld [vmem:[%s1527_s8 + $0xc0] sm:$0xf] }
  0x24   : > { %v258_v25 = vld [vmem:[%s1527_s8 + $0xc8] sm:$0xf]  ;;  %255 = vst [vmem:[%s1531_s9 + $0x5c] sm:$0xf] %v254_v23  ;;  %257 = vst [vmem:[%s1531_s9 + $0x60] sm:$0xf] %v256_v24 }
  0x25   : > { %259 = vst [vmem:[%s1531_s9 + $0x64] sm:$0xf] %v258_v25  ;;  %v260_v26 = vld [vmem:[%s1527_s8 + $0xd0] sm:$0xf]  ;;  %v262_v27 = vld [vmem:[%s1527_s8 + $0xd8] sm:$0xf] }
  0x26   : > { %v264_v28 = vld [vmem:[%s1527_s8 + $0xe0] sm:$0xf]  ;;  %261 = vst [vmem:[%s1531_s9 + $0x68] sm:$0xf] %v260_v26  ;;  %263 = vst [vmem:[%s1531_s9 + $0x6c] sm:$0xf] %v262_v27 }
  0x27   : > { %265 = vst [vmem:[%s1531_s9 + $0x70] sm:$0xf] %v264_v28  ;;  %v266_v29 = vld [vmem:[%s1527_s8 + $0xe8] sm:$0xf]  ;;  %v268_v30 = vld [vmem:[%s1527_s8 + $0xf0] sm:$0xf] }
  0x28   : > { %v270_v31 = vld [vmem:[%s1527_s8 + $0xf8] sm:$0xf]  ;;  %267 = vst [vmem:[%s1531_s9 + $0x74] sm:$0xf] %v266_v29  ;;  %269 = vst [vmem:[%s1531_s9 + $0x78] sm:$0xf] %v268_v30 }
  0x29   : > { %271 = vst [vmem:[%s1531_s9 + $0x7c] sm:$0xf] %v270_v31 }
  0x2a PF: > { %370 = sbr.rel (!%p1511_p4) target bundleno = 54 (0x36), region = 73  ;;  %s372_s10 = sand.u32 (%p1511_p4), 1, %s1444_s19  }
  0x2b   : > { %s1237_s11 = sshll.u32 (%p1511_p4), %s1448_s20, 3  ;;  %s1236_s12 = sshll.u32 (%p1511_p4), %s372_s10, 7 }
  0x2c   : > { %s1602_s15 = scalar_lea.vmem (%p1511_p4), %s1790_s4, %s1237_s11  ;;  %s374_s16 = scalar_lea.vmem (%p1511_p4), [#allocation3], %s1236_s12 }
  0x2d   : > { %v434_v32 = vld [vmem:[%s1602_s15] sm:$0xff] (%p1511_p4)  ;;  %v436_v33 = vld [vmem:[%s1602_s15 + $0x10] sm:$0xff] (%p1511_p4) }
  0x2e   : > { %v438_v34 = vld [vmem:[%s1602_s15 + $0x20] sm:$0xff] (%p1511_p4)  ;;  %435 = vst [vmem:[%s374_s16] sm:$0xff] (%p1511_p4), %v434_v32  ;;  %437 = vst [vmem:[%s374_s16 + $0x8] sm:$0xff] (%p1511_p4), %v436_v33  ;;  %v440_v35 = vld [vmem:[%s1602_s15 + $0x30] sm:$0xff] (%p1511_p4) }
  0x2f   : > { %439 = vst [vmem:[%s374_s16 + $0x10] sm:$0xff] (%p1511_p4), %v438_v34  ;;  %v442_v36 = vld [vmem:[%s1602_s15 + $0x40] sm:$0xff] (%p1511_p4)  ;;  %v444_v37 = vld [vmem:[%s1602_s15 + $0x50] sm:$0xff] (%p1511_p4)  ;;  %441 = vst [vmem:[%s374_s16 + $0x18] sm:$0xff] (%p1511_p4), %v440_v35 }
  0x30   : > { %443 = vst [vmem:[%s374_s16 + $0x20] sm:$0xff] (%p1511_p4), %v442_v36  ;;  %445 = vst [vmem:[%s374_s16 + $0x28] sm:$0xff] (%p1511_p4), %v444_v37  ;;  %v446_v38 = vld [vmem:[%s1602_s15 + $0x60] sm:$0xff] (%p1511_p4)  ;;  %v448_v39 = vld [vmem:[%s1602_s15 + $0x70] sm:$0xff] (%p1511_p4) }
  0x31   : > { %v450_v40 = vld [vmem:[%s1602_s15 + $0x80] sm:$0xff]  ;;  %447 = vst [vmem:[%s374_s16 + $0x30] sm:$0xff] %v446_v38  ;;  %449 = vst [vmem:[%s374_s16 + $0x38] sm:$0xff] %v448_v39  ;;  %v452_v41 = vld [vmem:[%s1602_s15 + $0x90] sm:$0xff] }
  0x32   : > { %451 = vst [vmem:[%s374_s16 + $0x40] sm:$0xff] %v450_v40  ;;  %v454_v42 = vld [vmem:[%s1602_s15 + $0xa0] sm:$0xff]  ;;  %v456_v43 = vld [vmem:[%s1602_s15 + $0xb0] sm:$0xff]  ;;  %453 = vst [vmem:[%s374_s16 + $0x48] sm:$0xff] %v452_v41 }
  0x33   : > { %455 = vst [vmem:[%s374_s16 + $0x50] sm:$0xff] %v454_v42  ;;  %457 = vst [vmem:[%s374_s16 + $0x58] sm:$0xff] %v456_v43  ;;  %v458_v44 = vld [vmem:[%s1602_s15 + $0xc0] sm:$0xff]  ;;  %v460_v45 = vld [vmem:[%s1602_s15 + $0xd0] sm:$0xff] }
  0x34   : > { %v462_v46 = vld [vmem:[%s1602_s15 + $0xe0] sm:$0xff]  ;;  %459 = vst [vmem:[%s374_s16 + $0x60] sm:$0xff] %v458_v44  ;;  %461 = vst [vmem:[%s374_s16 + $0x68] sm:$0xff] %v460_v45  ;;  %v464_v47 = vld [vmem:[%s1602_s15 + $0xf0] sm:$0xff] }
  0x35   : > { %463 = vst [vmem:[%s374_s16 + $0x70] sm:$0xff] %v462_v46  ;;  %465 = vst [vmem:[%s374_s16 + $0x78] sm:$0xff] %v464_v47 }
  0x36 PF: > { %p1238_p7 = scmp.ge.s32.totalorder %s1448_s20, 1  ;;  %p470_p8 = scmp.lt.s32.totalorder %s1448_s20, 3 }
  0x38   : > { %p471_p9 = pnand %p1238_p7, %p470_p8 }
  0x39   : > { %s477_s17 = sand.u32 (!%p471_p9), 1, %s1440_s18   ;;  %v1402_v48 = vld [vmem:[%s1786_s0 + $0x4] ss:$8 sps:$4 sm:$0xff] (!%p471_p9)   ;;  %v1400_v2 = vld [vmem:[%s1786_s0] ss:$8 sps:$4 sm:$0xff] (!%p471_p9)   ;;  %p520_p10 = scmp.lt.s32.totalorder (!%p471_p9), %s1496_s21, 1 }
  0x3a   : > { %474 = sbr.rel (%p471_p9) target bundleno = 460 (0x1cc), region = 111  ;;  %s1623_s23 = sshll.u32 (!%p471_p9), %s477_s17, 7  ;;  %783 = vmatprep.mubr.bf16.mxu0 (!%p471_p9), %v1402_v48  ;;  %v1408_v60 = vld [vmem:[%s1786_s0 + $0x44] ss:$8 sps:$4 sm:$0xff] (!%p471_p9)   ;;  %v1406_v3 = vld [vmem:[%s1786_s0 + $0x40] ss:$8 sps:$4 sm:$0xff] (!%p471_p9)  }
  0x3b   : > { %s1629_s28 = scalar_lea.vmem (!%p471_p9), [#allocation2], %s1623_s23  ;;  %815 = vmatprep.mubr.bf16.mxu1 (!%p471_p9), %v1408_v60  ;;  %v1403_v4 = vld [vmem:[%s1786_s0 + $0x14] ss:$8 sps:$4 sm:$0xff] (!%p471_p9)   ;;  %v1405_v6 = vld [vmem:[%s1786_s0 + $0x10] ss:$8 sps:$4 sm:$0xff] (!%p471_p9)   ;;  %s1736_s18 = scalar_lea.vmem (!%p471_p9), [#allocation4], %s1623_s23 }
  0x3c   : > { %v1384_v49 = vld [vmem:[%s1629_s28 + $0x40] sm:$0xff] (!%p471_p9)   ;;  %v1386_v51 = vld [vmem:[%s1629_s28 + $0x48] sm:$0xff] (!%p471_p9)   ;;  %v1388_v53 = vld [vmem:[%s1629_s28 + $0x50] sm:$0xff] (!%p471_p9)  }
  0x3d   : > { %v1385_v50 = vld [vmem:[%s1629_s28] sm:$0xff] (!%p471_p9)   ;;  %1280 = vmatprep.subr.bf16.mxu0 (!%p471_p9), %v1384_v49  ;;  %1344 = vmatprep.subr.bf16.mxu1 (!%p471_p9), %v1384_v49  ;;  %v1387_v52 = vld [vmem:[%s1629_s28 + $0x8] sm:$0xff] (!%p471_p9)   ;;  %v1389_v54 = vld [vmem:[%s1629_s28 + $0x10] sm:$0xff] (!%p471_p9)  }
  0x3e   : > { %1281 = vmatpush3.bf16.msra.mxu0 (!%p471_p9), %v1385_v50  ;;  %1352 = vmatpush3.bf16.msra.mxu1 (!%p471_p9), %v1385_v50  ;;  %v1390_v55 = vld [vmem:[%s1629_s28 + $0x58] sm:$0xff] (!%p471_p9)   ;;  %v1392_v57 = vld [vmem:[%s1629_s28 + $0x60] sm:$0xff] (!%p471_p9)   ;;  %v1394_v59 = vld [vmem:[%s1629_s28 + $0x68] sm:$0xff] (!%p471_p9)  }
  0x3f   : > { %1282 = vmatprep.subr.bf16.mxu0 (!%p471_p9), %v1386_v51  ;;  %1345 = vmatprep.subr.bf16.mxu1 (!%p471_p9), %v1386_v51  ;;  %v1391_v56 = vld [vmem:[%s1629_s28 + $0x18] sm:$0xff] (!%p471_p9)   ;;  %v1393_v58 = vld [vmem:[%s1629_s28 + $0x20] sm:$0xff] (!%p471_p9)   ;;  %v1395_v61 = vld [vmem:[%s1629_s28 + $0x28] sm:$0xff] (!%p471_p9)  }
  0x40   : > { %v1396_v62 = vld [vmem:[%s1629_s28 + $0x70] sm:$0xff] (!%p471_p9)   ;;  %v1398_v0 = vld [vmem:[%s1629_s28 + $0x78] sm:$0xff] (!%p471_p9)   ;;  %v1409_v8 = vld [vmem:[%s1786_s0 + $0x24] ss:$8 sps:$4 sm:$0xff] (!%p471_p9)  }
  0x41   : > { %v1397_v63 = vld [vmem:[%s1629_s28 + $0x30] sm:$0xff]   ;;  %v1399_v1 = vld [vmem:[%s1629_s28 + $0x38] sm:$0xff]   ;;  %v1418_v9 = vld [vmem:[%s1786_s0 + $0x64] ss:$8 sps:$4 sm:$0xff]   ;;  %s1706_s13 = scalar_select %p520_p10, %s1496_s21, 1 }
  0x42   : > { %1283 = vmatpush3.bf16.msra.mxu0 %v1387_v52  ;;  %1353 = vmatpush3.bf16.msra.mxu1 %v1387_v52  ;;  %v1412_v5 = vld [vmem:[%s1786_s0 + $0x54] ss:$8 sps:$4 sm:$0xff]   ;;  %v1414_v7 = vld [vmem:[%s1786_s0 + $0x50] ss:$8 sps:$4 sm:$0xff]   ;;  %v1411_v10 = vld [vmem:[%s1786_s0 + $0x20] ss:$8 sps:$4 sm:$0xff]  }
  0x43   : > { %1284 = vmatprep.subr.bf16.mxu0 %v1388_v53  ;;  %1346 = vmatprep.subr.bf16.mxu1 %v1388_v53  ;;  %v1420_v11 = vld [vmem:[%s1786_s0 + $0x60] ss:$8 sps:$4 sm:$0xff]   ;;  %v1415_v12 = vld [vmem:[%s1786_s0 + $0x34] ss:$8 sps:$4 sm:$0xff]   ;;  %v1417_v14 = vld [vmem:[%s1786_s0 + $0x30] ss:$8 sps:$4 sm:$0xff]   ;;  %s522_s16 = scalar_lea.vmem %s1788_s2, %s1706_s13  ;;  %s525_s26 = scalar_lea.vmem %s1789_s3, %s1706_s13 }
  0x44   : > { %v1421_v13 = vld [vmem:[%s1786_s0 + $0x74] ss:$8 sps:$4 sm:$0xff]   ;;  %v1423_v15 = vld [vmem:[%s1786_s0 + $0x70] ss:$8 sps:$4 sm:$0xff]   ;;  %s1717_s28 = scalar_lea.vmem [#allocation3], %s1623_s23  ;;  %s1277_s23 = sshll.u32 (%p1515_p5), %s1496_s21, 3 }
  0x45   : > { %s1045_s30 = scalar_lea.vmem (%p1515_p5), %s1791_s5, %s1277_s23 }
  0x46   : > { %1285 = vmatpush3.bf16.msra.mxu0 %v1389_v54  ;;  %1354 = vmatpush3.bf16.msra.mxu1 %v1389_v54 }
  0x47   : > { %1286 = vmatprep.subr.bf16.mxu0 %v1390_v55  ;;  %1347 = vmatprep.subr.bf16.mxu1 %v1390_v55 }
  0x4a   : > { %1287 = vmatpush3.bf16.msra.mxu0 %v1391_v56  ;;  %1355 = vmatpush3.bf16.msra.mxu1 %v1391_v56 }
  0x4b   : > { %1288 = vmatprep.subr.bf16.mxu0 %v1392_v57  ;;  %1348 = vmatprep.subr.bf16.mxu1 %v1392_v57 }
  0x4e   : > { %1289 = vmatpush3.bf16.msra.mxu0 %v1393_v58  ;;  %1356 = vmatpush3.bf16.msra.mxu1 %v1393_v58 }
  0x4f   : > { %1290 = vmatprep.subr.bf16.mxu0 %v1394_v59  ;;  %1349 = vmatprep.subr.bf16.mxu1 %v1394_v59 }
  0x52   : > { %1291 = vmatpush3.bf16.msra.mxu0 %v1395_v61  ;;  %1357 = vmatpush3.bf16.msra.mxu1 %v1395_v61 }
  0x53   : > { %1292 = vmatprep.subr.bf16.mxu0 %v1396_v62  ;;  %1350 = vmatprep.subr.bf16.mxu1 %v1396_v62 }
  0x56   : > { %1293 = vmatpush3.bf16.msra.mxu0 %v1397_v63  ;;  %1358 = vmatpush3.bf16.msra.mxu1 %v1397_v63 }
  0x57   : > { %1294 = vmatprep.subr.bf16.mxu0 %v1398_v0  ;;  %1351 = vmatprep.subr.bf16.mxu1 %v1398_v0 }
  0x5a   : > { %1295 = vmatpush3.bf16.msra.mxu0 %v1399_v1  ;;  %1359 = vmatpush3.bf16.msra.mxu1 %v1399_v1 }
  0x5d   : > { %784 = vmatmul.mubr.bf16.vlgmr.msra.gmra.mrb[0].mxu0 %v1400_v2  ;;  %816 = vmatmul.mubr.bf16.vlgmr.msra.gmra.mrb[0].mxu1 %v1406_v3 }
  0x5e   : > { %791 = vmatprep.mubr.bf16.mxu0 %v1403_v4  ;;  %823 = vmatprep.mubr.bf16.mxu1 %v1412_v5 }
  0x65   : > { %792 = vmatmul.mubr.bf16.gmra.mrb[4].mxu0 %v1405_v6  ;;  %824 = vmatmul.mubr.bf16.gmra.mrb[4].mxu1 %v1414_v7 }
  0x66   : > { %799 = vmatprep.mubr.bf16.mxu0 %v1409_v8  ;;  %831 = vmatprep.mubr.bf16.mxu1 %v1418_v9 }
  0x6d   : > { %800 = vmatmul.mubr.bf16.gmra.mrb[8].mxu0 %v1411_v10  ;;  %832 = vmatmul.mubr.bf16.gmra.mrb[8].mxu1 %v1420_v11 }
  0x6e   : > { %807 = vmatprep.mubr.bf16.mxu0 %v1415_v12  ;;  %839 = vmatprep.mubr.bf16.mxu1 %v1421_v13 }
  0x75   : > { %808 = vmatmul.mubr.bf16.gmra.mrb[12].mxu0 %v1417_v14  ;;  %840 = vmatmul.mubr.bf16.gmra.mrb[12].mxu1 %v1423_v15 }
 0x130   : > { %v1296_v16 = vpop.f32.mrb[0].mxu0  ;;  %v1320_v17 = vpop.f32.mrb[0].mxu1 }
 0x131   : > { %v1297_v18 = vpop.f32.mrb[1].mxu0  ;;  %v1321_v19 = vpop.f32.mrb[1].mxu1 }
 0x132   : > { %v1692_v20 = vadd.f32 %v1297_v18, %v1296_v16  ;;  %v1299_v21 = vpop.f32.mrb[2].mxu0  ;;  %v1694_v22 = vadd.f32 %v1321_v19, %v1320_v17  ;;  %v1323_v23 = vpop.f32.mrb[2].mxu1 }
 0x133   : > { %v1300_v24 = vpop.f32.mrb[3].mxu0  ;;  %v1324_v25 = vpop.f32.mrb[3].mxu1 }
 0x134   : > { %v1301_v26 = vadd.f32 %v1300_v24, %v1299_v21  ;;  %v1696_v27 = vadd.f32 %v1324_v25, %v1323_v23 }
 0x136   : > { %v848_v28 = vadd.f32 %v1301_v26, %v1692_v20 }
 0x138   : > { %v1302_v29 = vpop.f32.mrb[4].mxu0  ;;  %v1326_v30 = vpop.f32.mrb[4].mxu1 }
 0x139   : > { %v1303_v31 = vpop.f32.mrb[5].mxu0  ;;  %v1327_v32 = vpop.f32.mrb[5].mxu1 }
 0x13a   : > { %v1304_v33 = vadd.f32 %v1303_v31, %v1302_v29  ;;  %v1305_v34 = vpop.f32.mrb[6].mxu0  ;;  %v1328_v35 = vadd.f32 %v1327_v32, %v1326_v30  ;;  %v1329_v36 = vpop.f32.mrb[6].mxu1 }
 0x13b   : > { %v1306_v37 = vpop.f32.mrb[7].mxu0  ;;  %v1330_v38 = vpop.f32.mrb[7].mxu1 }
 0x13c   : > { %v849_v39 = vadd.f32 %v1304_v33, %v848_v28  ;;  %v1307_v40 = vadd.f32 %v1306_v37, %v1305_v34  ;;  %v1331_v41 = vadd.f32 %v1330_v38, %v1329_v36 }
 0x13e   : > { %v850_v42 = vadd.f32 %v1307_v40, %v849_v39 }
 0x140   : > { %v1308_v43 = vpop.f32.mrb[8].mxu0  ;;  %v1332_v44 = vpop.f32.mrb[8].mxu1 }
 0x141   : > { %v1309_v45 = vpop.f32.mrb[9].mxu0  ;;  %v1333_v46 = vpop.f32.mrb[9].mxu1 }
 0x142   : > { %v1310_v47 = vadd.f32 %v1309_v45, %v1308_v43  ;;  %v1311_v48 = vpop.f32.mrb[10].mxu0  ;;  %v1334_v49 = vadd.f32 %v1333_v46, %v1332_v44  ;;  %v1335_v50 = vpop.f32.mrb[10].mxu1 }
 0x143   : > { %v1312_v51 = vpop.f32.mrb[11].mxu0  ;;  %v1336_v52 = vpop.f32.mrb[11].mxu1 }
 0x144   : > { %v851_v53 = vadd.f32 %v1310_v47, %v850_v42  ;;  %v1313_v54 = vadd.f32 %v1312_v51, %v1311_v48  ;;  %v1337_v55 = vadd.f32 %v1336_v52, %v1335_v50 }
 0x146   : > { %v852_v56 = vadd.f32 %v1313_v54, %v851_v53 }
 0x148   : > { %v1314_v57 = vpop.f32.mrb[12].mxu0  ;;  %v1338_v58 = vpop.f32.mrb[12].mxu1 }
 0x149   : > { %v1315_v59 = vpop.f32.mrb[13].mxu0  ;;  %v1339_v60 = vpop.f32.mrb[13].mxu1 }
 0x14a   : > { %v1316_v61 = vadd.f32 %v1315_v59, %v1314_v57  ;;  %v1317_v62 = vpop.f32.mrb[14].mxu0  ;;  %v1340_v63 = vadd.f32 %v1339_v60, %v1338_v58  ;;  %v1341_v0 = vpop.f32.mrb[14].mxu1 }
 0x14b   : > { %v1318_v1 = vpop.f32.mrb[15].mxu0  ;;  %v1342_v2 = vpop.f32.mrb[15].mxu1 }
 0x14c   : > { %v853_v3 = vadd.f32 %v1316_v61, %v852_v56  ;;  %v1319_v4 = vadd.f32 %v1318_v1, %v1317_v62  ;;  %v1343_v5 = vadd.f32 %v1342_v2, %v1341_v0 }
 0x14e   : > { %v854_v6 = vadd.f32 %v1319_v4, %v853_v3 }
 0x150   : > { %v855_v7 = vadd.f32 %v1694_v22, %v854_v6 }
 0x152   : > { %v856_v8 = vadd.f32 %v1696_v27, %v855_v7 }
 0x154   : > { %v857_v9 = vadd.f32 %v1328_v35, %v856_v8 }
 0x156   : > { %v858_v10 = vadd.f32 %v1331_v41, %v857_v9 }
 0x158   : > { %v859_v11 = vadd.f32 %v1334_v49, %v858_v10 }
 0x15a   : > { %v860_v12 = vadd.f32 %v1337_v55, %v859_v11 }
 0x15c   : > { %v861_v13 = vadd.f32 %v1340_v63, %v860_v12 }
 0x15e   : > { %v862_v14 = vadd.f32 %v1343_v5, %v861_v13 }
 0x160   : > { %v863_v15 = vrot.slane %v862_v14, 4 }
 0x162   : > { %v864_v16 = vadd.f32 %v863_v15, %v862_v14 }
 0x164   : > { %v865_v17 = vrot.slane %v864_v16, 2 }
 0x166   : > { %v866_v18 = vadd.f32 %v865_v17, %v864_v16 }
 0x168   : > { %v867_v19 = vrot.slane %v866_v18, 1 }
 0x16a   : > { %v868_v21 = vadd.f32 %v867_v19, %v866_v18 }
 0x16c   : > { %v870_v23 = vmul.f32 0.0078125, %v868_v21 }
 0x16e   : > { %v871_v24 = vsub.f32 %v1692_v20, %v870_v23  ;;  %v872_v25 = vsub.f32 %v1301_v26, %v870_v23  ;;  %v873_v28 = vsub.f32 %v1304_v33, %v870_v23  ;;  %v874_v29 = vsub.f32 %v1307_v40, %v870_v23 }
 0x16f   : > { %v875_v30 = vsub.f32 %v1310_v47, %v870_v23  ;;  %v876_v31 = vsub.f32 %v1313_v54, %v870_v23  ;;  %v877_v32 = vsub.f32 %v1316_v61, %v870_v23  ;;  %v878_v34 = vsub.f32 %v1319_v4, %v870_v23 }
 0x170   : > { %v879_v36 = vsub.f32 %v1694_v22, %v870_v23  ;;  %v880_v37 = vsub.f32 %v1696_v27, %v870_v23  ;;  %v881_v38 = vsub.f32 %v1328_v35, %v870_v23  ;;  %v882_v39 = vsub.f32 %v1331_v41, %v870_v23 }
 0x171   : > { %v883_v42 = vsub.f32 %v1334_v49, %v870_v23  ;;  %v884_v43 = vsub.f32 %v1337_v55, %v870_v23  ;;  %v885_v44 = vsub.f32 %v1340_v63, %v870_v23  ;;  %v886_v45 = vsub.f32 %v1343_v5, %v870_v23 }
 0x172   : > { %v887_v46 = vmul.f32 %v871_v24, %v871_v24  ;;  %v888_v48 = vmul.f32 %v872_v25, %v872_v25  ;;  %v889_v20 = vmul.f32 %v873_v28, %v873_v28  ;;  %v890_v33 = vmul.f32 %v874_v29, %v874_v29 }
 0x173   : > { %v891_v47 = vmul.f32 %v875_v30, %v875_v30  ;;  %v892_v51 = vmul.f32 %v876_v31, %v876_v31  ;;  %v893_v53 = vmul.f32 %v877_v32, %v877_v32  ;;  %v894_v54 = vmul.f32 %v878_v34, %v878_v34 }
 0x174   : > { %v903_v26 = vadd.f32 %v888_v48, %v887_v46  ;;  %v895_v35 = vmul.f32 %v879_v36, %v879_v36  ;;  %v896_v49 = vmul.f32 %v880_v37, %v880_v37  ;;  %v897_v56 = vmul.f32 %v881_v38, %v881_v38  ;;  %v1274_v46 = vld [vmem:[%s522_s16] ss:$0 sm:$0xff] }
 0x175   : > { %v898_v58 = vmul.f32 %v882_v39, %v882_v39  ;;  %v899_v60 = vmul.f32 %v883_v42, %v883_v42  ;;  %v900_v62 = vmul.f32 %v884_v43, %v884_v43  ;;  %v901_v0 = vmul.f32 %v885_v44, %v885_v44 }
 0x176   : > { %v904_v40 = vadd.f32 %v903_v26, %v889_v20  ;;  %v902_v2 = vmul.f32 %v886_v45, %v886_v45 }
 0x178   : > { %v905_v50 = vadd.f32 %v904_v40, %v890_v33 }
 0x17a   : > { %v906_v52 = vadd.f32 %v905_v50, %v891_v47 }
 0x17c   : > { %v907_v22 = vadd.f32 %v906_v52, %v892_v51  ;;  %v1275_v52 = vld [vmem:[%s525_s26] ss:$0 sm:$0xff] }
 0x17e   : > { %v908_v27 = vadd.f32 %v907_v22, %v893_v53 }
 0x180   : > { %v909_v41 = vadd.f32 %v908_v27, %v894_v54 }
 0x182   : > { %v910_v55 = vadd.f32 %v909_v41, %v895_v35  ;;  %v990_v41 = vld [vmem:[%s1717_s28 + $0x8] sm:$0xff] }
 0x184   : > { %v911_v57 = vadd.f32 %v910_v55, %v896_v49  ;;  %v991_v49 = vld [vmem:[%s1717_s28 + $0x10] sm:$0xff]  ;;  %v992_v55 = vld [vmem:[%s1717_s28 + $0x18] sm:$0xff] }
 0x186   : > { %v912_v59 = vadd.f32 %v911_v57, %v897_v56 }
 0x188   : > { %v913_v61 = vadd.f32 %v912_v59, %v898_v58 }
 0x18a   : > { %v914_v63 = vadd.f32 %v913_v61, %v899_v60  ;;  %v993_v60 = vld [vmem:[%s1717_s28 + $0x20] sm:$0xff]  ;;  %v994_v61 = vld [vmem:[%s1717_s28 + $0x28] sm:$0xff] }
 0x18c   : > { %v915_v1 = vadd.f32 %v914_v63, %v900_v62  ;;  %v995_v62 = vld [vmem:[%s1717_s28 + $0x30] sm:$0xff] }
 0x18e   : > { %v916_v3 = vadd.f32 %v915_v1, %v901_v0 }
 0x190   : > { %v917_v4 = vadd.f32 %v916_v3, %v902_v2  ;;  %v996_v3 = vld [vmem:[%s1717_s28 + $0x38] sm:$0xff] }
 0x192   : > { %v918_v5 = vrot.slane %v917_v4, 4 }
 0x194   : > { %v919_v6 = vadd.f32 %v918_v5, %v917_v4  ;;  %v997_v4 = vld [vmem:[%s1717_s28 + $0x40] sm:$0xff]  ;;  %v998_v5 = vld [vmem:[%s1717_s28 + $0x48] sm:$0xff] }
 0x196   : > { %v920_v7 = vrot.slane %v919_v6, 2 }
 0x198   : > { %v921_v8 = vadd.f32 %v920_v7, %v919_v6 }
 0x19a   : > { %v922_v9 = vrot.slane %v921_v8, 1 }
 0x19c   : > { %v923_v10 = vadd.f32 %v922_v9, %v921_v8 }
 0x19e   : > { %v924_v11 = vmul.f32 0.0078125, %v923_v10  ;;  %v999_v10 = vld [vmem:[%s1717_s28 + $0x50] sm:$0xff] }
 0x1a0   : > { %v925_v12 = vadd.f32 1e-05, %v924_v11  ;;  %v1000_v11 = vld [vmem:[%s1717_s28 + $0x58] sm:$0xff] }
 0x1a2   : > { %1424 = vrsqrt.f32 %v925_v12  ;;  %v1001_v12 = vld [vmem:[%s1717_s28 + $0x60] sm:$0xff] }
 0x1ac   : > { %v1425_v13 = vpop.eup %1424 }
 0x1ad   : > { %v927_v14 = vmul.f32 %v1425_v13, %v871_v24  ;;  %v928_v15 = vmul.f32 %v1425_v13, %v872_v25  ;;  %v929_v16 = vmul.f32 %v1425_v13, %v873_v28  ;;  %v930_v17 = vmul.f32 %v1425_v13, %v874_v29 }
 0x1ae   : > { %v931_v18 = vmul.f32 %v1425_v13, %v875_v30  ;;  %v932_v19 = vmul.f32 %v1425_v13, %v876_v31  ;;  %v933_v21 = vmul.f32 %v1425_v13, %v877_v32  ;;  %v934_v23 = vmul.f32 %v1425_v13, %v878_v34 }
 0x1af   : > { %v935_v48 = vmul.f32 %v1425_v13, %v879_v36  ;;  %v936_v20 = vmul.f32 %v1425_v13, %v880_v37  ;;  %v937_v26 = vmul.f32 %v1425_v13, %v881_v38  ;;  %v938_v33 = vmul.f32 %v1425_v13, %v882_v39 }
 0x1b0   : > { %v939_v40 = vmul.f32 %v1425_v13, %v883_v42  ;;  %v940_v47 = vmul.f32 %v1425_v13, %v884_v43  ;;  %v941_v50 = vmul.f32 %v1425_v13, %v885_v44  ;;  %v942_v24 = vmul.f32 %v1425_v13, %v886_v45  ;;  %v989_v44 = vld [vmem:[%s1717_s28] sm:$0xff]  ;;  %v1002_v13 = vld [vmem:[%s1717_s28 + $0x68] sm:$0xff] }
 0x1b1   : > { %v950_v25 = vmul.f32 %v1274_v46, %v927_v14  ;;  %v951_v28 = vmul.f32 %v1274_v46, %v928_v15  ;;  %v952_v29 = vmul.f32 %v1274_v46, %v929_v16  ;;  %v953_v30 = vmul.f32 %v1274_v46, %v930_v17  ;;  %v1003_v14 = vld [vmem:[%s1717_s28 + $0x70] sm:$0xff]  ;;  %v1004_v15 = vld [vmem:[%s1717_s28 + $0x78] sm:$0xff] }
 0x1b2   : > { %v954_v31 = vmul.f32 %v1274_v46, %v931_v18  ;;  %v955_v32 = vmul.f32 %v1274_v46, %v932_v19  ;;  %v956_v34 = vmul.f32 %v1274_v46, %v933_v21  ;;  %v957_v51 = vmul.f32 %v1274_v46, %v934_v23 }
 0x1b3   : > { %v958_v53 = vmul.f32 %v1274_v46, %v935_v48  ;;  %v959_v22 = vmul.f32 %v1274_v46, %v936_v20  ;;  %v960_v36 = vmul.f32 %v1274_v46, %v937_v26  ;;  %v961_v37 = vmul.f32 %v1274_v46, %v938_v33 }
 0x1b4   : > { %v962_v38 = vmul.f32 %v1274_v46, %v939_v40  ;;  %v963_v39 = vmul.f32 %v1274_v46, %v940_v47  ;;  %v964_v42 = vmul.f32 %v1274_v46, %v941_v50  ;;  %v965_v43 = vmul.f32 %v1274_v46, %v942_v24 }
 0x1b5   : > { %v973_v45 = vadd.f32 %v1275_v52, %v950_v25  ;;  %v974_v54 = vadd.f32 %v1275_v52, %v951_v28  ;;  %v975_v27 = vadd.f32 %v1275_v52, %v952_v29  ;;  %v976_v35 = vadd.f32 %v1275_v52, %v953_v30 }
 0x1b6   : > { %v977_v56 = vadd.f32 %v1275_v52, %v954_v31  ;;  %v978_v57 = vadd.f32 %v1275_v52, %v955_v32  ;;  %v979_v58 = vadd.f32 %v1275_v52, %v956_v34  ;;  %v980_v59 = vadd.f32 %v1275_v52, %v957_v51 }
 0x1b7   : > { %v981_v63 = vadd.f32 %v1275_v52, %v958_v53  ;;  %v982_v0 = vadd.f32 %v1275_v52, %v959_v22  ;;  %v983_v1 = vadd.f32 %v1275_v52, %v960_v36  ;;  %v984_v2 = vadd.f32 %v1275_v52, %v961_v37 }
 0x1b8   : > { %v985_v6 = vadd.f32 %v1275_v52, %v962_v38  ;;  %v986_v7 = vadd.f32 %v1275_v52, %v963_v39  ;;  %v987_v8 = vadd.f32 %v1275_v52, %v964_v42  ;;  %v988_v9 = vadd.f32 %v1275_v52, %v965_v43 }
 0x1b9   : > { %v1005_v16 = vadd.f32 %v989_v44, %v973_v45  ;;  %v1006_v17 = vadd.f32 %v990_v41, %v974_v54  ;;  %v1007_v18 = vadd.f32 %v991_v49, %v975_v27  ;;  %v1008_v19 = vadd.f32 %v992_v55, %v976_v35 }
 0x1ba   : > { %v1009_v21 = vadd.f32 %v993_v60, %v977_v56  ;;  %v1010_v23 = vadd.f32 %v994_v61, %v978_v57  ;;  %v1011_v46 = vadd.f32 %v995_v62, %v979_v58  ;;  %v1012_v48 = vadd.f32 %v996_v3, %v980_v59 }
 0x1bb   : > { %v1013_v20 = vadd.f32 %v997_v4, %v981_v63  ;;  %v1014_v26 = vadd.f32 %v998_v5, %v982_v0  ;;  %v1015_v33 = vadd.f32 %v999_v10, %v983_v1  ;;  %v1016_v40 = vadd.f32 %v1000_v11, %v984_v2  ;;  %1021 = vst [vmem:[%s1736_s18] sm:$0xff] %v1005_v16 }
 0x1bc   : > { %1022 = vst [vmem:[%s1736_s18 + $0x8] sm:$0xff] %v1006_v17  ;;  %1023 = vst [vmem:[%s1736_s18 + $0x10] sm:$0xff] %v1007_v18  ;;  %v1017_v47 = vadd.f32 %v1001_v12, %v985_v6  ;;  %v1018_v50 = vadd.f32 %v1002_v13, %v986_v7  ;;  %v1019_v24 = vadd.f32 %v1003_v14, %v987_v8 }
 0x1bd   : > { %1024 = vst [vmem:[%s1736_s18 + $0x18] sm:$0xff] %v1008_v19  ;;  %v1020_v25 = vadd.f32 %v1004_v15, %v988_v9  ;;  %1025 = vst [vmem:[%s1736_s18 + $0x20] sm:$0xff] %v1009_v21  ;;  %1043 = sbr.rel (!%p1515_p5) target bundleno = 460 (0x1cc), region = 123 }
 0x1be   : > { %1026 = vst [vmem:[%s1736_s18 + $0x28] sm:$0xff] %v1010_v23  ;;  %1027 = vst [vmem:[%s1736_s18 + $0x30] sm:$0xff] %v1011_v46 }
 0x1bf   : > { %1028 = vst [vmem:[%s1736_s18 + $0x38] sm:$0xff] %v1012_v48  ;;  %1029 = vst [vmem:[%s1736_s18 + $0x40] sm:$0xff] %v1013_v20 }
 0x1c0   : > { %1030 = vst [vmem:[%s1736_s18 + $0x48] sm:$0xff] %v1014_v26  ;;  %1031 = vst [vmem:[%s1736_s18 + $0x50] sm:$0xff] %v1015_v33 }
 0x1c1   : > { %1032 = vst [vmem:[%s1736_s18 + $0x58] sm:$0xff] %v1016_v40  ;;  %1033 = vst [vmem:[%s1736_s18 + $0x60] sm:$0xff] %v1017_v47 }
 0x1c2   : > { %1034 = vst [vmem:[%s1736_s18 + $0x68] sm:$0xff] %v1018_v50  ;;  %1035 = vst [vmem:[%s1736_s18 + $0x70] sm:$0xff] %v1019_v24  ;;  %v1103_v28 = vld [vmem:[%s1736_s18] sm:$0xff] (%p1515_p5) }
 0x1c3   : > { %1036 = vst [vmem:[%s1736_s18 + $0x78] sm:$0xff] %v1020_v25  ;;  %v1105_v29 = vld [vmem:[%s1736_s18 + $0x8] sm:$0xff] (%p1515_p5)  ;;  %v1107_v30 = vld [vmem:[%s1736_s18 + $0x10] sm:$0xff] (%p1515_p5)  ;;  %1104 = vst [vmem:[%s1045_s30] sm:$0xff] (%p1515_p5), %v1103_v28 }
 0x1c4   : > { %v1109_v31 = vld [vmem:[%s1736_s18 + $0x18] sm:$0xff]  ;;  %v1111_v32 = vld [vmem:[%s1736_s18 + $0x20] sm:$0xff]  ;;  %1106 = vst [vmem:[%s1045_s30 + $0x10] sm:$0xff] %v1105_v29  ;;  %1108 = vst [vmem:[%s1045_s30 + $0x20] sm:$0xff] %v1107_v30 }
 0x1c5   : > { %v1113_v34 = vld [vmem:[%s1736_s18 + $0x28] sm:$0xff]  ;;  %1110 = vst [vmem:[%s1045_s30 + $0x30] sm:$0xff] %v1109_v31  ;;  %1112 = vst [vmem:[%s1045_s30 + $0x40] sm:$0xff] %v1111_v32  ;;  %v1115_v51 = vld [vmem:[%s1736_s18 + $0x30] sm:$0xff] }
 0x1c6   : > { %1114 = vst [vmem:[%s1045_s30 + $0x50] sm:$0xff] %v1113_v34  ;;  %v1117_v52 = vld [vmem:[%s1736_s18 + $0x38] sm:$0xff]  ;;  %v1119_v53 = vld [vmem:[%s1736_s18 + $0x40] sm:$0xff]  ;;  %1116 = vst [vmem:[%s1045_s30 + $0x60] sm:$0xff] %v1115_v51 }
 0x1c7   : > { %1118 = vst [vmem:[%s1045_s30 + $0x70] sm:$0xff] %v1117_v52  ;;  %1120 = vst [vmem:[%s1045_s30 + $0x80] sm:$0xff] %v1119_v53  ;;  %v1121_v22 = vld [vmem:[%s1736_s18 + $0x48] sm:$0xff]  ;;  %v1123_v36 = vld [vmem:[%s1736_s18 + $0x50] sm:$0xff] }
 0x1c8   : > { %v1125_v37 = vld [vmem:[%s1736_s18 + $0x58] sm:$0xff]  ;;  %1122 = vst [vmem:[%s1045_s30 + $0x90] sm:$0xff] %v1121_v22  ;;  %1124 = vst [vmem:[%s1045_s30 + $0xa0] sm:$0xff] %v1123_v36  ;;  %v1127_v38 = vld [vmem:[%s1736_s18 + $0x60] sm:$0xff] }
 0x1c9   : > { %1126 = vst [vmem:[%s1045_s30 + $0xb0] sm:$0xff] %v1125_v37  ;;  %v1129_v39 = vld [vmem:[%s1736_s18 + $0x68] sm:$0xff]  ;;  %v1131_v42 = vld [vmem:[%s1736_s18 + $0x70] sm:$0xff]  ;;  %1128 = vst [vmem:[%s1045_s30 + $0xc0] sm:$0xff] %v1127_v38 }
 0x1ca   : > { %1130 = vst [vmem:[%s1045_s30 + $0xd0] sm:$0xff] %v1129_v39  ;;  %1132 = vst [vmem:[%s1045_s30 + $0xe0] sm:$0xff] %v1131_v42  ;;  %v1133_v43 = vld [vmem:[%s1736_s18 + $0x78] sm:$0xff] }
 0x1cb   : > { %1134 = vst [vmem:[%s1045_s30 + $0xf0] sm:$0xff] %v1133_v43 }
 0x1cc PF: > { %p12_p11 = scmp.ge.s32.totalorder %s1499_s22, 4   ;;  %s1794_s18 = smov %s1444_s19 }
 0x1cd   : > { %s1795_s19 = smov %s1509_s25  ;;  %s1796_s20 = smov %s1499_s22 }
 0x1ce   :  { %14 = sbr.rel (!%p12_p11) target bundleno = 2 (0x2), region = 206 }

// kernel: decoder_forward.7
= control target key start
LH: loop header
LB: loop body
LE: loop exit
PB: predicated region body
PF: predicated region fallthrough
CT: control target
= control target key end

     0   :  { %s5977_s15 = smov 0   ;;  %s5979_s16 = smov 0   ;;  %s7477_s0 = inlined_call_operand.vmem [shape: bf16[128,2304], index: 0, kind: input, shape index: {}]   ;;  %s7478_s1 = inlined_call_operand.vmem [shape: bf16[2304,256], index: 1, kind: input, shape index: {}]   ;;  %s7479_s2 = inlined_call_operand.vmem [shape: f32[1,256], index: 2, kind: input, shape index: {}]   ;;  %s7480_s3 = inlined_call_operand.vmem [shape: f32[1,256], index: 3, kind: input, shape index: {}]   ;;  %s7481_s4 = inlined_call_operand.vmem [shape: f32[128,256], index: 4, kind: output, shape index: {}]  }
   0x1   :  { %s5981_s17 = smov 0  }
   0x2 LB: > { %s5993_s18 = sadd.s32 4294967295, %s5950_s17   ;;  %s5996_s19 = sadd.s32 1, %s5950_s17   ;;  %s5950_s17 = sphi %s5981_s17, %s7485_s17   ;;  %s5946_s16 = sphi %s5979_s16, %s7484_s16   ;;  %s5942_s15 = sphi %s5977_s15, %s7483_s15  }
   0x3   : > { %s39_s20 = ssub.s32 %s5950_s17, %s5996_s19  ;;  %s42_s21 = sadd.s32 1, %s5946_s16 }
   0x4   : > { %p40_p0 = scmp.eq.s32.totalorder %s39_s20, 0  ;;  %p49_p1 = scmp.ne.s32.totalorder %s5946_s16, %s5942_s15 }
   0x5   : > { %p50_p2 = scmp.eq.s32.totalorder %s5950_s17, 0  ;;  %p131_p3 = scmp.eq.s32.totalorder %s5993_s18, 1 }
   0x6   : > { %s6006_s22 = scalar_select %p40_p0, %s5946_s16, %s42_s21  }
   0x7   : > { %p51_p4 = por %p50_p2, %p49_p1  ;;  %p6008_p5 = por %p131_p3, %p49_p1 }
   0x8   : > { %p4650_p6 = scmp.ge.s32.totalorder %s5950_s17, 2 }
   0xa   : > { %156 = sbr.rel (%p4650_p6) target bundleno = 213 (0xd5), region = 20 }
  0x11   : > { %159 = sbr.rel (!%p51_p4) target bundleno = 213 (0xd5), region = 24  ;;  %s161_s24 = sand.u32 (%p51_p4), 1, %s5946_s16  }
  0x12   : > { %s4651_s25 = sshll.u32 (%p51_p4), %s5950_s17, 2  ;;  %s5540_s26 = smul.u32 (%p51_p4), 1152, %s161_s24 }
  0x13   : > { %s6018_s29 = scalar_lea.vmem (%p51_p4), %s7478_s1, %s4651_s25 }
  0x14   : > { %v181_v0 = vld [vmem:[%s6018_s29] sm:$0xf] (%p51_p4)  ;;  %v183_v1 = vld [vmem:[%s6018_s29 + $0x8] sm:$0xf] (%p51_p4)  ;;  %v185_v2 = vld [vmem:[%s6018_s29 + $0x10] sm:$0xf] (%p51_p4) }
  0x15   : > { %v187_v3 = vld [vmem:[%s6018_s29 + $0x18] sm:$0xf] (%p51_p4)  ;;  %v189_v4 = vld [vmem:[%s6018_s29 + $0x20] sm:$0xf] (%p51_p4)  ;;  %s6025_s30 = scalar_lea.vmem (%p51_p4), [#allocation2], %s5540_s26 }
  0x16   : > { %182 = vst [vmem:[%s6025_s30] sm:$0xf] (%p51_p4), %v181_v0  ;;  %184 = vst [vmem:[%s6025_s30 + $0x4] sm:$0xf] (%p51_p4), %v183_v1  ;;  %v191_v5 = vld [vmem:[%s6018_s29 + $0x28] sm:$0xf] (%p51_p4) }
  0x17   : > { %186 = vst [vmem:[%s6025_s30 + $0x8] sm:$0xf] (%p51_p4), %v185_v2  ;;  %188 = vst [vmem:[%s6025_s30 + $0xc] sm:$0xf] (%p51_p4), %v187_v3  ;;  %v193_v6 = vld [vmem:[%s6018_s29 + $0x30] sm:$0xf] (%p51_p4) }
  0x18   : > { %190 = vst [vmem:[%s6025_s30 + $0x10] sm:$0xf] %v189_v4  ;;  %v195_v7 = vld [vmem:[%s6018_s29 + $0x38] sm:$0xf]  ;;  %192 = vst [vmem:[%s6025_s30 + $0x14] sm:$0xf] %v191_v5 }
  0x19   : > { %194 = vst [vmem:[%s6025_s30 + $0x18] sm:$0xf] %v193_v6  ;;  %196 = vst [vmem:[%s6025_s30 + $0x1c] sm:$0xf] %v195_v7  ;;  %v197_v8 = vld [vmem:[%s6018_s29 + $0x40] sm:$0xf] }
  0x1a   : > { %v199_v9 = vld [vmem:[%s6018_s29 + $0x48] sm:$0xf]  ;;  %v201_v10 = vld [vmem:[%s6018_s29 + $0x50] sm:$0xf]  ;;  %198 = vst [vmem:[%s6025_s30 + $0x20] sm:$0xf] %v197_v8 }
  0x1b   : > { %200 = vst [vmem:[%s6025_s30 + $0x24] sm:$0xf] %v199_v9  ;;  %202 = vst [vmem:[%s6025_s30 + $0x28] sm:$0xf] %v201_v10  ;;  %v203_v11 = vld [vmem:[%s6018_s29 + $0x58] sm:$0xf] }
  0x1c   : > { %v205_v12 = vld [vmem:[%s6018_s29 + $0x60] sm:$0xf]  ;;  %v207_v13 = vld [vmem:[%s6018_s29 + $0x68] sm:$0xf]  ;;  %204 = vst [vmem:[%s6025_s30 + $0x2c] sm:$0xf] %v203_v11 }
  0x1d   : > { %206 = vst [vmem:[%s6025_s30 + $0x30] sm:$0xf] %v205_v12  ;;  %208 = vst [vmem:[%s6025_s30 + $0x34] sm:$0xf] %v207_v13  ;;  %v209_v14 = vld [vmem:[%s6018_s29 + $0x70] sm:$0xf] }
  0x1e   : > { %v211_v15 = vld [vmem:[%s6018_s29 + $0x78] sm:$0xf]  ;;  %v213_v16 = vld [vmem:[%s6018_s29 + $0x80] sm:$0xf]  ;;  %210 = vst [vmem:[%s6025_s30 + $0x38] sm:$0xf] %v209_v14 }
  0x1f   : > { %212 = vst [vmem:[%s6025_s30 + $0x3c] sm:$0xf] %v211_v15  ;;  %214 = vst [vmem:[%s6025_s30 + $0x40] sm:$0xf] %v213_v16  ;;  %v215_v17 = vld [vmem:[%s6018_s29 + $0x88] sm:$0xf] }
  0x20   : > { %v217_v18 = vld [vmem:[%s6018_s29 + $0x90] sm:$0xf]  ;;  %v219_v19 = vld [vmem:[%s6018_s29 + $0x98] sm:$0xf]  ;;  %216 = vst [vmem:[%s6025_s30 + $0x44] sm:$0xf] %v215_v17 }
  0x21   : > { %218 = vst [vmem:[%s6025_s30 + $0x48] sm:$0xf] %v217_v18  ;;  %220 = vst [vmem:[%s6025_s30 + $0x4c] sm:$0xf] %v219_v19  ;;  %v221_v20 = vld [vmem:[%s6018_s29 + $0xa0] sm:$0xf] }
  0x22   : > { %v223_v21 = vld [vmem:[%s6018_s29 + $0xa8] sm:$0xf]  ;;  %v225_v22 = vld [vmem:[%s6018_s29 + $0xb0] sm:$0xf]  ;;  %222 = vst [vmem:[%s6025_s30 + $0x50] sm:$0xf] %v221_v20 }
  0x23   : > { %224 = vst [vmem:[%s6025_s30 + $0x54] sm:$0xf] %v223_v21  ;;  %226 = vst [vmem:[%s6025_s30 + $0x58] sm:$0xf] %v225_v22  ;;  %v227_v23 = vld [vmem:[%s6018_s29 + $0xb8] sm:$0xf] }
  0x24   : > { %v229_v24 = vld [vmem:[%s6018_s29 + $0xc0] sm:$0xf]  ;;  %v231_v25 = vld [vmem:[%s6018_s29 + $0xc8] sm:$0xf]  ;;  %228 = vst [vmem:[%s6025_s30 + $0x5c] sm:$0xf] %v227_v23 }
  0x25   : > { %230 = vst [vmem:[%s6025_s30 + $0x60] sm:$0xf] %v229_v24  ;;  %232 = vst [vmem:[%s6025_s30 + $0x64] sm:$0xf] %v231_v25  ;;  %v233_v26 = vld [vmem:[%s6018_s29 + $0xd0] sm:$0xf] }
  0x26   : > { %v235_v27 = vld [vmem:[%s6018_s29 + $0xd8] sm:$0xf]  ;;  %v237_v28 = vld [vmem:[%s6018_s29 + $0xe0] sm:$0xf]  ;;  %234 = vst [vmem:[%s6025_s30 + $0x68] sm:$0xf] %v233_v26 }
  0x27   : > { %236 = vst [vmem:[%s6025_s30 + $0x6c] sm:$0xf] %v235_v27  ;;  %238 = vst [vmem:[%s6025_s30 + $0x70] sm:$0xf] %v237_v28  ;;  %v239_v29 = vld [vmem:[%s6018_s29 + $0xe8] sm:$0xf] }
  0x28   : > { %v241_v30 = vld [vmem:[%s6018_s29 + $0xf0] sm:$0xf]  ;;  %v243_v31 = vld [vmem:[%s6018_s29 + $0xf8] sm:$0xf]  ;;  %240 = vst [vmem:[%s6025_s30 + $0x74] sm:$0xf] %v239_v29 }
  0x29   : > { %242 = vst [vmem:[%s6025_s30 + $0x78] sm:$0xf] %v241_v30  ;;  %244 = vst [vmem:[%s6025_s30 + $0x7c] sm:$0xf] %v243_v31  ;;  %v245_v32 = vld [vmem:[%s6018_s29 + $0x100] sm:$0xf] }
  0x2a   : > { %v247_v33 = vld [vmem:[%s6018_s29 + $0x108] sm:$0xf]  ;;  %v249_v34 = vld [vmem:[%s6018_s29 + $0x110] sm:$0xf]  ;;  %246 = vst [vmem:[%s6025_s30 + $0x80] sm:$0xf] %v245_v32 }
  0x2b   : > { %248 = vst [vmem:[%s6025_s30 + $0x84] sm:$0xf] %v247_v33  ;;  %250 = vst [vmem:[%s6025_s30 + $0x88] sm:$0xf] %v249_v34  ;;  %v251_v35 = vld [vmem:[%s6018_s29 + $0x118] sm:$0xf] }
  0x2c   : > { %v253_v36 = vld [vmem:[%s6018_s29 + $0x120] sm:$0xf]  ;;  %v255_v37 = vld [vmem:[%s6018_s29 + $0x128] sm:$0xf]  ;;  %252 = vst [vmem:[%s6025_s30 + $0x8c] sm:$0xf] %v251_v35 }
  0x2d   : > { %254 = vst [vmem:[%s6025_s30 + $0x90] sm:$0xf] %v253_v36  ;;  %256 = vst [vmem:[%s6025_s30 + $0x94] sm:$0xf] %v255_v37  ;;  %v257_v38 = vld [vmem:[%s6018_s29 + $0x130] sm:$0xf] }
  0x2e   : > { %v259_v39 = vld [vmem:[%s6018_s29 + $0x138] sm:$0xf]  ;;  %v261_v40 = vld [vmem:[%s6018_s29 + $0x140] sm:$0xf]  ;;  %258 = vst [vmem:[%s6025_s30 + $0x98] sm:$0xf] %v257_v38 }
  0x2f   : > { %260 = vst [vmem:[%s6025_s30 + $0x9c] sm:$0xf] %v259_v39  ;;  %262 = vst [vmem:[%s6025_s30 + $0xa0] sm:$0xf] %v261_v40  ;;  %v263_v41 = vld [vmem:[%s6018_s29 + $0x148] sm:$0xf] }
  0x30   : > { %v265_v42 = vld [vmem:[%s6018_s29 + $0x150] sm:$0xf]  ;;  %v267_v43 = vld [vmem:[%s6018_s29 + $0x158] sm:$0xf]  ;;  %264 = vst [vmem:[%s6025_s30 + $0xa4] sm:$0xf] %v263_v41 }
  0x31   : > { %266 = vst [vmem:[%s6025_s30 + $0xa8] sm:$0xf] %v265_v42  ;;  %268 = vst [vmem:[%s6025_s30 + $0xac] sm:$0xf] %v267_v43  ;;  %v269_v44 = vld [vmem:[%s6018_s29 + $0x160] sm:$0xf] }
  0x32   : > { %v271_v45 = vld [vmem:[%s6018_s29 + $0x168] sm:$0xf]  ;;  %v273_v46 = vld [vmem:[%s6018_s29 + $0x170] sm:$0xf]  ;;  %270 = vst [vmem:[%s6025_s30 + $0xb0] sm:$0xf] %v269_v44 }
  0x33   : > { %272 = vst [vmem:[%s6025_s30 + $0xb4] sm:$0xf] %v271_v45  ;;  %274 = vst [vmem:[%s6025_s30 + $0xb8] sm:$0xf] %v273_v46  ;;  %v275_v47 = vld [vmem:[%s6018_s29 + $0x178] sm:$0xf] }
  0x34   : > { %v277_v48 = vld [vmem:[%s6018_s29 + $0x180] sm:$0xf]  ;;  %v279_v49 = vld [vmem:[%s6018_s29 + $0x188] sm:$0xf]  ;;  %276 = vst [vmem:[%s6025_s30 + $0xbc] sm:$0xf] %v275_v47 }
  0x35   : > { %278 = vst [vmem:[%s6025_s30 + $0xc0] sm:$0xf] %v277_v48  ;;  %280 = vst [vmem:[%s6025_s30 + $0xc4] sm:$0xf] %v279_v49  ;;  %v281_v50 = vld [vmem:[%s6018_s29 + $0x190] sm:$0xf] }
  0x36   : > { %v283_v51 = vld [vmem:[%s6018_s29 + $0x198] sm:$0xf]  ;;  %v285_v52 = vld [vmem:[%s6018_s29 + $0x1a0] sm:$0xf]  ;;  %282 = vst [vmem:[%s6025_s30 + $0xc8] sm:$0xf] %v281_v50 }
  0x37   : > { %284 = vst [vmem:[%s6025_s30 + $0xcc] sm:$0xf] %v283_v51  ;;  %286 = vst [vmem:[%s6025_s30 + $0xd0] sm:$0xf] %v285_v52  ;;  %v287_v53 = vld [vmem:[%s6018_s29 + $0x1a8] sm:$0xf] }
  0x38   : > { %v289_v54 = vld [vmem:[%s6018_s29 + $0x1b0] sm:$0xf]  ;;  %v291_v55 = vld [vmem:[%s6018_s29 + $0x1b8] sm:$0xf]  ;;  %288 = vst [vmem:[%s6025_s30 + $0xd4] sm:$0xf] %v287_v53 }
  0x39   : > { %290 = vst [vmem:[%s6025_s30 + $0xd8] sm:$0xf] %v289_v54  ;;  %292 = vst [vmem:[%s6025_s30 + $0xdc] sm:$0xf] %v291_v55  ;;  %v293_v56 = vld [vmem:[%s6018_s29 + $0x1c0] sm:$0xf] }
  0x3a   : > { %v295_v57 = vld [vmem:[%s6018_s29 + $0x1c8] sm:$0xf]  ;;  %v297_v58 = vld [vmem:[%s6018_s29 + $0x1d0] sm:$0xf]  ;;  %294 = vst [vmem:[%s6025_s30 + $0xe0] sm:$0xf] %v293_v56 }
  0x3b   : > { %296 = vst [vmem:[%s6025_s30 + $0xe4] sm:$0xf] %v295_v57  ;;  %298 = vst [vmem:[%s6025_s30 + $0xe8] sm:$0xf] %v297_v58  ;;  %v299_v59 = vld [vmem:[%s6018_s29 + $0x1d8] sm:$0xf] }
  0x3c   : > { %v301_v60 = vld [vmem:[%s6018_s29 + $0x1e0] sm:$0xf]  ;;  %v303_v61 = vld [vmem:[%s6018_s29 + $0x1e8] sm:$0xf]  ;;  %300 = vst [vmem:[%s6025_s30 + $0xec] sm:$0xf] %v299_v59 }
  0x3d   : > { %302 = vst [vmem:[%s6025_s30 + $0xf0] sm:$0xf] %v301_v60  ;;  %304 = vst [vmem:[%s6025_s30 + $0xf4] sm:$0xf] %v303_v61  ;;  %v305_v62 = vld [vmem:[%s6018_s29 + $0x1f0] sm:$0xf] }
  0x3e   : > { %v307_v63 = vld [vmem:[%s6018_s29 + $0x1f8] sm:$0xf]  ;;  %v309_v0 = vld [vmem:[%s6018_s29 + $0x200] sm:$0xf]  ;;  %306 = vst [vmem:[%s6025_s30 + $0xf8] sm:$0xf] %v305_v62 }
  0x3f   : > { %308 = vst [vmem:[%s6025_s30 + $0xfc] sm:$0xf] %v307_v63  ;;  %310 = vst [vmem:[%s6025_s30 + $0x100] sm:$0xf] %v309_v0  ;;  %v311_v1 = vld [vmem:[%s6018_s29 + $0x208] sm:$0xf] }
  0x40   : > { %v313_v2 = vld [vmem:[%s6018_s29 + $0x210] sm:$0xf]  ;;  %v315_v3 = vld [vmem:[%s6018_s29 + $0x218] sm:$0xf]  ;;  %312 = vst [vmem:[%s6025_s30 + $0x104] sm:$0xf] %v311_v1 }
  0x41   : > { %314 = vst [vmem:[%s6025_s30 + $0x108] sm:$0xf] %v313_v2  ;;  %316 = vst [vmem:[%s6025_s30 + $0x10c] sm:$0xf] %v315_v3  ;;  %v317_v4 = vld [vmem:[%s6018_s29 + $0x220] sm:$0xf] }
  0x42   : > { %v319_v5 = vld [vmem:[%s6018_s29 + $0x228] sm:$0xf]  ;;  %v321_v6 = vld [vmem:[%s6018_s29 + $0x230] sm:$0xf]  ;;  %318 = vst [vmem:[%s6025_s30 + $0x110] sm:$0xf] %v317_v4 }
  0x43   : > { %320 = vst [vmem:[%s6025_s30 + $0x114] sm:$0xf] %v319_v5  ;;  %322 = vst [vmem:[%s6025_s30 + $0x118] sm:$0xf] %v321_v6  ;;  %v323_v7 = vld [vmem:[%s6018_s29 + $0x238] sm:$0xf] }
  0x44   : > { %v325_v8 = vld [vmem:[%s6018_s29 + $0x240] sm:$0xf]  ;;  %v327_v9 = vld [vmem:[%s6018_s29 + $0x248] sm:$0xf]  ;;  %324 = vst [vmem:[%s6025_s30 + $0x11c] sm:$0xf] %v323_v7 }
  0x45   : > { %326 = vst [vmem:[%s6025_s30 + $0x120] sm:$0xf] %v325_v8  ;;  %328 = vst [vmem:[%s6025_s30 + $0x124] sm:$0xf] %v327_v9  ;;  %v329_v10 = vld [vmem:[%s6018_s29 + $0x250] sm:$0xf] }
  0x46   : > { %v331_v11 = vld [vmem:[%s6018_s29 + $0x258] sm:$0xf]  ;;  %v333_v12 = vld [vmem:[%s6018_s29 + $0x260] sm:$0xf]  ;;  %330 = vst [vmem:[%s6025_s30 + $0x128] sm:$0xf] %v329_v10 }
  0x47   : > { %332 = vst [vmem:[%s6025_s30 + $0x12c] sm:$0xf] %v331_v11  ;;  %334 = vst [vmem:[%s6025_s30 + $0x130] sm:$0xf] %v333_v12  ;;  %v335_v13 = vld [vmem:[%s6018_s29 + $0x268] sm:$0xf] }
  0x48   : > { %v337_v14 = vld [vmem:[%s6018_s29 + $0x270] sm:$0xf]  ;;  %v339_v15 = vld [vmem:[%s6018_s29 + $0x278] sm:$0xf]  ;;  %336 = vst [vmem:[%s6025_s30 + $0x134] sm:$0xf] %v335_v13 }
  0x49   : > { %338 = vst [vmem:[%s6025_s30 + $0x138] sm:$0xf] %v337_v14  ;;  %340 = vst [vmem:[%s6025_s30 + $0x13c] sm:$0xf] %v339_v15  ;;  %v341_v16 = vld [vmem:[%s6018_s29 + $0x280] sm:$0xf] }
  0x4a   : > { %v343_v17 = vld [vmem:[%s6018_s29 + $0x288] sm:$0xf]  ;;  %v345_v18 = vld [vmem:[%s6018_s29 + $0x290] sm:$0xf]  ;;  %342 = vst [vmem:[%s6025_s30 + $0x140] sm:$0xf] %v341_v16 }
  0x4b   : > { %344 = vst [vmem:[%s6025_s30 + $0x144] sm:$0xf] %v343_v17  ;;  %346 = vst [vmem:[%s6025_s30 + $0x148] sm:$0xf] %v345_v18  ;;  %v347_v19 = vld [vmem:[%s6018_s29 + $0x298] sm:$0xf] }
  0x4c   : > { %v349_v20 = vld [vmem:[%s6018_s29 + $0x2a0] sm:$0xf]  ;;  %v351_v21 = vld [vmem:[%s6018_s29 + $0x2a8] sm:$0xf]  ;;  %348 = vst [vmem:[%s6025_s30 + $0x14c] sm:$0xf] %v347_v19 }
  0x4d   : > { %350 = vst [vmem:[%s6025_s30 + $0x150] sm:$0xf] %v349_v20  ;;  %352 = vst [vmem:[%s6025_s30 + $0x154] sm:$0xf] %v351_v21  ;;  %v353_v22 = vld [vmem:[%s6018_s29 + $0x2b0] sm:$0xf] }
  0x4e   : > { %v355_v23 = vld [vmem:[%s6018_s29 + $0x2b8] sm:$0xf]  ;;  %v357_v24 = vld [vmem:[%s6018_s29 + $0x2c0] sm:$0xf]  ;;  %354 = vst [vmem:[%s6025_s30 + $0x158] sm:$0xf] %v353_v22 }
  0x4f   : > { %356 = vst [vmem:[%s6025_s30 + $0x15c] sm:$0xf] %v355_v23  ;;  %358 = vst [vmem:[%s6025_s30 + $0x160] sm:$0xf] %v357_v24  ;;  %v359_v25 = vld [vmem:[%s6018_s29 + $0x2c8] sm:$0xf] }
  0x50   : > { %v361_v26 = vld [vmem:[%s6018_s29 + $0x2d0] sm:$0xf]  ;;  %v363_v27 = vld [vmem:[%s6018_s29 + $0x2d8] sm:$0xf]  ;;  %360 = vst [vmem:[%s6025_s30 + $0x164] sm:$0xf] %v359_v25 }
  0x51   : > { %362 = vst [vmem:[%s6025_s30 + $0x168] sm:$0xf] %v361_v26  ;;  %364 = vst [vmem:[%s6025_s30 + $0x16c] sm:$0xf] %v363_v27  ;;  %v365_v28 = vld [vmem:[%s6018_s29 + $0x2e0] sm:$0xf] }
  0x52   : > { %v367_v29 = vld [vmem:[%s6018_s29 + $0x2e8] sm:$0xf]  ;;  %v369_v30 = vld [vmem:[%s6018_s29 + $0x2f0] sm:$0xf]  ;;  %366 = vst [vmem:[%s6025_s30 + $0x170] sm:$0xf] %v365_v28 }
  0x53   : > { %368 = vst [vmem:[%s6025_s30 + $0x174] sm:$0xf] %v367_v29  ;;  %370 = vst [vmem:[%s6025_s30 + $0x178] sm:$0xf] %v369_v30  ;;  %v371_v31 = vld [vmem:[%s6018_s29 + $0x2f8] sm:$0xf] }
  0x54   : > { %v373_v32 = vld [vmem:[%s6018_s29 + $0x300] sm:$0xf]  ;;  %v375_v33 = vld [vmem:[%s6018_s29 + $0x308] sm:$0xf]  ;;  %372 = vst [vmem:[%s6025_s30 + $0x17c] sm:$0xf] %v371_v31 }
  0x55   : > { %374 = vst [vmem:[%s6025_s30 + $0x180] sm:$0xf] %v373_v32  ;;  %376 = vst [vmem:[%s6025_s30 + $0x184] sm:$0xf] %v375_v33  ;;  %v377_v34 = vld [vmem:[%s6018_s29 + $0x310] sm:$0xf] }
  0x56   : > { %v379_v35 = vld [vmem:[%s6018_s29 + $0x318] sm:$0xf]  ;;  %v381_v36 = vld [vmem:[%s6018_s29 + $0x320] sm:$0xf]  ;;  %378 = vst [vmem:[%s6025_s30 + $0x188] sm:$0xf] %v377_v34 }
  0x57   : > { %380 = vst [vmem:[%s6025_s30 + $0x18c] sm:$0xf] %v379_v35  ;;  %382 = vst [vmem:[%s6025_s30 + $0x190] sm:$0xf] %v381_v36  ;;  %v383_v37 = vld [vmem:[%s6018_s29 + $0x328] sm:$0xf] }
  0x58   : > { %v385_v38 = vld [vmem:[%s6018_s29 + $0x330] sm:$0xf]  ;;  %v387_v39 = vld [vmem:[%s6018_s29 + $0x338] sm:$0xf]  ;;  %384 = vst [vmem:[%s6025_s30 + $0x194] sm:$0xf] %v383_v37 }
  0x59   : > { %386 = vst [vmem:[%s6025_s30 + $0x198] sm:$0xf] %v385_v38  ;;  %388 = vst [vmem:[%s6025_s30 + $0x19c] sm:$0xf] %v387_v39  ;;  %v389_v40 = vld [vmem:[%s6018_s29 + $0x340] sm:$0xf] }
  0x5a   : > { %v391_v41 = vld [vmem:[%s6018_s29 + $0x348] sm:$0xf]  ;;  %v393_v42 = vld [vmem:[%s6018_s29 + $0x350] sm:$0xf]  ;;  %390 = vst [vmem:[%s6025_s30 + $0x1a0] sm:$0xf] %v389_v40 }
  0x5b   : > { %392 = vst [vmem:[%s6025_s30 + $0x1a4] sm:$0xf] %v391_v41  ;;  %394 = vst [vmem:[%s6025_s30 + $0x1a8] sm:$0xf] %v393_v42  ;;  %v395_v43 = vld [vmem:[%s6018_s29 + $0x358] sm:$0xf] }
  0x5c   : > { %v397_v44 = vld [vmem:[%s6018_s29 + $0x360] sm:$0xf]  ;;  %v399_v45 = vld [vmem:[%s6018_s29 + $0x368] sm:$0xf]  ;;  %396 = vst [vmem:[%s6025_s30 + $0x1ac] sm:$0xf] %v395_v43 }
  0x5d   : > { %398 = vst [vmem:[%s6025_s30 + $0x1b0] sm:$0xf] %v397_v44  ;;  %400 = vst [vmem:[%s6025_s30 + $0x1b4] sm:$0xf] %v399_v45  ;;  %v401_v46 = vld [vmem:[%s6018_s29 + $0x370] sm:$0xf] }
  0x5e   : > { %v403_v47 = vld [vmem:[%s6018_s29 + $0x378] sm:$0xf]  ;;  %v405_v48 = vld [vmem:[%s6018_s29 + $0x380] sm:$0xf]  ;;  %402 = vst [vmem:[%s6025_s30 + $0x1b8] sm:$0xf] %v401_v46 }
  0x5f   : > { %404 = vst [vmem:[%s6025_s30 + $0x1bc] sm:$0xf] %v403_v47  ;;  %406 = vst [vmem:[%s6025_s30 + $0x1c0] sm:$0xf] %v405_v48  ;;  %v407_v49 = vld [vmem:[%s6018_s29 + $0x388] sm:$0xf] }
  0x60   : > { %v409_v50 = vld [vmem:[%s6018_s29 + $0x390] sm:$0xf]  ;;  %v411_v51 = vld [vmem:[%s6018_s29 + $0x398] sm:$0xf]  ;;  %408 = vst [vmem:[%s6025_s30 + $0x1c4] sm:$0xf] %v407_v49 }
  0x61   : > { %410 = vst [vmem:[%s6025_s30 + $0x1c8] sm:$0xf] %v409_v50  ;;  %412 = vst [vmem:[%s6025_s30 + $0x1cc] sm:$0xf] %v411_v51  ;;  %v413_v52 = vld [vmem:[%s6018_s29 + $0x3a0] sm:$0xf] }
  0x62   : > { %v415_v53 = vld [vmem:[%s6018_s29 + $0x3a8] sm:$0xf]  ;;  %v417_v54 = vld [vmem:[%s6018_s29 + $0x3b0] sm:$0xf]  ;;  %414 = vst [vmem:[%s6025_s30 + $0x1d0] sm:$0xf] %v413_v52 }
  0x63   : > { %416 = vst [vmem:[%s6025_s30 + $0x1d4] sm:$0xf] %v415_v53  ;;  %418 = vst [vmem:[%s6025_s30 + $0x1d8] sm:$0xf] %v417_v54  ;;  %v419_v55 = vld [vmem:[%s6018_s29 + $0x3b8] sm:$0xf] }
  0x64   : > { %v421_v56 = vld [vmem:[%s6018_s29 + $0x3c0] sm:$0xf]  ;;  %v423_v57 = vld [vmem:[%s6018_s29 + $0x3c8] sm:$0xf]  ;;  %420 = vst [vmem:[%s6025_s30 + $0x1dc] sm:$0xf] %v419_v55 }
  0x65   : > { %422 = vst [vmem:[%s6025_s30 + $0x1e0] sm:$0xf] %v421_v56  ;;  %424 = vst [vmem:[%s6025_s30 + $0x1e4] sm:$0xf] %v423_v57  ;;  %v425_v58 = vld [vmem:[%s6018_s29 + $0x3d0] sm:$0xf] }
  0x66   : > { %v427_v59 = vld [vmem:[%s6018_s29 + $0x3d8] sm:$0xf]  ;;  %v429_v60 = vld [vmem:[%s6018_s29 + $0x3e0] sm:$0xf]  ;;  %426 = vst [vmem:[%s6025_s30 + $0x1e8] sm:$0xf] %v425_v58 }
  0x67   : > { %428 = vst [vmem:[%s6025_s30 + $0x1ec] sm:$0xf] %v427_v59  ;;  %430 = vst [vmem:[%s6025_s30 + $0x1f0] sm:$0xf] %v429_v60  ;;  %v431_v61 = vld [vmem:[%s6018_s29 + $0x3e8] sm:$0xf] }
  0x68   : > { %v433_v62 = vld [vmem:[%s6018_s29 + $0x3f0] sm:$0xf]  ;;  %v435_v63 = vld [vmem:[%s6018_s29 + $0x3f8] sm:$0xf]  ;;  %432 = vst [vmem:[%s6025_s30 + $0x1f4] sm:$0xf] %v431_v61 }
  0x69   : > { %434 = vst [vmem:[%s6025_s30 + $0x1f8] sm:$0xf] %v433_v62  ;;  %436 = vst [vmem:[%s6025_s30 + $0x1fc] sm:$0xf] %v435_v63  ;;  %v437_v0 = vld [vmem:[%s6018_s29 + $0x400] sm:$0xf] }
  0x6a   : > { %v439_v1 = vld [vmem:[%s6018_s29 + $0x408] sm:$0xf]  ;;  %v441_v2 = vld [vmem:[%s6018_s29 + $0x410] sm:$0xf]  ;;  %438 = vst [vmem:[%s6025_s30 + $0x200] sm:$0xf] %v437_v0 }
  0x6b   : > { %440 = vst [vmem:[%s6025_s30 + $0x204] sm:$0xf] %v439_v1  ;;  %442 = vst [vmem:[%s6025_s30 + $0x208] sm:$0xf] %v441_v2  ;;  %v443_v3 = vld [vmem:[%s6018_s29 + $0x418] sm:$0xf] }
  0x6c   : > { %v445_v4 = vld [vmem:[%s6018_s29 + $0x420] sm:$0xf]  ;;  %v447_v5 = vld [vmem:[%s6018_s29 + $0x428] sm:$0xf]  ;;  %444 = vst [vmem:[%s6025_s30 + $0x20c] sm:$0xf] %v443_v3 }
  0x6d   : > { %446 = vst [vmem:[%s6025_s30 + $0x210] sm:$0xf] %v445_v4  ;;  %448 = vst [vmem:[%s6025_s30 + $0x214] sm:$0xf] %v447_v5  ;;  %v449_v6 = vld [vmem:[%s6018_s29 + $0x430] sm:$0xf] }
  0x6e   : > { %v451_v7 = vld [vmem:[%s6018_s29 + $0x438] sm:$0xf]  ;;  %v453_v8 = vld [vmem:[%s6018_s29 + $0x440] sm:$0xf]  ;;  %450 = vst [vmem:[%s6025_s30 + $0x218] sm:$0xf] %v449_v6 }
  0x6f   : > { %452 = vst [vmem:[%s6025_s30 + $0x21c] sm:$0xf] %v451_v7  ;;  %454 = vst [vmem:[%s6025_s30 + $0x220] sm:$0xf] %v453_v8  ;;  %v455_v9 = vld [vmem:[%s6018_s29 + $0x448] sm:$0xf] }
  0x70   : > { %v457_v10 = vld [vmem:[%s6018_s29 + $0x450] sm:$0xf]  ;;  %v459_v11 = vld [vmem:[%s6018_s29 + $0x458] sm:$0xf]  ;;  %456 = vst [vmem:[%s6025_s30 + $0x224] sm:$0xf] %v455_v9 }
  0x71   : > { %458 = vst [vmem:[%s6025_s30 + $0x228] sm:$0xf] %v457_v10  ;;  %460 = vst [vmem:[%s6025_s30 + $0x22c] sm:$0xf] %v459_v11  ;;  %v461_v12 = vld [vmem:[%s6018_s29 + $0x460] sm:$0xf] }
  0x72   : > { %v463_v13 = vld [vmem:[%s6018_s29 + $0x468] sm:$0xf]  ;;  %v465_v14 = vld [vmem:[%s6018_s29 + $0x470] sm:$0xf]  ;;  %462 = vst [vmem:[%s6025_s30 + $0x230] sm:$0xf] %v461_v12 }
  0x73   : > { %464 = vst [vmem:[%s6025_s30 + $0x234] sm:$0xf] %v463_v13  ;;  %466 = vst [vmem:[%s6025_s30 + $0x238] sm:$0xf] %v465_v14  ;;  %v467_v15 = vld [vmem:[%s6018_s29 + $0x478] sm:$0xf] }
  0x74   : > { %v469_v16 = vld [vmem:[%s6018_s29 + $0x480] sm:$0xf]  ;;  %v471_v17 = vld [vmem:[%s6018_s29 + $0x488] sm:$0xf]  ;;  %468 = vst [vmem:[%s6025_s30 + $0x23c] sm:$0xf] %v467_v15 }
  0x75   : > { %470 = vst [vmem:[%s6025_s30 + $0x240] sm:$0xf] %v469_v16  ;;  %472 = vst [vmem:[%s6025_s30 + $0x244] sm:$0xf] %v471_v17  ;;  %v473_v18 = vld [vmem:[%s6018_s29 + $0x490] sm:$0xf] }
  0x76   : > { %v475_v19 = vld [vmem:[%s6018_s29 + $0x498] sm:$0xf]  ;;  %v477_v20 = vld [vmem:[%s6018_s29 + $0x4a0] sm:$0xf]  ;;  %474 = vst [vmem:[%s6025_s30 + $0x248] sm:$0xf] %v473_v18 }
  0x77   : > { %476 = vst [vmem:[%s6025_s30 + $0x24c] sm:$0xf] %v475_v19  ;;  %478 = vst [vmem:[%s6025_s30 + $0x250] sm:$0xf] %v477_v20  ;;  %v479_v21 = vld [vmem:[%s6018_s29 + $0x4a8] sm:$0xf] }
  0x78   : > { %v481_v22 = vld [vmem:[%s6018_s29 + $0x4b0] sm:$0xf]  ;;  %v483_v23 = vld [vmem:[%s6018_s29 + $0x4b8] sm:$0xf]  ;;  %480 = vst [vmem:[%s6025_s30 + $0x254] sm:$0xf] %v479_v21 }
  0x79   : > { %482 = vst [vmem:[%s6025_s30 + $0x258] sm:$0xf] %v481_v22  ;;  %484 = vst [vmem:[%s6025_s30 + $0x25c] sm:$0xf] %v483_v23  ;;  %v485_v24 = vld [vmem:[%s6018_s29 + $0x4c0] sm:$0xf] }
  0x7a   : > { %v487_v25 = vld [vmem:[%s6018_s29 + $0x4c8] sm:$0xf]  ;;  %v489_v26 = vld [vmem:[%s6018_s29 + $0x4d0] sm:$0xf]  ;;  %486 = vst [vmem:[%s6025_s30 + $0x260] sm:$0xf] %v485_v24 }
  0x7b   : > { %488 = vst [vmem:[%s6025_s30 + $0x264] sm:$0xf] %v487_v25  ;;  %490 = vst [vmem:[%s6025_s30 + $0x268] sm:$0xf] %v489_v26  ;;  %v491_v27 = vld [vmem:[%s6018_s29 + $0x4d8] sm:$0xf] }
  0x7c   : > { %v493_v28 = vld [vmem:[%s6018_s29 + $0x4e0] sm:$0xf]  ;;  %v495_v29 = vld [vmem:[%s6018_s29 + $0x4e8] sm:$0xf]  ;;  %492 = vst [vmem:[%s6025_s30 + $0x26c] sm:$0xf] %v491_v27 }
  0x7d   : > { %494 = vst [vmem:[%s6025_s30 + $0x270] sm:$0xf] %v493_v28  ;;  %496 = vst [vmem:[%s6025_s30 + $0x274] sm:$0xf] %v495_v29  ;;  %v497_v30 = vld [vmem:[%s6018_s29 + $0x4f0] sm:$0xf] }
  0x7e   : > { %v499_v31 = vld [vmem:[%s6018_s29 + $0x4f8] sm:$0xf]  ;;  %v501_v32 = vld [vmem:[%s6018_s29 + $0x500] sm:$0xf]  ;;  %498 = vst [vmem:[%s6025_s30 + $0x278] sm:$0xf] %v497_v30 }
  0x7f   : > { %500 = vst [vmem:[%s6025_s30 + $0x27c] sm:$0xf] %v499_v31  ;;  %502 = vst [vmem:[%s6025_s30 + $0x280] sm:$0xf] %v501_v32  ;;  %v503_v33 = vld [vmem:[%s6018_s29 + $0x508] sm:$0xf] }
  0x80   : > { %v505_v34 = vld [vmem:[%s6018_s29 + $0x510] sm:$0xf]  ;;  %v507_v35 = vld [vmem:[%s6018_s29 + $0x518] sm:$0xf]  ;;  %504 = vst [vmem:[%s6025_s30 + $0x284] sm:$0xf] %v503_v33 }
  0x81   : > { %506 = vst [vmem:[%s6025_s30 + $0x288] sm:$0xf] %v505_v34  ;;  %508 = vst [vmem:[%s6025_s30 + $0x28c] sm:$0xf] %v507_v35  ;;  %v509_v36 = vld [vmem:[%s6018_s29 + $0x520] sm:$0xf] }
  0x82   : > { %v511_v37 = vld [vmem:[%s6018_s29 + $0x528] sm:$0xf]  ;;  %v513_v38 = vld [vmem:[%s6018_s29 + $0x530] sm:$0xf]  ;;  %510 = vst [vmem:[%s6025_s30 + $0x290] sm:$0xf] %v509_v36 }
  0x83   : > { %512 = vst [vmem:[%s6025_s30 + $0x294] sm:$0xf] %v511_v37  ;;  %514 = vst [vmem:[%s6025_s30 + $0x298] sm:$0xf] %v513_v38  ;;  %v515_v39 = vld [vmem:[%s6018_s29 + $0x538] sm:$0xf] }
  0x84   : > { %v517_v40 = vld [vmem:[%s6018_s29 + $0x540] sm:$0xf]  ;;  %v519_v41 = vld [vmem:[%s6018_s29 + $0x548] sm:$0xf]  ;;  %516 = vst [vmem:[%s6025_s30 + $0x29c] sm:$0xf] %v515_v39 }
  0x85   : > { %518 = vst [vmem:[%s6025_s30 + $0x2a0] sm:$0xf] %v517_v40  ;;  %520 = vst [vmem:[%s6025_s30 + $0x2a4] sm:$0xf] %v519_v41  ;;  %v521_v42 = vld [vmem:[%s6018_s29 + $0x550] sm:$0xf] }
  0x86   : > { %v523_v43 = vld [vmem:[%s6018_s29 + $0x558] sm:$0xf]  ;;  %v525_v44 = vld [vmem:[%s6018_s29 + $0x560] sm:$0xf]  ;;  %522 = vst [vmem:[%s6025_s30 + $0x2a8] sm:$0xf] %v521_v42 }
  0x87   : > { %524 = vst [vmem:[%s6025_s30 + $0x2ac] sm:$0xf] %v523_v43  ;;  %526 = vst [vmem:[%s6025_s30 + $0x2b0] sm:$0xf] %v525_v44  ;;  %v527_v45 = vld [vmem:[%s6018_s29 + $0x568] sm:$0xf] }
  0x88   : > { %v529_v46 = vld [vmem:[%s6018_s29 + $0x570] sm:$0xf]  ;;  %v531_v47 = vld [vmem:[%s6018_s29 + $0x578] sm:$0xf]  ;;  %528 = vst [vmem:[%s6025_s30 + $0x2b4] sm:$0xf] %v527_v45 }
  0x89   : > { %530 = vst [vmem:[%s6025_s30 + $0x2b8] sm:$0xf] %v529_v46  ;;  %532 = vst [vmem:[%s6025_s30 + $0x2bc] sm:$0xf] %v531_v47  ;;  %v533_v48 = vld [vmem:[%s6018_s29 + $0x580] sm:$0xf] }
  0x8a   : > { %v535_v49 = vld [vmem:[%s6018_s29 + $0x588] sm:$0xf]  ;;  %v537_v50 = vld [vmem:[%s6018_s29 + $0x590] sm:$0xf]  ;;  %534 = vst [vmem:[%s6025_s30 + $0x2c0] sm:$0xf] %v533_v48 }
  0x8b   : > { %536 = vst [vmem:[%s6025_s30 + $0x2c4] sm:$0xf] %v535_v49  ;;  %538 = vst [vmem:[%s6025_s30 + $0x2c8] sm:$0xf] %v537_v50  ;;  %v539_v51 = vld [vmem:[%s6018_s29 + $0x598] sm:$0xf] }
  0x8c   : > { %v541_v52 = vld [vmem:[%s6018_s29 + $0x5a0] sm:$0xf]  ;;  %v543_v53 = vld [vmem:[%s6018_s29 + $0x5a8] sm:$0xf]  ;;  %540 = vst [vmem:[%s6025_s30 + $0x2cc] sm:$0xf] %v539_v51 }
  0x8d   : > { %542 = vst [vmem:[%s6025_s30 + $0x2d0] sm:$0xf] %v541_v52  ;;  %544 = vst [vmem:[%s6025_s30 + $0x2d4] sm:$0xf] %v543_v53  ;;  %v545_v54 = vld [vmem:[%s6018_s29 + $0x5b0] sm:$0xf] }
  0x8e   : > { %v547_v55 = vld [vmem:[%s6018_s29 + $0x5b8] sm:$0xf]  ;;  %v549_v56 = vld [vmem:[%s6018_s29 + $0x5c0] sm:$0xf]  ;;  %546 = vst [vmem:[%s6025_s30 + $0x2d8] sm:$0xf] %v545_v54 }
  0x8f   : > { %548 = vst [vmem:[%s6025_s30 + $0x2dc] sm:$0xf] %v547_v55  ;;  %550 = vst [vmem:[%s6025_s30 + $0x2e0] sm:$0xf] %v549_v56  ;;  %v551_v57 = vld [vmem:[%s6018_s29 + $0x5c8] sm:$0xf] }
  0x90   : > { %v553_v58 = vld [vmem:[%s6018_s29 + $0x5d0] sm:$0xf]  ;;  %v555_v59 = vld [vmem:[%s6018_s29 + $0x5d8] sm:$0xf]  ;;  %552 = vst [vmem:[%s6025_s30 + $0x2e4] sm:$0xf] %v551_v57 }
  0x91   : > { %554 = vst [vmem:[%s6025_s30 + $0x2e8] sm:$0xf] %v553_v58  ;;  %556 = vst [vmem:[%s6025_s30 + $0x2ec] sm:$0xf] %v555_v59  ;;  %v557_v60 = vld [vmem:[%s6018_s29 + $0x5e0] sm:$0xf] }
  0x92   : > { %v559_v61 = vld [vmem:[%s6018_s29 + $0x5e8] sm:$0xf]  ;;  %v561_v62 = vld [vmem:[%s6018_s29 + $0x5f0] sm:$0xf]  ;;  %558 = vst [vmem:[%s6025_s30 + $0x2f0] sm:$0xf] %v557_v60 }
  0x93   : > { %560 = vst [vmem:[%s6025_s30 + $0x2f4] sm:$0xf] %v559_v61  ;;  %562 = vst [vmem:[%s6025_s30 + $0x2f8] sm:$0xf] %v561_v62  ;;  %v563_v63 = vld [vmem:[%s6018_s29 + $0x5f8] sm:$0xf] }
  0x94   : > { %v565_v0 = vld [vmem:[%s6018_s29 + $0x600] sm:$0xf]  ;;  %v567_v1 = vld [vmem:[%s6018_s29 + $0x608] sm:$0xf]  ;;  %564 = vst [vmem:[%s6025_s30 + $0x2fc] sm:$0xf] %v563_v63 }
  0x95   : > { %566 = vst [vmem:[%s6025_s30 + $0x300] sm:$0xf] %v565_v0  ;;  %568 = vst [vmem:[%s6025_s30 + $0x304] sm:$0xf] %v567_v1  ;;  %v569_v2 = vld [vmem:[%s6018_s29 + $0x610] sm:$0xf] }
  0x96   : > { %v571_v3 = vld [vmem:[%s6018_s29 + $0x618] sm:$0xf]  ;;  %v573_v4 = vld [vmem:[%s6018_s29 + $0x620] sm:$0xf]  ;;  %570 = vst [vmem:[%s6025_s30 + $0x308] sm:$0xf] %v569_v2 }
  0x97   : > { %572 = vst [vmem:[%s6025_s30 + $0x30c] sm:$0xf] %v571_v3  ;;  %574 = vst [vmem:[%s6025_s30 + $0x310] sm:$0xf] %v573_v4  ;;  %v575_v5 = vld [vmem:[%s6018_s29 + $0x628] sm:$0xf] }
  0x98   : > { %v577_v6 = vld [vmem:[%s6018_s29 + $0x630] sm:$0xf]  ;;  %v579_v7 = vld [vmem:[%s6018_s29 + $0x638] sm:$0xf]  ;;  %576 = vst [vmem:[%s6025_s30 + $0x314] sm:$0xf] %v575_v5 }
  0x99   : > { %578 = vst [vmem:[%s6025_s30 + $0x318] sm:$0xf] %v577_v6  ;;  %580 = vst [vmem:[%s6025_s30 + $0x31c] sm:$0xf] %v579_v7  ;;  %v581_v8 = vld [vmem:[%s6018_s29 + $0x640] sm:$0xf] }
  0x9a   : > { %v583_v9 = vld [vmem:[%s6018_s29 + $0x648] sm:$0xf]  ;;  %v585_v10 = vld [vmem:[%s6018_s29 + $0x650] sm:$0xf]  ;;  %582 = vst [vmem:[%s6025_s30 + $0x320] sm:$0xf] %v581_v8 }
  0x9b   : > { %584 = vst [vmem:[%s6025_s30 + $0x324] sm:$0xf] %v583_v9  ;;  %586 = vst [vmem:[%s6025_s30 + $0x328] sm:$0xf] %v585_v10  ;;  %v587_v11 = vld [vmem:[%s6018_s29 + $0x658] sm:$0xf] }
  0x9c   : > { %v589_v12 = vld [vmem:[%s6018_s29 + $0x660] sm:$0xf]  ;;  %v591_v13 = vld [vmem:[%s6018_s29 + $0x668] sm:$0xf]  ;;  %588 = vst [vmem:[%s6025_s30 + $0x32c] sm:$0xf] %v587_v11 }
  0x9d   : > { %590 = vst [vmem:[%s6025_s30 + $0x330] sm:$0xf] %v589_v12  ;;  %592 = vst [vmem:[%s6025_s30 + $0x334] sm:$0xf] %v591_v13  ;;  %v593_v14 = vld [vmem:[%s6018_s29 + $0x670] sm:$0xf] }
  0x9e   : > { %v595_v15 = vld [vmem:[%s6018_s29 + $0x678] sm:$0xf]  ;;  %v597_v16 = vld [vmem:[%s6018_s29 + $0x680] sm:$0xf]  ;;  %594 = vst [vmem:[%s6025_s30 + $0x338] sm:$0xf] %v593_v14 }
  0x9f   : > { %596 = vst [vmem:[%s6025_s30 + $0x33c] sm:$0xf] %v595_v15  ;;  %598 = vst [vmem:[%s6025_s30 + $0x340] sm:$0xf] %v597_v16  ;;  %v599_v17 = vld [vmem:[%s6018_s29 + $0x688] sm:$0xf] }
  0xa0   : > { %v601_v18 = vld [vmem:[%s6018_s29 + $0x690] sm:$0xf]  ;;  %v603_v19 = vld [vmem:[%s6018_s29 + $0x698] sm:$0xf]  ;;  %600 = vst [vmem:[%s6025_s30 + $0x344] sm:$0xf] %v599_v17 }
  0xa1   : > { %602 = vst [vmem:[%s6025_s30 + $0x348] sm:$0xf] %v601_v18  ;;  %604 = vst [vmem:[%s6025_s30 + $0x34c] sm:$0xf] %v603_v19  ;;  %v605_v20 = vld [vmem:[%s6018_s29 + $0x6a0] sm:$0xf] }
  0xa2   : > { %v607_v21 = vld [vmem:[%s6018_s29 + $0x6a8] sm:$0xf]  ;;  %v609_v22 = vld [vmem:[%s6018_s29 + $0x6b0] sm:$0xf]  ;;  %606 = vst [vmem:[%s6025_s30 + $0x350] sm:$0xf] %v605_v20 }
  0xa3   : > { %608 = vst [vmem:[%s6025_s30 + $0x354] sm:$0xf] %v607_v21  ;;  %610 = vst [vmem:[%s6025_s30 + $0x358] sm:$0xf] %v609_v22  ;;  %v611_v23 = vld [vmem:[%s6018_s29 + $0x6b8] sm:$0xf] }
  0xa4   : > { %v613_v24 = vld [vmem:[%s6018_s29 + $0x6c0] sm:$0xf]  ;;  %v615_v25 = vld [vmem:[%s6018_s29 + $0x6c8] sm:$0xf]  ;;  %612 = vst [vmem:[%s6025_s30 + $0x35c] sm:$0xf] %v611_v23 }
  0xa5   : > { %614 = vst [vmem:[%s6025_s30 + $0x360] sm:$0xf] %v613_v24  ;;  %616 = vst [vmem:[%s6025_s30 + $0x364] sm:$0xf] %v615_v25  ;;  %v617_v26 = vld [vmem:[%s6018_s29 + $0x6d0] sm:$0xf] }
  0xa6   : > { %v619_v27 = vld [vmem:[%s6018_s29 + $0x6d8] sm:$0xf]  ;;  %v621_v28 = vld [vmem:[%s6018_s29 + $0x6e0] sm:$0xf]  ;;  %618 = vst [vmem:[%s6025_s30 + $0x368] sm:$0xf] %v617_v26 }
  0xa7   : > { %620 = vst [vmem:[%s6025_s30 + $0x36c] sm:$0xf] %v619_v27  ;;  %622 = vst [vmem:[%s6025_s30 + $0x370] sm:$0xf] %v621_v28  ;;  %v623_v29 = vld [vmem:[%s6018_s29 + $0x6e8] sm:$0xf] }
  0xa8   : > { %v625_v30 = vld [vmem:[%s6018_s29 + $0x6f0] sm:$0xf]  ;;  %v627_v31 = vld [vmem:[%s6018_s29 + $0x6f8] sm:$0xf]  ;;  %624 = vst [vmem:[%s6025_s30 + $0x374] sm:$0xf] %v623_v29 }
  0xa9   : > { %626 = vst [vmem:[%s6025_s30 + $0x378] sm:$0xf] %v625_v30  ;;  %628 = vst [vmem:[%s6025_s30 + $0x37c] sm:$0xf] %v627_v31  ;;  %v629_v32 = vld [vmem:[%s6018_s29 + $0x700] sm:$0xf] }
  0xaa   : > { %v631_v33 = vld [vmem:[%s6018_s29 + $0x708] sm:$0xf]  ;;  %v633_v34 = vld [vmem:[%s6018_s29 + $0x710] sm:$0xf]  ;;  %630 = vst [vmem:[%s6025_s30 + $0x380] sm:$0xf] %v629_v32 }
  0xab   : > { %632 = vst [vmem:[%s6025_s30 + $0x384] sm:$0xf] %v631_v33  ;;  %634 = vst [vmem:[%s6025_s30 + $0x388] sm:$0xf] %v633_v34  ;;  %v635_v35 = vld [vmem:[%s6018_s29 + $0x718] sm:$0xf] }
  0xac   : > { %v637_v36 = vld [vmem:[%s6018_s29 + $0x720] sm:$0xf]  ;;  %v639_v37 = vld [vmem:[%s6018_s29 + $0x728] sm:$0xf]  ;;  %636 = vst [vmem:[%s6025_s30 + $0x38c] sm:$0xf] %v635_v35 }
  0xad   : > { %638 = vst [vmem:[%s6025_s30 + $0x390] sm:$0xf] %v637_v36  ;;  %640 = vst [vmem:[%s6025_s30 + $0x394] sm:$0xf] %v639_v37  ;;  %v641_v38 = vld [vmem:[%s6018_s29 + $0x730] sm:$0xf] }
  0xae   : > { %v643_v39 = vld [vmem:[%s6018_s29 + $0x738] sm:$0xf]  ;;  %v645_v40 = vld [vmem:[%s6018_s29 + $0x740] sm:$0xf]  ;;  %642 = vst [vmem:[%s6025_s30 + $0x398] sm:$0xf] %v641_v38 }
  0xaf   : > { %644 = vst [vmem:[%s6025_s30 + $0x39c] sm:$0xf] %v643_v39  ;;  %646 = vst [vmem:[%s6025_s30 + $0x3a0] sm:$0xf] %v645_v40  ;;  %v647_v41 = vld [vmem:[%s6018_s29 + $0x748] sm:$0xf] }
  0xb0   : > { %v649_v42 = vld [vmem:[%s6018_s29 + $0x750] sm:$0xf]  ;;  %v651_v43 = vld [vmem:[%s6018_s29 + $0x758] sm:$0xf]  ;;  %648 = vst [vmem:[%s6025_s30 + $0x3a4] sm:$0xf] %v647_v41 }
  0xb1   : > { %650 = vst [vmem:[%s6025_s30 + $0x3a8] sm:$0xf] %v649_v42  ;;  %652 = vst [vmem:[%s6025_s30 + $0x3ac] sm:$0xf] %v651_v43  ;;  %v653_v44 = vld [vmem:[%s6018_s29 + $0x760] sm:$0xf] }
  0xb2   : > { %v655_v45 = vld [vmem:[%s6018_s29 + $0x768] sm:$0xf]  ;;  %v657_v46 = vld [vmem:[%s6018_s29 + $0x770] sm:$0xf]  ;;  %654 = vst [vmem:[%s6025_s30 + $0x3b0] sm:$0xf] %v653_v44 }
  0xb3   : > { %656 = vst [vmem:[%s6025_s30 + $0x3b4] sm:$0xf] %v655_v45  ;;  %658 = vst [vmem:[%s6025_s30 + $0x3b8] sm:$0xf] %v657_v46  ;;  %v659_v47 = vld [vmem:[%s6018_s29 + $0x778] sm:$0xf] }
  0xb4   : > { %v661_v48 = vld [vmem:[%s6018_s29 + $0x780] sm:$0xf]  ;;  %v663_v49 = vld [vmem:[%s6018_s29 + $0x788] sm:$0xf]  ;;  %660 = vst [vmem:[%s6025_s30 + $0x3bc] sm:$0xf] %v659_v47 }
  0xb5   : > { %662 = vst [vmem:[%s6025_s30 + $0x3c0] sm:$0xf] %v661_v48  ;;  %664 = vst [vmem:[%s6025_s30 + $0x3c4] sm:$0xf] %v663_v49  ;;  %v665_v50 = vld [vmem:[%s6018_s29 + $0x790] sm:$0xf] }
  0xb6   : > { %v667_v51 = vld [vmem:[%s6018_s29 + $0x798] sm:$0xf]  ;;  %v669_v52 = vld [vmem:[%s6018_s29 + $0x7a0] sm:$0xf]  ;;  %666 = vst [vmem:[%s6025_s30 + $0x3c8] sm:$0xf] %v665_v50 }
  0xb7   : > { %668 = vst [vmem:[%s6025_s30 + $0x3cc] sm:$0xf] %v667_v51  ;;  %670 = vst [vmem:[%s6025_s30 + $0x3d0] sm:$0xf] %v669_v52  ;;  %v671_v53 = vld [vmem:[%s6018_s29 + $0x7a8] sm:$0xf] }
  0xb8   : > { %v673_v54 = vld [vmem:[%s6018_s29 + $0x7b0] sm:$0xf]  ;;  %v675_v55 = vld [vmem:[%s6018_s29 + $0x7b8] sm:$0xf]  ;;  %672 = vst [vmem:[%s6025_s30 + $0x3d4] sm:$0xf] %v671_v53 }
  0xb9   : > { %674 = vst [vmem:[%s6025_s30 + $0x3d8] sm:$0xf] %v673_v54  ;;  %676 = vst [vmem:[%s6025_s30 + $0x3dc] sm:$0xf] %v675_v55  ;;  %v677_v56 = vld [vmem:[%s6018_s29 + $0x7c0] sm:$0xf] }
  0xba   : > { %v679_v57 = vld [vmem:[%s6018_s29 + $0x7c8] sm:$0xf]  ;;  %v681_v58 = vld [vmem:[%s6018_s29 + $0x7d0] sm:$0xf]  ;;  %678 = vst [vmem:[%s6025_s30 + $0x3e0] sm:$0xf] %v677_v56 }
  0xbb   : > { %680 = vst [vmem:[%s6025_s30 + $0x3e4] sm:$0xf] %v679_v57  ;;  %682 = vst [vmem:[%s6025_s30 + $0x3e8] sm:$0xf] %v681_v58  ;;  %v683_v59 = vld [vmem:[%s6018_s29 + $0x7d8] sm:$0xf] }
  0xbc   : > { %v685_v60 = vld [vmem:[%s6018_s29 + $0x7e0] sm:$0xf]  ;;  %v687_v61 = vld [vmem:[%s6018_s29 + $0x7e8] sm:$0xf]  ;;  %684 = vst [vmem:[%s6025_s30 + $0x3ec] sm:$0xf] %v683_v59 }
  0xbd   : > { %686 = vst [vmem:[%s6025_s30 + $0x3f0] sm:$0xf] %v685_v60  ;;  %688 = vst [vmem:[%s6025_s30 + $0x3f4] sm:$0xf] %v687_v61  ;;  %v689_v62 = vld [vmem:[%s6018_s29 + $0x7f0] sm:$0xf] }
  0xbe   : > { %v691_v63 = vld [vmem:[%s6018_s29 + $0x7f8] sm:$0xf]  ;;  %v693_v0 = vld [vmem:[%s6018_s29 + $0x800] sm:$0xf]  ;;  %690 = vst [vmem:[%s6025_s30 + $0x3f8] sm:$0xf] %v689_v62 }
  0xbf   : > { %692 = vst [vmem:[%s6025_s30 + $0x3fc] sm:$0xf] %v691_v63  ;;  %694 = vst [vmem:[%s6025_s30 + $0x400] sm:$0xf] %v693_v0  ;;  %v695_v1 = vld [vmem:[%s6018_s29 + $0x808] sm:$0xf] }
  0xc0   : > { %v697_v2 = vld [vmem:[%s6018_s29 + $0x810] sm:$0xf]  ;;  %v699_v3 = vld [vmem:[%s6018_s29 + $0x818] sm:$0xf]  ;;  %696 = vst [vmem:[%s6025_s30 + $0x404] sm:$0xf] %v695_v1 }
  0xc1   : > { %698 = vst [vmem:[%s6025_s30 + $0x408] sm:$0xf] %v697_v2  ;;  %700 = vst [vmem:[%s6025_s30 + $0x40c] sm:$0xf] %v699_v3  ;;  %v701_v4 = vld [vmem:[%s6018_s29 + $0x820] sm:$0xf] }
  0xc2   : > { %v703_v5 = vld [vmem:[%s6018_s29 + $0x828] sm:$0xf]  ;;  %v705_v6 = vld [vmem:[%s6018_s29 + $0x830] sm:$0xf]  ;;  %702 = vst [vmem:[%s6025_s30 + $0x410] sm:$0xf] %v701_v4 }
  0xc3   : > { %704 = vst [vmem:[%s6025_s30 + $0x414] sm:$0xf] %v703_v5  ;;  %706 = vst [vmem:[%s6025_s30 + $0x418] sm:$0xf] %v705_v6  ;;  %v707_v7 = vld [vmem:[%s6018_s29 + $0x838] sm:$0xf] }
  0xc4   : > { %v709_v8 = vld [vmem:[%s6018_s29 + $0x840] sm:$0xf]  ;;  %v711_v9 = vld [vmem:[%s6018_s29 + $0x848] sm:$0xf]  ;;  %708 = vst [vmem:[%s6025_s30 + $0x41c] sm:$0xf] %v707_v7 }
  0xc5   : > { %710 = vst [vmem:[%s6025_s30 + $0x420] sm:$0xf] %v709_v8  ;;  %712 = vst [vmem:[%s6025_s30 + $0x424] sm:$0xf] %v711_v9  ;;  %v713_v10 = vld [vmem:[%s6018_s29 + $0x850] sm:$0xf] }
  0xc6   : > { %v715_v11 = vld [vmem:[%s6018_s29 + $0x858] sm:$0xf]  ;;  %v717_v12 = vld [vmem:[%s6018_s29 + $0x860] sm:$0xf]  ;;  %714 = vst [vmem:[%s6025_s30 + $0x428] sm:$0xf] %v713_v10 }
  0xc7   : > { %716 = vst [vmem:[%s6025_s30 + $0x42c] sm:$0xf] %v715_v11  ;;  %718 = vst [vmem:[%s6025_s30 + $0x430] sm:$0xf] %v717_v12  ;;  %v719_v13 = vld [vmem:[%s6018_s29 + $0x868] sm:$0xf] }
  0xc8   : > { %v721_v14 = vld [vmem:[%s6018_s29 + $0x870] sm:$0xf]  ;;  %v723_v15 = vld [vmem:[%s6018_s29 + $0x878] sm:$0xf]  ;;  %720 = vst [vmem:[%s6025_s30 + $0x434] sm:$0xf] %v719_v13 }
  0xc9   : > { %722 = vst [vmem:[%s6025_s30 + $0x438] sm:$0xf] %v721_v14  ;;  %724 = vst [vmem:[%s6025_s30 + $0x43c] sm:$0xf] %v723_v15  ;;  %v725_v16 = vld [vmem:[%s6018_s29 + $0x880] sm:$0xf] }
  0xca   : > { %v727_v17 = vld [vmem:[%s6018_s29 + $0x888] sm:$0xf]  ;;  %v729_v18 = vld [vmem:[%s6018_s29 + $0x890] sm:$0xf]  ;;  %726 = vst [vmem:[%s6025_s30 + $0x440] sm:$0xf] %v725_v16 }
  0xcb   : > { %728 = vst [vmem:[%s6025_s30 + $0x444] sm:$0xf] %v727_v17  ;;  %730 = vst [vmem:[%s6025_s30 + $0x448] sm:$0xf] %v729_v18  ;;  %v731_v19 = vld [vmem:[%s6018_s29 + $0x898] sm:$0xf] }
  0xcc   : > { %v733_v20 = vld [vmem:[%s6018_s29 + $0x8a0] sm:$0xf]  ;;  %v735_v21 = vld [vmem:[%s6018_s29 + $0x8a8] sm:$0xf]  ;;  %732 = vst [vmem:[%s6025_s30 + $0x44c] sm:$0xf] %v731_v19 }
  0xcd   : > { %734 = vst [vmem:[%s6025_s30 + $0x450] sm:$0xf] %v733_v20  ;;  %736 = vst [vmem:[%s6025_s30 + $0x454] sm:$0xf] %v735_v21  ;;  %v737_v22 = vld [vmem:[%s6018_s29 + $0x8b0] sm:$0xf] }
  0xce   : > { %v739_v23 = vld [vmem:[%s6018_s29 + $0x8b8] sm:$0xf]  ;;  %v741_v24 = vld [vmem:[%s6018_s29 + $0x8c0] sm:$0xf]  ;;  %738 = vst [vmem:[%s6025_s30 + $0x458] sm:$0xf] %v737_v22 }
  0xcf   : > { %740 = vst [vmem:[%s6025_s30 + $0x45c] sm:$0xf] %v739_v23  ;;  %742 = vst [vmem:[%s6025_s30 + $0x460] sm:$0xf] %v741_v24  ;;  %v743_v25 = vld [vmem:[%s6018_s29 + $0x8c8] sm:$0xf] }
  0xd0   : > { %v745_v26 = vld [vmem:[%s6018_s29 + $0x8d0] sm:$0xf]  ;;  %v747_v27 = vld [vmem:[%s6018_s29 + $0x8d8] sm:$0xf]  ;;  %744 = vst [vmem:[%s6025_s30 + $0x464] sm:$0xf] %v743_v25 }
  0xd1   : > { %746 = vst [vmem:[%s6025_s30 + $0x468] sm:$0xf] %v745_v26  ;;  %748 = vst [vmem:[%s6025_s30 + $0x46c] sm:$0xf] %v747_v27  ;;  %v749_v28 = vld [vmem:[%s6018_s29 + $0x8e0] sm:$0xf] }
  0xd2   : > { %v751_v29 = vld [vmem:[%s6018_s29 + $0x8e8] sm:$0xf]  ;;  %v753_v30 = vld [vmem:[%s6018_s29 + $0x8f0] sm:$0xf]  ;;  %750 = vst [vmem:[%s6025_s30 + $0x470] sm:$0xf] %v749_v28 }
  0xd3   : > { %752 = vst [vmem:[%s6025_s30 + $0x474] sm:$0xf] %v751_v29  ;;  %754 = vst [vmem:[%s6025_s30 + $0x478] sm:$0xf] %v753_v30  ;;  %v755_v31 = vld [vmem:[%s6018_s29 + $0x8f8] sm:$0xf] }
  0xd4   : > { %756 = vst [vmem:[%s6025_s30 + $0x47c] sm:$0xf] %v755_v31 }
  0xd5 PF: > { %p4652_p7 = scmp.ge.s32.totalorder %s5950_s17, 1  ;;  %p1366_p8 = scmp.lt.s32.totalorder %s5950_s17, 3 }
  0xd7   : > { %p1367_p9 = pnand %p4652_p7, %p1366_p8 }
  0xd8   : > { %s1373_s5 = sand.u32 (!%p1367_p9), 1, %s5942_s15   ;;  %v5584_v32 = vld [vmem:[%s7477_s0 + $0x4] ss:$72 sps:$4 sm:$0xff] (!%p1367_p9)   ;;  %v5582_v51 = vld [vmem:[%s7477_s0] ss:$72 sps:$4 sm:$0xff] (!%p1367_p9)   ;;  %p1403_p10 = scmp.lt.s32.totalorder (!%p1367_p9), %s5993_s18, 1 }
  0xd9   : > { %1370 = sbr.rel (%p1367_p9) target bundleno = 864 (0x360), region = 73  ;;  %v5587_v33 = vld [vmem:[%s7477_s0 + $0x244] ss:$72 sps:$4 sm:$0xff] (!%p1367_p9)   ;;  %3458 = vmatprep.mubr.bf16.mxu0 (!%p1367_p9), %v5584_v32  ;;  %v5585_v52 = vld [vmem:[%s7477_s0 + $0x240] ss:$72 sps:$4 sm:$0xff] (!%p1367_p9)   ;;  %s4653_s9 = sshll.u32 (!%p1367_p9), %s1373_s5, 7 }
  0xda   : > { %s5541_s6 = smul.u32 (!%p1367_p9), 1152, %s1373_s5  ;;  %3490 = vmatprep.mubr.bf16.mxu1 (!%p1367_p9), %v5587_v33  ;;  %v5596_v57 = vld [vmem:[%s7477_s0 + $0x94] ss:$72 sps:$4 sm:$0xff] (!%p1367_p9)   ;;  %v5600_v63 = vld [vmem:[%s7477_s0 + $0x90] ss:$72 sps:$4 sm:$0xff] (!%p1367_p9)   ;;  %s7427_s15 = scalar_lea.vmem (!%p1367_p9), [#allocation3], %s4653_s9 }
  0xdb   : > { %v5598_v59 = vld [vmem:[%s7477_s0 + $0x2d4] ss:$72 sps:$4 sm:$0xff] (!%p1367_p9)   ;;  %v5601_v0 = vld [vmem:[%s7477_s0 + $0x2d0] ss:$72 sps:$4 sm:$0xff] (!%p1367_p9)   ;;  %v5610_v6 = vld [vmem:[%s7477_s0 + $0x124] ss:$72 sps:$4 sm:$0xff] (!%p1367_p9)  }
  0xdc   : > { %s6609_s11 = scalar_lea.vmem (!%p1367_p9), [#allocation2], %s5541_s6  ;;  %v5612_v8 = vld [vmem:[%s7477_s0 + $0x364] ss:$72 sps:$4 sm:$0xff] (!%p1367_p9)   ;;  %v5614_v11 = vld [vmem:[%s7477_s0 + $0x120] ss:$72 sps:$4 sm:$0xff] (!%p1367_p9)  }
  0xdd   : > { %v5566_v34 = vld [vmem:[%s6609_s11 + $0x40] sm:$0xff] (!%p1367_p9)   ;;  %v5568_v36 = vld [vmem:[%s6609_s11 + $0x48] sm:$0xff] (!%p1367_p9)   ;;  %v5570_v38 = vld [vmem:[%s6609_s11 + $0x50] sm:$0xff] (!%p1367_p9)  }
  0xde   : > { %v5567_v35 = vld [vmem:[%s6609_s11] sm:$0xff] (!%p1367_p9)   ;;  %4948 = vmatprep.subr.bf16.mxu0 (!%p1367_p9), %v5566_v34  ;;  %5524 = vmatprep.subr.bf16.mxu1 (!%p1367_p9), %v5566_v34  ;;  %v5569_v37 = vld [vmem:[%s6609_s11 + $0x8] sm:$0xff] (!%p1367_p9)   ;;  %v5571_v39 = vld [vmem:[%s6609_s11 + $0x10] sm:$0xff] (!%p1367_p9)  }
  0xdf   : > { %4949 = vmatpush3.bf16.msra.mxu0 (!%p1367_p9), %v5567_v35  ;;  %5532 = vmatpush3.bf16.msra.mxu1 (!%p1367_p9), %v5567_v35  ;;  %v5572_v40 = vld [vmem:[%s6609_s11 + $0x58] sm:$0xff] (!%p1367_p9)   ;;  %v5574_v42 = vld [vmem:[%s6609_s11 + $0x60] sm:$0xff] (!%p1367_p9)   ;;  %v5576_v44 = vld [vmem:[%s6609_s11 + $0x68] sm:$0xff] (!%p1367_p9)  }
  0xe0   : > { %4950 = vmatprep.subr.bf16.mxu0 %v5568_v36  ;;  %5525 = vmatprep.subr.bf16.mxu1 %v5568_v36  ;;  %v5573_v41 = vld [vmem:[%s6609_s11 + $0x18] sm:$0xff]   ;;  %v5575_v43 = vld [vmem:[%s6609_s11 + $0x20] sm:$0xff]   ;;  %v5577_v45 = vld [vmem:[%s6609_s11 + $0x28] sm:$0xff]   ;;  %s7415_s27 = scalar_select %p1403_p10, %s5993_s18, 1 }
  0xe1   : > { %v5578_v46 = vld [vmem:[%s6609_s11 + $0x70] sm:$0xff]   ;;  %v5580_v48 = vld [vmem:[%s6609_s11 + $0x78] sm:$0xff]   ;;  %v5588_v50 = vld [vmem:[%s6609_s11 + $0xc0] sm:$0xff]   ;;  %s4945_s5 = sshll.u32 (%p6008_p5), %s5993_s18, 3 }
  0xe2   : > { %v5579_v47 = vld [vmem:[%s6609_s11 + $0x30] sm:$0xff]   ;;  %v5581_v49 = vld [vmem:[%s6609_s11 + $0x38] sm:$0xff]   ;;  %v5589_v53 = vld [vmem:[%s6609_s11 + $0x140] sm:$0xff]   ;;  %s1405_s30 = scalar_lea.vmem %s7479_s2, %s7415_s27  ;;  %s1408_s8 = scalar_lea.vmem %s7480_s3, %s7415_s27 }
  0xe3   : > { %4951 = vmatpush3.bf16.msra.mxu0 %v5569_v37  ;;  %5533 = vmatpush3.bf16.msra.mxu1 %v5569_v37  ;;  %v5590_v54 = vld [vmem:[%s6609_s11 + $0x80] sm:$0xff]   ;;  %v5592_v56 = vld [vmem:[%s6609_s11 + $0xc8] sm:$0xff]   ;;  %v5602_v62 = vld [vmem:[%s6609_s11 + $0xd0] sm:$0xff]   ;;  %s4480_s13 = scalar_lea.vmem (%p6008_p5), %s7481_s4, %s4945_s5 }
  0xe4   : > { %4952 = vmatprep.subr.bf16.mxu0 %v5570_v38  ;;  %5526 = vmatprep.subr.bf16.mxu1 %v5570_v38  ;;  %v5591_v55 = vld [vmem:[%s6609_s11 + $0x100] sm:$0xff]   ;;  %v5593_v58 = vld [vmem:[%s6609_s11 + $0x148] sm:$0xff]   ;;  %v5603_v1 = vld [vmem:[%s6609_s11 + $0x150] sm:$0xff]  }
  0xe5   : > { %v5594_v60 = vld [vmem:[%s6609_s11 + $0x88] sm:$0xff]   ;;  %v5604_v2 = vld [vmem:[%s6609_s11 + $0x90] sm:$0xff]   ;;  %v5606_v4 = vld [vmem:[%s6609_s11 + $0xd8] sm:$0xff]  }
  0xe6   : > { %v5595_v61 = vld [vmem:[%s6609_s11 + $0x108] sm:$0xff]   ;;  %v5605_v3 = vld [vmem:[%s6609_s11 + $0x110] sm:$0xff]   ;;  %v5607_v5 = vld [vmem:[%s6609_s11 + $0x158] sm:$0xff]  }
  0xe7   : > { %4953 = vmatpush3.bf16.msra.mxu0 %v5571_v39  ;;  %5534 = vmatpush3.bf16.msra.mxu1 %v5571_v39  ;;  %v5608_v7 = vld [vmem:[%s6609_s11 + $0x98] sm:$0xff]   ;;  %v5616_v10 = vld [vmem:[%s6609_s11 + $0xe0] sm:$0xff]   ;;  %v5620_v16 = vld [vmem:[%s6609_s11 + $0xe8] sm:$0xff]  }
  0xe8   : > { %4954 = vmatprep.subr.bf16.mxu0 %v5572_v40  ;;  %5527 = vmatprep.subr.bf16.mxu1 %v5572_v40  ;;  %v5609_v9 = vld [vmem:[%s6609_s11 + $0x118] sm:$0xff]   ;;  %v5615_v12 = vld [vmem:[%s7477_s0 + $0x360] ss:$72 sps:$4 sm:$0xff]   ;;  %v5630_v22 = vld [vmem:[%s6609_s11 + $0xf0] sm:$0xff]  }
  0xe9   : > { %v5617_v13 = vld [vmem:[%s6609_s11 + $0x160] sm:$0xff]   ;;  %v5621_v17 = vld [vmem:[%s6609_s11 + $0x168] sm:$0xff]   ;;  %v5624_v18 = vld [vmem:[%s7477_s0 + $0x1b4] ss:$72 sps:$4 sm:$0xff]  }
  0xea   : > { %v5618_v14 = vld [vmem:[%s6609_s11 + $0xa0] sm:$0xff]   ;;  %v5622_v19 = vld [vmem:[%s6609_s11 + $0xa8] sm:$0xff]   ;;  %v5626_v20 = vld [vmem:[%s7477_s0 + $0x3f4] ss:$72 sps:$4 sm:$0xff]  }
  0xeb   : > { %4955 = vmatpush3.bf16.msra.mxu0 %v5573_v41  ;;  %5535 = vmatpush3.bf16.msra.mxu1 %v5573_v41  ;;  %v5619_v15 = vld [vmem:[%s6609_s11 + $0x120] sm:$0xff]   ;;  %v5623_v21 = vld [vmem:[%s6609_s11 + $0x128] sm:$0xff]   ;;  %v5628_v23 = vld [vmem:[%s7477_s0 + $0x1b0] ss:$72 sps:$4 sm:$0xff]  }
  0xec   : > { %4956 = vmatprep.subr.bf16.mxu0 %v5574_v42  ;;  %5528 = vmatprep.subr.bf16.mxu1 %v5574_v42  ;;  %v5629_v24 = vld [vmem:[%s7477_s0 + $0x3f0] ss:$72 sps:$4 sm:$0xff]   ;;  %v5640_v30 = vld [vmem:[%s7477_s0 + $0xc] ss:$72 sps:$4 sm:$0xff]   ;;  %v5644_v34 = vld [vmem:[%s6609_s11 + $0x1c0] sm:$0xff]  }
  0xed   : > { %v5631_v25 = vld [vmem:[%s6609_s11 + $0x170] sm:$0xff]   ;;  %v5634_v28 = vld [vmem:[%s6609_s11 + $0xf8] sm:$0xff]   ;;  %v5646_v36 = vld [vmem:[%s6609_s11 + $0x240] sm:$0xff]  }
  0xee   : > { %v5632_v26 = vld [vmem:[%s6609_s11 + $0xb0] sm:$0xff]   ;;  %v5635_v29 = vld [vmem:[%s6609_s11 + $0x178] sm:$0xff]   ;;  %v5645_v38 = vld [vmem:[%s6609_s11 + $0x180] sm:$0xff]  }
  0xef   : > { %4957 = vmatpush3.bf16.msra.mxu0 %v5575_v43  ;;  %5536 = vmatpush3.bf16.msra.mxu1 %v5575_v43  ;;  %v5633_v27 = vld [vmem:[%s6609_s11 + $0x130] sm:$0xff]   ;;  %v5636_v31 = vld [vmem:[%s6609_s11 + $0xb8] sm:$0xff]   ;;  %v5647_v39 = vld [vmem:[%s6609_s11 + $0x200] sm:$0xff]  }
  0xf0   : > { %4958 = vmatprep.subr.bf16.mxu0 %v5576_v44  ;;  %5529 = vmatprep.subr.bf16.mxu1 %v5576_v44  ;;  %v5643_v32 = vld [vmem:[%s7477_s0 + $0x14] ss:$72 sps:$4 sm:$0xff]   ;;  %v5638_v35 = vld [vmem:[%s7477_s0 + $0x8] ss:$72 sps:$4 sm:$0xff]   ;;  %v5650_v41 = vld [vmem:[%s7477_s0 + $0xa4] ss:$72 sps:$4 sm:$0xff]  }
  0xf1   : > { %v5637_v33 = vld [vmem:[%s6609_s11 + $0x138] sm:$0xff]   ;;  %v5654_v42 = vld [vmem:[%s6609_s11 + $0x1c8] sm:$0xff]  }
  0xf2   : > { %v5641_v37 = vld [vmem:[%s7477_s0 + $0x10] ss:$72 sps:$4 sm:$0xff]   ;;  %v5648_v40 = vld [vmem:[%s7477_s0 + $0x9c] ss:$72 sps:$4 sm:$0xff]   ;;  %v5655_v43 = vld [vmem:[%s6609_s11 + $0x188] sm:$0xff]  }
  0xf3   : > { %4959 = vmatpush3.bf16.msra.mxu0 %v5577_v45  ;;  %5537 = vmatpush3.bf16.msra.mxu1 %v5577_v45  ;;  %v5656_v44 = vld [vmem:[%s6609_s11 + $0x248] sm:$0xff]  }
  0xf4   : > { %4960 = vmatprep.subr.bf16.mxu0 %v5578_v46  ;;  %5530 = vmatprep.subr.bf16.mxu1 %v5578_v46  ;;  %v5657_v45 = vld [vmem:[%s6609_s11 + $0x208] sm:$0xff]   ;;  %v5652_v46 = vld [vmem:[%s7477_s0 + $0x98] ss:$72 sps:$4 sm:$0xff]  }
  0xf7   : > { %4961 = vmatpush3.bf16.msra.mxu0 %v5579_v47  ;;  %5538 = vmatpush3.bf16.msra.mxu1 %v5579_v47  ;;  %v5653_v47 = vld [vmem:[%s7477_s0 + $0xa0] ss:$72 sps:$4 sm:$0xff]  }
  0xf8   : > { %4962 = vmatprep.subr.bf16.mxu0 %v5580_v48  ;;  %5531 = vmatprep.subr.bf16.mxu1 %v5580_v48  ;;  %v5658_v48 = vld [vmem:[%s7477_s0 + $0x12c] ss:$72 sps:$4 sm:$0xff]  }
  0xfb   : > { %4963 = vmatpush3.bf16.msra.mxu0 %v5581_v49  ;;  %5539 = vmatpush3.bf16.msra.mxu1 %v5581_v49  ;;  %v5660_v49 = vld [vmem:[%s7477_s0 + $0x134] ss:$72 sps:$4 sm:$0xff]  }
  0xfc   : > { %5012 = vmatprep.subr.bf16.mxu1 %v5588_v50  ;;  %5076 = vmatprep.subr.bf16.mxu0 %v5589_v53  ;;  %v5664_v50 = vld [vmem:[%s6609_s11 + $0x1d0] sm:$0xff]  }
  0xfd   : > { %v5667_v53 = vld [vmem:[%s6609_s11 + $0x210] sm:$0xff]  }
  0xfe   : > { %3459 = vmatmul.mubr.bf16.vlgmr.msra.gmra.mrb[0].mxu0 %v5582_v51  ;;  %3491 = vmatmul.mubr.bf16.vlgmr.msra.gmra.mrb[0].mxu1 %v5585_v52  ;;  %v5665_v51 = vld [vmem:[%s6609_s11 + $0x190] sm:$0xff]  }
  0xff   : > { %5013 = vmatpush3.bf16.msra.mxu1 %v5590_v54  ;;  %5077 = vmatpush3.bf16.msra.mxu0 %v5591_v55  ;;  %v5666_v52 = vld [vmem:[%s6609_s11 + $0x250] sm:$0xff]  }
 0x100   : > { %5014 = vmatprep.subr.bf16.mxu1 %v5592_v56  ;;  %5078 = vmatprep.subr.bf16.mxu0 %v5593_v58  ;;  %v5662_v54 = vld [vmem:[%s7477_s0 + $0x128] ss:$72 sps:$4 sm:$0xff]   ;;  %v5668_v56 = vld [vmem:[%s7477_s0 + $0x1bc] ss:$72 sps:$4 sm:$0xff]  }
 0x101   : > { %3466 = vmatprep.mubr.bf16.mxu0 %v5596_v57  ;;  %3498 = vmatprep.mubr.bf16.mxu1 %v5598_v59  ;;  %v5663_v55 = vld [vmem:[%s7477_s0 + $0x130] ss:$72 sps:$4 sm:$0xff]   ;;  %v5670_v57 = vld [vmem:[%s7477_s0 + $0x1c4] ss:$72 sps:$4 sm:$0xff]  }
 0x102   : > { %v5674_v58 = vld [vmem:[%s6609_s11 + $0x1d8] sm:$0xff]  }
 0x103   : > { %5015 = vmatpush3.bf16.msra.mxu1 %v5594_v60  ;;  %5079 = vmatpush3.bf16.msra.mxu0 %v5595_v61  ;;  %v5675_v59 = vld [vmem:[%s6609_s11 + $0x198] sm:$0xff]  }
 0x104   : > { %5016 = vmatprep.subr.bf16.mxu1 %v5602_v62  ;;  %5080 = vmatprep.subr.bf16.mxu0 %v5603_v1  ;;  %v5676_v60 = vld [vmem:[%s6609_s11 + $0x258] sm:$0xff]   ;;  %v5678_v1 = vld [vmem:[%s7477_s0 + $0x24c] ss:$72 sps:$4 sm:$0xff]  }
 0x105   : > { %v5677_v61 = vld [vmem:[%s6609_s11 + $0x218] sm:$0xff]  }
 0x106   : > { %3467 = vmatmul.mubr.bf16.gmra.mrb[4].mxu0 %v5600_v63  ;;  %3499 = vmatmul.mubr.bf16.gmra.mrb[4].mxu1 %v5601_v0  ;;  %v5672_v62 = vld [vmem:[%s7477_s0 + $0x1b8] ss:$72 sps:$4 sm:$0xff]  }
 0x107   : > { %5017 = vmatpush3.bf16.msra.mxu1 %v5604_v2  ;;  %5081 = vmatpush3.bf16.msra.mxu0 %v5605_v3  ;;  %v5673_v63 = vld [vmem:[%s7477_s0 + $0x1c0] ss:$72 sps:$4 sm:$0xff]   ;;  %v5680_v2 = vld [vmem:[%s7477_s0 + $0x254] ss:$72 sps:$4 sm:$0xff]  }
 0x108   : > { %5018 = vmatprep.subr.bf16.mxu1 %v5606_v4  ;;  %5082 = vmatprep.subr.bf16.mxu0 %v5607_v5  ;;  %v5684_v0 = vld [vmem:[%s6609_s11 + $0x1e0] sm:$0xff]  }
 0x109   : > { %3474 = vmatprep.mubr.bf16.mxu0 %v5610_v6  ;;  %3506 = vmatprep.mubr.bf16.mxu1 %v5612_v8  ;;  %v5685_v3 = vld [vmem:[%s6609_s11 + $0x1a0] sm:$0xff]   ;;  %v5694_v6 = vld [vmem:[%s6609_s11 + $0x1e8] sm:$0xff]   ;;  %v5683_v8 = vld [vmem:[%s7477_s0 + $0x250] ss:$72 sps:$4 sm:$0xff]  }
 0x10a   : > { %v5686_v4 = vld [vmem:[%s6609_s11 + $0x260] sm:$0xff]  }
 0x10b   : > { %5019 = vmatpush3.bf16.msra.mxu1 %v5608_v7  ;;  %5083 = vmatpush3.bf16.msra.mxu0 %v5609_v9  ;;  %v5687_v5 = vld [vmem:[%s6609_s11 + $0x220] sm:$0xff]   ;;  %v5682_v7 = vld [vmem:[%s7477_s0 + $0x248] ss:$72 sps:$4 sm:$0xff]  }
 0x10c   : > { %5020 = vmatprep.subr.bf16.mxu1 %v5616_v10  ;;  %5084 = vmatprep.subr.bf16.mxu0 %v5617_v13  ;;  %v5695_v9 = vld [vmem:[%s6609_s11 + $0x1a8] sm:$0xff]   ;;  %v5688_v10 = vld [vmem:[%s7477_s0 + $0x2dc] ss:$72 sps:$4 sm:$0xff]  }
 0x10d   : > { %v5690_v13 = vld [vmem:[%s7477_s0 + $0x2e4] ss:$72 sps:$4 sm:$0xff]  }
 0x10e   : > { %3475 = vmatmul.mubr.bf16.gmra.mrb[8].mxu0 %v5614_v11  ;;  %3507 = vmatmul.mubr.bf16.gmra.mrb[8].mxu1 %v5615_v12  ;;  %v5696_v11 = vld [vmem:[%s6609_s11 + $0x268] sm:$0xff]  }
 0x10f   : > { %5021 = vmatpush3.bf16.msra.mxu1 %v5618_v14  ;;  %5085 = vmatpush3.bf16.msra.mxu0 %v5619_v15  ;;  %v5697_v12 = vld [vmem:[%s6609_s11 + $0x228] sm:$0xff]   ;;  %v5704_v14 = vld [vmem:[%s6609_s11 + $0x1f0] sm:$0xff]  }
 0x110   : > { %5022 = vmatprep.subr.bf16.mxu1 %v5620_v16  ;;  %5086 = vmatprep.subr.bf16.mxu0 %v5621_v17  ;;  %v5705_v15 = vld [vmem:[%s6609_s11 + $0x1b0] sm:$0xff]   ;;  %v5692_v16 = vld [vmem:[%s7477_s0 + $0x2d8] ss:$72 sps:$4 sm:$0xff]  }
 0x111   : > { %3482 = vmatprep.mubr.bf16.mxu0 %v5624_v18  ;;  %3514 = vmatprep.mubr.bf16.mxu1 %v5626_v20  ;;  %v5706_v17 = vld [vmem:[%s6609_s11 + $0x270] sm:$0xff]  }
 0x112   : > { %v5707_v18 = vld [vmem:[%s6609_s11 + $0x230] sm:$0xff]  }
 0x113   : > { %5023 = vmatpush3.bf16.msra.mxu1 %v5622_v19  ;;  %5087 = vmatpush3.bf16.msra.mxu0 %v5623_v21  ;;  %v5693_v19 = vld [vmem:[%s7477_s0 + $0x2e0] ss:$72 sps:$4 sm:$0xff]   ;;  %v5698_v20 = vld [vmem:[%s7477_s0 + $0x36c] ss:$72 sps:$4 sm:$0xff]  }
 0x114   : > { %5024 = vmatprep.subr.bf16.mxu1 %v5630_v22  ;;  %5088 = vmatprep.subr.bf16.mxu0 %v5631_v25  ;;  %v5700_v21 = vld [vmem:[%s7477_s0 + $0x374] ss:$72 sps:$4 sm:$0xff]  }
 0x115   : > { %v5714_v22 = vld [vmem:[%s6609_s11 + $0x1f8] sm:$0xff]  }
 0x116   : > { %3483 = vmatmul.mubr.bf16.gmra.mrb[12].mxu0 %v5628_v23  ;;  %3515 = vmatmul.mubr.bf16.gmra.mrb[12].mxu1 %v5629_v24  ;;  %v5715_v23 = vld [vmem:[%s6609_s11 + $0x1b8] sm:$0xff]  }
 0x117   : > { %5025 = vmatpush3.bf16.msra.mxu1 %v5632_v26  ;;  %5089 = vmatpush3.bf16.msra.mxu0 %v5633_v27  ;;  %v5716_v24 = vld [vmem:[%s6609_s11 + $0x278] sm:$0xff]   ;;  %v5702_v26 = vld [vmem:[%s7477_s0 + $0x368] ss:$72 sps:$4 sm:$0xff]  }
 0x118   : > { %5026 = vmatprep.subr.bf16.mxu1 %v5634_v28  ;;  %5090 = vmatprep.subr.bf16.mxu0 %v5635_v29  ;;  %v5717_v25 = vld [vmem:[%s6609_s11 + $0x238] sm:$0xff]   ;;  %v5710_v29 = vld [vmem:[%s7477_s0 + $0x404] ss:$72 sps:$4 sm:$0xff]  }
 0x119   : > { %3555 = vmatprep.mubr.bf16.mxu1 %v5640_v30  ;;  %3652 = vmatprep.mubr.bf16.mxu0 %v5643_v32  ;;  %v5703_v27 = vld [vmem:[%s7477_s0 + $0x370] ss:$72 sps:$4 sm:$0xff]   ;;  %v5708_v28 = vld [vmem:[%s7477_s0 + $0x3fc] ss:$72 sps:$4 sm:$0xff]  }
 0x11a   : > { %v5724_v30 = vld [vmem:[%s6609_s11 + $0x2c0] sm:$0xff]  }
 0x11b   : > { %5027 = vmatpush3.bf16.msra.mxu1 %v5636_v31  ;;  %5091 = vmatpush3.bf16.msra.mxu0 %v5637_v33  ;;  %v5726_v31 = vld [vmem:[%s6609_s11 + $0x340] sm:$0xff]  }
 0x11c   : > { %5140 = vmatprep.subr.bf16.mxu1 %v5644_v34  ;;  %5204 = vmatprep.subr.bf16.mxu0 %v5646_v36  ;;  %v5712_v32 = vld [vmem:[%s7477_s0 + $0x3f8] ss:$72 sps:$4 sm:$0xff]   ;;  %v5720_v34 = vld [vmem:[%s7477_s0 + $0x1c] ss:$72 sps:$4 sm:$0xff]  }
 0x11d   : > { %v5713_v33 = vld [vmem:[%s7477_s0 + $0x400] ss:$72 sps:$4 sm:$0xff]  }
 0x11e   : > { %3556 = vmatmul.mubr.bf16.vlgmr.msra.gmra.mrb[16].mxu1 %v5638_v35  ;;  %3653 = vmatmul.mubr.bf16.vlgmr.msra.gmra.mrb[16].mxu0 %v5641_v37  ;;  %v5723_v35 = vld [vmem:[%s7477_s0 + $0x24] ss:$72 sps:$4 sm:$0xff]   ;;  %v5718_v36 = vld [vmem:[%s7477_s0 + $0x18] ss:$72 sps:$4 sm:$0xff]  }
 0x11f   : > { %5141 = vmatpush3.bf16.msra.mxu1 %v5645_v38  ;;  %5205 = vmatpush3.bf16.msra.mxu0 %v5647_v39  ;;  %v5721_v37 = vld [vmem:[%s7477_s0 + $0x20] ss:$72 sps:$4 sm:$0xff]  }
 0x120   : > { %3563 = vmatprep.mubr.bf16.mxu1 %v5648_v40  ;;  %3660 = vmatprep.mubr.bf16.mxu0 %v5650_v41  ;;  %v5725_v38 = vld [vmem:[%s6609_s11 + $0x280] sm:$0xff]   ;;  %v5728_v40 = vld [vmem:[%s7477_s0 + $0xac] ss:$72 sps:$4 sm:$0xff]  }
 0x121   : > { %5142 = vmatprep.subr.bf16.mxu1 %v5654_v42  ;;  %5206 = vmatprep.subr.bf16.mxu0 %v5656_v44  ;;  %v5727_v39 = vld [vmem:[%s6609_s11 + $0x300] sm:$0xff]   ;;  %v5730_v41 = vld [vmem:[%s7477_s0 + $0xb4] ss:$72 sps:$4 sm:$0xff]   ;;  %v5734_v42 = vld [vmem:[%s6609_s11 + $0x2c8] sm:$0xff]  }
 0x122   : > { %v5735_v44 = vld [vmem:[%s6609_s11 + $0x288] sm:$0xff]  }
 0x123   : > { %5143 = vmatpush3.bf16.msra.mxu1 %v5655_v43  ;;  %5207 = vmatpush3.bf16.msra.mxu0 %v5657_v45  ;;  %v5736_v43 = vld [vmem:[%s6609_s11 + $0x348] sm:$0xff]  }
 0x124   : > { %5144 = vmatprep.subr.bf16.mxu1 %v5664_v50  ;;  %5208 = vmatprep.subr.bf16.mxu0 %v5666_v52  ;;  %v5737_v45 = vld [vmem:[%s6609_s11 + $0x308] sm:$0xff]   ;;  %v5738_v50 = vld [vmem:[%s7477_s0 + $0x13c] ss:$72 sps:$4 sm:$0xff]   ;;  %v5745_v52 = vld [vmem:[%s6609_s11 + $0x290] sm:$0xff]  }
 0x126   : > { %3564 = vmatmul.mubr.bf16.gmra.mrb[20].mxu1 %v5652_v46  ;;  %3661 = vmatmul.mubr.bf16.gmra.mrb[20].mxu0 %v5653_v47  ;;  %v5744_v46 = vld [vmem:[%s6609_s11 + $0x2d0] sm:$0xff]  }
 0x127   : > { %3571 = vmatprep.mubr.bf16.mxu1 %v5658_v48  ;;  %3668 = vmatprep.mubr.bf16.mxu0 %v5660_v49  ;;  %v5732_v47 = vld [vmem:[%s7477_s0 + $0xa8] ss:$72 sps:$4 sm:$0xff]  }
 0x128   : > { %5145 = vmatpush3.bf16.msra.mxu1 %v5665_v51  ;;  %5209 = vmatpush3.bf16.msra.mxu0 %v5667_v53  ;;  %v5733_v48 = vld [vmem:[%s7477_s0 + $0xb0] ss:$72 sps:$4 sm:$0xff]   ;;  %v5740_v51 = vld [vmem:[%s7477_s0 + $0x144] ss:$72 sps:$4 sm:$0xff]  }
 0x129   : > { %5146 = vmatprep.subr.bf16.mxu1 %v5674_v58  ;;  %5210 = vmatprep.subr.bf16.mxu0 %v5676_v60  ;;  %v5746_v49 = vld [vmem:[%s6609_s11 + $0x350] sm:$0xff]   ;;  %v5742_v58 = vld [vmem:[%s7477_s0 + $0x138] ss:$72 sps:$4 sm:$0xff]  }
 0x12a   : > { %v5747_v53 = vld [vmem:[%s6609_s11 + $0x310] sm:$0xff]   ;;  %v5766_v60 = vld [vmem:[%s6609_s11 + $0x360] sm:$0xff]  }
 0x12c   : > { %5147 = vmatpush3.bf16.msra.mxu1 %v5675_v59  ;;  %5211 = vmatpush3.bf16.msra.mxu0 %v5677_v61  ;;  %v5764_v59 = vld [vmem:[%s6609_s11 + $0x2e0] sm:$0xff]  }
 0x12d   : > { %5148 = vmatprep.subr.bf16.mxu1 %v5684_v0  ;;  %5212 = vmatprep.subr.bf16.mxu0 %v5686_v4  ;;  %v5743_v61 = vld [vmem:[%s7477_s0 + $0x140] ss:$72 sps:$4 sm:$0xff]  }
 0x12e   : > { %3572 = vmatmul.mubr.bf16.gmra.mrb[24].mxu1 %v5662_v54  ;;  %3669 = vmatmul.mubr.bf16.gmra.mrb[24].mxu0 %v5663_v55  ;;  %v5754_v54 = vld [vmem:[%s6609_s11 + $0x2d8] sm:$0xff]   ;;  %v5765_v0 = vld [vmem:[%s6609_s11 + $0x2a0] sm:$0xff]   ;;  %v5775_v4 = vld [vmem:[%s6609_s11 + $0x2a8] sm:$0xff]  }
 0x12f   : > { %3579 = vmatprep.mubr.bf16.mxu1 %v5668_v56  ;;  %3676 = vmatprep.mubr.bf16.mxu0 %v5670_v57  ;;  %v5756_v55 = vld [vmem:[%s6609_s11 + $0x358] sm:$0xff]  }
 0x130   : > { %5149 = vmatpush3.bf16.msra.mxu1 %v5685_v3  ;;  %5213 = vmatpush3.bf16.msra.mxu0 %v5687_v5  ;;  %v5755_v56 = vld [vmem:[%s6609_s11 + $0x298] sm:$0xff]   ;;  %v5776_v3 = vld [vmem:[%s6609_s11 + $0x368] sm:$0xff]  }
 0x131   : > { %5150 = vmatprep.subr.bf16.mxu1 %v5694_v6  ;;  %5214 = vmatprep.subr.bf16.mxu0 %v5696_v11  ;;  %v5757_v57 = vld [vmem:[%s6609_s11 + $0x318] sm:$0xff]   ;;  %v5752_v5 = vld [vmem:[%s7477_s0 + $0x1c8] ss:$72 sps:$4 sm:$0xff]  }
 0x132   : > { %v5777_v6 = vld [vmem:[%s6609_s11 + $0x328] sm:$0xff]   ;;  %v5785_v11 = vld [vmem:[%s6609_s11 + $0x2b0] sm:$0xff]  }
 0x134   : > { %5151 = vmatpush3.bf16.msra.mxu1 %v5695_v9  ;;  %5215 = vmatpush3.bf16.msra.mxu0 %v5697_v12  ;;  %v5760_v9 = vld [vmem:[%s7477_s0 + $0x264] ss:$72 sps:$4 sm:$0xff]   ;;  %v5786_v12 = vld [vmem:[%s6609_s11 + $0x370] sm:$0xff]  }
 0x135   : > { %5152 = vmatprep.subr.bf16.mxu1 %v5704_v14  ;;  %5216 = vmatprep.subr.bf16.mxu0 %v5706_v17  ;;  %v5762_v14 = vld [vmem:[%s7477_s0 + $0x258] ss:$72 sps:$4 sm:$0xff]   ;;  %v5770_v17 = vld [vmem:[%s7477_s0 + $0x2f4] ss:$72 sps:$4 sm:$0xff]  }
 0x136   : > { %3580 = vmatmul.mubr.bf16.gmra.mrb[28].mxu1 %v5672_v62  ;;  %3677 = vmatmul.mubr.bf16.gmra.mrb[28].mxu0 %v5673_v63  ;;  %v5748_v62 = vld [vmem:[%s7477_s0 + $0x1cc] ss:$72 sps:$4 sm:$0xff]  }
 0x137   : > { %3587 = vmatprep.mubr.bf16.mxu1 %v5678_v1  ;;  %3684 = vmatprep.mubr.bf16.mxu0 %v5680_v2  ;;  %v5750_v63 = vld [vmem:[%s7477_s0 + $0x1d4] ss:$72 sps:$4 sm:$0xff]   ;;  %v5767_v1 = vld [vmem:[%s6609_s11 + $0x320] sm:$0xff]   ;;  %v5774_v2 = vld [vmem:[%s6609_s11 + $0x2e8] sm:$0xff]  }
 0x138   : > { %5153 = vmatpush3.bf16.msra.mxu1 %v5705_v15  ;;  %5217 = vmatpush3.bf16.msra.mxu0 %v5707_v18  ;;  %v5763_v15 = vld [vmem:[%s7477_s0 + $0x260] ss:$72 sps:$4 sm:$0xff]   ;;  %v5794_v18 = vld [vmem:[%s6609_s11 + $0x2f8] sm:$0xff]  }
 0x139   : > { %5154 = vmatprep.subr.bf16.mxu1 %v5714_v22  ;;  %5218 = vmatprep.subr.bf16.mxu0 %v5716_v24  ;;  %v5772_v22 = vld [vmem:[%s7477_s0 + $0x2e8] ss:$72 sps:$4 sm:$0xff]   ;;  %v5804_v24 = vld [vmem:[%s6609_s11 + $0x3c0] sm:$0xff]  }
 0x13c   : > { %5155 = vmatpush3.bf16.msra.mxu1 %v5715_v23  ;;  %5219 = vmatpush3.bf16.msra.mxu0 %v5717_v25  ;;  %v5773_v23 = vld [vmem:[%s7477_s0 + $0x2f0] ss:$72 sps:$4 sm:$0xff]   ;;  %v5778_v25 = vld [vmem:[%s7477_s0 + $0x37c] ss:$72 sps:$4 sm:$0xff]  }
 0x13d   : > { %5268 = vmatprep.subr.bf16.mxu1 %v5724_v30  ;;  %5332 = vmatprep.subr.bf16.mxu0 %v5726_v31  ;;  %v5788_v30 = vld [vmem:[%s7477_s0 + $0x40c] ss:$72 sps:$4 sm:$0xff]  }
 0x13e   : > { %3588 = vmatmul.mubr.bf16.gmra.mrb[32].mxu1 %v5682_v7  ;;  %3685 = vmatmul.mubr.bf16.gmra.mrb[32].mxu0 %v5683_v8  ;;  %v5753_v7 = vld [vmem:[%s7477_s0 + $0x1d0] ss:$72 sps:$4 sm:$0xff]   ;;  %v5758_v8 = vld [vmem:[%s7477_s0 + $0x25c] ss:$72 sps:$4 sm:$0xff]  }
 0x13f   : > { %3595 = vmatprep.mubr.bf16.mxu1 %v5688_v10  ;;  %3692 = vmatprep.mubr.bf16.mxu0 %v5690_v13  ;;  %v5784_v10 = vld [vmem:[%s6609_s11 + $0x2f0] sm:$0xff]  }
 0x140   : > { %v5787_v13 = vld [vmem:[%s6609_s11 + $0x330] sm:$0xff]  }
 0x141   : > { %v5790_v31 = vld [vmem:[%s7477_s0 + $0x414] ss:$72 sps:$4 sm:$0xff]  }
 0x146   : > { %3596 = vmatmul.mubr.bf16.gmra.mrb[36].mxu1 %v5692_v16  ;;  %3693 = vmatmul.mubr.bf16.gmra.mrb[36].mxu0 %v5693_v19  ;;  %v5768_v16 = vld [vmem:[%s7477_s0 + $0x2ec] ss:$72 sps:$4 sm:$0xff]   ;;  %v5795_v19 = vld [vmem:[%s6609_s11 + $0x2b8] sm:$0xff]  }
 0x147   : > { %3603 = vmatprep.mubr.bf16.mxu1 %v5698_v20  ;;  %3700 = vmatprep.mubr.bf16.mxu0 %v5700_v21  ;;  %v5796_v20 = vld [vmem:[%s6609_s11 + $0x378] sm:$0xff]  }
 0x148   : > { %v5797_v21 = vld [vmem:[%s6609_s11 + $0x338] sm:$0xff]  }
 0x14e   : > { %3604 = vmatmul.mubr.bf16.gmra.mrb[40].mxu1 %v5702_v26  ;;  %3701 = vmatmul.mubr.bf16.gmra.mrb[40].mxu0 %v5703_v27  ;;  %v5806_v26 = vld [vmem:[%s6609_s11 + $0x440] sm:$0xff]  }
 0x14f   : > { %3611 = vmatprep.mubr.bf16.mxu1 %v5708_v28  ;;  %3708 = vmatprep.mubr.bf16.mxu0 %v5710_v29  ;;  %v5780_v27 = vld [vmem:[%s7477_s0 + $0x384] ss:$72 sps:$4 sm:$0xff]   ;;  %v5782_v28 = vld [vmem:[%s7477_s0 + $0x378] ss:$72 sps:$4 sm:$0xff]  }
 0x150   : > { %v5783_v29 = vld [vmem:[%s7477_s0 + $0x380] ss:$72 sps:$4 sm:$0xff]  }
 0x156   : > { %3612 = vmatmul.mubr.bf16.gmra.mrb[44].mxu1 %v5712_v32  ;;  %3709 = vmatmul.mubr.bf16.gmra.mrb[44].mxu0 %v5713_v33  ;;  %v5792_v32 = vld [vmem:[%s7477_s0 + $0x408] ss:$72 sps:$4 sm:$0xff]  }
 0x157   : > { %3749 = vmatprep.mubr.bf16.mxu1 %v5720_v34  ;;  %3846 = vmatprep.mubr.bf16.mxu0 %v5723_v35  ;;  %v5793_v33 = vld [vmem:[%s7477_s0 + $0x410] ss:$72 sps:$4 sm:$0xff]   ;;  %v5800_v34 = vld [vmem:[%s7477_s0 + $0x2c] ss:$72 sps:$4 sm:$0xff]  }
 0x158   : > { %v5803_v35 = vld [vmem:[%s7477_s0 + $0x34] ss:$72 sps:$4 sm:$0xff]  }
 0x15e   : > { %3750 = vmatmul.mubr.bf16.vlgmr.msra.gmra.mrb[48].mxu1 %v5718_v36  ;;  %3847 = vmatmul.mubr.bf16.vlgmr.msra.gmra.mrb[48].mxu0 %v5721_v37  ;;  %v5798_v36 = vld [vmem:[%s7477_s0 + $0x28] ss:$72 sps:$4 sm:$0xff]  }
 0x15f   : > { %5269 = vmatpush3.bf16.msra.mxu1 %v5725_v38  ;;  %5333 = vmatpush3.bf16.msra.mxu0 %v5727_v39  ;;  %v5801_v37 = vld [vmem:[%s7477_s0 + $0x30] ss:$72 sps:$4 sm:$0xff]   ;;  %v5805_v38 = vld [vmem:[%s6609_s11 + $0x380] sm:$0xff]  }
 0x160   : > { %3757 = vmatprep.mubr.bf16.mxu1 %v5728_v40  ;;  %3854 = vmatprep.mubr.bf16.mxu0 %v5730_v41  ;;  %v5807_v39 = vld [vmem:[%s6609_s11 + $0x400] sm:$0xff]  }
 0x161   : > { %5270 = vmatprep.subr.bf16.mxu1 %v5734_v42  ;;  %5334 = vmatprep.subr.bf16.mxu0 %v5736_v43  ;;  %v5808_v40 = vld [vmem:[%s7477_s0 + $0xbc] ss:$72 sps:$4 sm:$0xff]   ;;  %v5814_v42 = vld [vmem:[%s6609_s11 + $0x3c8] sm:$0xff]  }
 0x162   : > { %v5810_v41 = vld [vmem:[%s7477_s0 + $0xc4] ss:$72 sps:$4 sm:$0xff]  }
 0x163   : > { %5271 = vmatpush3.bf16.msra.mxu1 %v5735_v44  ;;  %5335 = vmatpush3.bf16.msra.mxu0 %v5737_v45  ;;  %v5816_v43 = vld [vmem:[%s6609_s11 + $0x448] sm:$0xff]  }
 0x164   : > { %5272 = vmatprep.subr.bf16.mxu1 %v5744_v46  ;;  %5336 = vmatprep.subr.bf16.mxu0 %v5746_v49  ;;  %v5815_v44 = vld [vmem:[%s6609_s11 + $0x388] sm:$0xff]   ;;  %v5812_v46 = vld [vmem:[%s7477_s0 + $0xb8] ss:$72 sps:$4 sm:$0xff]   ;;  %v5826_v49 = vld [vmem:[%s6609_s11 + $0x450] sm:$0xff]  }
 0x165   : > { %v5817_v45 = vld [vmem:[%s6609_s11 + $0x408] sm:$0xff]  }
 0x166   : > { %3758 = vmatmul.mubr.bf16.gmra.mrb[52].mxu1 %v5732_v47  ;;  %3855 = vmatmul.mubr.bf16.gmra.mrb[52].mxu0 %v5733_v48  ;;  %v5813_v47 = vld [vmem:[%s7477_s0 + $0xc0] ss:$72 sps:$4 sm:$0xff]   ;;  %v5824_v48 = vld [vmem:[%s6609_s11 + $0x3d0] sm:$0xff]  }
 0x167   : > { %3765 = vmatprep.mubr.bf16.mxu1 %v5738_v50  ;;  %3862 = vmatprep.mubr.bf16.mxu0 %v5740_v51  ;;  %v5818_v50 = vld [vmem:[%s7477_s0 + $0x14c] ss:$72 sps:$4 sm:$0xff]  }
 0x168   : > { %5273 = vmatpush3.bf16.msra.mxu1 %v5745_v52  ;;  %5337 = vmatpush3.bf16.msra.mxu0 %v5747_v53  ;;  %v5820_v51 = vld [vmem:[%s7477_s0 + $0x154] ss:$72 sps:$4 sm:$0xff]  }
 0x169   : > { %5274 = vmatprep.subr.bf16.mxu1 %v5754_v54  ;;  %5338 = vmatprep.subr.bf16.mxu0 %v5756_v55  ;;  %v5825_v52 = vld [vmem:[%s6609_s11 + $0x390] sm:$0xff]   ;;  %v5834_v54 = vld [vmem:[%s6609_s11 + $0x3d8] sm:$0xff]  }
 0x16a   : > { %v5827_v53 = vld [vmem:[%s6609_s11 + $0x410] sm:$0xff]   ;;  %v5836_v55 = vld [vmem:[%s6609_s11 + $0x458] sm:$0xff]  }
 0x16c   : > { %5275 = vmatpush3.bf16.msra.mxu1 %v5755_v56  ;;  %5339 = vmatpush3.bf16.msra.mxu0 %v5757_v57  ;;  %v5835_v56 = vld [vmem:[%s6609_s11 + $0x398] sm:$0xff]  }
 0x16d   : > { %5276 = vmatprep.subr.bf16.mxu1 %v5764_v59  ;;  %5340 = vmatprep.subr.bf16.mxu0 %v5766_v60  ;;  %v5837_v57 = vld [vmem:[%s6609_s11 + $0x418] sm:$0xff]   ;;  %v5844_v60 = vld [vmem:[%s6609_s11 + $0x3e0] sm:$0xff]  }
 0x16e   : > { %3766 = vmatmul.mubr.bf16.gmra.mrb[56].mxu1 %v5742_v58  ;;  %3863 = vmatmul.mubr.bf16.gmra.mrb[56].mxu0 %v5743_v61  ;;  %v5822_v58 = vld [vmem:[%s7477_s0 + $0x148] ss:$72 sps:$4 sm:$0xff]   ;;  %v5828_v61 = vld [vmem:[%s7477_s0 + $0x1dc] ss:$72 sps:$4 sm:$0xff]  }
 0x16f   : > { %3773 = vmatprep.mubr.bf16.mxu1 %v5748_v62  ;;  %3870 = vmatprep.mubr.bf16.mxu0 %v5750_v63  ;;  %v5823_v59 = vld [vmem:[%s7477_s0 + $0x150] ss:$72 sps:$4 sm:$0xff]   ;;  %v5830_v62 = vld [vmem:[%s7477_s0 + $0x1e4] ss:$72 sps:$4 sm:$0xff]  }
 0x170   : > { %5277 = vmatpush3.bf16.msra.mxu1 %v5765_v0  ;;  %5341 = vmatpush3.bf16.msra.mxu0 %v5767_v1  ;;  %v5846_v63 = vld [vmem:[%s6609_s11 + $0x460] sm:$0xff]  }
 0x171   : > { %5278 = vmatprep.subr.bf16.mxu1 %v5774_v2  ;;  %5342 = vmatprep.subr.bf16.mxu0 %v5776_v3  ;;  %v5845_v0 = vld [vmem:[%s6609_s11 + $0x3a0] sm:$0xff]   ;;  %v5854_v2 = vld [vmem:[%s6609_s11 + $0x3e8] sm:$0xff]  }
 0x172   : > { %v5847_v1 = vld [vmem:[%s6609_s11 + $0x420] sm:$0xff]   ;;  %v5856_v3 = vld [vmem:[%s6609_s11 + $0x468] sm:$0xff]  }
 0x174   : > { %5279 = vmatpush3.bf16.msra.mxu1 %v5775_v4  ;;  %5343 = vmatpush3.bf16.msra.mxu0 %v5777_v6  ;;  %v5855_v4 = vld [vmem:[%s6609_s11 + $0x3a8] sm:$0xff]   ;;  %v5832_v6 = vld [vmem:[%s7477_s0 + $0x1d8] ss:$72 sps:$4 sm:$0xff]  }
 0x175   : > { %5280 = vmatprep.subr.bf16.mxu1 %v5784_v10  ;;  %5344 = vmatprep.subr.bf16.mxu0 %v5786_v12  ;;  %v5866_v10 = vld [vmem:[%s6609_s11 + $0x470] sm:$0xff]  }
 0x176   : > { %3774 = vmatmul.mubr.bf16.gmra.mrb[60].mxu1 %v5752_v5  ;;  %3871 = vmatmul.mubr.bf16.gmra.mrb[60].mxu0 %v5753_v7  ;;  %v5857_v5 = vld [vmem:[%s6609_s11 + $0x428] sm:$0xff]   ;;  %v5865_v12 = vld [vmem:[%s6609_s11 + $0x3b0] sm:$0xff]  }
 0x177   : > { %3781 = vmatprep.mubr.bf16.mxu1 %v5758_v8  ;;  %3878 = vmatprep.mubr.bf16.mxu0 %v5760_v9  ;;  %v5833_v7 = vld [vmem:[%s7477_s0 + $0x1e0] ss:$72 sps:$4 sm:$0xff]   ;;  %v5864_v8 = vld [vmem:[%s6609_s11 + $0x3f0] sm:$0xff]  }
 0x178   : > { %5281 = vmatpush3.bf16.msra.mxu1 %v5785_v11  ;;  %5345 = vmatpush3.bf16.msra.mxu0 %v5787_v13  ;;  %v5838_v9 = vld [vmem:[%s7477_s0 + $0x26c] ss:$72 sps:$4 sm:$0xff]  }
 0x179   : > { %5282 = vmatprep.subr.bf16.mxu1 %v5794_v18  ;;  %5346 = vmatprep.subr.bf16.mxu0 %v5796_v20  ;;  %v5840_v11 = vld [vmem:[%s7477_s0 + $0x274] ss:$72 sps:$4 sm:$0xff]   ;;  %v5842_v18 = vld [vmem:[%s7477_s0 + $0x268] ss:$72 sps:$4 sm:$0xff]  }
 0x17a   : > { %v5867_v13 = vld [vmem:[%s6609_s11 + $0x430] sm:$0xff]   ;;  %v5848_v20 = vld [vmem:[%s7477_s0 + $0x2fc] ss:$72 sps:$4 sm:$0xff]  }
 0x17c   : > { %5283 = vmatpush3.bf16.msra.mxu1 %v5795_v19  ;;  %5347 = vmatpush3.bf16.msra.mxu0 %v5797_v21  ;;  %v5843_v19 = vld [vmem:[%s7477_s0 + $0x270] ss:$72 sps:$4 sm:$0xff]   ;;  %v5850_v21 = vld [vmem:[%s7477_s0 + $0x304] ss:$72 sps:$4 sm:$0xff]  }
 0x17d   : > { %5396 = vmatprep.subr.bf16.mxu1 %v5804_v24  ;;  %5460 = vmatprep.subr.bf16.mxu0 %v5806_v26  ;;  %v5858_v24 = vld [vmem:[%s7477_s0 + $0x38c] ss:$72 sps:$4 sm:$0xff]   ;;  %v5862_v26 = vld [vmem:[%s7477_s0 + $0x388] ss:$72 sps:$4 sm:$0xff]  }
 0x17e   : > { %3782 = vmatmul.mubr.bf16.gmra.mrb[64].mxu1 %v5762_v14  ;;  %3879 = vmatmul.mubr.bf16.gmra.mrb[64].mxu0 %v5763_v15  ;;  %v5874_v14 = vld [vmem:[%s6609_s11 + $0x3f8] sm:$0xff]  }
 0x17f   : > { %3789 = vmatprep.mubr.bf16.mxu1 %v5768_v16  ;;  %3886 = vmatprep.mubr.bf16.mxu0 %v5770_v17  ;;  %v5876_v15 = vld [vmem:[%s6609_s11 + $0x478] sm:$0xff]  }
 0x180   : > { %v5875_v16 = vld [vmem:[%s6609_s11 + $0x3b8] sm:$0xff]  }
 0x181   : > { %v5877_v17 = vld [vmem:[%s6609_s11 + $0x438] sm:$0xff]  }
 0x186   : > { %3790 = vmatmul.mubr.bf16.gmra.mrb[68].mxu1 %v5772_v22  ;;  %3887 = vmatmul.mubr.bf16.gmra.mrb[68].mxu0 %v5773_v23  ;;  %v5852_v22 = vld [vmem:[%s7477_s0 + $0x2f8] ss:$72 sps:$4 sm:$0xff]  }
 0x187   : > { %3797 = vmatprep.mubr.bf16.mxu1 %v5778_v25  ;;  %3894 = vmatprep.mubr.bf16.mxu0 %v5780_v27  ;;  %v5853_v23 = vld [vmem:[%s7477_s0 + $0x300] ss:$72 sps:$4 sm:$0xff]   ;;  %v5860_v25 = vld [vmem:[%s7477_s0 + $0x394] ss:$72 sps:$4 sm:$0xff]   ;;  %v5863_v27 = vld [vmem:[%s7477_s0 + $0x390] ss:$72 sps:$4 sm:$0xff]  }
 0x18e   : > { %3798 = vmatmul.mubr.bf16.gmra.mrb[72].mxu1 %v5782_v28  ;;  %3895 = vmatmul.mubr.bf16.gmra.mrb[72].mxu0 %v5783_v29  ;;  %v5868_v28 = vld [vmem:[%s7477_s0 + $0x41c] ss:$72 sps:$4 sm:$0xff]  }
 0x18f   : > { %3805 = vmatprep.mubr.bf16.mxu1 %v5788_v30  ;;  %3902 = vmatprep.mubr.bf16.mxu0 %v5790_v31  ;;  %v5870_v29 = vld [vmem:[%s7477_s0 + $0x424] ss:$72 sps:$4 sm:$0xff]  }
 0x196   : > { %3806 = vmatmul.mubr.bf16.gmra.mrb[76].mxu1 %v5792_v32  ;;  %3903 = vmatmul.mubr.bf16.gmra.mrb[76].mxu0 %v5793_v33 }
 0x197   : > { %3943 = vmatprep.mubr.bf16.mxu1 %v5800_v34  ;;  %4040 = vmatprep.mubr.bf16.mxu0 %v5803_v35  ;;  %v5872_v34 = vld [vmem:[%s7477_s0 + $0x418] ss:$72 sps:$4 sm:$0xff]  }
 0x198   : > { %v5873_v35 = vld [vmem:[%s7477_s0 + $0x420] ss:$72 sps:$4 sm:$0xff]  }
 0x19e   : > { %3944 = vmatmul.mubr.bf16.vlgmr.msra.gmra.mrb[80].mxu1 %v5798_v36  ;;  %4041 = vmatmul.mubr.bf16.vlgmr.msra.gmra.mrb[80].mxu0 %v5801_v37 }
 0x19f   : > { %5397 = vmatpush3.bf16.msra.mxu1 %v5805_v38  ;;  %5461 = vmatpush3.bf16.msra.mxu0 %v5807_v39 }
 0x1a0   : > { %3951 = vmatprep.mubr.bf16.mxu1 %v5808_v40  ;;  %4048 = vmatprep.mubr.bf16.mxu0 %v5810_v41  ;;  %v5880_v40 = vld [vmem:[%s7477_s0 + $0x3c] ss:$72 sps:$4 sm:$0xff]  }
 0x1a1   : > { %5398 = vmatprep.subr.bf16.mxu1 %v5814_v42  ;;  %5462 = vmatprep.subr.bf16.mxu0 %v5816_v43  ;;  %v5883_v41 = vld [vmem:[%s7477_s0 + $0x44] ss:$72 sps:$4 sm:$0xff]  }
 0x1a3   : > { %5399 = vmatpush3.bf16.msra.mxu1 %v5815_v44  ;;  %5463 = vmatpush3.bf16.msra.mxu0 %v5817_v45 }
 0x1a4   : > { %5400 = vmatprep.subr.bf16.mxu1 %v5824_v48  ;;  %5464 = vmatprep.subr.bf16.mxu0 %v5826_v49 }
 0x1a6   : > { %3952 = vmatmul.mubr.bf16.gmra.mrb[84].mxu1 %v5812_v46  ;;  %4049 = vmatmul.mubr.bf16.gmra.mrb[84].mxu0 %v5813_v47 }
 0x1a7   : > { %3959 = vmatprep.mubr.bf16.mxu1 %v5818_v50  ;;  %4056 = vmatprep.mubr.bf16.mxu0 %v5820_v51  ;;  %v5878_v50 = vld [vmem:[%s7477_s0 + $0x38] ss:$72 sps:$4 sm:$0xff]  }
 0x1a8   : > { %5401 = vmatpush3.bf16.msra.mxu1 %v5825_v52  ;;  %5465 = vmatpush3.bf16.msra.mxu0 %v5827_v53  ;;  %v5881_v51 = vld [vmem:[%s7477_s0 + $0x40] ss:$72 sps:$4 sm:$0xff]  }
 0x1a9   : > { %5402 = vmatprep.subr.bf16.mxu1 %v5834_v54  ;;  %5466 = vmatprep.subr.bf16.mxu0 %v5836_v55 }
 0x1ac   : > { %5403 = vmatpush3.bf16.msra.mxu1 %v5835_v56  ;;  %5467 = vmatpush3.bf16.msra.mxu0 %v5837_v57  ;;  %v5884_v56 = vld [vmem:[%s7477_s0 + $0xcc] ss:$72 sps:$4 sm:$0xff]  }
 0x1ad   : > { %5404 = vmatprep.subr.bf16.mxu1 %v5844_v60  ;;  %5468 = vmatprep.subr.bf16.mxu0 %v5846_v63  ;;  %v5886_v57 = vld [vmem:[%s7477_s0 + $0xd4] ss:$72 sps:$4 sm:$0xff]  }
 0x1ae   : > { %3960 = vmatmul.mubr.bf16.gmra.mrb[88].mxu1 %v5822_v58  ;;  %4057 = vmatmul.mubr.bf16.gmra.mrb[88].mxu0 %v5823_v59 }
 0x1af   : > { %3967 = vmatprep.mubr.bf16.mxu1 %v5828_v61  ;;  %4064 = vmatprep.mubr.bf16.mxu0 %v5830_v62 }
 0x1b0   : > { %5405 = vmatpush3.bf16.msra.mxu1 %v5845_v0  ;;  %5469 = vmatpush3.bf16.msra.mxu0 %v5847_v1 }
 0x1b1   : > { %5406 = vmatprep.subr.bf16.mxu1 %v5854_v2  ;;  %5470 = vmatprep.subr.bf16.mxu0 %v5856_v3  ;;  %v5888_v2 = vld [vmem:[%s7477_s0 + $0xc8] ss:$72 sps:$4 sm:$0xff]  }
 0x1b2   : > { %v5889_v3 = vld [vmem:[%s7477_s0 + $0xd0] ss:$72 sps:$4 sm:$0xff]  }
 0x1b4   : > { %5407 = vmatpush3.bf16.msra.mxu1 %v5855_v4  ;;  %5471 = vmatpush3.bf16.msra.mxu0 %v5857_v5 }
 0x1b5   : > { %5408 = vmatprep.subr.bf16.mxu1 %v5864_v8  ;;  %5472 = vmatprep.subr.bf16.mxu0 %v5866_v10  ;;  %v5890_v8 = vld [vmem:[%s7477_s0 + $0x15c] ss:$72 sps:$4 sm:$0xff]  }
 0x1b6   : > { %3968 = vmatmul.mubr.bf16.gmra.mrb[92].mxu1 %v5832_v6  ;;  %4065 = vmatmul.mubr.bf16.gmra.mrb[92].mxu0 %v5833_v7 }
 0x1b7   : > { %3975 = vmatprep.mubr.bf16.mxu1 %v5838_v9  ;;  %4072 = vmatprep.mubr.bf16.mxu0 %v5840_v11  ;;  %v5892_v9 = vld [vmem:[%s7477_s0 + $0x164] ss:$72 sps:$4 sm:$0xff]  }
 0x1b8   : > { %5409 = vmatpush3.bf16.msra.mxu1 %v5865_v12  ;;  %5473 = vmatpush3.bf16.msra.mxu0 %v5867_v13 }
 0x1b9   : > { %5410 = vmatprep.subr.bf16.mxu1 %v5874_v14  ;;  %5474 = vmatprep.subr.bf16.mxu0 %v5876_v15 }
 0x1bc   : > { %5411 = vmatpush3.bf16.msra.mxu1 %v5875_v16  ;;  %5475 = vmatpush3.bf16.msra.mxu0 %v5877_v17 }
 0x1be   : > { %3976 = vmatmul.mubr.bf16.gmra.mrb[96].mxu1 %v5842_v18  ;;  %4073 = vmatmul.mubr.bf16.gmra.mrb[96].mxu0 %v5843_v19  ;;  %v5894_v18 = vld [vmem:[%s7477_s0 + $0x158] ss:$72 sps:$4 sm:$0xff]  }
 0x1bf   : > { %3983 = vmatprep.mubr.bf16.mxu1 %v5848_v20  ;;  %4080 = vmatprep.mubr.bf16.mxu0 %v5850_v21  ;;  %v5895_v19 = vld [vmem:[%s7477_s0 + $0x160] ss:$72 sps:$4 sm:$0xff]  }
 0x1c6   : > { %3984 = vmatmul.mubr.bf16.gmra.mrb[100].mxu1 %v5852_v22  ;;  %4081 = vmatmul.mubr.bf16.gmra.mrb[100].mxu0 %v5853_v23 }
 0x1c7   : > { %3991 = vmatprep.mubr.bf16.mxu1 %v5858_v24  ;;  %4088 = vmatprep.mubr.bf16.mxu0 %v5860_v25  ;;  %v5896_v24 = vld [vmem:[%s7477_s0 + $0x1ec] ss:$72 sps:$4 sm:$0xff]  }
 0x1c8   : > { %v5898_v25 = vld [vmem:[%s7477_s0 + $0x1f4] ss:$72 sps:$4 sm:$0xff]  }
 0x1ce   : > { %3992 = vmatmul.mubr.bf16.gmra.mrb[104].mxu1 %v5862_v26  ;;  %4089 = vmatmul.mubr.bf16.gmra.mrb[104].mxu0 %v5863_v27 }
 0x1cf   : > { %3999 = vmatprep.mubr.bf16.mxu1 %v5868_v28  ;;  %4096 = vmatprep.mubr.bf16.mxu0 %v5870_v29 }
 0x1d1   : > { %v4964_v30 = vpop.f32.mrb[0].mxu0  ;;  %v4988_v31 = vpop.f32.mrb[0].mxu1 }
 0x1d2   : > { %v4965_v32 = vpop.f32.mrb[1].mxu0  ;;  %v4989_v33 = vpop.f32.mrb[1].mxu1 }
 0x1d3   : > { %v7085_v36 = vadd.f32 %v4965_v32, %v4964_v30  ;;  %v7087_v37 = vadd.f32 %v4989_v33, %v4988_v31  ;;  %v4967_v38 = vpop.f32.mrb[2].mxu0  ;;  %v4991_v39 = vpop.f32.mrb[2].mxu1 }
 0x1d4   : > { %v4968_v42 = vpop.f32.mrb[3].mxu0  ;;  %v4992_v43 = vpop.f32.mrb[3].mxu1 }
 0x1d5   : > { %v7095_v44 = vadd.f32 %v4968_v42, %v4967_v38  ;;  %v7097_v45 = vadd.f32 %v4992_v43, %v4991_v39  ;;  %v5902_v42 = vld [vmem:[%s7477_s0 + $0x27c] ss:$72 sps:$4 sm:$0xff]  }
 0x1d6   : > { %4000 = vmatmul.mubr.bf16.gmra.mrb[108].mxu1 %v5872_v34  ;;  %4097 = vmatmul.mubr.bf16.gmra.mrb[108].mxu0 %v5873_v35  ;;  %v5900_v34 = vld [vmem:[%s7477_s0 + $0x1e8] ss:$72 sps:$4 sm:$0xff]   ;;  %v5904_v43 = vld [vmem:[%s7477_s0 + $0x284] ss:$72 sps:$4 sm:$0xff]  }
 0x1d7   : > { %4137 = vmatprep.mubr.bf16.mxu1 %v5880_v40  ;;  %4234 = vmatprep.mubr.bf16.mxu0 %v5883_v41  ;;  %v5901_v35 = vld [vmem:[%s7477_s0 + $0x1f0] ss:$72 sps:$4 sm:$0xff]  }
 0x1d9   : > { %v4970_v46 = vpop.f32.mrb[4].mxu0  ;;  %v4994_v47 = vpop.f32.mrb[4].mxu1 }
 0x1da   : > { %v4971_v48 = vpop.f32.mrb[5].mxu0  ;;  %v4995_v49 = vpop.f32.mrb[5].mxu1 }
 0x1db   : > { %v7105_v52 = vadd.f32 %v4971_v48, %v4970_v46  ;;  %v7107_v53 = vadd.f32 %v4995_v49, %v4994_v47  ;;  %v4973_v54 = vpop.f32.mrb[6].mxu0  ;;  %v4997_v55 = vpop.f32.mrb[6].mxu1 }
 0x1dc   : > { %v4974_v58 = vpop.f32.mrb[7].mxu0  ;;  %v4998_v59 = vpop.f32.mrb[7].mxu1 }
 0x1dd   : > { %v7115_v60 = vadd.f32 %v4974_v58, %v4973_v54  ;;  %v7117_v61 = vadd.f32 %v4998_v59, %v4997_v55 }
 0x1de   : > { %4138 = vmatmul.mubr.bf16.vlgmr.msra.gmra.mrb[112].mxu1 %v5878_v50  ;;  %4235 = vmatmul.mubr.bf16.vlgmr.msra.gmra.mrb[112].mxu0 %v5881_v51 }
 0x1df   : > { %4145 = vmatprep.mubr.bf16.mxu1 %v5884_v56  ;;  %4242 = vmatprep.mubr.bf16.mxu0 %v5886_v57 }
 0x1e1   : > { %v4976_v62 = vpop.f32.mrb[8].mxu0  ;;  %v5000_v63 = vpop.f32.mrb[8].mxu1 }
 0x1e2   : > { %v4977_v0 = vpop.f32.mrb[9].mxu0  ;;  %v5001_v1 = vpop.f32.mrb[9].mxu1 }
 0x1e3   : > { %v7125_v4 = vadd.f32 %v4977_v0, %v4976_v62  ;;  %v7127_v5 = vadd.f32 %v5001_v1, %v5000_v63  ;;  %v4979_v6 = vpop.f32.mrb[10].mxu0  ;;  %v5003_v7 = vpop.f32.mrb[10].mxu1  ;;  %v5907_v62 = vld [vmem:[%s7477_s0 + $0x280] ss:$72 sps:$4 sm:$0xff]  }
 0x1e4   : > { %v4980_v10 = vpop.f32.mrb[11].mxu0  ;;  %v5004_v11 = vpop.f32.mrb[11].mxu1 }
 0x1e5   : > { %v7135_v12 = vadd.f32 %v4980_v10, %v4979_v6  ;;  %v7137_v13 = vadd.f32 %v5004_v11, %v5003_v7 }
 0x1e6   : > { %4146 = vmatmul.mubr.bf16.gmra.mrb[116].mxu1 %v5888_v2  ;;  %4243 = vmatmul.mubr.bf16.gmra.mrb[116].mxu0 %v5889_v3  ;;  %v5908_v2 = vld [vmem:[%s7477_s0 + $0x30c] ss:$72 sps:$4 sm:$0xff]  }
 0x1e7   : > { %4153 = vmatprep.mubr.bf16.mxu1 %v5890_v8  ;;  %4250 = vmatprep.mubr.bf16.mxu0 %v5892_v9  ;;  %v5910_v3 = vld [vmem:[%s7477_s0 + $0x314] ss:$72 sps:$4 sm:$0xff]  }
 0x1e9   : > { %v4982_v14 = vpop.f32.mrb[12].mxu0  ;;  %v5006_v15 = vpop.f32.mrb[12].mxu1 }
 0x1ea   : > { %v4983_v16 = vpop.f32.mrb[13].mxu0  ;;  %v5007_v17 = vpop.f32.mrb[13].mxu1 }
 0x1eb   : > { %v7145_v20 = vadd.f32 %v4983_v16, %v4982_v14  ;;  %v7147_v21 = vadd.f32 %v5007_v17, %v5006_v15  ;;  %v4985_v22 = vpop.f32.mrb[14].mxu0  ;;  %v5009_v23 = vpop.f32.mrb[14].mxu1 }
 0x1ec   : > { %v4986_v26 = vpop.f32.mrb[15].mxu0  ;;  %v5010_v27 = vpop.f32.mrb[15].mxu1 }
 0x1ed   : > { %v7155_v28 = vadd.f32 %v4986_v26, %v4985_v22  ;;  %v7157_v29 = vadd.f32 %v5010_v27, %v5009_v23  ;;  %v5913_v22 = vld [vmem:[%s7477_s0 + $0x310] ss:$72 sps:$4 sm:$0xff]   ;;  %v5914_v26 = vld [vmem:[%s7477_s0 + $0x39c] ss:$72 sps:$4 sm:$0xff]  }
 0x1ee   : > { %4154 = vmatmul.mubr.bf16.gmra.mrb[120].mxu1 %v5894_v18  ;;  %4251 = vmatmul.mubr.bf16.gmra.mrb[120].mxu0 %v5895_v19  ;;  %v5916_v27 = vld [vmem:[%s7477_s0 + $0x3a4] ss:$72 sps:$4 sm:$0xff]  }
 0x1ef   : > { %4161 = vmatprep.mubr.bf16.mxu1 %v5896_v24  ;;  %4258 = vmatprep.mubr.bf16.mxu0 %v5898_v25 }
 0x1f1   : > { %v5028_v30 = vpop.f32.mrb[16].mxu1  ;;  %v5092_v31 = vpop.f32.mrb[16].mxu0 }
 0x1f2   : > { %v5029_v32 = vpop.f32.mrb[17].mxu1  ;;  %v5093_v33 = vpop.f32.mrb[17].mxu0 }
 0x1f3   : > { %v5030_v38 = vadd.f32 %v5029_v32, %v5028_v30  ;;  %v5094_v39 = vadd.f32 %v5093_v33, %v5092_v31  ;;  %v5031_v40 = vpop.f32.mrb[18].mxu1  ;;  %v5095_v41 = vpop.f32.mrb[18].mxu0 }
 0x1f4   : > { %v5032_v46 = vpop.f32.mrb[19].mxu1  ;;  %v5096_v47 = vpop.f32.mrb[19].mxu0 }
 0x1f5   : > { %v3558_v48 = vadd.f32 %v5030_v38, %v7085_v36  ;;  %v5033_v49 = vadd.f32 %v5032_v46, %v5031_v40  ;;  %v5097_v50 = vadd.f32 %v5096_v47, %v5095_v41  ;;  %v5906_v36 = vld [vmem:[%s7477_s0 + $0x278] ss:$72 sps:$4 sm:$0xff]  }
 0x1f6   : > { %4162 = vmatmul.mubr.bf16.gmra.mrb[124].mxu1 %v5900_v34  ;;  %4259 = vmatmul.mubr.bf16.gmra.mrb[124].mxu0 %v5901_v35  ;;  %v5919_v46 = vld [vmem:[%s7477_s0 + $0x3a0] ss:$72 sps:$4 sm:$0xff]  }
 0x1f7   : > { %v7172_v51 = vadd.f32 %v5094_v39, %v3558_v48  ;;  %v3561_v54 = vadd.f32 %v5033_v49, %v7095_v44  ;;  %4169 = vmatprep.mubr.bf16.mxu1 %v5902_v42  ;;  %4266 = vmatprep.mubr.bf16.mxu0 %v5904_v43 }
 0x1f9   : > { %v7175_v55 = vadd.f32 %v5097_v50, %v3561_v54  ;;  %v5034_v56 = vpop.f32.mrb[20].mxu1  ;;  %v5098_v57 = vpop.f32.mrb[20].mxu0  ;;  %v5920_v50 = vld [vmem:[%s7477_s0 + $0x42c] ss:$72 sps:$4 sm:$0xff]  }
 0x1fa   : > { %v5035_v58 = vpop.f32.mrb[21].mxu1  ;;  %v5099_v59 = vpop.f32.mrb[21].mxu0  ;;  %v5922_v54 = vld [vmem:[%s7477_s0 + $0x434] ss:$72 sps:$4 sm:$0xff]  }
 0x1fb   : > { %v5036_v63 = vadd.f32 %v5035_v58, %v5034_v56  ;;  %v5100_v0 = vadd.f32 %v5099_v59, %v5098_v57  ;;  %v5037_v1 = vpop.f32.mrb[22].mxu1  ;;  %v5101_v44 = vpop.f32.mrb[22].mxu0 }
 0x1fc   : > { %v5038_v6 = vpop.f32.mrb[23].mxu1  ;;  %v5102_v7 = vpop.f32.mrb[23].mxu0 }
 0x1fd   : > { %v3566_v8 = vadd.f32 %v5036_v63, %v7105_v52  ;;  %v5039_v9 = vadd.f32 %v5038_v6, %v5037_v1  ;;  %v5103_v10 = vadd.f32 %v5102_v7, %v5101_v44  ;;  %v5912_v52 = vld [vmem:[%s7477_s0 + $0x308] ss:$72 sps:$4 sm:$0xff]  }
 0x1fe   : > { %4170 = vmatmul.mubr.bf16.gmra.mrb[128].mxu1 %v5906_v36  ;;  %4267 = vmatmul.mubr.bf16.gmra.mrb[128].mxu0 %v5907_v62  ;;  %v5925_v6 = vld [vmem:[%s7477_s0 + $0x430] ss:$72 sps:$4 sm:$0xff]  }
 0x1ff   : > { %v7190_v11 = vadd.f32 %v5100_v0, %v3566_v8  ;;  %v3569_v14 = vadd.f32 %v5039_v9, %v7115_v60  ;;  %4177 = vmatprep.mubr.bf16.mxu1 %v5908_v2  ;;  %4274 = vmatprep.mubr.bf16.mxu0 %v5910_v3 }
 0x201   : > { %v7193_v15 = vadd.f32 %v5103_v10, %v3569_v14  ;;  %v5040_v16 = vpop.f32.mrb[24].mxu1  ;;  %v5104_v17 = vpop.f32.mrb[24].mxu0 }
 0x202   : > { %v5041_v18 = vpop.f32.mrb[25].mxu1  ;;  %v5105_v19 = vpop.f32.mrb[25].mxu0 }
 0x203   : > { %v5042_v23 = vadd.f32 %v5041_v18, %v5040_v16  ;;  %v5106_v24 = vadd.f32 %v5105_v19, %v5104_v17  ;;  %v5043_v25 = vpop.f32.mrb[26].mxu1  ;;  %v5107_v60 = vpop.f32.mrb[26].mxu0 }
 0x204   : > { %v5044_v30 = vpop.f32.mrb[27].mxu1  ;;  %v5108_v31 = vpop.f32.mrb[27].mxu0 }
 0x205   : > { %v3574_v32 = vadd.f32 %v5042_v23, %v7125_v4  ;;  %v5045_v33 = vadd.f32 %v5044_v30, %v5043_v25  ;;  %v5109_v34 = vadd.f32 %v5108_v31, %v5107_v60  ;;  %v5918_v4 = vld [vmem:[%s7477_s0 + $0x398] ss:$72 sps:$4 sm:$0xff]  }
 0x206   : > { %4178 = vmatmul.mubr.bf16.gmra.mrb[132].mxu1 %v5912_v52  ;;  %4275 = vmatmul.mubr.bf16.gmra.mrb[132].mxu0 %v5913_v22 }
 0x207   : > { %v7208_v35 = vadd.f32 %v5106_v24, %v3574_v32  ;;  %v3577_v38 = vadd.f32 %v5045_v33, %v7135_v12  ;;  %4185 = vmatprep.mubr.bf16.mxu1 %v5914_v26  ;;  %4282 = vmatprep.mubr.bf16.mxu0 %v5916_v27 }
 0x209   : > { %v7211_v39 = vadd.f32 %v5109_v34, %v3577_v38  ;;  %v5046_v40 = vpop.f32.mrb[28].mxu1  ;;  %v5110_v41 = vpop.f32.mrb[28].mxu0 }
 0x20a   : > { %v5047_v42 = vpop.f32.mrb[29].mxu1  ;;  %v5111_v43 = vpop.f32.mrb[29].mxu0 }
 0x20b   : > { %v5048_v47 = vadd.f32 %v5047_v42, %v5046_v40  ;;  %v5112_v48 = vadd.f32 %v5111_v43, %v5110_v41  ;;  %v5049_v49 = vpop.f32.mrb[30].mxu1  ;;  %v5113_v12 = vpop.f32.mrb[30].mxu0 }
 0x20c   : > { %v5050_v56 = vpop.f32.mrb[31].mxu1  ;;  %v5114_v57 = vpop.f32.mrb[31].mxu0 }
 0x20d   : > { %v3582_v58 = vadd.f32 %v5048_v47, %v7145_v20  ;;  %v5051_v59 = vadd.f32 %v5050_v56, %v5049_v49  ;;  %v5115_v36 = vadd.f32 %v5114_v57, %v5113_v12  ;;  %v5924_v20 = vld [vmem:[%s7477_s0 + $0x428] ss:$72 sps:$4 sm:$0xff]  }
 0x20e   : > { %4186 = vmatmul.mubr.bf16.gmra.mrb[136].mxu1 %v5918_v4  ;;  %4283 = vmatmul.mubr.bf16.gmra.mrb[136].mxu0 %v5919_v46 }
 0x20f   : > { %v7226_v62 = vadd.f32 %v5112_v48, %v3582_v58  ;;  %v3585_v63 = vadd.f32 %v5051_v59, %v7155_v28  ;;  %4193 = vmatprep.mubr.bf16.mxu1 %v5920_v50  ;;  %4290 = vmatprep.mubr.bf16.mxu0 %v5922_v54 }
 0x211   : > { %v7229_v0 = vadd.f32 %v5115_v36, %v3585_v63  ;;  %v5052_v1 = vpop.f32.mrb[32].mxu1  ;;  %v5116_v44 = vpop.f32.mrb[32].mxu0 }
 0x212   : > { %v5053_v2 = vpop.f32.mrb[33].mxu1  ;;  %v5117_v3 = vpop.f32.mrb[33].mxu0 }
 0x213   : > { %v5054_v7 = vadd.f32 %v5053_v2, %v5052_v1  ;;  %v5118_v8 = vadd.f32 %v5117_v3, %v5116_v44  ;;  %v5055_v9 = vpop.f32.mrb[34].mxu1  ;;  %v5119_v28 = vpop.f32.mrb[34].mxu0 }
 0x214   : > { %v5056_v10 = vpop.f32.mrb[35].mxu1  ;;  %v5120_v14 = vpop.f32.mrb[35].mxu0 }
 0x215   : > { %v3590_v16 = vadd.f32 %v5054_v7, %v7087_v37  ;;  %v5057_v17 = vadd.f32 %v5056_v10, %v5055_v9  ;;  %v5121_v18 = vadd.f32 %v5120_v14, %v5119_v28 }
 0x216   : > { %4194 = vmatmul.mubr.bf16.gmra.mrb[140].mxu1 %v5924_v20  ;;  %4291 = vmatmul.mubr.bf16.gmra.mrb[140].mxu0 %v5925_v6 }
 0x217   : > { %v7238_v19 = vadd.f32 %v5118_v8, %v3590_v16  ;;  %v3593_v52 = vadd.f32 %v5057_v17, %v7097_v45 }
 0x219   : > { %v7241_v22 = vadd.f32 %v5121_v18, %v3593_v52  ;;  %v5058_v23 = vpop.f32.mrb[36].mxu1  ;;  %v5122_v24 = vpop.f32.mrb[36].mxu0 }
 0x21a   : > { %v5059_v25 = vpop.f32.mrb[37].mxu1  ;;  %v5123_v60 = vpop.f32.mrb[37].mxu0 }
 0x21b   : > { %v5060_v26 = vadd.f32 %v5059_v25, %v5058_v23  ;;  %v5124_v27 = vadd.f32 %v5123_v60, %v5122_v24  ;;  %v5061_v30 = vpop.f32.mrb[38].mxu1  ;;  %v5125_v31 = vpop.f32.mrb[38].mxu0 }
 0x21c   : > { %v5062_v32 = vpop.f32.mrb[39].mxu1  ;;  %v5126_v37 = vpop.f32.mrb[39].mxu0 }
 0x21d   : > { %v3598_v33 = vadd.f32 %v5060_v26, %v7107_v53  ;;  %v5063_v34 = vadd.f32 %v5062_v32, %v5061_v30  ;;  %v5127_v38 = vadd.f32 %v5126_v37, %v5125_v31 }
 0x21f   : > { %v7244_v40 = vadd.f32 %v5124_v27, %v3598_v33  ;;  %v3601_v45 = vadd.f32 %v5063_v34, %v7117_v61 }
 0x221   : > { %v7247_v41 = vadd.f32 %v5127_v38, %v3601_v45  ;;  %v5064_v42 = vpop.f32.mrb[40].mxu1  ;;  %v5128_v43 = vpop.f32.mrb[40].mxu0 }
 0x222   : > { %v5065_v4 = vpop.f32.mrb[41].mxu1  ;;  %v5129_v46 = vpop.f32.mrb[41].mxu0 }
 0x223   : > { %v5066_v47 = vadd.f32 %v5065_v4, %v5064_v42  ;;  %v5130_v48 = vadd.f32 %v5129_v46, %v5128_v43  ;;  %v5067_v49 = vpop.f32.mrb[42].mxu1  ;;  %v5131_v12 = vpop.f32.mrb[42].mxu0 }
 0x224   : > { %v5068_v50 = vpop.f32.mrb[43].mxu1  ;;  %v5132_v54 = vpop.f32.mrb[43].mxu0 }
 0x225   : > { %v3606_v53 = vadd.f32 %v5066_v47, %v7127_v5  ;;  %v5069_v56 = vadd.f32 %v5068_v50, %v5067_v49  ;;  %v5133_v57 = vadd.f32 %v5132_v54, %v5131_v12 }
 0x227   : > { %v7250_v58 = vadd.f32 %v5130_v48, %v3606_v53  ;;  %v3609_v61 = vadd.f32 %v5069_v56, %v7137_v13 }
 0x229   : > { %v7253_v59 = vadd.f32 %v5133_v57, %v3609_v61  ;;  %v5070_v36 = vpop.f32.mrb[44].mxu1  ;;  %v5134_v63 = vpop.f32.mrb[44].mxu0 }
 0x22a   : > { %v5071_v1 = vpop.f32.mrb[45].mxu1  ;;  %v5135_v44 = vpop.f32.mrb[45].mxu0 }
 0x22b   : > { %v5072_v2 = vadd.f32 %v5071_v1, %v5070_v36  ;;  %v5136_v3 = vadd.f32 %v5135_v44, %v5134_v63  ;;  %v5073_v20 = vpop.f32.mrb[46].mxu1  ;;  %v5137_v6 = vpop.f32.mrb[46].mxu0 }
 0x22c   : > { %v5074_v7 = vpop.f32.mrb[47].mxu1  ;;  %v5138_v8 = vpop.f32.mrb[47].mxu0 }
 0x22d   : > { %v3614_v5 = vadd.f32 %v5072_v2, %v7147_v21  ;;  %v5075_v9 = vadd.f32 %v5074_v7, %v5073_v20  ;;  %v5139_v28 = vadd.f32 %v5138_v8, %v5137_v6 }
 0x22f   : > { %v7256_v10 = vadd.f32 %v5136_v3, %v3614_v5  ;;  %v3617_v13 = vadd.f32 %v5075_v9, %v7157_v29 }
 0x231   : > { %v7259_v14 = vadd.f32 %v5139_v28, %v3617_v13  ;;  %v5156_v16 = vpop.f32.mrb[48].mxu1  ;;  %v5220_v17 = vpop.f32.mrb[48].mxu0 }
 0x232   : > { %v5157_v18 = vpop.f32.mrb[49].mxu1  ;;  %v5221_v52 = vpop.f32.mrb[49].mxu0 }
 0x233   : > { %v5158_v23 = vadd.f32 %v5157_v18, %v5156_v16  ;;  %v5222_v24 = vadd.f32 %v5221_v52, %v5220_v17  ;;  %v5159_v25 = vpop.f32.mrb[50].mxu1  ;;  %v5223_v60 = vpop.f32.mrb[50].mxu0 }
 0x234   : > { %v5160_v26 = vpop.f32.mrb[51].mxu1  ;;  %v5224_v27 = vpop.f32.mrb[51].mxu0 }
 0x235   : > { %v3752_v21 = vadd.f32 %v5158_v23, %v7172_v51  ;;  %v5161_v30 = vadd.f32 %v5160_v26, %v5159_v25  ;;  %v5225_v31 = vadd.f32 %v5224_v27, %v5223_v60 }
 0x237   : > { %v7262_v32 = vadd.f32 %v5222_v24, %v3752_v21  ;;  %v3755_v29 = vadd.f32 %v5161_v30, %v7175_v55 }
 0x239   : > { %v7265_v37 = vadd.f32 %v5225_v31, %v3755_v29  ;;  %v5162_v33 = vpop.f32.mrb[52].mxu1  ;;  %v5226_v34 = vpop.f32.mrb[52].mxu0 }
 0x23a   : > { %v5163_v38 = vpop.f32.mrb[53].mxu1  ;;  %v5227_v45 = vpop.f32.mrb[53].mxu0 }
 0x23b   : > { %v5164_v42 = vadd.f32 %v5163_v38, %v5162_v33  ;;  %v5228_v43 = vadd.f32 %v5227_v45, %v5226_v34  ;;  %v5165_v4 = vpop.f32.mrb[54].mxu1  ;;  %v5229_v46 = vpop.f32.mrb[54].mxu0 }
 0x23c   : > { %v5166_v47 = vpop.f32.mrb[55].mxu1  ;;  %v5230_v48 = vpop.f32.mrb[55].mxu0 }
 0x23d   : > { %v3760_v51 = vadd.f32 %v5164_v42, %v7190_v11  ;;  %v5167_v49 = vadd.f32 %v5166_v47, %v5165_v4  ;;  %v5231_v12 = vadd.f32 %v5230_v48, %v5229_v46 }
 0x23f   : > { %v7268_v50 = vadd.f32 %v5228_v43, %v3760_v51  ;;  %v3763_v55 = vadd.f32 %v5167_v49, %v7193_v15 }
 0x241   : > { %v7271_v54 = vadd.f32 %v5231_v12, %v3763_v55  ;;  %v5168_v53 = vpop.f32.mrb[56].mxu1  ;;  %v5232_v56 = vpop.f32.mrb[56].mxu0 }
 0x242   : > { %v5169_v57 = vpop.f32.mrb[57].mxu1  ;;  %v5233_v61 = vpop.f32.mrb[57].mxu0 }
 0x243   : > { %v5170_v36 = vadd.f32 %v5169_v57, %v5168_v53  ;;  %v5234_v63 = vadd.f32 %v5233_v61, %v5232_v56  ;;  %v5171_v1 = vpop.f32.mrb[58].mxu1  ;;  %v5235_v44 = vpop.f32.mrb[58].mxu0 }
 0x244   : > { %v5172_v2 = vpop.f32.mrb[59].mxu1  ;;  %v5236_v3 = vpop.f32.mrb[59].mxu0 }
 0x245   : > { %v3768_v11 = vadd.f32 %v5170_v36, %v7208_v35  ;;  %v5173_v20 = vadd.f32 %v5172_v2, %v5171_v1  ;;  %v5237_v6 = vadd.f32 %v5236_v3, %v5235_v44 }
 0x247   : > { %v7274_v7 = vadd.f32 %v5234_v63, %v3768_v11  ;;  %v3771_v15 = vadd.f32 %v5173_v20, %v7211_v39 }
 0x249   : > { %v7277_v8 = vadd.f32 %v5237_v6, %v3771_v15  ;;  %v5174_v5 = vpop.f32.mrb[60].mxu1  ;;  %v5238_v9 = vpop.f32.mrb[60].mxu0 }
 0x24a   : > { %v5175_v28 = vpop.f32.mrb[61].mxu1  ;;  %v5239_v13 = vpop.f32.mrb[61].mxu0 }
 0x24b   : > { %v5176_v16 = vadd.f32 %v5175_v28, %v5174_v5  ;;  %v5240_v17 = vadd.f32 %v5239_v13, %v5238_v9  ;;  %v5177_v18 = vpop.f32.mrb[62].mxu1  ;;  %v5241_v52 = vpop.f32.mrb[62].mxu0 }
 0x24c   : > { %v5178_v23 = vpop.f32.mrb[63].mxu1  ;;  %v5242_v24 = vpop.f32.mrb[63].mxu0 }
 0x24d   : > { %v3776_v35 = vadd.f32 %v5176_v16, %v7226_v62  ;;  %v5179_v25 = vadd.f32 %v5178_v23, %v5177_v18  ;;  %v5243_v60 = vadd.f32 %v5242_v24, %v5241_v52 }
 0x24f   : > { %v7280_v26 = vadd.f32 %v5240_v17, %v3776_v35  ;;  %v3779_v39 = vadd.f32 %v5179_v25, %v7229_v0 }
 0x251   : > { %v7283_v27 = vadd.f32 %v5243_v60, %v3779_v39  ;;  %v5180_v21 = vpop.f32.mrb[64].mxu1  ;;  %v5244_v30 = vpop.f32.mrb[64].mxu0 }
 0x252   : > { %v5181_v31 = vpop.f32.mrb[65].mxu1  ;;  %v5245_v29 = vpop.f32.mrb[65].mxu0 }
 0x253   : > { %v5182_v33 = vadd.f32 %v5181_v31, %v5180_v21  ;;  %v5246_v34 = vadd.f32 %v5245_v29, %v5244_v30  ;;  %v5183_v38 = vpop.f32.mrb[66].mxu1  ;;  %v5247_v45 = vpop.f32.mrb[66].mxu0 }
 0x254   : > { %v5184_v42 = vpop.f32.mrb[67].mxu1  ;;  %v5248_v43 = vpop.f32.mrb[67].mxu0 }
 0x255   : > { %v3784_v62 = vadd.f32 %v5182_v33, %v7238_v19  ;;  %v5185_v4 = vadd.f32 %v5184_v42, %v5183_v38  ;;  %v5249_v46 = vadd.f32 %v5248_v43, %v5247_v45 }
 0x257   : > { %v7286_v47 = vadd.f32 %v5246_v34, %v3784_v62  ;;  %v3787_v0 = vadd.f32 %v5185_v4, %v7241_v22 }
 0x259   : > { %v7289_v48 = vadd.f32 %v5249_v46, %v3787_v0  ;;  %v5186_v51 = vpop.f32.mrb[68].mxu1  ;;  %v5250_v49 = vpop.f32.mrb[68].mxu0 }
 0x25a   : > { %v5187_v12 = vpop.f32.mrb[69].mxu1  ;;  %v5251_v55 = vpop.f32.mrb[69].mxu0 }
 0x25b   : > { %v5188_v53 = vadd.f32 %v5187_v12, %v5186_v51  ;;  %v5252_v56 = vadd.f32 %v5251_v55, %v5250_v49  ;;  %v5189_v57 = vpop.f32.mrb[70].mxu1  ;;  %v5253_v61 = vpop.f32.mrb[70].mxu0 }
 0x25c   : > { %v5190_v36 = vpop.f32.mrb[71].mxu1  ;;  %v5254_v63 = vpop.f32.mrb[71].mxu0 }
 0x25d   : > { %v3792_v19 = vadd.f32 %v5188_v53, %v7244_v40  ;;  %v5191_v1 = vadd.f32 %v5190_v36, %v5189_v57  ;;  %v5255_v44 = vadd.f32 %v5254_v63, %v5253_v61 }
 0x25f   : > { %v7292_v2 = vadd.f32 %v5252_v56, %v3792_v19  ;;  %v3795_v22 = vadd.f32 %v5191_v1, %v7247_v41 }
 0x261   : > { %v7295_v3 = vadd.f32 %v5255_v44, %v3795_v22  ;;  %v5192_v11 = vpop.f32.mrb[72].mxu1  ;;  %v5256_v20 = vpop.f32.mrb[72].mxu0 }
 0x262   : > { %v5193_v6 = vpop.f32.mrb[73].mxu1  ;;  %v5257_v15 = vpop.f32.mrb[73].mxu0 }
 0x263   : > { %v5194_v5 = vadd.f32 %v5193_v6, %v5192_v11  ;;  %v5258_v9 = vadd.f32 %v5257_v15, %v5256_v20  ;;  %v5195_v28 = vpop.f32.mrb[74].mxu1  ;;  %v5259_v13 = vpop.f32.mrb[74].mxu0 }
 0x264   : > { %v5196_v16 = vpop.f32.mrb[75].mxu1  ;;  %v5260_v17 = vpop.f32.mrb[75].mxu0 }
 0x265   : > { %v3800_v40 = vadd.f32 %v5194_v5, %v7250_v58  ;;  %v5197_v18 = vadd.f32 %v5196_v16, %v5195_v28  ;;  %v5261_v52 = vadd.f32 %v5260_v17, %v5259_v13 }
 0x267   : > { %v7298_v23 = vadd.f32 %v5258_v9, %v3800_v40  ;;  %v3803_v41 = vadd.f32 %v5197_v18, %v7253_v59 }
 0x269   : > { %v7301_v24 = vadd.f32 %v5261_v52, %v3803_v41  ;;  %v5198_v35 = vpop.f32.mrb[76].mxu1  ;;  %v5262_v25 = vpop.f32.mrb[76].mxu0 }
 0x26a   : > { %v5199_v60 = vpop.f32.mrb[77].mxu1  ;;  %v5263_v39 = vpop.f32.mrb[77].mxu0 }
 0x26b   : > { %v5200_v21 = vadd.f32 %v5199_v60, %v5198_v35  ;;  %v5264_v30 = vadd.f32 %v5263_v39, %v5262_v25  ;;  %v5201_v31 = vpop.f32.mrb[78].mxu1  ;;  %v5265_v29 = vpop.f32.mrb[78].mxu0 }
 0x26c   : > { %v5202_v33 = vpop.f32.mrb[79].mxu1  ;;  %v5266_v34 = vpop.f32.mrb[79].mxu0 }
 0x26d   : > { %v3808_v58 = vadd.f32 %v5200_v21, %v7256_v10  ;;  %v5203_v38 = vadd.f32 %v5202_v33, %v5201_v31  ;;  %v5267_v45 = vadd.f32 %v5266_v34, %v5265_v29 }
 0x26f   : > { %v7304_v42 = vadd.f32 %v5264_v30, %v3808_v58  ;;  %v3811_v59 = vadd.f32 %v5203_v38, %v7259_v14 }
 0x271   : > { %v7307_v43 = vadd.f32 %v5267_v45, %v3811_v59  ;;  %v5284_v62 = vpop.f32.mrb[80].mxu1  ;;  %v5348_v4 = vpop.f32.mrb[80].mxu0 }
 0x272   : > { %v5285_v46 = vpop.f32.mrb[81].mxu1  ;;  %v5349_v0 = vpop.f32.mrb[81].mxu0 }
 0x273   : > { %v5286_v51 = vadd.f32 %v5285_v46, %v5284_v62  ;;  %v5350_v49 = vadd.f32 %v5349_v0, %v5348_v4  ;;  %v5287_v12 = vpop.f32.mrb[82].mxu1  ;;  %v5351_v55 = vpop.f32.mrb[82].mxu0 }
 0x274   : > { %v5288_v53 = vpop.f32.mrb[83].mxu1  ;;  %v5352_v56 = vpop.f32.mrb[83].mxu0 }
 0x275   : > { %v3946_v10 = vadd.f32 %v5286_v51, %v7262_v32  ;;  %v5289_v57 = vadd.f32 %v5288_v53, %v5287_v12  ;;  %v5353_v61 = vadd.f32 %v5352_v56, %v5351_v55 }
 0x277   : > { %v7310_v36 = vadd.f32 %v5350_v49, %v3946_v10  ;;  %v3949_v14 = vadd.f32 %v5289_v57, %v7265_v37 }
 0x279   : > { %v7313_v63 = vadd.f32 %v5353_v61, %v3949_v14  ;;  %v5290_v19 = vpop.f32.mrb[84].mxu1  ;;  %v5354_v1 = vpop.f32.mrb[84].mxu0 }
 0x27a   : > { %v5291_v44 = vpop.f32.mrb[85].mxu1  ;;  %v5355_v22 = vpop.f32.mrb[85].mxu0 }
 0x27b   : > { %v5292_v11 = vadd.f32 %v5291_v44, %v5290_v19  ;;  %v5356_v20 = vadd.f32 %v5355_v22, %v5354_v1  ;;  %v5293_v6 = vpop.f32.mrb[86].mxu1  ;;  %v5357_v15 = vpop.f32.mrb[86].mxu0 }
 0x27c   : > { %v5294_v5 = vpop.f32.mrb[87].mxu1  ;;  %v5358_v9 = vpop.f32.mrb[87].mxu0 }
 0x27d   : > { %v3954_v32 = vadd.f32 %v5292_v11, %v7268_v50  ;;  %v5295_v28 = vadd.f32 %v5294_v5, %v5293_v6  ;;  %v5359_v13 = vadd.f32 %v5358_v9, %v5357_v15 }
 0x27f   : > { %v7316_v16 = vadd.f32 %v5356_v20, %v3954_v32  ;;  %v3957_v37 = vadd.f32 %v5295_v28, %v7271_v54 }
 0x281   : > { %v7319_v17 = vadd.f32 %v5359_v13, %v3957_v37  ;;  %v5296_v40 = vpop.f32.mrb[88].mxu1  ;;  %v5360_v18 = vpop.f32.mrb[88].mxu0 }
 0x282   : > { %v5297_v52 = vpop.f32.mrb[89].mxu1  ;;  %v5361_v41 = vpop.f32.mrb[89].mxu0 }
 0x283   : > { %v5298_v35 = vadd.f32 %v5297_v52, %v5296_v40  ;;  %v5362_v25 = vadd.f32 %v5361_v41, %v5360_v18  ;;  %v5299_v60 = vpop.f32.mrb[90].mxu1  ;;  %v5363_v39 = vpop.f32.mrb[90].mxu0 }
 0x284   : > { %v5300_v21 = vpop.f32.mrb[91].mxu1  ;;  %v5364_v30 = vpop.f32.mrb[91].mxu0 }
 0x285   : > { %v3962_v50 = vadd.f32 %v5298_v35, %v7274_v7  ;;  %v5301_v31 = vadd.f32 %v5300_v21, %v5299_v60  ;;  %v5365_v29 = vadd.f32 %v5364_v30, %v5363_v39 }
 0x287   : > { %v7322_v33 = vadd.f32 %v5362_v25, %v3962_v50  ;;  %v3965_v54 = vadd.f32 %v5301_v31, %v7277_v8 }
 0x289   : > { %v7325_v34 = vadd.f32 %v5365_v29, %v3965_v54  ;;  %v5302_v58 = vpop.f32.mrb[92].mxu1  ;;  %v5366_v38 = vpop.f32.mrb[92].mxu0 }
 0x28a   : > { %v5303_v45 = vpop.f32.mrb[93].mxu1  ;;  %v5367_v59 = vpop.f32.mrb[93].mxu0 }
 0x28b   : > { %v5304_v62 = vadd.f32 %v5303_v45, %v5302_v58  ;;  %v5368_v4 = vadd.f32 %v5367_v59, %v5366_v38  ;;  %v5305_v46 = vpop.f32.mrb[94].mxu1  ;;  %v5369_v0 = vpop.f32.mrb[94].mxu0 }
 0x28c   : > { %v5306_v51 = vpop.f32.mrb[95].mxu1  ;;  %v5370_v49 = vpop.f32.mrb[95].mxu0 }
 0x28d   : > { %v3970_v7 = vadd.f32 %v5304_v62, %v7280_v26  ;;  %v5307_v12 = vadd.f32 %v5306_v51, %v5305_v46  ;;  %v5371_v55 = vadd.f32 %v5370_v49, %v5369_v0 }
 0x28f   : > { %v7328_v53 = vadd.f32 %v5368_v4, %v3970_v7  ;;  %v3973_v8 = vadd.f32 %v5307_v12, %v7283_v27 }
 0x291   : > { %v7331_v56 = vadd.f32 %v5371_v55, %v3973_v8  ;;  %v5308_v10 = vpop.f32.mrb[96].mxu1  ;;  %v5372_v57 = vpop.f32.mrb[96].mxu0 }
 0x292   : > { %v5309_v61 = vpop.f32.mrb[97].mxu1  ;;  %v5373_v14 = vpop.f32.mrb[97].mxu0 }
 0x293   : > { %v5310_v19 = vadd.f32 %v5309_v61, %v5308_v10  ;;  %v5374_v1 = vadd.f32 %v5373_v14, %v5372_v57  ;;  %v5311_v44 = vpop.f32.mrb[98].mxu1  ;;  %v5375_v22 = vpop.f32.mrb[98].mxu0 }
 0x294   : > { %v5312_v11 = vpop.f32.mrb[99].mxu1  ;;  %v5376_v20 = vpop.f32.mrb[99].mxu0 }
 0x295   : > { %v3978_v26 = vadd.f32 %v5310_v19, %v7286_v47  ;;  %v5313_v6 = vadd.f32 %v5312_v11, %v5311_v44  ;;  %v5377_v15 = vadd.f32 %v5376_v20, %v5375_v22 }
 0x297   : > { %v7334_v5 = vadd.f32 %v5374_v1, %v3978_v26  ;;  %v3981_v27 = vadd.f32 %v5313_v6, %v7289_v48 }
 0x299   : > { %v7337_v9 = vadd.f32 %v5377_v15, %v3981_v27  ;;  %v5314_v32 = vpop.f32.mrb[100].mxu1  ;;  %v5378_v28 = vpop.f32.mrb[100].mxu0 }
 0x29a   : > { %v5315_v13 = vpop.f32.mrb[101].mxu1  ;;  %v5379_v37 = vpop.f32.mrb[101].mxu0 }
 0x29b   : > { %v5316_v40 = vadd.f32 %v5315_v13, %v5314_v32  ;;  %v5380_v18 = vadd.f32 %v5379_v37, %v5378_v28  ;;  %v5317_v52 = vpop.f32.mrb[102].mxu1  ;;  %v5381_v41 = vpop.f32.mrb[102].mxu0 }
 0x29c   : > { %v5318_v35 = vpop.f32.mrb[103].mxu1  ;;  %v5382_v25 = vpop.f32.mrb[103].mxu0 }
 0x29d   : > { %v3986_v47 = vadd.f32 %v5316_v40, %v7292_v2  ;;  %v5319_v60 = vadd.f32 %v5318_v35, %v5317_v52  ;;  %v5383_v39 = vadd.f32 %v5382_v25, %v5381_v41 }
 0x29f   : > { %v7340_v21 = vadd.f32 %v5380_v18, %v3986_v47  ;;  %v3989_v48 = vadd.f32 %v5319_v60, %v7295_v3 }
 0x2a1   : > { %v7343_v30 = vadd.f32 %v5383_v39, %v3989_v48  ;;  %v5320_v50 = vpop.f32.mrb[104].mxu1  ;;  %v5384_v31 = vpop.f32.mrb[104].mxu0 }
 0x2a2   : > { %v5321_v29 = vpop.f32.mrb[105].mxu1  ;;  %v5385_v54 = vpop.f32.mrb[105].mxu0 }
 0x2a3   : > { %v5322_v58 = vadd.f32 %v5321_v29, %v5320_v50  ;;  %v5386_v38 = vadd.f32 %v5385_v54, %v5384_v31  ;;  %v5323_v45 = vpop.f32.mrb[106].mxu1  ;;  %v5387_v59 = vpop.f32.mrb[106].mxu0 }
 0x2a4   : > { %v5324_v62 = vpop.f32.mrb[107].mxu1  ;;  %v5388_v4 = vpop.f32.mrb[107].mxu0 }
 0x2a5   : > { %v3994_v2 = vadd.f32 %v5322_v58, %v7298_v23  ;;  %v5325_v46 = vadd.f32 %v5324_v62, %v5323_v45  ;;  %v5389_v0 = vadd.f32 %v5388_v4, %v5387_v59 }
 0x2a7   : > { %v7346_v51 = vadd.f32 %v5386_v38, %v3994_v2  ;;  %v3997_v3 = vadd.f32 %v5325_v46, %v7301_v24 }
 0x2a9   : > { %v7349_v49 = vadd.f32 %v5389_v0, %v3997_v3  ;;  %v5326_v7 = vpop.f32.mrb[108].mxu1  ;;  %v5390_v12 = vpop.f32.mrb[108].mxu0 }
 0x2aa   : > { %v5327_v55 = vpop.f32.mrb[109].mxu1  ;;  %v5391_v8 = vpop.f32.mrb[109].mxu0 }
 0x2ab   : > { %v5328_v10 = vadd.f32 %v5327_v55, %v5326_v7  ;;  %v5392_v57 = vadd.f32 %v5391_v8, %v5390_v12  ;;  %v5329_v61 = vpop.f32.mrb[110].mxu1  ;;  %v5393_v14 = vpop.f32.mrb[110].mxu0 }
 0x2ac   : > { %v5330_v19 = vpop.f32.mrb[111].mxu1  ;;  %v5394_v1 = vpop.f32.mrb[111].mxu0 }
 0x2ad   : > { %v4002_v23 = vadd.f32 %v5328_v10, %v7304_v42  ;;  %v5331_v44 = vadd.f32 %v5330_v19, %v5329_v61  ;;  %v5395_v22 = vadd.f32 %v5394_v1, %v5393_v14 }
 0x2af   : > { %v7352_v11 = vadd.f32 %v5392_v57, %v4002_v23  ;;  %v4005_v24 = vadd.f32 %v5331_v44, %v7307_v43 }
 0x2b1   : > { %v7355_v20 = vadd.f32 %v5395_v22, %v4005_v24  ;;  %v5412_v26 = vpop.f32.mrb[112].mxu1  ;;  %v5476_v6 = vpop.f32.mrb[112].mxu0 }
 0x2b2   : > { %v5413_v15 = vpop.f32.mrb[113].mxu1  ;;  %v5477_v27 = vpop.f32.mrb[113].mxu0 }
 0x2b3   : > { %v5414_v32 = vadd.f32 %v5413_v15, %v5412_v26  ;;  %v5478_v28 = vadd.f32 %v5477_v27, %v5476_v6  ;;  %v5415_v13 = vpop.f32.mrb[114].mxu1  ;;  %v5479_v37 = vpop.f32.mrb[114].mxu0 }
 0x2b4   : > { %v5416_v40 = vpop.f32.mrb[115].mxu1  ;;  %v5480_v18 = vpop.f32.mrb[115].mxu0 }
 0x2b5   : > { %v4140_v42 = vadd.f32 %v5414_v32, %v7310_v36  ;;  %v5417_v52 = vadd.f32 %v5416_v40, %v5415_v13  ;;  %v5481_v41 = vadd.f32 %v5480_v18, %v5479_v37 }
 0x2b7   : > { %v7358_v35 = vadd.f32 %v5478_v28, %v4140_v42  ;;  %v4143_v43 = vadd.f32 %v5417_v52, %v7313_v63 }
 0x2b9   : > { %v7361_v25 = vadd.f32 %v5481_v41, %v4143_v43  ;;  %v5418_v47 = vpop.f32.mrb[116].mxu1  ;;  %v5482_v60 = vpop.f32.mrb[116].mxu0 }
 0x2ba   : > { %v5419_v39 = vpop.f32.mrb[117].mxu1  ;;  %v5483_v48 = vpop.f32.mrb[117].mxu0 }
 0x2bb   : > { %v4299_v50 = vadd.f32 %v7361_v25, %v7358_v35  ;;  %v5420_v31 = vadd.f32 %v5419_v39, %v5418_v47  ;;  %v5484_v29 = vadd.f32 %v5483_v48, %v5482_v60  ;;  %v5421_v54 = vpop.f32.mrb[118].mxu1  ;;  %v5485_v58 = vpop.f32.mrb[118].mxu0 }
 0x2bc   : > { %v5422_v36 = vpop.f32.mrb[119].mxu1  ;;  %v5486_v38 = vpop.f32.mrb[119].mxu0 }
 0x2bd   : > { %v4148_v45 = vadd.f32 %v5420_v31, %v7316_v16  ;;  %v5423_v59 = vadd.f32 %v5422_v36, %v5421_v54  ;;  %v5487_v62 = vadd.f32 %v5486_v38, %v5485_v58 }
 0x2bf   : > { %v7366_v63 = vadd.f32 %v5484_v29, %v4148_v45  ;;  %v4151_v4 = vadd.f32 %v5423_v59, %v7319_v17 }
 0x2c1   : > { %v4300_v2 = vadd.f32 %v4299_v50, %v7366_v63  ;;  %v7370_v46 = vadd.f32 %v5487_v62, %v4151_v4  ;;  %v5424_v0 = vpop.f32.mrb[120].mxu1  ;;  %v5488_v3 = vpop.f32.mrb[120].mxu0 }
 0x2c2   : > { %v5425_v7 = vpop.f32.mrb[121].mxu1  ;;  %v5489_v12 = vpop.f32.mrb[121].mxu0 }
 0x2c3   : > { %v4301_v55 = vadd.f32 %v4300_v2, %v7370_v46  ;;  %v5426_v8 = vadd.f32 %v5425_v7, %v5424_v0  ;;  %v5490_v10 = vadd.f32 %v5489_v12, %v5488_v3  ;;  %v5427_v57 = vpop.f32.mrb[122].mxu1  ;;  %v5491_v16 = vpop.f32.mrb[122].mxu0 }
 0x2c4   : > { %v5428_v61 = vpop.f32.mrb[123].mxu1  ;;  %v5492_v14 = vpop.f32.mrb[123].mxu0 }
 0x2c5   : > { %v4156_v19 = vadd.f32 %v5426_v8, %v7322_v33  ;;  %v5429_v1 = vadd.f32 %v5428_v61, %v5427_v57  ;;  %v5493_v17 = vadd.f32 %v5492_v14, %v5491_v16 }
 0x2c7   : > { %v7374_v23 = vadd.f32 %v5490_v10, %v4156_v19  ;;  %v4159_v44 = vadd.f32 %v5429_v1, %v7325_v34 }
 0x2c9   : > { %v4302_v22 = vadd.f32 %v4301_v55, %v7374_v23  ;;  %v7378_v24 = vadd.f32 %v5493_v17, %v4159_v44  ;;  %v5430_v26 = vpop.f32.mrb[124].mxu1  ;;  %v5494_v6 = vpop.f32.mrb[124].mxu0 }
 0x2ca   : > { %v5431_v15 = vpop.f32.mrb[125].mxu1  ;;  %v5495_v27 = vpop.f32.mrb[125].mxu0 }
 0x2cb   : > { %v4303_v32 = vadd.f32 %v4302_v22, %v7378_v24  ;;  %v5432_v28 = vadd.f32 %v5431_v15, %v5430_v26  ;;  %v5496_v13 = vadd.f32 %v5495_v27, %v5494_v6  ;;  %v5433_v37 = vpop.f32.mrb[126].mxu1  ;;  %v5497_v33 = vpop.f32.mrb[126].mxu0 }
 0x2cc   : > { %v5434_v40 = vpop.f32.mrb[127].mxu1  ;;  %v5498_v18 = vpop.f32.mrb[127].mxu0 }
 0x2cd   : > { %v4164_v42 = vadd.f32 %v5432_v28, %v7328_v53  ;;  %v5435_v52 = vadd.f32 %v5434_v40, %v5433_v37  ;;  %v5499_v34 = vadd.f32 %v5498_v18, %v5497_v33 }
 0x2cf   : > { %v7382_v41 = vadd.f32 %v5496_v13, %v4164_v42  ;;  %v4167_v43 = vadd.f32 %v5435_v52, %v7331_v56 }
 0x2d1   : > { %v4304_v47 = vadd.f32 %v4303_v32, %v7382_v41  ;;  %v7386_v60 = vadd.f32 %v5499_v34, %v4167_v43  ;;  %v5436_v39 = vpop.f32.mrb[128].mxu1  ;;  %v5500_v48 = vpop.f32.mrb[128].mxu0 }
 0x2d2   : > { %v5437_v50 = vpop.f32.mrb[129].mxu1  ;;  %v5501_v31 = vpop.f32.mrb[129].mxu0 }
 0x2d3   : > { %v4305_v29 = vadd.f32 %v4304_v47, %v7386_v60  ;;  %v5438_v54 = vadd.f32 %v5437_v50, %v5436_v39  ;;  %v5502_v58 = vadd.f32 %v5501_v31, %v5500_v48  ;;  %v5439_v36 = vpop.f32.mrb[130].mxu1  ;;  %v5503_v53 = vpop.f32.mrb[130].mxu0 }
 0x2d4   : > { %v5440_v38 = vpop.f32.mrb[131].mxu1  ;;  %v5504_v45 = vpop.f32.mrb[131].mxu0 }
 0x2d5   : > { %v4172_v59 = vadd.f32 %v5438_v54, %v7334_v5  ;;  %v5441_v62 = vadd.f32 %v5440_v38, %v5439_v36  ;;  %v5505_v56 = vadd.f32 %v5504_v45, %v5503_v53 }
 0x2d7   : > { %v7390_v4 = vadd.f32 %v5502_v58, %v4172_v59  ;;  %v4175_v2 = vadd.f32 %v5441_v62, %v7337_v9 }
 0x2d9   : > { %v4306_v0 = vadd.f32 %v4305_v29, %v7390_v4  ;;  %v7394_v3 = vadd.f32 %v5505_v56, %v4175_v2  ;;  %v5442_v7 = vpop.f32.mrb[132].mxu1  ;;  %v5506_v12 = vpop.f32.mrb[132].mxu0 }
 0x2da   : > { %v5443_v55 = vpop.f32.mrb[133].mxu1  ;;  %v5507_v8 = vpop.f32.mrb[133].mxu0 }
 0x2db   : > { %v4307_v10 = vadd.f32 %v4306_v0, %v7394_v3  ;;  %v5444_v57 = vadd.f32 %v5443_v55, %v5442_v7  ;;  %v5508_v16 = vadd.f32 %v5507_v8, %v5506_v12  ;;  %v5445_v61 = vpop.f32.mrb[134].mxu1  ;;  %v5509_v5 = vpop.f32.mrb[134].mxu0 }
 0x2dc   : > { %v5446_v14 = vpop.f32.mrb[135].mxu1  ;;  %v5510_v19 = vpop.f32.mrb[135].mxu0 }
 0x2dd   : > { %v4180_v1 = vadd.f32 %v5444_v57, %v7340_v21  ;;  %v5447_v17 = vadd.f32 %v5446_v14, %v5445_v61  ;;  %v5511_v9 = vadd.f32 %v5510_v19, %v5509_v5 }
 0x2df   : > { %v4277_v44 = vadd.f32 %v5508_v16, %v4180_v1  ;;  %v4183_v22 = vadd.f32 %v5447_v17, %v7343_v30 }
 0x2e1   : > { %v4308_v26 = vadd.f32 %v4307_v10, %v4277_v44  ;;  %v4280_v6 = vadd.f32 %v5511_v9, %v4183_v22  ;;  %v5448_v15 = vpop.f32.mrb[136].mxu1  ;;  %v5512_v27 = vpop.f32.mrb[136].mxu0 }
 0x2e2   : > { %v5449_v32 = vpop.f32.mrb[137].mxu1  ;;  %v5513_v28 = vpop.f32.mrb[137].mxu0 }
 0x2e3   : > { %v4309_v13 = vadd.f32 %v4308_v26, %v4280_v6  ;;  %v5450_v37 = vadd.f32 %v5449_v32, %v5448_v15  ;;  %v5514_v33 = vadd.f32 %v5513_v28, %v5512_v27  ;;  %v5451_v40 = vpop.f32.mrb[138].mxu1  ;;  %v5515_v18 = vpop.f32.mrb[138].mxu0 }
 0x2e4   : > { %v5452_v42 = vpop.f32.mrb[139].mxu1  ;;  %v5516_v52 = vpop.f32.mrb[139].mxu0 }
 0x2e5   : > { %v4188_v21 = vadd.f32 %v5450_v37, %v7346_v51  ;;  %v5453_v34 = vadd.f32 %v5452_v42, %v5451_v40  ;;  %v5517_v43 = vadd.f32 %v5516_v52, %v5515_v18 }
 0x2e7   : > { %v4285_v47 = vadd.f32 %v5514_v33, %v4188_v21  ;;  %v4191_v30 = vadd.f32 %v5453_v34, %v7349_v49 }
 0x2e9   : > { %v4310_v39 = vadd.f32 %v4309_v13, %v4285_v47  ;;  %v4288_v48 = vadd.f32 %v5517_v43, %v4191_v30  ;;  %v5454_v50 = vpop.f32.mrb[140].mxu1  ;;  %v5518_v31 = vpop.f32.mrb[140].mxu0 }
 0x2ea   : > { %v5455_v29 = vpop.f32.mrb[141].mxu1  ;;  %v5519_v54 = vpop.f32.mrb[141].mxu0 }
 0x2eb   : > { %v4311_v58 = vadd.f32 %v4310_v39, %v4288_v48  ;;  %v5456_v36 = vadd.f32 %v5455_v29, %v5454_v50  ;;  %v5520_v53 = vadd.f32 %v5519_v54, %v5518_v31  ;;  %v5457_v38 = vpop.f32.mrb[142].mxu1  ;;  %v5521_v45 = vpop.f32.mrb[142].mxu0 }
 0x2ec   : > { %v5458_v59 = vpop.f32.mrb[143].mxu1  ;;  %v5522_v62 = vpop.f32.mrb[143].mxu0 }
 0x2ed   : > { %v4196_v51 = vadd.f32 %v5456_v36, %v7352_v11  ;;  %v5459_v56 = vadd.f32 %v5458_v59, %v5457_v38  ;;  %v5523_v2 = vadd.f32 %v5522_v62, %v5521_v45 }
 0x2ef   : > { %v4293_v0 = vadd.f32 %v5520_v53, %v4196_v51  ;;  %v4199_v49 = vadd.f32 %v5459_v56, %v7355_v20 }
 0x2f1   : > { %v4312_v7 = vadd.f32 %v4311_v58, %v4293_v0  ;;  %v4296_v12 = vadd.f32 %v5523_v2, %v4199_v49 }
 0x2f3   : > { %v4313_v55 = vadd.f32 %v4312_v7, %v4296_v12 }
 0x2f5   : > { %v4314_v8 = vrot.slane %v4313_v55, 4 }
 0x2f7   : > { %v4315_v10 = vadd.f32 %v4314_v8, %v4313_v55 }
 0x2f9   : > { %v4316_v57 = vrot.slane %v4315_v10, 2 }
 0x2fb   : > { %v4317_v16 = vadd.f32 %v4316_v57, %v4315_v10 }
 0x2fd   : > { %v4318_v61 = vrot.slane %v4317_v16, 1 }
 0x2ff   : > { %v4319_v5 = vadd.f32 %v4318_v61, %v4317_v16 }
 0x301   : > { %v4321_v14 = vmul.f32 0.0078125, %v4319_v5 }
 0x303   : > { %v4322_v19 = vsub.f32 %v7358_v35, %v4321_v14  ;;  %v4323_v1 = vsub.f32 %v7361_v25, %v4321_v14  ;;  %v4324_v11 = vsub.f32 %v7366_v63, %v4321_v14  ;;  %v4325_v17 = vsub.f32 %v7370_v46, %v4321_v14 }
 0x304   : > { %v4326_v20 = vsub.f32 %v7374_v23, %v4321_v14  ;;  %v4327_v9 = vsub.f32 %v7378_v24, %v4321_v14  ;;  %v4328_v22 = vsub.f32 %v7382_v41, %v4321_v14  ;;  %v4329_v26 = vsub.f32 %v7386_v60, %v4321_v14 }
 0x305   : > { %v4330_v15 = vsub.f32 %v7390_v4, %v4321_v14  ;;  %v4331_v27 = vsub.f32 %v7394_v3, %v4321_v14  ;;  %v4332_v32 = vsub.f32 %v4277_v44, %v4321_v14  ;;  %v4333_v35 = vsub.f32 %v4280_v6, %v4321_v14 }
 0x306   : > { %v4334_v28 = vsub.f32 %v4285_v47, %v4321_v14  ;;  %v4335_v25 = vsub.f32 %v4288_v48, %v4321_v14  ;;  %v4336_v13 = vsub.f32 %v4293_v0, %v4321_v14  ;;  %v4337_v63 = vsub.f32 %v4296_v12, %v4321_v14 }
 0x307   : > { %v4338_v37 = vmul.f32 %v4322_v19, %v4322_v19  ;;  %v4339_v46 = vmul.f32 %v4323_v1, %v4323_v1  ;;  %v4340_v33 = vmul.f32 %v4324_v11, %v4324_v11  ;;  %v4341_v40 = vmul.f32 %v4325_v17, %v4325_v17 }
 0x308   : > { %v4342_v18 = vmul.f32 %v4326_v20, %v4326_v20  ;;  %v4343_v42 = vmul.f32 %v4327_v9, %v4327_v9  ;;  %v4344_v52 = vmul.f32 %v4328_v22, %v4328_v22  ;;  %v4345_v21 = vmul.f32 %v4329_v26, %v4329_v26 }
 0x309   : > { %v4354_v23 = vadd.f32 %v4339_v46, %v4338_v37  ;;  %v4346_v44 = vmul.f32 %v4330_v15, %v4330_v15  ;;  %v4347_v34 = vmul.f32 %v4331_v27, %v4331_v27  ;;  %v4348_v47 = vmul.f32 %v4332_v32, %v4332_v32  ;;  %v4942_v37 = vld [vmem:[%s1405_s30] ss:$0 sm:$0xff] }
 0x30a   : > { %v4349_v39 = vmul.f32 %v4333_v35, %v4333_v35  ;;  %v4350_v50 = vmul.f32 %v4334_v28, %v4334_v28  ;;  %v4351_v29 = vmul.f32 %v4335_v25, %v4335_v25  ;;  %v4352_v58 = vmul.f32 %v4336_v13, %v4336_v13 }
 0x30b   : > { %v4355_v24 = vadd.f32 %v4354_v23, %v4340_v33  ;;  %v4353_v53 = vmul.f32 %v4337_v63, %v4337_v63 }
 0x30d   : > { %v4356_v41 = vadd.f32 %v4355_v24, %v4341_v40 }
 0x30f   : > { %v4357_v60 = vadd.f32 %v4356_v41, %v4342_v18 }
 0x311   : > { %v4358_v4 = vadd.f32 %v4357_v60, %v4343_v42  ;;  %v4943_v60 = vld [vmem:[%s1408_s8] ss:$0 sm:$0xff] }
 0x313   : > { %v4359_v3 = vadd.f32 %v4358_v4, %v4344_v52 }
 0x315   : > { %v4360_v6 = vadd.f32 %v4359_v3, %v4345_v21 }
 0x317   : > { %v4361_v43 = vadd.f32 %v4360_v6, %v4346_v44 }
 0x319   : > { %v4362_v30 = vadd.f32 %v4361_v43, %v4347_v34 }
 0x31b   : > { %v4363_v48 = vadd.f32 %v4362_v30, %v4348_v47 }
 0x31d   : > { %v4364_v31 = vadd.f32 %v4363_v48, %v4349_v39 }
 0x31f   : > { %v4365_v54 = vadd.f32 %v4364_v31, %v4350_v50 }
 0x321   : > { %v4366_v36 = vadd.f32 %v4365_v54, %v4351_v29 }
 0x323   : > { %v4367_v38 = vadd.f32 %v4366_v36, %v4352_v58 }
 0x325   : > { %v4368_v45 = vadd.f32 %v4367_v38, %v4353_v53 }
 0x327   : > { %v4369_v59 = vrot.slane %v4368_v45, 4 }
 0x329   : > { %v4370_v62 = vadd.f32 %v4369_v59, %v4368_v45 }
 0x32b   : > { %v4371_v51 = vrot.slane %v4370_v62, 2 }
 0x32d   : > { %v4372_v56 = vadd.f32 %v4371_v51, %v4370_v62 }
 0x32f   : > { %v4373_v2 = vrot.slane %v4372_v56, 1 }
 0x331   : > { %v4374_v0 = vadd.f32 %v4373_v2, %v4372_v56 }
 0x333   : > { %v4375_v49 = vmul.f32 0.0078125, %v4374_v0 }
 0x335   : > { %v4376_v7 = vadd.f32 1e-05, %v4375_v49 }
 0x337   : > { %5926 = vrsqrt.f32 %v4376_v7 }
 0x341   : > { %v5927_v12 = vpop.eup %5926 }
 0x342   : > { %v4378_v55 = vmul.f32 %v5927_v12, %v4322_v19  ;;  %v4379_v8 = vmul.f32 %v5927_v12, %v4323_v1  ;;  %v4380_v10 = vmul.f32 %v5927_v12, %v4324_v11  ;;  %v4381_v57 = vmul.f32 %v5927_v12, %v4325_v17 }
 0x343   : > { %v4382_v16 = vmul.f32 %v5927_v12, %v4326_v20  ;;  %v4383_v61 = vmul.f32 %v5927_v12, %v4327_v9  ;;  %v4384_v5 = vmul.f32 %v5927_v12, %v4328_v22  ;;  %v4385_v14 = vmul.f32 %v5927_v12, %v4329_v26 }
 0x344   : > { %v4386_v46 = vmul.f32 %v5927_v12, %v4330_v15  ;;  %v4387_v33 = vmul.f32 %v5927_v12, %v4331_v27  ;;  %v4388_v23 = vmul.f32 %v5927_v12, %v4332_v32  ;;  %v4389_v40 = vmul.f32 %v5927_v12, %v4333_v35 }
 0x345   : > { %v4390_v24 = vmul.f32 %v5927_v12, %v4334_v28  ;;  %v4391_v18 = vmul.f32 %v5927_v12, %v4335_v25  ;;  %v4392_v41 = vmul.f32 %v5927_v12, %v4336_v13  ;;  %v4393_v19 = vmul.f32 %v5927_v12, %v4337_v63 }
 0x346   : > { %v4401_v1 = vmul.f32 %v4942_v37, %v4378_v55  ;;  %v4402_v11 = vmul.f32 %v4942_v37, %v4379_v8  ;;  %v4403_v17 = vmul.f32 %v4942_v37, %v4380_v10  ;;  %v4404_v20 = vmul.f32 %v4942_v37, %v4381_v57 }
 0x347   : > { %v4405_v9 = vmul.f32 %v4942_v37, %v4382_v16  ;;  %v4406_v22 = vmul.f32 %v4942_v37, %v4383_v61  ;;  %v4407_v26 = vmul.f32 %v4942_v37, %v4384_v5  ;;  %v4408_v42 = vmul.f32 %v4942_v37, %v4385_v14 }
 0x348   : > { %v4409_v52 = vmul.f32 %v4942_v37, %v4386_v46  ;;  %v4410_v4 = vmul.f32 %v4942_v37, %v4387_v33  ;;  %v4411_v15 = vmul.f32 %v4942_v37, %v4388_v23  ;;  %v4412_v27 = vmul.f32 %v4942_v37, %v4389_v40 }
 0x349   : > { %v4413_v32 = vmul.f32 %v4942_v37, %v4390_v24  ;;  %v4414_v35 = vmul.f32 %v4942_v37, %v4391_v18  ;;  %v4415_v28 = vmul.f32 %v4942_v37, %v4392_v41  ;;  %v4416_v25 = vmul.f32 %v4942_v37, %v4393_v19 }
 0x34a   : > { %v4424_v13 = vadd.f32 %v4943_v60, %v4401_v1  ;;  %v4425_v63 = vadd.f32 %v4943_v60, %v4402_v11  ;;  %v4426_v21 = vadd.f32 %v4943_v60, %v4403_v17  ;;  %v4427_v3 = vadd.f32 %v4943_v60, %v4404_v20 }
 0x34b   : > { %v4428_v44 = vadd.f32 %v4943_v60, %v4405_v9  ;;  %v4429_v6 = vadd.f32 %v4943_v60, %v4406_v22  ;;  %v4430_v34 = vadd.f32 %v4943_v60, %v4407_v26  ;;  %v4431_v43 = vadd.f32 %v4943_v60, %v4408_v42 }
 0x34c   : > { %v4432_v47 = vadd.f32 %v4943_v60, %v4409_v52  ;;  %v4433_v30 = vadd.f32 %v4943_v60, %v4410_v4  ;;  %v4434_v39 = vadd.f32 %v4943_v60, %v4411_v15  ;;  %v4435_v48 = vadd.f32 %v4943_v60, %v4412_v27 }
 0x34d   : > { %v4436_v50 = vadd.f32 %v4943_v60, %v4413_v32  ;;  %v4437_v31 = vadd.f32 %v4943_v60, %v4414_v35  ;;  %v4438_v29 = vadd.f32 %v4943_v60, %v4415_v28  ;;  %v4439_v54 = vadd.f32 %v4943_v60, %v4416_v25 }
 0x34e   : > { %v4440_v58 = vmax.f32 %v4424_v13, 0.0  ;;  %v4441_v36 = vmax.f32 %v4425_v63, 0.0  ;;  %v4442_v53 = vmax.f32 %v4426_v21, 0.0  ;;  %v4443_v38 = vmax.f32 %v4427_v3, 0.0 }
 0x34f   : > { %v4444_v45 = vmax.f32 %v4428_v44, 0.0  ;;  %v4445_v59 = vmax.f32 %v4429_v6, 0.0  ;;  %v4446_v62 = vmax.f32 %v4430_v34, 0.0  ;;  %v4447_v51 = vmax.f32 %v4431_v43, 0.0 }
 0x350   : > { %v4448_v56 = vmax.f32 %v4432_v47, 0.0  ;;  %v4449_v2 = vmax.f32 %v4433_v30, 0.0  ;;  %v4450_v0 = vmax.f32 %v4434_v39, 0.0  ;;  %v4451_v49 = vmax.f32 %v4435_v48, 0.0  ;;  %4456 = vst [vmem:[%s7427_s15] sm:$0xff] %v4440_v58  ;;  %4457 = vst [vmem:[%s7427_s15 + $0x8] sm:$0xff] %v4441_v36 }
 0x351   : > { %4458 = vst [vmem:[%s7427_s15 + $0x10] sm:$0xff] %v4442_v53  ;;  %4459 = vst [vmem:[%s7427_s15 + $0x18] sm:$0xff] %v4443_v38  ;;  %v4452_v7 = vmax.f32 %v4436_v50, 0.0  ;;  %v4453_v12 = vmax.f32 %v4437_v31, 0.0  ;;  %v4454_v55 = vmax.f32 %v4438_v29, 0.0  ;;  %v4455_v8 = vmax.f32 %v4439_v54, 0.0 }
 0x352   : > { %4460 = vst [vmem:[%s7427_s15 + $0x20] sm:$0xff] %v4444_v45  ;;  %4461 = vst [vmem:[%s7427_s15 + $0x28] sm:$0xff] %v4445_v59  ;;  %4478 = sbr.rel (!%p6008_p5) target bundleno = 864 (0x360), region = 81 }
 0x353   : > { %4462 = vst [vmem:[%s7427_s15 + $0x30] sm:$0xff] %v4446_v62  ;;  %4463 = vst [vmem:[%s7427_s15 + $0x38] sm:$0xff] %v4447_v51 }
 0x354   : > { %4464 = vst [vmem:[%s7427_s15 + $0x40] sm:$0xff] %v4448_v56  ;;  %4465 = vst [vmem:[%s7427_s15 + $0x48] sm:$0xff] %v4449_v2 }
 0x355   : > { %4466 = vst [vmem:[%s7427_s15 + $0x50] sm:$0xff] %v4450_v0  ;;  %4467 = vst [vmem:[%s7427_s15 + $0x58] sm:$0xff] %v4451_v49 }
 0x356   : > { %4468 = vst [vmem:[%s7427_s15 + $0x60] sm:$0xff] %v4452_v7  ;;  %4469 = vst [vmem:[%s7427_s15 + $0x68] sm:$0xff] %v4453_v12 }
 0x357   : > { %4470 = vst [vmem:[%s7427_s15 + $0x70] sm:$0xff] %v4454_v55  ;;  %4471 = vst [vmem:[%s7427_s15 + $0x78] sm:$0xff] %v4455_v8  ;;  %v4538_v10 = vld [vmem:[%s7427_s15] sm:$0xff] (%p6008_p5)  ;;  %v4540_v57 = vld [vmem:[%s7427_s15 + $0x8] sm:$0xff] (%p6008_p5) }
 0x358   : > { %v4542_v16 = vld [vmem:[%s7427_s15 + $0x10] sm:$0xff] (%p6008_p5)  ;;  %v4544_v61 = vld [vmem:[%s7427_s15 + $0x18] sm:$0xff] (%p6008_p5)  ;;  %4539 = vst [vmem:[%s4480_s13] sm:$0xff] (%p6008_p5), %v4538_v10  ;;  %4541 = vst [vmem:[%s4480_s13 + $0x10] sm:$0xff] (%p6008_p5), %v4540_v57 }
 0x359   : > { %v4546_v5 = vld [vmem:[%s7427_s15 + $0x20] sm:$0xff]  ;;  %v4548_v14 = vld [vmem:[%s7427_s15 + $0x28] sm:$0xff]  ;;  %4543 = vst [vmem:[%s4480_s13 + $0x20] sm:$0xff] %v4542_v16  ;;  %4545 = vst [vmem:[%s4480_s13 + $0x30] sm:$0xff] %v4544_v61 }
 0x35a   : > { %4547 = vst [vmem:[%s4480_s13 + $0x40] sm:$0xff] %v4546_v5  ;;  %4549 = vst [vmem:[%s4480_s13 + $0x50] sm:$0xff] %v4548_v14  ;;  %v4550_v37 = vld [vmem:[%s7427_s15 + $0x30] sm:$0xff]  ;;  %v4552_v46 = vld [vmem:[%s7427_s15 + $0x38] sm:$0xff] }
 0x35b   : > { %v4554_v33 = vld [vmem:[%s7427_s15 + $0x40] sm:$0xff]  ;;  %4551 = vst [vmem:[%s4480_s13 + $0x60] sm:$0xff] %v4550_v37  ;;  %4553 = vst [vmem:[%s4480_s13 + $0x70] sm:$0xff] %v4552_v46  ;;  %v4556_v23 = vld [vmem:[%s7427_s15 + $0x48] sm:$0xff] }
 0x35c   : > { %4555 = vst [vmem:[%s4480_s13 + $0x80] sm:$0xff] %v4554_v33  ;;  %v4558_v40 = vld [vmem:[%s7427_s15 + $0x50] sm:$0xff]  ;;  %v4560_v24 = vld [vmem:[%s7427_s15 + $0x58] sm:$0xff]  ;;  %4557 = vst [vmem:[%s4480_s13 + $0x90] sm:$0xff] %v4556_v23 }
 0x35d   : > { %4559 = vst [vmem:[%s4480_s13 + $0xa0] sm:$0xff] %v4558_v40  ;;  %4561 = vst [vmem:[%s4480_s13 + $0xb0] sm:$0xff] %v4560_v24  ;;  %v4562_v18 = vld [vmem:[%s7427_s15 + $0x60] sm:$0xff]  ;;  %v4564_v41 = vld [vmem:[%s7427_s15 + $0x68] sm:$0xff] }
 0x35e   : > { %v4566_v19 = vld [vmem:[%s7427_s15 + $0x70] sm:$0xff]  ;;  %4563 = vst [vmem:[%s4480_s13 + $0xc0] sm:$0xff] %v4562_v18  ;;  %4565 = vst [vmem:[%s4480_s13 + $0xd0] sm:$0xff] %v4564_v41  ;;  %v4568_v1 = vld [vmem:[%s7427_s15 + $0x78] sm:$0xff] }
 0x35f   : > { %4567 = vst [vmem:[%s4480_s13 + $0xe0] sm:$0xff] %v4566_v19  ;;  %4569 = vst [vmem:[%s4480_s13 + $0xf0] sm:$0xff] %v4568_v1 }
 0x360 PF: > { %p11_p11 = scmp.ge.s32.totalorder %s5996_s19, 4   ;;  %s7483_s15 = smov %s5946_s16 }
 0x361   : > { %s7484_s16 = smov %s6006_s22  ;;  %s7485_s17 = smov %s5996_s19 }
 0x362   :  { %13 = sbr.rel (!%p11_p11) target bundleno = 2 (0x2), region = 156 }

// kernel: decoder_forward.12
= control target key start
LH: loop header
LB: loop body
LE: loop exit
PB: predicated region body
PF: predicated region fallthrough
CT: control target
= control target key end

     0   :  { %vm78_vm0 = vcmask 523264   ;;  %s2262_s0 = inlined_call_operand.vmem [shape: f32[512,64], index: 0, kind: input, shape index: {}]   ;;  %s2263_s1 = inlined_call_operand.vmem [shape: f32[1,64], index: 1, kind: input, shape index: {}]   ;;  %s2264_s2 = inlined_call_operand.vmem [shape: f32[1,64], index: 2, kind: input, shape index: {}]   ;;  %s2265_s3 = inlined_call_operand.vmem [shape: f32[512,64], index: 3, kind: output, shape index: {}]  }
   0x1   :  { %v843_v0 = vld [vmem:[%s2262_s0] sm:$0xff]  ;;  %v848_v1 = vld [vmem:[%s2262_s0 + $0x8] sm:$0xff]  ;;  %v853_v2 = vld [vmem:[%s2262_s0 + $0x10] sm:$0xff] }
   0x2   :  { %v858_v3 = vld [vmem:[%s2262_s0 + $0x18] sm:$0xff]  ;;  %v79_v4 = vsel %vm78_vm0, %v843_v0, 0.0  ;;  %v80_v5 = vsel %vm78_vm0, %v848_v1, 0.0  ;;  %v82_v6 = vsel %vm78_vm0, %v853_v2, 0.0  ;;  %v869_v7 = vld [vmem:[%s2262_s0 + $0x20] sm:$0xff]  ;;  %v876_v10 = vld [vmem:[%s2262_s0 + $0x28] sm:$0xff] }
   0x3   :  { %v81_v8 = vadd.f32 %v80_v5, %v79_v4  ;;  %v84_v9 = vsel %vm78_vm0, %v858_v3, 0.0  ;;  %v86_v12 = vsel %vm78_vm0, %v869_v7, 0.0  ;;  %v883_v13 = vld [vmem:[%s2262_s0 + $0x30] sm:$0xff]  ;;  %v88_v15 = vsel %vm78_vm0, %v876_v10, 0.0  ;;  %v890_v16 = vld [vmem:[%s2262_s0 + $0x38] sm:$0xff]  ;;  %v897_v19 = vld [vmem:[%s2262_s0 + $0x40] sm:$0xff] }
   0x4   :  { %v90_v18 = vsel %vm78_vm0, %v883_v13, 0.0  ;;  %v92_v21 = vsel %vm78_vm0, %v890_v16, 0.0  ;;  %v904_v22 = vld [vmem:[%s2262_s0 + $0x48] sm:$0xff]  ;;  %v94_v24 = vsel %vm78_vm0, %v897_v19, 0.0  ;;  %v911_v25 = vld [vmem:[%s2262_s0 + $0x50] sm:$0xff]  ;;  %v918_v28 = vld [vmem:[%s2262_s0 + $0x58] sm:$0xff] }
   0x5   :  { %v83_v11 = vadd.f32 %v82_v6, %v81_v8  ;;  %v96_v27 = vsel %vm78_vm0, %v904_v22, 0.0  ;;  %v98_v30 = vsel %vm78_vm0, %v911_v25, 0.0  ;;  %v925_v31 = vld [vmem:[%s2262_s0 + $0x60] sm:$0xff]  ;;  %v100_v33 = vsel %vm78_vm0, %v918_v28, 0.0  ;;  %v932_v34 = vld [vmem:[%s2262_s0 + $0x68] sm:$0xff]  ;;  %v939_v37 = vld [vmem:[%s2262_s0 + $0x70] sm:$0xff] }
   0x6   :  { %v102_v36 = vsel %vm78_vm0, %v925_v31, 0.0  ;;  %v104_v39 = vsel %vm78_vm0, %v932_v34, 0.0  ;;  %v946_v40 = vld [vmem:[%s2262_s0 + $0x78] sm:$0xff]  ;;  %v106_v42 = vsel %vm78_vm0, %v939_v37, 0.0  ;;  %v953_v43 = vld [vmem:[%s2262_s0 + $0x80] sm:$0xff]  ;;  %v960_v46 = vld [vmem:[%s2262_s0 + $0x88] sm:$0xff] }
   0x7   :  { %v85_v14 = vadd.f32 %v84_v9, %v83_v11  ;;  %v108_v45 = vsel %vm78_vm0, %v946_v40, 0.0  ;;  %v110_v48 = vsel %vm78_vm0, %v953_v43, 0.0  ;;  %v967_v49 = vld [vmem:[%s2262_s0 + $0x90] sm:$0xff]  ;;  %v112_v51 = vsel %vm78_vm0, %v960_v46, 0.0  ;;  %v974_v52 = vld [vmem:[%s2262_s0 + $0x98] sm:$0xff]  ;;  %v981_v55 = vld [vmem:[%s2262_s0 + $0xa0] sm:$0xff] }
   0x8   :  { %v114_v54 = vsel %vm78_vm0, %v967_v49, 0.0  ;;  %v116_v57 = vsel %vm78_vm0, %v974_v52, 0.0  ;;  %v988_v58 = vld [vmem:[%s2262_s0 + $0xa8] sm:$0xff]  ;;  %v118_v60 = vsel %vm78_vm0, %v981_v55, 0.0  ;;  %v995_v61 = vld [vmem:[%s2262_s0 + $0xb0] sm:$0xff]  ;;  %v1002_v4 = vld [vmem:[%s2262_s0 + $0xb8] sm:$0xff] }
   0x9   :  { %v87_v17 = vadd.f32 %v86_v12, %v85_v14  ;;  %v120_v63 = vsel %vm78_vm0, %v988_v58, 0.0  ;;  %v122_v6 = vsel %vm78_vm0, %v995_v61, 0.0  ;;  %v1009_v8 = vld [vmem:[%s2262_s0 + $0xc0] sm:$0xff]  ;;  %v124_v11 = vsel %vm78_vm0, %v1002_v4, 0.0  ;;  %v1016_v12 = vld [vmem:[%s2262_s0 + $0xc8] sm:$0xff] }
   0xb   :  { %v89_v20 = vadd.f32 %v88_v15, %v87_v17  ;;  %v126_v15 = vsel %vm78_vm0, %v1009_v8, 0.0  ;;  %v1023_v17 = vld [vmem:[%s2262_s0 + $0xd0] sm:$0xff] }
   0xd   :  { %v91_v23 = vadd.f32 %v90_v18, %v89_v20  ;;  %v128_v20 = vsel %vm78_vm0, %v1016_v12, 0.0 }
   0xf   :  { %v93_v26 = vadd.f32 %v92_v21, %v91_v23  ;;  %v1030_v21 = vld [vmem:[%s2262_s0 + $0xd8] sm:$0xff] }
  0x11   :  { %v95_v29 = vadd.f32 %v94_v24, %v93_v26  ;;  %v130_v24 = vsel %vm78_vm0, %v1023_v17, 0.0  ;;  %v1037_v26 = vld [vmem:[%s2262_s0 + $0xe0] sm:$0xff] }
  0x13   :  { %v97_v32 = vadd.f32 %v96_v27, %v95_v29  ;;  %v132_v29 = vsel %vm78_vm0, %v1030_v21, 0.0 }
  0x15   :  { %v99_v35 = vadd.f32 %v98_v30, %v97_v32  ;;  %v1044_v30 = vld [vmem:[%s2262_s0 + $0xe8] sm:$0xff] }
  0x17   :  { %v101_v38 = vadd.f32 %v100_v33, %v99_v35  ;;  %v134_v33 = vsel %vm78_vm0, %v1037_v26, 0.0  ;;  %v1051_v35 = vld [vmem:[%s2262_s0 + $0xf0] sm:$0xff] }
  0x19   :  { %v103_v41 = vadd.f32 %v102_v36, %v101_v38  ;;  %v136_v38 = vsel %vm78_vm0, %v1044_v30, 0.0 }
  0x1b   :  { %v105_v44 = vadd.f32 %v104_v39, %v103_v41  ;;  %v1058_v39 = vld [vmem:[%s2262_s0 + $0xf8] sm:$0xff] }
  0x1d   :  { %v107_v47 = vadd.f32 %v106_v42, %v105_v44  ;;  %v138_v42 = vsel %vm78_vm0, %v1051_v35, 0.0  ;;  %v1065_v44 = vld [vmem:[%s2262_s0 + $0x100] sm:$0xff] }
  0x1f   :  { %v109_v50 = vadd.f32 %v108_v45, %v107_v47  ;;  %v140_v47 = vsel %vm78_vm0, %v1058_v39, 0.0 }
  0x21   :  { %v111_v53 = vadd.f32 %v110_v48, %v109_v50  ;;  %v1072_v48 = vld [vmem:[%s2262_s0 + $0x108] sm:$0xff] }
  0x23   :  { %v113_v56 = vadd.f32 %v112_v51, %v111_v53  ;;  %v142_v51 = vsel %vm78_vm0, %v1065_v44, 0.0  ;;  %v1079_v53 = vld [vmem:[%s2262_s0 + $0x110] sm:$0xff] }
  0x25   :  { %v115_v59 = vadd.f32 %v114_v54, %v113_v56  ;;  %v144_v56 = vsel %vm78_vm0, %v1072_v48, 0.0 }
  0x27   :  { %v117_v62 = vadd.f32 %v116_v57, %v115_v59  ;;  %v1086_v57 = vld [vmem:[%s2262_s0 + $0x118] sm:$0xff] }
  0x29   :  { %v119_v5 = vadd.f32 %v118_v60, %v117_v62  ;;  %v146_v60 = vsel %vm78_vm0, %v1079_v53, 0.0  ;;  %v1093_v62 = vld [vmem:[%s2262_s0 + $0x120] sm:$0xff] }
  0x2b   :  { %v121_v9 = vadd.f32 %v120_v63, %v119_v5  ;;  %v148_v5 = vsel %vm78_vm0, %v1086_v57, 0.0 }
  0x2d   :  { %v123_v14 = vadd.f32 %v122_v6, %v121_v9  ;;  %v1100_v6 = vld [vmem:[%s2262_s0 + $0x128] sm:$0xff] }
  0x2f   :  { %v125_v18 = vadd.f32 %v124_v11, %v123_v14  ;;  %v150_v11 = vsel %vm78_vm0, %v1093_v62, 0.0  ;;  %v1107_v14 = vld [vmem:[%s2262_s0 + $0x130] sm:$0xff] }
  0x31   :  { %v127_v23 = vadd.f32 %v126_v15, %v125_v18  ;;  %v152_v18 = vsel %vm78_vm0, %v1100_v6, 0.0 }
  0x33   :  { %v129_v27 = vadd.f32 %v128_v20, %v127_v23  ;;  %v1114_v20 = vld [vmem:[%s2262_s0 + $0x138] sm:$0xff] }
  0x35   :  { %v131_v32 = vadd.f32 %v130_v24, %v129_v27  ;;  %v154_v24 = vsel %vm78_vm0, %v1107_v14, 0.0  ;;  %v1121_v27 = vld [vmem:[%s2262_s0 + $0x140] sm:$0xff] }
  0x37   :  { %v133_v36 = vadd.f32 %v132_v29, %v131_v32  ;;  %v156_v32 = vsel %vm78_vm0, %v1114_v20, 0.0 }
  0x39   :  { %v135_v41 = vadd.f32 %v134_v33, %v133_v36  ;;  %v1128_v33 = vld [vmem:[%s2262_s0 + $0x148] sm:$0xff] }
  0x3b   :  { %v137_v45 = vadd.f32 %v136_v38, %v135_v41  ;;  %v158_v38 = vsel %vm78_vm0, %v1121_v27, 0.0  ;;  %v1135_v41 = vld [vmem:[%s2262_s0 + $0x150] sm:$0xff] }
  0x3d   :  { %v139_v50 = vadd.f32 %v138_v42, %v137_v45  ;;  %v160_v45 = vsel %vm78_vm0, %v1128_v33, 0.0 }
  0x3f   :  { %v141_v54 = vadd.f32 %v140_v47, %v139_v50  ;;  %v1142_v47 = vld [vmem:[%s2262_s0 + $0x158] sm:$0xff] }
  0x41   :  { %v143_v59 = vadd.f32 %v142_v51, %v141_v54  ;;  %v162_v51 = vsel %vm78_vm0, %v1135_v41, 0.0  ;;  %v1149_v54 = vld [vmem:[%s2262_s0 + $0x160] sm:$0xff] }
  0x43   :  { %v145_v63 = vadd.f32 %v144_v56, %v143_v59  ;;  %v164_v59 = vsel %vm78_vm0, %v1142_v47, 0.0 }
  0x45   :  { %v147_v9 = vadd.f32 %v146_v60, %v145_v63  ;;  %v1156_v60 = vld [vmem:[%s2262_s0 + $0x168] sm:$0xff] }
  0x47   :  { %v149_v15 = vadd.f32 %v148_v5, %v147_v9  ;;  %v166_v5 = vsel %vm78_vm0, %v1149_v54, 0.0  ;;  %v1163_v9 = vld [vmem:[%s2262_s0 + $0x170] sm:$0xff] }
  0x49   :  { %v151_v23 = vadd.f32 %v150_v11, %v149_v15  ;;  %v168_v15 = vsel %vm78_vm0, %v1156_v60, 0.0 }
  0x4b   :  { %v153_v29 = vadd.f32 %v152_v18, %v151_v23  ;;  %v1170_v18 = vld [vmem:[%s2262_s0 + $0x178] sm:$0xff] }
  0x4d   :  { %v155_v36 = vadd.f32 %v154_v24, %v153_v29  ;;  %v170_v24 = vsel %vm78_vm0, %v1163_v9, 0.0  ;;  %v1177_v29 = vld [vmem:[%s2262_s0 + $0x180] sm:$0xff] }
  0x4f   :  { %v157_v42 = vadd.f32 %v156_v32, %v155_v36  ;;  %v172_v36 = vsel %vm78_vm0, %v1170_v18, 0.0 }
  0x51   :  { %v159_v50 = vadd.f32 %v158_v38, %v157_v42  ;;  %v1184_v38 = vld [vmem:[%s2262_s0 + $0x188] sm:$0xff] }
  0x52   :  { %2301 = vst [vmem:[#allocation2_spill] sm:$0xff] %v1184_v38 }
  0x53   :  { %v161_v56 = vadd.f32 %v160_v45, %v159_v50  ;;  %v174_v45 = vsel %vm78_vm0, %v1177_v29, 0.0  ;;  %v1191_v50 = vld [vmem:[%s2262_s0 + $0x190] sm:$0xff] }
  0x54   :  { %2302 = vst [vmem:[#allocation3_spill] sm:$0xff] %v1191_v50 }
  0x55   :  { %v163_v63 = vadd.f32 %v162_v51, %v161_v56  ;;  %v176_v56 = vsel %vm78_vm0, %v1184_v38, 0.0 }
  0x57   :  { %v165_v11 = vadd.f32 %v164_v59, %v163_v63  ;;  %v1198_v59 = vld [vmem:[%s2262_s0 + $0x198] sm:$0xff] }
  0x58   :  { %2303 = vst [vmem:[#allocation4_spill] sm:$0xff] %v1198_v59 }
  0x59   :  { %v167_v23 = vadd.f32 %v166_v5, %v165_v11  ;;  %v178_v5 = vsel %vm78_vm0, %v1191_v50, 0.0  ;;  %v1205_v11 = vld [vmem:[%s2262_s0 + $0x1a0] sm:$0xff] }
  0x5a   :  { %2304 = vst [vmem:[#allocation5_spill] sm:$0xff] %v1205_v11 }
  0x5b   :  { %v169_v32 = vadd.f32 %v168_v15, %v167_v23  ;;  %v180_v23 = vsel %vm78_vm0, %v1198_v59, 0.0 }
  0x5d   :  { %v171_v42 = vadd.f32 %v170_v24, %v169_v32  ;;  %v1212_v24 = vld [vmem:[%s2262_s0 + $0x1a8] sm:$0xff] }
  0x5e   :  { %2305 = vst [vmem:[#allocation6_spill] sm:$0xff] %v1212_v24 }
  0x5f   :  { %v173_v51 = vadd.f32 %v172_v36, %v171_v42  ;;  %v182_v36 = vsel %vm78_vm0, %v1205_v11, 0.0  ;;  %v1219_v42 = vld [vmem:[%s2262_s0 + $0x1b0] sm:$0xff] }
  0x60   :  { %2306 = vst [vmem:[#allocation7_spill] sm:$0xff] %v1219_v42 }
  0x61   :  { %v175_v63 = vadd.f32 %v174_v45, %v173_v51  ;;  %v184_v51 = vsel %vm78_vm0, %v1212_v24, 0.0 }
  0x63   :  { %v177_v15 = vadd.f32 %v176_v56, %v175_v63  ;;  %v1226_v56 = vld [vmem:[%s2262_s0 + $0x1b8] sm:$0xff] }
  0x64   :  { %2307 = vst [vmem:[#allocation8_spill] sm:$0xff] %v1226_v56 }
  0x65   :  { %v179_v32 = vadd.f32 %v178_v5, %v177_v15  ;;  %v186_v5 = vsel %vm78_vm0, %v1219_v42, 0.0  ;;  %v1233_v15 = vld [vmem:[%s2262_s0 + $0x1c0] sm:$0xff] }
  0x66   :  { %2308 = vst [vmem:[#allocation9_spill] sm:$0xff] %v1233_v15 }
  0x67   :  { %v181_v45 = vadd.f32 %v180_v23, %v179_v32  ;;  %v188_v23 = vsel %vm78_vm0, %v1226_v56, 0.0  ;;  %v1240_v32 = vld [vmem:[%s2262_s0 + $0x1c8] sm:$0xff] }
  0x68   :  { %2309 = vst [vmem:[#allocation10_spill] sm:$0xff] %v1240_v32 }
  0x69   :  { %v183_v63 = vadd.f32 %v182_v36, %v181_v45  ;;  %v190_v36 = vsel %vm78_vm0, %v1233_v15, 0.0  ;;  %v1247_v45 = vld [vmem:[%s2262_s0 + $0x1d0] sm:$0xff] }
  0x6a   :  { %2310 = vst [vmem:[#allocation11_spill] sm:$0xff] %v1247_v45 }
  0x6b   :  { %v185_v11 = vadd.f32 %v184_v51, %v183_v63  ;;  %v192_v51 = vsel %vm78_vm0, %v1240_v32, 0.0  ;;  %v1254_v63 = vld [vmem:[%s2262_s0 + $0x1d8] sm:$0xff] }
  0x6c   :  { %2311 = vst [vmem:[#allocation12_spill] sm:$0xff] %v1254_v63  ;;  %v196_v15 = vsel %vm78_vm0, %v1254_v63, 0.0 }
  0x6d   :  { %v187_v24 = vadd.f32 %v186_v5, %v185_v11  ;;  %v194_v11 = vsel %vm78_vm0, %v1247_v45, 0.0 }
  0x6f   :  { %v189_v42 = vadd.f32 %v188_v23, %v187_v24  ;;  %v1263_v24 = vld [vmem:[%s2262_s0 + $0x1e0] sm:$0xff] }
  0x70   :  { %2312 = vst [vmem:[#allocation13_spill] sm:$0xff] %v1263_v24  ;;  %v198_v59 = vsel %vm78_vm0, %v1263_v24, 0.0 }
  0x71   :  { %v191_v56 = vadd.f32 %v190_v36, %v189_v42  ;;  %v1270_v42 = vld [vmem:[%s2262_s0 + $0x1e8] sm:$0xff] }
  0x72   :  { %2313 = vst [vmem:[#allocation14_spill] sm:$0xff] %v1270_v42 }
  0x73   :  { %v193_v5 = vadd.f32 %v192_v51, %v191_v56  ;;  %v200_v56 = vsel %vm78_vm0, %v1270_v42, 0.0  ;;  %v1277_v51 = vld [vmem:[%s2262_s0 + $0x1f0] sm:$0xff] }
  0x74   :  { %2314 = vst [vmem:[#allocation15_spill] sm:$0xff] %v1277_v51 }
  0x75   :  { %v195_v23 = vadd.f32 %v194_v11, %v193_v5  ;;  %v1284_v11 = vld [vmem:[%s2262_s0 + $0x1f8] sm:$0xff] }
  0x77   :  { %v197_v32 = vadd.f32 %v196_v15, %v195_v23  ;;  %v202_v15 = vsel %vm78_vm0, %v1277_v51, 0.0 }
  0x79   :  { %v199_v36 = vadd.f32 %v198_v59, %v197_v32  ;;  %v204_v59 = vsel %vm78_vm0, %v1284_v11, 0.0 }
  0x7b   :  { %v201_v63 = vadd.f32 %v200_v56, %v199_v36 }
  0x7d   :  { %v203_v5 = vadd.f32 %v202_v15, %v201_v63 }
  0x7f   :  { %v205_v32 = vadd.f32 %v204_v59, %v203_v5 }
  0x81   :  { %v206_v23 = vrot.slane %v205_v32, 4 }
  0x83   :  { %v207_v42 = vadd.f32 %v206_v23, %v205_v32 }
  0x85   :  { %v208_v24 = vrot.slane %v207_v42, 2 }
  0x87   :  { %v209_v45 = vadd.f32 %v208_v24, %v207_v42 }
  0x89   :  { %v210_v50 = vrot.slane %v209_v45, 1 }
  0x8b   :  { %v211_v38 = vadd.f32 %v210_v50, %v209_v45 }
  0x8d   :  { %v1288_v36 = vmul.f32 0.001953125, %v211_v38 }
  0x8f   :  { %v1292_v56 = vsub.f32 %v843_v0, %v1288_v36  ;;  %v1296_v51 = vsub.f32 %v848_v1, %v1288_v36  ;;  %v1300_v63 = vsub.f32 %v853_v2, %v1288_v36  ;;  %v1304_v15 = vsub.f32 %v858_v3, %v1288_v36 }
  0x90   :  { %v1308_v38 = vsub.f32 %v869_v7, %v1288_v36  ;;  %v1318_v2 = vsub.f32 %v876_v10, %v1288_v36  ;;  %v1324_v7 = vsub.f32 %v883_v13, %v1288_v36  ;;  %v1333_v10 = vsub.f32 %v890_v16, %v1288_v36 }
  0x91   :  { %v278_v0 = vmul.f32 %v1292_v56, %v1292_v56  ;;  %v279_v50 = vmul.f32 %v1296_v51, %v1296_v51  ;;  %v280_v1 = vmul.f32 %v1300_v63, %v1300_v63  ;;  %v281_v3 = vmul.f32 %v1304_v15, %v1304_v15 }
  0x92   :  { %2315 = vst [vmem:[#allocation16_spill] sm:$0xff] %v1308_v38  ;;  %v282_v45 = vmul.f32 %v1308_v38, %v1308_v38  ;;  %v283_v32 = vmul.f32 %v1318_v2, %v1318_v2  ;;  %v1340_v38 = vsub.f32 %v897_v19, %v1288_v36  ;;  %v1347_v16 = vsub.f32 %v904_v22, %v1288_v36 }
  0x93   :  { %v342_v24 = vsel %vm78_vm0, %v278_v0, 0.0  ;;  %v343_v42 = vsel %vm78_vm0, %v279_v50, 0.0  ;;  %v345_v5 = vsel %vm78_vm0, %v280_v1, 0.0  ;;  %v347_v13 = vsel %vm78_vm0, %v281_v3, 0.0 }
  0x94   :  { %v344_v59 = vadd.f32 %v343_v42, %v342_v24  ;;  %v284_v0 = vmul.f32 %v1324_v7, %v1324_v7  ;;  %v349_v50 = vsel %vm78_vm0, %v282_v45, 0.0  ;;  %v285_v24 = vmul.f32 %v1333_v10, %v1333_v10 }
  0x95   :  { %v351_v3 = vsel %vm78_vm0, %v283_v32, 0.0  ;;  %v1354_v19 = vsub.f32 %v911_v25, %v1288_v36  ;;  %v1361_v22 = vsub.f32 %v918_v28, %v1288_v36  ;;  %v1368_v25 = vsub.f32 %v925_v31, %v1288_v36 }
  0x96   :  { %v346_v23 = vadd.f32 %v345_v5, %v344_v59  ;;  %v286_v5 = vmul.f32 %v1340_v38, %v1340_v38  ;;  %v353_v45 = vsel %vm78_vm0, %v284_v0, 0.0  ;;  %v355_v32 = vsel %vm78_vm0, %v285_v24, 0.0 }
  0x97   :  { %v1375_v28 = vsub.f32 %v932_v34, %v1288_v36  ;;  %v1382_v31 = vsub.f32 %v939_v37, %v1288_v36  ;;  %v1389_v34 = vsub.f32 %v946_v40, %v1288_v36  ;;  %v1396_v37 = vsub.f32 %v953_v43, %v1288_v36 }
  0x98   :  { %v348_v1 = vadd.f32 %v347_v13, %v346_v23  ;;  %v287_v13 = vmul.f32 %v1347_v16, %v1347_v16  ;;  %v357_v0 = vsel %vm78_vm0, %v286_v5, 0.0  ;;  %v1403_v40 = vsub.f32 %v960_v46, %v1288_v36 }
  0x99   :  { %v1410_v43 = vsub.f32 %v967_v49, %v1288_v36  ;;  %v1417_v46 = vsub.f32 %v974_v52, %v1288_v36  ;;  %v1424_v49 = vsub.f32 %v981_v55, %v1288_v36  ;;  %v1431_v52 = vsub.f32 %v988_v58, %v1288_v36 }
  0x9a   :  { %v350_v42 = vadd.f32 %v349_v50, %v348_v1  ;;  %v288_v50 = vmul.f32 %v1354_v19, %v1354_v19  ;;  %v359_v24 = vsel %vm78_vm0, %v287_v13, 0.0  ;;  %v1438_v55 = vsub.f32 %v995_v61, %v1288_v36 }
  0x9b   :  { %v1445_v58 = vsub.f32 %v1002_v4, %v1288_v36  ;;  %v1452_v61 = vsub.f32 %v1009_v8, %v1288_v36  ;;  %v1459_v4 = vsub.f32 %v1016_v12, %v1288_v36  ;;  %v1466_v8 = vsub.f32 %v1023_v17, %v1288_v36 }
  0x9c   :  { %v352_v59 = vadd.f32 %v351_v3, %v350_v42  ;;  %v289_v3 = vmul.f32 %v1361_v22, %v1361_v22  ;;  %v361_v5 = vsel %vm78_vm0, %v288_v50, 0.0  ;;  %v1473_v12 = vsub.f32 %v1030_v21, %v1288_v36 }
  0x9d   :  { %v1480_v17 = vsub.f32 %v1037_v26, %v1288_v36  ;;  %v1487_v21 = vsub.f32 %v1044_v30, %v1288_v36  ;;  %v1494_v26 = vsub.f32 %v1051_v35, %v1288_v36  ;;  %v1501_v30 = vsub.f32 %v1058_v39, %v1288_v36 }
  0x9e   :  { %v354_v23 = vadd.f32 %v353_v45, %v352_v59  ;;  %v290_v45 = vmul.f32 %v1368_v25, %v1368_v25  ;;  %v363_v13 = vsel %vm78_vm0, %v289_v3, 0.0  ;;  %v1508_v35 = vsub.f32 %v1065_v44, %v1288_v36 }
  0x9f   :  { %v1515_v39 = vsub.f32 %v1072_v48, %v1288_v36  ;;  %v1522_v44 = vsub.f32 %v1079_v53, %v1288_v36  ;;  %v1529_v48 = vsub.f32 %v1086_v57, %v1288_v36  ;;  %v1536_v53 = vsub.f32 %v1093_v62, %v1288_v36 }
  0xa0   :  { %v356_v1 = vadd.f32 %v355_v32, %v354_v23  ;;  %v291_v32 = vmul.f32 %v1375_v28, %v1375_v28  ;;  %v365_v50 = vsel %vm78_vm0, %v290_v45, 0.0  ;;  %v1543_v57 = vsub.f32 %v1100_v6, %v1288_v36 }
  0xa1   :  { %v1550_v62 = vsub.f32 %v1107_v14, %v1288_v36  ;;  %v1557_v6 = vsub.f32 %v1114_v20, %v1288_v36  ;;  %v1564_v14 = vsub.f32 %v1121_v27, %v1288_v36  ;;  %v1571_v20 = vsub.f32 %v1128_v33, %v1288_v36 }
  0xa2   :  { %v358_v42 = vadd.f32 %v357_v0, %v356_v1  ;;  %v292_v0 = vmul.f32 %v1382_v31, %v1382_v31  ;;  %v367_v3 = vsel %vm78_vm0, %v291_v32, 0.0  ;;  %v1578_v27 = vsub.f32 %v1135_v41, %v1288_v36 }
  0xa3   :  { %v1585_v33 = vsub.f32 %v1142_v47, %v1288_v36  ;;  %v1592_v41 = vsub.f32 %v1149_v54, %v1288_v36  ;;  %v1599_v47 = vsub.f32 %v1156_v60, %v1288_v36  ;;  %v1606_v54 = vsub.f32 %v1163_v9, %v1288_v36 }
  0xa4   :  { %v360_v59 = vadd.f32 %v359_v24, %v358_v42  ;;  %v293_v24 = vmul.f32 %v1389_v34, %v1389_v34  ;;  %v369_v45 = vsel %vm78_vm0, %v292_v0, 0.0  ;;  %v1613_v60 = vsub.f32 %v1170_v18, %v1288_v36 }
  0xa5   :  { %2316 = vst [vmem:[#allocation17_spill] sm:$0xff] %v1592_v41  ;;  %2317 = vst [vmem:[#allocation18_spill] sm:$0xff] %v1599_v47  ;;  %v1620_v9 = vsub.f32 %v1177_v29, %v1288_v36 }
  0xa6   :  { %v362_v23 = vadd.f32 %v361_v5, %v360_v59  ;;  %v294_v5 = vmul.f32 %v1396_v37, %v1396_v37  ;;  %v371_v32 = vsel %vm78_vm0, %v293_v24, 0.0  ;;  %2318 = vst [vmem:[#allocation19_spill] sm:$0xff] %v1606_v54  ;;  %2319 = vst [vmem:[#allocation20_spill] sm:$0xff] %v1613_v60 }
  0xa7   :  { %2320 = vst [vmem:[#allocation21_spill] sm:$0xff] %v1620_v9 }
  0xa8   :  { %v364_v1 = vadd.f32 %v363_v13, %v362_v23  ;;  %v295_v13 = vmul.f32 %v1403_v40, %v1403_v40  ;;  %v373_v0 = vsel %vm78_vm0, %v294_v5, 0.0 }
  0xaa   :  { %v366_v42 = vadd.f32 %v365_v50, %v364_v1  ;;  %v296_v50 = vmul.f32 %v1410_v43, %v1410_v43  ;;  %v375_v24 = vsel %vm78_vm0, %v295_v13, 0.0 }
  0xac   :  { %v368_v59 = vadd.f32 %v367_v3, %v366_v42  ;;  %v297_v3 = vmul.f32 %v1417_v46, %v1417_v46  ;;  %v377_v5 = vsel %vm78_vm0, %v296_v50, 0.0 }
  0xae   :  { %v370_v23 = vadd.f32 %v369_v45, %v368_v59  ;;  %v298_v45 = vmul.f32 %v1424_v49, %v1424_v49  ;;  %v379_v13 = vsel %vm78_vm0, %v297_v3, 0.0 }
  0xb0   :  { %v372_v1 = vadd.f32 %v371_v32, %v370_v23  ;;  %v299_v32 = vmul.f32 %v1431_v52, %v1431_v52  ;;  %v381_v50 = vsel %vm78_vm0, %v298_v45, 0.0 }
  0xb2   :  { %v374_v42 = vadd.f32 %v373_v0, %v372_v1  ;;  %v300_v0 = vmul.f32 %v1438_v55, %v1438_v55  ;;  %v383_v3 = vsel %vm78_vm0, %v299_v32, 0.0 }
  0xb4   :  { %v376_v59 = vadd.f32 %v375_v24, %v374_v42  ;;  %v301_v24 = vmul.f32 %v1445_v58, %v1445_v58  ;;  %v385_v45 = vsel %vm78_vm0, %v300_v0, 0.0 }
  0xb6   :  { %v378_v23 = vadd.f32 %v377_v5, %v376_v59  ;;  %v302_v5 = vmul.f32 %v1452_v61, %v1452_v61  ;;  %v387_v32 = vsel %vm78_vm0, %v301_v24, 0.0 }
  0xb8   :  { %v380_v1 = vadd.f32 %v379_v13, %v378_v23  ;;  %v303_v13 = vmul.f32 %v1459_v4, %v1459_v4  ;;  %v389_v0 = vsel %vm78_vm0, %v302_v5, 0.0 }
  0xba   :  { %v382_v42 = vadd.f32 %v381_v50, %v380_v1  ;;  %v304_v50 = vmul.f32 %v1466_v8, %v1466_v8  ;;  %v391_v24 = vsel %vm78_vm0, %v303_v13, 0.0 }
  0xbc   :  { %v384_v59 = vadd.f32 %v383_v3, %v382_v42  ;;  %v305_v3 = vmul.f32 %v1473_v12, %v1473_v12  ;;  %v393_v5 = vsel %vm78_vm0, %v304_v50, 0.0 }
  0xbe   :  { %v386_v23 = vadd.f32 %v385_v45, %v384_v59  ;;  %v306_v45 = vmul.f32 %v1480_v17, %v1480_v17  ;;  %v395_v13 = vsel %vm78_vm0, %v305_v3, 0.0 }
  0xc0   :  { %v388_v1 = vadd.f32 %v387_v32, %v386_v23  ;;  %v307_v32 = vmul.f32 %v1487_v21, %v1487_v21  ;;  %v397_v50 = vsel %vm78_vm0, %v306_v45, 0.0 }
  0xc2   :  { %v390_v42 = vadd.f32 %v389_v0, %v388_v1  ;;  %v308_v0 = vmul.f32 %v1494_v26, %v1494_v26  ;;  %v399_v3 = vsel %vm78_vm0, %v307_v32, 0.0 }
  0xc4   :  { %v392_v59 = vadd.f32 %v391_v24, %v390_v42  ;;  %v309_v24 = vmul.f32 %v1501_v30, %v1501_v30  ;;  %v401_v45 = vsel %vm78_vm0, %v308_v0, 0.0 }
  0xc6   :  { %v394_v23 = vadd.f32 %v393_v5, %v392_v59  ;;  %v310_v5 = vmul.f32 %v1508_v35, %v1508_v35  ;;  %v403_v32 = vsel %vm78_vm0, %v309_v24, 0.0 }
  0xc8   :  { %v396_v1 = vadd.f32 %v395_v13, %v394_v23  ;;  %v311_v13 = vmul.f32 %v1515_v39, %v1515_v39  ;;  %v405_v0 = vsel %vm78_vm0, %v310_v5, 0.0 }
  0xca   :  { %v398_v42 = vadd.f32 %v397_v50, %v396_v1  ;;  %v312_v50 = vmul.f32 %v1522_v44, %v1522_v44  ;;  %v407_v24 = vsel %vm78_vm0, %v311_v13, 0.0 }
  0xcc   :  { %v400_v59 = vadd.f32 %v399_v3, %v398_v42  ;;  %v313_v3 = vmul.f32 %v1529_v48, %v1529_v48  ;;  %v409_v5 = vsel %vm78_vm0, %v312_v50, 0.0 }
  0xce   :  { %v402_v23 = vadd.f32 %v401_v45, %v400_v59  ;;  %v314_v45 = vmul.f32 %v1536_v53, %v1536_v53  ;;  %v411_v13 = vsel %vm78_vm0, %v313_v3, 0.0 }
  0xd0   :  { %v404_v1 = vadd.f32 %v403_v32, %v402_v23  ;;  %v315_v32 = vmul.f32 %v1543_v57, %v1543_v57  ;;  %v413_v50 = vsel %vm78_vm0, %v314_v45, 0.0 }
  0xd2   :  { %v406_v42 = vadd.f32 %v405_v0, %v404_v1  ;;  %v316_v0 = vmul.f32 %v1550_v62, %v1550_v62  ;;  %v415_v3 = vsel %vm78_vm0, %v315_v32, 0.0 }
  0xd4   :  { %v408_v59 = vadd.f32 %v407_v24, %v406_v42  ;;  %v317_v24 = vmul.f32 %v1557_v6, %v1557_v6  ;;  %v417_v45 = vsel %vm78_vm0, %v316_v0, 0.0 }
  0xd6   :  { %v410_v23 = vadd.f32 %v409_v5, %v408_v59  ;;  %v318_v5 = vmul.f32 %v1564_v14, %v1564_v14  ;;  %v419_v32 = vsel %vm78_vm0, %v317_v24, 0.0 }
  0xd8   :  { %v412_v1 = vadd.f32 %v411_v13, %v410_v23  ;;  %v319_v13 = vmul.f32 %v1571_v20, %v1571_v20  ;;  %v421_v0 = vsel %vm78_vm0, %v318_v5, 0.0 }
  0xda   :  { %v414_v42 = vadd.f32 %v413_v50, %v412_v1  ;;  %v320_v50 = vmul.f32 %v1578_v27, %v1578_v27  ;;  %v423_v24 = vsel %vm78_vm0, %v319_v13, 0.0 }
  0xdc   :  { %v416_v59 = vadd.f32 %v415_v3, %v414_v42  ;;  %v321_v3 = vmul.f32 %v1585_v33, %v1585_v33  ;;  %v425_v5 = vsel %vm78_vm0, %v320_v50, 0.0 }
  0xde   :  { %v418_v23 = vadd.f32 %v417_v45, %v416_v59  ;;  %v322_v45 = vmul.f32 %v1592_v41, %v1592_v41  ;;  %v427_v13 = vsel %vm78_vm0, %v321_v3, 0.0 }
  0xe0   :  { %v420_v1 = vadd.f32 %v419_v32, %v418_v23  ;;  %v323_v32 = vmul.f32 %v1599_v47, %v1599_v47  ;;  %v429_v50 = vsel %vm78_vm0, %v322_v45, 0.0 }
  0xe2   :  { %v422_v42 = vadd.f32 %v421_v0, %v420_v1  ;;  %v324_v0 = vmul.f32 %v1606_v54, %v1606_v54  ;;  %v431_v3 = vsel %vm78_vm0, %v323_v32, 0.0  ;;  %v326_v54 = vmul.f32 %v1620_v9, %v1620_v9 }
  0xe4   :  { %v424_v59 = vadd.f32 %v423_v24, %v422_v42  ;;  %v2321_v24 = vld [vmem:[#allocation2_spill] sm:$0xff]  ;;  %v325_v42 = vmul.f32 %v1613_v60, %v1613_v60  ;;  %v433_v45 = vsel %vm78_vm0, %v324_v0, 0.0  ;;  %v437_v0 = vsel %vm78_vm0, %v326_v54, 0.0 }
  0xe5   :  { %v1627_v18 = vsub.f32 %v2321_v24, %v1288_v36 }
  0xe6   :  { %v426_v23 = vadd.f32 %v425_v5, %v424_v59  ;;  %v2323_v59 = vld [vmem:[#allocation3_spill] sm:$0xff]  ;;  %v435_v32 = vsel %vm78_vm0, %v325_v42, 0.0 }
  0xe7   :  { %2322 = vst [vmem:[#allocation2_spill] sm:$0xff] %v1627_v18  ;;  %v1634_v29 = vsub.f32 %v2323_v59, %v1288_v36  ;;  %v327_v60 = vmul.f32 %v1627_v18, %v1627_v18 }
  0xe8   :  { %v428_v1 = vadd.f32 %v427_v13, %v426_v23  ;;  %v2325_v23 = vld [vmem:[#allocation4_spill] sm:$0xff] }
  0xe9   :  { %2324 = vst [vmem:[#allocation3_spill] sm:$0xff] %v1634_v29  ;;  %v1641_v24 = vsub.f32 %v2325_v23, %v1288_v36  ;;  %v328_v9 = vmul.f32 %v1634_v29, %v1634_v29  ;;  %v439_v42 = vsel %vm78_vm0, %v327_v60, 0.0 }
  0xea   :  { %v430_v5 = vadd.f32 %v429_v50, %v428_v1  ;;  %v2327_v1 = vld [vmem:[#allocation5_spill] sm:$0xff] }
  0xeb   :  { %2326 = vst [vmem:[#allocation4_spill] sm:$0xff] %v1641_v24  ;;  %v1648_v59 = vsub.f32 %v2327_v1, %v1288_v36  ;;  %v329_v18 = vmul.f32 %v1641_v24, %v1641_v24  ;;  %v441_v54 = vsel %vm78_vm0, %v328_v9, 0.0 }
  0xec   :  { %v432_v13 = vadd.f32 %v431_v3, %v430_v5  ;;  %v2329_v5 = vld [vmem:[#allocation6_spill] sm:$0xff] }
  0xed   :  { %2328 = vst [vmem:[#allocation5_spill] sm:$0xff] %v1648_v59  ;;  %v1655_v23 = vsub.f32 %v2329_v5, %v1288_v36  ;;  %v330_v29 = vmul.f32 %v1648_v59, %v1648_v59  ;;  %v443_v60 = vsel %vm78_vm0, %v329_v18, 0.0 }
  0xee   :  { %v434_v50 = vadd.f32 %v433_v45, %v432_v13  ;;  %v2331_v13 = vld [vmem:[#allocation7_spill] sm:$0xff] }
  0xef   :  { %2330 = vst [vmem:[#allocation6_spill] sm:$0xff] %v1655_v23  ;;  %v1662_v1 = vsub.f32 %v2331_v13, %v1288_v36  ;;  %v331_v24 = vmul.f32 %v1655_v23, %v1655_v23  ;;  %v445_v9 = vsel %vm78_vm0, %v330_v29, 0.0 }
  0xf0   :  { %v436_v3 = vadd.f32 %v435_v32, %v434_v50  ;;  %v2333_v50 = vld [vmem:[#allocation8_spill] sm:$0xff] }
  0xf1   :  { %2332 = vst [vmem:[#allocation7_spill] sm:$0xff] %v1662_v1  ;;  %v1669_v5 = vsub.f32 %v2333_v50, %v1288_v36  ;;  %v332_v59 = vmul.f32 %v1662_v1, %v1662_v1  ;;  %v447_v18 = vsel %vm78_vm0, %v331_v24, 0.0 }
  0xf2   :  { %v438_v45 = vadd.f32 %v437_v0, %v436_v3  ;;  %v2335_v3 = vld [vmem:[#allocation9_spill] sm:$0xff] }
  0xf3   :  { %2334 = vst [vmem:[#allocation8_spill] sm:$0xff] %v1669_v5  ;;  %v1676_v13 = vsub.f32 %v2335_v3, %v1288_v36  ;;  %v333_v23 = vmul.f32 %v1669_v5, %v1669_v5  ;;  %v449_v29 = vsel %vm78_vm0, %v332_v59, 0.0 }
  0xf4   :  { %v440_v32 = vadd.f32 %v439_v42, %v438_v45  ;;  %v2337_v45 = vld [vmem:[#allocation10_spill] sm:$0xff] }
  0xf5   :  { %2336 = vst [vmem:[#allocation9_spill] sm:$0xff] %v1676_v13  ;;  %v1683_v50 = vsub.f32 %v2337_v45, %v1288_v36  ;;  %v334_v1 = vmul.f32 %v1676_v13, %v1676_v13  ;;  %v451_v24 = vsel %vm78_vm0, %v333_v23, 0.0 }
  0xf6   :  { %v442_v0 = vadd.f32 %v441_v54, %v440_v32  ;;  %v2339_v32 = vld [vmem:[#allocation11_spill] sm:$0xff] }
  0xf7   :  { %2338 = vst [vmem:[#allocation10_spill] sm:$0xff] %v1683_v50  ;;  %v1690_v3 = vsub.f32 %v2339_v32, %v1288_v36  ;;  %v335_v5 = vmul.f32 %v1683_v50, %v1683_v50  ;;  %v453_v59 = vsel %vm78_vm0, %v334_v1, 0.0 }
  0xf8   :  { %v444_v42 = vadd.f32 %v443_v60, %v442_v0  ;;  %v2341_v0 = vld [vmem:[#allocation12_spill] sm:$0xff] }
  0xf9   :  { %2340 = vst [vmem:[#allocation11_spill] sm:$0xff] %v1690_v3  ;;  %v1697_v45 = vsub.f32 %v2341_v0, %v1288_v36  ;;  %v336_v13 = vmul.f32 %v1690_v3, %v1690_v3  ;;  %v455_v23 = vsel %vm78_vm0, %v335_v5, 0.0 }
  0xfa   :  { %v446_v54 = vadd.f32 %v445_v9, %v444_v42  ;;  %v2343_v42 = vld [vmem:[#allocation13_spill] sm:$0xff] }
  0xfb   :  { %2342 = vst [vmem:[#allocation12_spill] sm:$0xff] %v1697_v45  ;;  %v1704_v32 = vsub.f32 %v2343_v42, %v1288_v36  ;;  %v337_v50 = vmul.f32 %v1697_v45, %v1697_v45  ;;  %v457_v1 = vsel %vm78_vm0, %v336_v13, 0.0 }
  0xfc   :  { %v448_v60 = vadd.f32 %v447_v18, %v446_v54  ;;  %v2345_v54 = vld [vmem:[#allocation14_spill] sm:$0xff] }
  0xfd   :  { %2344 = vst [vmem:[#allocation13_spill] sm:$0xff] %v1704_v32  ;;  %v1711_v0 = vsub.f32 %v2345_v54, %v1288_v36  ;;  %v338_v3 = vmul.f32 %v1704_v32, %v1704_v32  ;;  %v459_v5 = vsel %vm78_vm0, %v337_v50, 0.0 }
  0xfe   :  { %v450_v9 = vadd.f32 %v449_v29, %v448_v60  ;;  %v2347_v60 = vld [vmem:[#allocation15_spill] sm:$0xff] }
  0xff   :  { %2346 = vst [vmem:[#allocation14_spill] sm:$0xff] %v1711_v0  ;;  %v1718_v42 = vsub.f32 %v2347_v60, %v1288_v36  ;;  %v339_v54 = vmul.f32 %v1711_v0, %v1711_v0  ;;  %v461_v60 = vsel %vm78_vm0, %v338_v3, 0.0 }
 0x100   :  { %v452_v18 = vadd.f32 %v451_v24, %v450_v9  ;;  %v1725_v9 = vsub.f32 %v1284_v11, %v1288_v36 }
 0x101   :  { %2348 = vst [vmem:[#allocation15_spill] sm:$0xff] %v1718_v42 }
 0x102   :  { %v454_v29 = vadd.f32 %v453_v59, %v452_v18  ;;  %2349 = vst [vmem:[#allocation22_spill] sm:$0xff] %v1725_v9  ;;  %v340_v18 = vmul.f32 %v1718_v42, %v1718_v42  ;;  %v341_v13 = vmul.f32 %v1725_v9, %v1725_v9 }
 0x104   :  { %v456_v24 = vadd.f32 %v455_v23, %v454_v29  ;;  %v463_v23 = vsel %vm78_vm0, %v339_v54, 0.0  ;;  %v465_v11 = vsel %vm78_vm0, %v340_v18, 0.0  ;;  %v467_v0 = vsel %vm78_vm0, %v341_v13, 0.0 }
 0x106   :  { %v458_v59 = vadd.f32 %v457_v1, %v456_v24 }
 0x108   :  { %v460_v45 = vadd.f32 %v459_v5, %v458_v59 }
 0x10a   :  { %v462_v29 = vadd.f32 %v461_v60, %v460_v45  ;;  %v1743_v45 = vld [vmem:[%s2263_s1] ss:$0 sm:$0xff] }
 0x10c   :  { %v464_v36 = vadd.f32 %v463_v23, %v462_v29 }
 0x10e   :  { %v466_v32 = vadd.f32 %v465_v11, %v464_v36 }
 0x110   :  { %v468_v50 = vadd.f32 %v467_v0, %v466_v32  ;;  %v1756_v0 = vld [vmem:[%s2264_s2] ss:$0 sm:$0xff] }
 0x112   :  { %v469_v1 = vrot.slane %v468_v50, 4 }
 0x114   :  { %v470_v24 = vadd.f32 %v469_v1, %v468_v50 }
 0x116   :  { %v471_v47 = vrot.slane %v470_v24, 2 }
 0x118   :  { %v472_v42 = vadd.f32 %v471_v47, %v470_v24 }
 0x11a   :  { %v473_v41 = vrot.slane %v472_v42, 1 }
 0x11c   :  { %v474_v3 = vadd.f32 %v473_v41, %v472_v42  ;;  %v2350_v42 = vld [vmem:[#allocation16_spill] sm:$0xff] }
 0x11e   :  { %v475_v5 = vmul.f32 0.001953125, %v474_v3 }
 0x120   :  { %v476_v59 = vadd.f32 1e-05, %v475_v5 }
 0x122   :  { %818 = vrsqrt.f32 %v476_v59 }
 0x12c   :  { %v1738_v9 = vpop.eup %818 }
 0x12d   :  { %v478_v54 = vmul.f32 %v1738_v9, %v1292_v56  ;;  %v479_v32 = vmul.f32 %v1738_v9, %v1296_v51  ;;  %v480_v47 = vmul.f32 %v1738_v9, %v1300_v63  ;;  %v481_v41 = vmul.f32 %v1738_v9, %v1304_v15 }
 0x12e   :  { %v482_v18 = vmul.f32 %v1738_v9, %v2350_v42  ;;  %v483_v56 = vmul.f32 %v1738_v9, %v1318_v2  ;;  %v484_v51 = vmul.f32 %v1738_v9, %v1324_v7  ;;  %v485_v63 = vmul.f32 %v1738_v9, %v1333_v10 }
 0x12f   :  { %v549_v60 = vmul.f32 %v1743_v45, %v478_v54  ;;  %v550_v15 = vmul.f32 %v1743_v45, %v479_v32  ;;  %v551_v13 = vmul.f32 %v1743_v45, %v480_v47  ;;  %v552_v23 = vmul.f32 %v1743_v45, %v481_v41 }
 0x130   :  { %v553_v29 = vmul.f32 %v1743_v45, %v482_v18  ;;  %v554_v11 = vmul.f32 %v1743_v45, %v483_v56  ;;  %v555_v2 = vmul.f32 %v1743_v45, %v484_v51  ;;  %v556_v36 = vmul.f32 %v1743_v45, %v485_v63 }
 0x131   :  { %v620_v7 = vadd.f32 %v1756_v0, %v549_v60  ;;  %v621_v10 = vadd.f32 %v1756_v0, %v550_v15  ;;  %v622_v50 = vadd.f32 %v1756_v0, %v551_v13  ;;  %v623_v1 = vadd.f32 %v1756_v0, %v552_v23 }
 0x132   :  { %v624_v24 = vadd.f32 %v1756_v0, %v553_v29  ;;  %v625_v3 = vadd.f32 %v1756_v0, %v554_v11  ;;  %v626_v5 = vadd.f32 %v1756_v0, %v555_v2  ;;  %v627_v59 = vadd.f32 %v1756_v0, %v556_v36 }
 0x133   :  { %v684_v54 = vmax.f32 %v620_v7, 0.0  ;;  %v685_v32 = vmax.f32 %v621_v10, 0.0  ;;  %v686_v47 = vmax.f32 %v622_v50, 0.0  ;;  %v687_v41 = vmax.f32 %v623_v1, 0.0 }
 0x134   :  { %v688_v42 = vmax.f32 %v624_v24, 0.0  ;;  %v689_v18 = vmax.f32 %v625_v3, 0.0  ;;  %v690_v56 = vmax.f32 %v626_v5, 0.0  ;;  %v691_v51 = vmax.f32 %v627_v59, 0.0 }
 0x135   :  { %748 = vst.msk [vmem:[%s2265_s3] sm:$0xff] %vm78_vm0, %v684_v54  ;;  %749 = vst.msk [vmem:[%s2265_s3 + $0x8] sm:$0xff] %vm78_vm0, %v685_v32  ;;  %v486_v63 = vmul.f32 %v1738_v9, %v1340_v38  ;;  %v487_v60 = vmul.f32 %v1738_v9, %v1347_v16  ;;  %v488_v15 = vmul.f32 %v1738_v9, %v1354_v19 }
 0x136   :  { %750 = vst.msk [vmem:[%s2265_s3 + $0x10] sm:$0xff] %vm78_vm0, %v686_v47  ;;  %751 = vst.msk [vmem:[%s2265_s3 + $0x18] sm:$0xff] %vm78_vm0, %v687_v41  ;;  %v489_v13 = vmul.f32 %v1738_v9, %v1361_v22  ;;  %v490_v38 = vmul.f32 %v1738_v9, %v1368_v25  ;;  %v491_v16 = vmul.f32 %v1738_v9, %v1375_v28 }
 0x137   :  { %752 = vst.msk [vmem:[%s2265_s3 + $0x20] sm:$0xff] %vm78_vm0, %v688_v42  ;;  %753 = vst.msk [vmem:[%s2265_s3 + $0x28] sm:$0xff] %vm78_vm0, %v689_v18  ;;  %v492_v19 = vmul.f32 %v1738_v9, %v1382_v31  ;;  %v493_v22 = vmul.f32 %v1738_v9, %v1389_v34  ;;  %v557_v23 = vmul.f32 %v1743_v45, %v486_v63 }
 0x138   :  { %754 = vst.msk [vmem:[%s2265_s3 + $0x30] sm:$0xff] %vm78_vm0, %v690_v56  ;;  %755 = vst.msk [vmem:[%s2265_s3 + $0x38] sm:$0xff] %vm78_vm0, %v691_v51  ;;  %v558_v29 = vmul.f32 %v1743_v45, %v487_v60  ;;  %v559_v11 = vmul.f32 %v1743_v45, %v488_v15  ;;  %v560_v2 = vmul.f32 %v1743_v45, %v489_v13 }
 0x139   :  { %v561_v36 = vmul.f32 %v1743_v45, %v490_v38  ;;  %v562_v25 = vmul.f32 %v1743_v45, %v491_v16  ;;  %v563_v28 = vmul.f32 %v1743_v45, %v492_v19  ;;  %v564_v7 = vmul.f32 %v1743_v45, %v493_v22 }
 0x13a   :  { %v628_v31 = vadd.f32 %v1756_v0, %v557_v23  ;;  %v629_v34 = vadd.f32 %v1756_v0, %v558_v29  ;;  %v630_v10 = vadd.f32 %v1756_v0, %v559_v11  ;;  %v631_v50 = vadd.f32 %v1756_v0, %v560_v2 }
 0x13b   :  { %v632_v1 = vadd.f32 %v1756_v0, %v561_v36  ;;  %v633_v24 = vadd.f32 %v1756_v0, %v562_v25  ;;  %v634_v3 = vadd.f32 %v1756_v0, %v563_v28  ;;  %v635_v5 = vadd.f32 %v1756_v0, %v564_v7 }
 0x13c   :  { %v692_v59 = vmax.f32 %v628_v31, 0.0  ;;  %v693_v54 = vmax.f32 %v629_v34, 0.0  ;;  %v694_v32 = vmax.f32 %v630_v10, 0.0  ;;  %v695_v47 = vmax.f32 %v631_v50, 0.0 }
 0x13d   :  { %v696_v41 = vmax.f32 %v632_v1, 0.0  ;;  %v697_v42 = vmax.f32 %v633_v24, 0.0  ;;  %v698_v18 = vmax.f32 %v634_v3, 0.0  ;;  %v699_v56 = vmax.f32 %v635_v5, 0.0 }
 0x13e   :  { %756 = vst.msk [vmem:[%s2265_s3 + $0x40] sm:$0xff] %vm78_vm0, %v692_v59  ;;  %757 = vst.msk [vmem:[%s2265_s3 + $0x48] sm:$0xff] %vm78_vm0, %v693_v54  ;;  %v494_v51 = vmul.f32 %v1738_v9, %v1396_v37  ;;  %v495_v63 = vmul.f32 %v1738_v9, %v1403_v40  ;;  %v496_v60 = vmul.f32 %v1738_v9, %v1410_v43 }
 0x13f   :  { %758 = vst.msk [vmem:[%s2265_s3 + $0x50] sm:$0xff] %vm78_vm0, %v694_v32  ;;  %759 = vst.msk [vmem:[%s2265_s3 + $0x58] sm:$0xff] %vm78_vm0, %v695_v47  ;;  %v497_v15 = vmul.f32 %v1738_v9, %v1417_v46  ;;  %v498_v37 = vmul.f32 %v1738_v9, %v1424_v49  ;;  %v499_v40 = vmul.f32 %v1738_v9, %v1431_v52 }
 0x140   :  { %760 = vst.msk [vmem:[%s2265_s3 + $0x60] sm:$0xff] %vm78_vm0, %v696_v41  ;;  %761 = vst.msk [vmem:[%s2265_s3 + $0x68] sm:$0xff] %vm78_vm0, %v697_v42  ;;  %v500_v43 = vmul.f32 %v1738_v9, %v1438_v55  ;;  %v501_v46 = vmul.f32 %v1738_v9, %v1445_v58  ;;  %v565_v13 = vmul.f32 %v1743_v45, %v494_v51 }
 0x141   :  { %762 = vst.msk [vmem:[%s2265_s3 + $0x70] sm:$0xff] %vm78_vm0, %v698_v18  ;;  %763 = vst.msk [vmem:[%s2265_s3 + $0x78] sm:$0xff] %vm78_vm0, %v699_v56  ;;  %v566_v38 = vmul.f32 %v1743_v45, %v495_v63  ;;  %v567_v16 = vmul.f32 %v1743_v45, %v496_v60  ;;  %v568_v19 = vmul.f32 %v1743_v45, %v497_v15 }
 0x142   :  { %v569_v22 = vmul.f32 %v1743_v45, %v498_v37  ;;  %v570_v49 = vmul.f32 %v1743_v45, %v499_v40  ;;  %v571_v52 = vmul.f32 %v1743_v45, %v500_v43  ;;  %v572_v23 = vmul.f32 %v1743_v45, %v501_v46 }
 0x143   :  { %v636_v55 = vadd.f32 %v1756_v0, %v565_v13  ;;  %v637_v58 = vadd.f32 %v1756_v0, %v566_v38  ;;  %v638_v29 = vadd.f32 %v1756_v0, %v567_v16  ;;  %v639_v11 = vadd.f32 %v1756_v0, %v568_v19 }
 0x144   :  { %v640_v2 = vadd.f32 %v1756_v0, %v569_v22  ;;  %v641_v36 = vadd.f32 %v1756_v0, %v570_v49  ;;  %v642_v25 = vadd.f32 %v1756_v0, %v571_v52  ;;  %v643_v28 = vadd.f32 %v1756_v0, %v572_v23 }
 0x145   :  { %v700_v7 = vmax.f32 %v636_v55, 0.0  ;;  %v701_v31 = vmax.f32 %v637_v58, 0.0  ;;  %v702_v34 = vmax.f32 %v638_v29, 0.0  ;;  %v703_v10 = vmax.f32 %v639_v11, 0.0 }
 0x146   :  { %v704_v50 = vmax.f32 %v640_v2, 0.0  ;;  %v705_v1 = vmax.f32 %v641_v36, 0.0  ;;  %v706_v24 = vmax.f32 %v642_v25, 0.0  ;;  %v707_v3 = vmax.f32 %v643_v28, 0.0 }
 0x147   :  { %764 = vst.msk [vmem:[%s2265_s3 + $0x80] sm:$0xff] %vm78_vm0, %v700_v7  ;;  %765 = vst.msk [vmem:[%s2265_s3 + $0x88] sm:$0xff] %vm78_vm0, %v701_v31  ;;  %v502_v5 = vmul.f32 %v1738_v9, %v1452_v61  ;;  %v503_v59 = vmul.f32 %v1738_v9, %v1459_v4  ;;  %v504_v54 = vmul.f32 %v1738_v9, %v1466_v8 }
 0x148   :  { %766 = vst.msk [vmem:[%s2265_s3 + $0x90] sm:$0xff] %vm78_vm0, %v702_v34  ;;  %767 = vst.msk [vmem:[%s2265_s3 + $0x98] sm:$0xff] %vm78_vm0, %v703_v10  ;;  %v505_v32 = vmul.f32 %v1738_v9, %v1473_v12  ;;  %v506_v61 = vmul.f32 %v1738_v9, %v1480_v17  ;;  %v507_v4 = vmul.f32 %v1738_v9, %v1487_v21 }
 0x149   :  { %768 = vst.msk [vmem:[%s2265_s3 + $0xa0] sm:$0xff] %vm78_vm0, %v704_v50  ;;  %769 = vst.msk [vmem:[%s2265_s3 + $0xa8] sm:$0xff] %vm78_vm0, %v705_v1  ;;  %v508_v8 = vmul.f32 %v1738_v9, %v1494_v26  ;;  %v509_v12 = vmul.f32 %v1738_v9, %v1501_v30  ;;  %v573_v47 = vmul.f32 %v1743_v45, %v502_v5 }
 0x14a   :  { %770 = vst.msk [vmem:[%s2265_s3 + $0xb0] sm:$0xff] %vm78_vm0, %v706_v24  ;;  %771 = vst.msk [vmem:[%s2265_s3 + $0xb8] sm:$0xff] %vm78_vm0, %v707_v3  ;;  %v574_v41 = vmul.f32 %v1743_v45, %v503_v59  ;;  %v575_v42 = vmul.f32 %v1743_v45, %v504_v54  ;;  %v576_v18 = vmul.f32 %v1743_v45, %v505_v32 }
 0x14b   :  { %v577_v56 = vmul.f32 %v1743_v45, %v506_v61  ;;  %v578_v17 = vmul.f32 %v1743_v45, %v507_v4  ;;  %v579_v21 = vmul.f32 %v1743_v45, %v508_v8  ;;  %v580_v51 = vmul.f32 %v1743_v45, %v509_v12 }
 0x14c   :  { %v644_v26 = vadd.f32 %v1756_v0, %v573_v47  ;;  %v645_v30 = vadd.f32 %v1756_v0, %v574_v41  ;;  %v646_v63 = vadd.f32 %v1756_v0, %v575_v42  ;;  %v647_v60 = vadd.f32 %v1756_v0, %v576_v18  ;;  %v2353_v18 = vld [vmem:[#allocation19_spill] sm:$0xff] }
 0x14d   :  { %v648_v15 = vadd.f32 %v1756_v0, %v577_v56  ;;  %v649_v37 = vadd.f32 %v1756_v0, %v578_v17  ;;  %v650_v40 = vadd.f32 %v1756_v0, %v579_v21  ;;  %v651_v43 = vadd.f32 %v1756_v0, %v580_v51  ;;  %v2354_v17 = vld [vmem:[#allocation20_spill] sm:$0xff] }
 0x14e   :  { %v708_v46 = vmax.f32 %v644_v26, 0.0  ;;  %v709_v13 = vmax.f32 %v645_v30, 0.0  ;;  %v710_v38 = vmax.f32 %v646_v63, 0.0  ;;  %v711_v16 = vmax.f32 %v647_v60, 0.0 }
 0x14f   :  { %v712_v19 = vmax.f32 %v648_v15, 0.0  ;;  %v713_v22 = vmax.f32 %v649_v37, 0.0  ;;  %v714_v49 = vmax.f32 %v650_v40, 0.0  ;;  %v715_v52 = vmax.f32 %v651_v43, 0.0 }
 0x150   :  { %772 = vst.msk [vmem:[%s2265_s3 + $0xc0] sm:$0xff] %vm78_vm0, %v708_v46  ;;  %773 = vst.msk [vmem:[%s2265_s3 + $0xc8] sm:$0xff] %vm78_vm0, %v709_v13  ;;  %v510_v23 = vmul.f32 %v1738_v9, %v1508_v35  ;;  %v511_v55 = vmul.f32 %v1738_v9, %v1515_v39  ;;  %v512_v58 = vmul.f32 %v1738_v9, %v1522_v44 }
 0x151   :  { %774 = vst.msk [vmem:[%s2265_s3 + $0xd0] sm:$0xff] %vm78_vm0, %v710_v38  ;;  %775 = vst.msk [vmem:[%s2265_s3 + $0xd8] sm:$0xff] %vm78_vm0, %v711_v16  ;;  %v513_v29 = vmul.f32 %v1738_v9, %v1529_v48  ;;  %v514_v35 = vmul.f32 %v1738_v9, %v1536_v53  ;;  %v515_v39 = vmul.f32 %v1738_v9, %v1543_v57 }
 0x152   :  { %776 = vst.msk [vmem:[%s2265_s3 + $0xe0] sm:$0xff] %vm78_vm0, %v712_v19  ;;  %777 = vst.msk [vmem:[%s2265_s3 + $0xe8] sm:$0xff] %vm78_vm0, %v713_v22  ;;  %v516_v44 = vmul.f32 %v1738_v9, %v1550_v62  ;;  %v517_v48 = vmul.f32 %v1738_v9, %v1557_v6  ;;  %v581_v11 = vmul.f32 %v1743_v45, %v510_v23 }
 0x153   :  { %778 = vst.msk [vmem:[%s2265_s3 + $0xf0] sm:$0xff] %vm78_vm0, %v714_v49  ;;  %779 = vst.msk [vmem:[%s2265_s3 + $0xf8] sm:$0xff] %vm78_vm0, %v715_v52  ;;  %v582_v2 = vmul.f32 %v1743_v45, %v511_v55  ;;  %v583_v36 = vmul.f32 %v1743_v45, %v512_v58  ;;  %v584_v25 = vmul.f32 %v1743_v45, %v513_v29 }
 0x154   :  { %v585_v28 = vmul.f32 %v1743_v45, %v514_v35  ;;  %v586_v53 = vmul.f32 %v1743_v45, %v515_v39  ;;  %v587_v57 = vmul.f32 %v1743_v45, %v516_v44  ;;  %v588_v7 = vmul.f32 %v1743_v45, %v517_v48  ;;  %v2355_v48 = vld [vmem:[#allocation21_spill] sm:$0xff] }
 0x155   :  { %v652_v62 = vadd.f32 %v1756_v0, %v581_v11  ;;  %v653_v6 = vadd.f32 %v1756_v0, %v582_v2  ;;  %v654_v31 = vadd.f32 %v1756_v0, %v583_v36  ;;  %v655_v34 = vadd.f32 %v1756_v0, %v584_v25  ;;  %v2356_v2 = vld [vmem:[#allocation2_spill] sm:$0xff]  ;;  %v2357_v25 = vld [vmem:[#allocation3_spill] sm:$0xff] }
 0x156   :  { %v656_v10 = vadd.f32 %v1756_v0, %v585_v28  ;;  %v657_v50 = vadd.f32 %v1756_v0, %v586_v53  ;;  %v658_v1 = vadd.f32 %v1756_v0, %v587_v57  ;;  %v659_v24 = vadd.f32 %v1756_v0, %v588_v7  ;;  %v2358_v53 = vld [vmem:[#allocation4_spill] sm:$0xff]  ;;  %v2359_v7 = vld [vmem:[#allocation5_spill] sm:$0xff] }
 0x157   :  { %v716_v3 = vmax.f32 %v652_v62, 0.0  ;;  %v717_v5 = vmax.f32 %v653_v6, 0.0  ;;  %v718_v59 = vmax.f32 %v654_v31, 0.0  ;;  %v719_v54 = vmax.f32 %v655_v34, 0.0  ;;  %v2360_v6 = vld [vmem:[#allocation6_spill] sm:$0xff]  ;;  %v2361_v34 = vld [vmem:[#allocation7_spill] sm:$0xff] }
 0x158   :  { %v720_v32 = vmax.f32 %v656_v10, 0.0  ;;  %v721_v61 = vmax.f32 %v657_v50, 0.0  ;;  %v722_v4 = vmax.f32 %v658_v1, 0.0  ;;  %v723_v8 = vmax.f32 %v659_v24, 0.0  ;;  %v2362_v50 = vld [vmem:[#allocation8_spill] sm:$0xff] }
 0x159   :  { %780 = vst.msk [vmem:[%s2265_s3 + $0x100] sm:$0xff] %vm78_vm0, %v716_v3  ;;  %781 = vst.msk [vmem:[%s2265_s3 + $0x108] sm:$0xff] %vm78_vm0, %v717_v5  ;;  %v518_v12 = vmul.f32 %v1738_v9, %v1564_v14  ;;  %v519_v47 = vmul.f32 %v1738_v9, %v1571_v20  ;;  %v520_v41 = vmul.f32 %v1738_v9, %v1578_v27  ;;  %v2351_v14 = vld [vmem:[#allocation17_spill] sm:$0xff]  ;;  %v2352_v27 = vld [vmem:[#allocation18_spill] sm:$0xff] }
 0x15a   :  { %782 = vst.msk [vmem:[%s2265_s3 + $0x110] sm:$0xff] %vm78_vm0, %v718_v59  ;;  %783 = vst.msk [vmem:[%s2265_s3 + $0x118] sm:$0xff] %vm78_vm0, %v719_v54  ;;  %v521_v42 = vmul.f32 %v1738_v9, %v1585_v33  ;;  %v522_v20 = vmul.f32 %v1738_v9, %v2351_v14  ;;  %v523_v33 = vmul.f32 %v1738_v9, %v2352_v27 }
 0x15b   :  { %784 = vst.msk [vmem:[%s2265_s3 + $0x120] sm:$0xff] %vm78_vm0, %v720_v32  ;;  %785 = vst.msk [vmem:[%s2265_s3 + $0x128] sm:$0xff] %vm78_vm0, %v721_v61  ;;  %v524_v56 = vmul.f32 %v1738_v9, %v2353_v18  ;;  %v525_v21 = vmul.f32 %v1738_v9, %v2354_v17  ;;  %v589_v51 = vmul.f32 %v1743_v45, %v518_v12 }
 0x15c   :  { %786 = vst.msk [vmem:[%s2265_s3 + $0x130] sm:$0xff] %vm78_vm0, %v722_v4  ;;  %787 = vst.msk [vmem:[%s2265_s3 + $0x138] sm:$0xff] %vm78_vm0, %v723_v8  ;;  %v590_v26 = vmul.f32 %v1743_v45, %v519_v47  ;;  %v591_v30 = vmul.f32 %v1743_v45, %v520_v41  ;;  %v592_v63 = vmul.f32 %v1743_v45, %v521_v42 }
 0x15d   :  { %v593_v60 = vmul.f32 %v1743_v45, %v522_v20  ;;  %v594_v15 = vmul.f32 %v1743_v45, %v523_v33  ;;  %v595_v37 = vmul.f32 %v1743_v45, %v524_v56  ;;  %v596_v40 = vmul.f32 %v1743_v45, %v525_v21 }
 0x15e   :  { %v660_v43 = vadd.f32 %v1756_v0, %v589_v51  ;;  %v661_v46 = vadd.f32 %v1756_v0, %v590_v26  ;;  %v662_v13 = vadd.f32 %v1756_v0, %v591_v30  ;;  %v663_v38 = vadd.f32 %v1756_v0, %v592_v63  ;;  %v2363_v63 = vld [vmem:[#allocation9_spill] sm:$0xff] }
 0x15f   :  { %v664_v16 = vadd.f32 %v1756_v0, %v593_v60  ;;  %v665_v19 = vadd.f32 %v1756_v0, %v594_v15  ;;  %v666_v22 = vadd.f32 %v1756_v0, %v595_v37  ;;  %v667_v49 = vadd.f32 %v1756_v0, %v596_v40  ;;  %v2364_v15 = vld [vmem:[#allocation10_spill] sm:$0xff]  ;;  %v2365_v40 = vld [vmem:[#allocation11_spill] sm:$0xff] }
 0x160   :  { %v724_v52 = vmax.f32 %v660_v43, 0.0  ;;  %v725_v23 = vmax.f32 %v661_v46, 0.0  ;;  %v726_v55 = vmax.f32 %v662_v13, 0.0  ;;  %v727_v58 = vmax.f32 %v663_v38, 0.0  ;;  %v2366_v46 = vld [vmem:[#allocation12_spill] sm:$0xff]  ;;  %v2367_v38 = vld [vmem:[#allocation13_spill] sm:$0xff] }
 0x161   :  { %v728_v29 = vmax.f32 %v664_v16, 0.0  ;;  %v729_v35 = vmax.f32 %v665_v19, 0.0  ;;  %v730_v39 = vmax.f32 %v666_v22, 0.0  ;;  %v731_v44 = vmax.f32 %v667_v49, 0.0  ;;  %v2368_v19 = vld [vmem:[#allocation14_spill] sm:$0xff]  ;;  %v2369_v49 = vld [vmem:[#allocation15_spill] sm:$0xff] }
 0x162   :  { %788 = vst.msk [vmem:[%s2265_s3 + $0x140] sm:$0xff] %vm78_vm0, %v724_v52  ;;  %789 = vst.msk [vmem:[%s2265_s3 + $0x148] sm:$0xff] %vm78_vm0, %v725_v23  ;;  %v526_v11 = vmul.f32 %v1738_v9, %v2355_v48  ;;  %v527_v36 = vmul.f32 %v1738_v9, %v2356_v2  ;;  %v528_v28 = vmul.f32 %v1738_v9, %v2357_v25  ;;  %v2370_v23 = vld [vmem:[#allocation22_spill] sm:$0xff] }
 0x163   :  { %790 = vst.msk [vmem:[%s2265_s3 + $0x150] sm:$0xff] %vm78_vm0, %v726_v55  ;;  %791 = vst.msk [vmem:[%s2265_s3 + $0x158] sm:$0xff] %vm78_vm0, %v727_v58  ;;  %v529_v57 = vmul.f32 %v1738_v9, %v2358_v53  ;;  %v530_v62 = vmul.f32 %v1738_v9, %v2359_v7  ;;  %v531_v31 = vmul.f32 %v1738_v9, %v2360_v6 }
 0x164   :  { %792 = vst.msk [vmem:[%s2265_s3 + $0x160] sm:$0xff] %vm78_vm0, %v728_v29  ;;  %793 = vst.msk [vmem:[%s2265_s3 + $0x168] sm:$0xff] %vm78_vm0, %v729_v35  ;;  %v532_v10 = vmul.f32 %v1738_v9, %v2361_v34  ;;  %v533_v1 = vmul.f32 %v1738_v9, %v2362_v50  ;;  %v597_v24 = vmul.f32 %v1743_v45, %v526_v11 }
 0x165   :  { %794 = vst.msk [vmem:[%s2265_s3 + $0x170] sm:$0xff] %vm78_vm0, %v730_v39  ;;  %795 = vst.msk [vmem:[%s2265_s3 + $0x178] sm:$0xff] %vm78_vm0, %v731_v44  ;;  %v598_v3 = vmul.f32 %v1743_v45, %v527_v36  ;;  %v599_v5 = vmul.f32 %v1743_v45, %v528_v28  ;;  %v600_v59 = vmul.f32 %v1743_v45, %v529_v57 }
 0x166   :  { %v601_v54 = vmul.f32 %v1743_v45, %v530_v62  ;;  %v602_v32 = vmul.f32 %v1743_v45, %v531_v31  ;;  %v603_v61 = vmul.f32 %v1743_v45, %v532_v10  ;;  %v604_v4 = vmul.f32 %v1743_v45, %v533_v1 }
 0x167   :  { %v668_v8 = vadd.f32 %v1756_v0, %v597_v24  ;;  %v669_v12 = vadd.f32 %v1756_v0, %v598_v3  ;;  %v670_v47 = vadd.f32 %v1756_v0, %v599_v5  ;;  %v671_v41 = vadd.f32 %v1756_v0, %v600_v59 }
 0x168   :  { %v672_v42 = vadd.f32 %v1756_v0, %v601_v54  ;;  %v673_v14 = vadd.f32 %v1756_v0, %v602_v32  ;;  %v674_v20 = vadd.f32 %v1756_v0, %v603_v61  ;;  %v675_v27 = vadd.f32 %v1756_v0, %v604_v4 }
 0x169   :  { %v732_v33 = vmax.f32 %v668_v8, 0.0  ;;  %v733_v18 = vmax.f32 %v669_v12, 0.0  ;;  %v734_v56 = vmax.f32 %v670_v47, 0.0  ;;  %v735_v17 = vmax.f32 %v671_v41, 0.0 }
 0x16a   :  { %v736_v21 = vmax.f32 %v672_v42, 0.0  ;;  %v737_v51 = vmax.f32 %v673_v14, 0.0  ;;  %v738_v26 = vmax.f32 %v674_v20, 0.0  ;;  %v739_v30 = vmax.f32 %v675_v27, 0.0 }
 0x16b   :  { %796 = vst.msk [vmem:[%s2265_s3 + $0x180] sm:$0xff] %vm78_vm0, %v732_v33  ;;  %797 = vst.msk [vmem:[%s2265_s3 + $0x188] sm:$0xff] %vm78_vm0, %v733_v18  ;;  %v534_v60 = vmul.f32 %v1738_v9, %v2363_v63  ;;  %v535_v37 = vmul.f32 %v1738_v9, %v2364_v15  ;;  %v536_v43 = vmul.f32 %v1738_v9, %v2365_v40 }
 0x16c   :  { %798 = vst.msk [vmem:[%s2265_s3 + $0x190] sm:$0xff] %vm78_vm0, %v734_v56  ;;  %799 = vst.msk [vmem:[%s2265_s3 + $0x198] sm:$0xff] %vm78_vm0, %v735_v17  ;;  %v537_v13 = vmul.f32 %v1738_v9, %v2366_v46  ;;  %v538_v16 = vmul.f32 %v1738_v9, %v2367_v38  ;;  %v539_v22 = vmul.f32 %v1738_v9, %v2368_v19 }
 0x16d   :  { %800 = vst.msk [vmem:[%s2265_s3 + $0x1a0] sm:$0xff] %vm78_vm0, %v736_v21  ;;  %801 = vst.msk [vmem:[%s2265_s3 + $0x1a8] sm:$0xff] %vm78_vm0, %v737_v51  ;;  %v540_v52 = vmul.f32 %v1738_v9, %v2369_v49  ;;  %v541_v55 = vmul.f32 %v1738_v9, %v2370_v23  ;;  %v605_v58 = vmul.f32 %v1743_v45, %v534_v60 }
 0x16e   :  { %802 = vst.msk [vmem:[%s2265_s3 + $0x1b0] sm:$0xff] %vm78_vm0, %v738_v26  ;;  %803 = vst.msk [vmem:[%s2265_s3 + $0x1b8] sm:$0xff] %vm78_vm0, %v739_v30  ;;  %v606_v29 = vmul.f32 %v1743_v45, %v535_v37  ;;  %v607_v35 = vmul.f32 %v1743_v45, %v536_v43  ;;  %v608_v39 = vmul.f32 %v1743_v45, %v537_v13 }
 0x16f   :  { %v609_v44 = vmul.f32 %v1743_v45, %v538_v16  ;;  %v610_v48 = vmul.f32 %v1743_v45, %v539_v22  ;;  %v611_v11 = vmul.f32 %v1743_v45, %v540_v52  ;;  %v612_v2 = vmul.f32 %v1743_v45, %v541_v55 }
 0x170   :  { %v676_v36 = vadd.f32 %v1756_v0, %v605_v58  ;;  %v677_v9 = vadd.f32 %v1756_v0, %v606_v29  ;;  %v678_v25 = vadd.f32 %v1756_v0, %v607_v35  ;;  %v679_v28 = vadd.f32 %v1756_v0, %v608_v39 }
 0x171   :  { %v680_v53 = vadd.f32 %v1756_v0, %v609_v44  ;;  %v681_v57 = vadd.f32 %v1756_v0, %v610_v48  ;;  %v682_v7 = vadd.f32 %v1756_v0, %v611_v11  ;;  %v683_v62 = vadd.f32 %v1756_v0, %v612_v2 }
 0x172   :  { %v740_v6 = vmax.f32 %v676_v36, 0.0  ;;  %v741_v31 = vmax.f32 %v677_v9, 0.0  ;;  %v742_v34 = vmax.f32 %v678_v25, 0.0  ;;  %v743_v45 = vmax.f32 %v679_v28, 0.0 }
 0x173   :  { %v744_v10 = vmax.f32 %v680_v53, 0.0  ;;  %v745_v50 = vmax.f32 %v681_v57, 0.0  ;;  %v746_v1 = vmax.f32 %v682_v7, 0.0  ;;  %v747_v24 = vmax.f32 %v683_v62, 0.0 }
 0x174   :  { %804 = vst.msk [vmem:[%s2265_s3 + $0x1c0] sm:$0xff] %vm78_vm0, %v740_v6  ;;  %805 = vst.msk [vmem:[%s2265_s3 + $0x1c8] sm:$0xff] %vm78_vm0, %v741_v31 }
 0x175   :  { %806 = vst.msk [vmem:[%s2265_s3 + $0x1d0] sm:$0xff] %vm78_vm0, %v742_v34  ;;  %807 = vst.msk [vmem:[%s2265_s3 + $0x1d8] sm:$0xff] %vm78_vm0, %v743_v45 }
 0x176   :  { %808 = vst.msk [vmem:[%s2265_s3 + $0x1e0] sm:$0xff] %vm78_vm0, %v744_v10  ;;  %809 = vst.msk [vmem:[%s2265_s3 + $0x1e8] sm:$0xff] %vm78_vm0, %v745_v50 }
 0x177   :  { %810 = vst.msk [vmem:[%s2265_s3 + $0x1f0] sm:$0xff] %vm78_vm0, %v746_v1  ;;  %811 = vst.msk [vmem:[%s2265_s3 + $0x1f8] sm:$0xff] %vm78_vm0, %v747_v24 }

// kernel: decoder_forward.11
= control target key start
LH: loop header
LB: loop body
LE: loop exit
PB: predicated region body
PF: predicated region fallthrough
CT: control target
= control target key end

     0   :  { %s5706_s9 = smov 0   ;;  %s5708_s10 = smov 0   ;;  %s7154_s0 = inlined_call_operand.vmem [shape: bf16[128,2304], index: 0, kind: input, shape index: {}]   ;;  %s7155_s1 = inlined_call_operand.vmem [shape: bf16[2304,256], index: 1, kind: input, shape index: {}]   ;;  %s7156_s2 = inlined_call_operand.vmem [shape: f32[128,256], index: 2, kind: output, shape index: {}]  }
   0x1   :  { %s5710_s11 = smov 0  }
   0x2 LB: > { %s4390_s12 = sadd.s32 4294967295, %s5689_s11   ;;  %s5723_s13 = sadd.s32 1, %s5689_s11   ;;  %s5689_s11 = sphi %s5710_s11, %s7160_s11   ;;  %s5685_s10 = sphi %s5708_s10, %s7159_s10   ;;  %s5681_s9 = sphi %s5706_s9, %s7158_s9  }
   0x3   : > { %s37_s14 = ssub.s32 %s5689_s11, %s5723_s13  ;;  %s40_s15 = sadd.s32 1, %s5685_s10 }
   0x4   : > { %p38_p0 = scmp.eq.s32.totalorder %s37_s14, 0  ;;  %p47_p1 = scmp.ne.s32.totalorder %s5685_s10, %s5681_s9 }
   0x5   : > { %p48_p2 = scmp.eq.s32.totalorder %s5689_s11, 0  ;;  %p77_p3 = scmp.eq.s32.totalorder %s4390_s12, 1 }
   0x6   : > { %s5734_s16 = scalar_select %p38_p0, %s5685_s10, %s40_s15  }
   0x7   : > { %p49_p4 = por %p48_p2, %p47_p1  ;;  %p5736_p5 = por %p77_p3, %p47_p1 }
   0x8   : > { %p4393_p6 = scmp.ge.s32.totalorder %s5689_s11, 2 }
   0xa   : > { %102 = sbr.rel (%p4393_p6) target bundleno = 213 (0xd5), region = 20 }
  0x11   : > { %105 = sbr.rel (!%p49_p4) target bundleno = 213 (0xd5), region = 24  ;;  %s107_s18 = sand.u32 (%p49_p4), 1, %s5685_s10  }
  0x12   : > { %s4394_s19 = sshll.u32 (%p49_p4), %s5689_s11, 2  ;;  %s5281_s20 = smul.u32 (%p49_p4), 1152, %s107_s18 }
  0x13   : > { %s5746_s23 = scalar_lea.vmem (%p49_p4), %s7155_s1, %s4394_s19 }
  0x14   : > { %v127_v0 = vld [vmem:[%s5746_s23] sm:$0xf] (%p49_p4)  ;;  %v129_v1 = vld [vmem:[%s5746_s23 + $0x8] sm:$0xf] (%p49_p4)  ;;  %v131_v2 = vld [vmem:[%s5746_s23 + $0x10] sm:$0xf] (%p49_p4) }
  0x15   : > { %v133_v3 = vld [vmem:[%s5746_s23 + $0x18] sm:$0xf] (%p49_p4)  ;;  %v135_v4 = vld [vmem:[%s5746_s23 + $0x20] sm:$0xf] (%p49_p4)  ;;  %s5753_s24 = scalar_lea.vmem (%p49_p4), [#allocation2], %s5281_s20 }
  0x16   : > { %128 = vst [vmem:[%s5753_s24] sm:$0xf] (%p49_p4), %v127_v0  ;;  %130 = vst [vmem:[%s5753_s24 + $0x4] sm:$0xf] (%p49_p4), %v129_v1  ;;  %v137_v5 = vld [vmem:[%s5746_s23 + $0x28] sm:$0xf] (%p49_p4) }
  0x17   : > { %132 = vst [vmem:[%s5753_s24 + $0x8] sm:$0xf] (%p49_p4), %v131_v2  ;;  %134 = vst [vmem:[%s5753_s24 + $0xc] sm:$0xf] (%p49_p4), %v133_v3  ;;  %v139_v6 = vld [vmem:[%s5746_s23 + $0x30] sm:$0xf] (%p49_p4) }
  0x18   : > { %136 = vst [vmem:[%s5753_s24 + $0x10] sm:$0xf] %v135_v4  ;;  %v141_v7 = vld [vmem:[%s5746_s23 + $0x38] sm:$0xf]  ;;  %138 = vst [vmem:[%s5753_s24 + $0x14] sm:$0xf] %v137_v5 }
  0x19   : > { %140 = vst [vmem:[%s5753_s24 + $0x18] sm:$0xf] %v139_v6  ;;  %142 = vst [vmem:[%s5753_s24 + $0x1c] sm:$0xf] %v141_v7  ;;  %v143_v8 = vld [vmem:[%s5746_s23 + $0x40] sm:$0xf] }
  0x1a   : > { %v145_v9 = vld [vmem:[%s5746_s23 + $0x48] sm:$0xf]  ;;  %v147_v10 = vld [vmem:[%s5746_s23 + $0x50] sm:$0xf]  ;;  %144 = vst [vmem:[%s5753_s24 + $0x20] sm:$0xf] %v143_v8 }
  0x1b   : > { %146 = vst [vmem:[%s5753_s24 + $0x24] sm:$0xf] %v145_v9  ;;  %148 = vst [vmem:[%s5753_s24 + $0x28] sm:$0xf] %v147_v10  ;;  %v149_v11 = vld [vmem:[%s5746_s23 + $0x58] sm:$0xf] }
  0x1c   : > { %v151_v12 = vld [vmem:[%s5746_s23 + $0x60] sm:$0xf]  ;;  %v153_v13 = vld [vmem:[%s5746_s23 + $0x68] sm:$0xf]  ;;  %150 = vst [vmem:[%s5753_s24 + $0x2c] sm:$0xf] %v149_v11 }
  0x1d   : > { %152 = vst [vmem:[%s5753_s24 + $0x30] sm:$0xf] %v151_v12  ;;  %154 = vst [vmem:[%s5753_s24 + $0x34] sm:$0xf] %v153_v13  ;;  %v155_v14 = vld [vmem:[%s5746_s23 + $0x70] sm:$0xf] }
  0x1e   : > { %v157_v15 = vld [vmem:[%s5746_s23 + $0x78] sm:$0xf]  ;;  %v159_v16 = vld [vmem:[%s5746_s23 + $0x80] sm:$0xf]  ;;  %156 = vst [vmem:[%s5753_s24 + $0x38] sm:$0xf] %v155_v14 }
  0x1f   : > { %158 = vst [vmem:[%s5753_s24 + $0x3c] sm:$0xf] %v157_v15  ;;  %160 = vst [vmem:[%s5753_s24 + $0x40] sm:$0xf] %v159_v16  ;;  %v161_v17 = vld [vmem:[%s5746_s23 + $0x88] sm:$0xf] }
  0x20   : > { %v163_v18 = vld [vmem:[%s5746_s23 + $0x90] sm:$0xf]  ;;  %v165_v19 = vld [vmem:[%s5746_s23 + $0x98] sm:$0xf]  ;;  %162 = vst [vmem:[%s5753_s24 + $0x44] sm:$0xf] %v161_v17 }
  0x21   : > { %164 = vst [vmem:[%s5753_s24 + $0x48] sm:$0xf] %v163_v18  ;;  %166 = vst [vmem:[%s5753_s24 + $0x4c] sm:$0xf] %v165_v19  ;;  %v167_v20 = vld [vmem:[%s5746_s23 + $0xa0] sm:$0xf] }
  0x22   : > { %v169_v21 = vld [vmem:[%s5746_s23 + $0xa8] sm:$0xf]  ;;  %v171_v22 = vld [vmem:[%s5746_s23 + $0xb0] sm:$0xf]  ;;  %168 = vst [vmem:[%s5753_s24 + $0x50] sm:$0xf] %v167_v20 }
  0x23   : > { %170 = vst [vmem:[%s5753_s24 + $0x54] sm:$0xf] %v169_v21  ;;  %172 = vst [vmem:[%s5753_s24 + $0x58] sm:$0xf] %v171_v22  ;;  %v173_v23 = vld [vmem:[%s5746_s23 + $0xb8] sm:$0xf] }
  0x24   : > { %v175_v24 = vld [vmem:[%s5746_s23 + $0xc0] sm:$0xf]  ;;  %v177_v25 = vld [vmem:[%s5746_s23 + $0xc8] sm:$0xf]  ;;  %174 = vst [vmem:[%s5753_s24 + $0x5c] sm:$0xf] %v173_v23 }
  0x25   : > { %176 = vst [vmem:[%s5753_s24 + $0x60] sm:$0xf] %v175_v24  ;;  %178 = vst [vmem:[%s5753_s24 + $0x64] sm:$0xf] %v177_v25  ;;  %v179_v26 = vld [vmem:[%s5746_s23 + $0xd0] sm:$0xf] }
  0x26   : > { %v181_v27 = vld [vmem:[%s5746_s23 + $0xd8] sm:$0xf]  ;;  %v183_v28 = vld [vmem:[%s5746_s23 + $0xe0] sm:$0xf]  ;;  %180 = vst [vmem:[%s5753_s24 + $0x68] sm:$0xf] %v179_v26 }
  0x27   : > { %182 = vst [vmem:[%s5753_s24 + $0x6c] sm:$0xf] %v181_v27  ;;  %184 = vst [vmem:[%s5753_s24 + $0x70] sm:$0xf] %v183_v28  ;;  %v185_v29 = vld [vmem:[%s5746_s23 + $0xe8] sm:$0xf] }
  0x28   : > { %v187_v30 = vld [vmem:[%s5746_s23 + $0xf0] sm:$0xf]  ;;  %v189_v31 = vld [vmem:[%s5746_s23 + $0xf8] sm:$0xf]  ;;  %186 = vst [vmem:[%s5753_s24 + $0x74] sm:$0xf] %v185_v29 }
  0x29   : > { %188 = vst [vmem:[%s5753_s24 + $0x78] sm:$0xf] %v187_v30  ;;  %190 = vst [vmem:[%s5753_s24 + $0x7c] sm:$0xf] %v189_v31  ;;  %v191_v32 = vld [vmem:[%s5746_s23 + $0x100] sm:$0xf] }
  0x2a   : > { %v193_v33 = vld [vmem:[%s5746_s23 + $0x108] sm:$0xf]  ;;  %v195_v34 = vld [vmem:[%s5746_s23 + $0x110] sm:$0xf]  ;;  %192 = vst [vmem:[%s5753_s24 + $0x80] sm:$0xf] %v191_v32 }
  0x2b   : > { %194 = vst [vmem:[%s5753_s24 + $0x84] sm:$0xf] %v193_v33  ;;  %196 = vst [vmem:[%s5753_s24 + $0x88] sm:$0xf] %v195_v34  ;;  %v197_v35 = vld [vmem:[%s5746_s23 + $0x118] sm:$0xf] }
  0x2c   : > { %v199_v36 = vld [vmem:[%s5746_s23 + $0x120] sm:$0xf]  ;;  %v201_v37 = vld [vmem:[%s5746_s23 + $0x128] sm:$0xf]  ;;  %198 = vst [vmem:[%s5753_s24 + $0x8c] sm:$0xf] %v197_v35 }
  0x2d   : > { %200 = vst [vmem:[%s5753_s24 + $0x90] sm:$0xf] %v199_v36  ;;  %202 = vst [vmem:[%s5753_s24 + $0x94] sm:$0xf] %v201_v37  ;;  %v203_v38 = vld [vmem:[%s5746_s23 + $0x130] sm:$0xf] }
  0x2e   : > { %v205_v39 = vld [vmem:[%s5746_s23 + $0x138] sm:$0xf]  ;;  %v207_v40 = vld [vmem:[%s5746_s23 + $0x140] sm:$0xf]  ;;  %204 = vst [vmem:[%s5753_s24 + $0x98] sm:$0xf] %v203_v38 }
  0x2f   : > { %206 = vst [vmem:[%s5753_s24 + $0x9c] sm:$0xf] %v205_v39  ;;  %208 = vst [vmem:[%s5753_s24 + $0xa0] sm:$0xf] %v207_v40  ;;  %v209_v41 = vld [vmem:[%s5746_s23 + $0x148] sm:$0xf] }
  0x30   : > { %v211_v42 = vld [vmem:[%s5746_s23 + $0x150] sm:$0xf]  ;;  %v213_v43 = vld [vmem:[%s5746_s23 + $0x158] sm:$0xf]  ;;  %210 = vst [vmem:[%s5753_s24 + $0xa4] sm:$0xf] %v209_v41 }
  0x31   : > { %212 = vst [vmem:[%s5753_s24 + $0xa8] sm:$0xf] %v211_v42  ;;  %214 = vst [vmem:[%s5753_s24 + $0xac] sm:$0xf] %v213_v43  ;;  %v215_v44 = vld [vmem:[%s5746_s23 + $0x160] sm:$0xf] }
  0x32   : > { %v217_v45 = vld [vmem:[%s5746_s23 + $0x168] sm:$0xf]  ;;  %v219_v46 = vld [vmem:[%s5746_s23 + $0x170] sm:$0xf]  ;;  %216 = vst [vmem:[%s5753_s24 + $0xb0] sm:$0xf] %v215_v44 }
  0x33   : > { %218 = vst [vmem:[%s5753_s24 + $0xb4] sm:$0xf] %v217_v45  ;;  %220 = vst [vmem:[%s5753_s24 + $0xb8] sm:$0xf] %v219_v46  ;;  %v221_v47 = vld [vmem:[%s5746_s23 + $0x178] sm:$0xf] }
  0x34   : > { %v223_v48 = vld [vmem:[%s5746_s23 + $0x180] sm:$0xf]  ;;  %v225_v49 = vld [vmem:[%s5746_s23 + $0x188] sm:$0xf]  ;;  %222 = vst [vmem:[%s5753_s24 + $0xbc] sm:$0xf] %v221_v47 }
  0x35   : > { %224 = vst [vmem:[%s5753_s24 + $0xc0] sm:$0xf] %v223_v48  ;;  %226 = vst [vmem:[%s5753_s24 + $0xc4] sm:$0xf] %v225_v49  ;;  %v227_v50 = vld [vmem:[%s5746_s23 + $0x190] sm:$0xf] }
  0x36   : > { %v229_v51 = vld [vmem:[%s5746_s23 + $0x198] sm:$0xf]  ;;  %v231_v52 = vld [vmem:[%s5746_s23 + $0x1a0] sm:$0xf]  ;;  %228 = vst [vmem:[%s5753_s24 + $0xc8] sm:$0xf] %v227_v50 }
  0x37   : > { %230 = vst [vmem:[%s5753_s24 + $0xcc] sm:$0xf] %v229_v51  ;;  %232 = vst [vmem:[%s5753_s24 + $0xd0] sm:$0xf] %v231_v52  ;;  %v233_v53 = vld [vmem:[%s5746_s23 + $0x1a8] sm:$0xf] }
  0x38   : > { %v235_v54 = vld [vmem:[%s5746_s23 + $0x1b0] sm:$0xf]  ;;  %v237_v55 = vld [vmem:[%s5746_s23 + $0x1b8] sm:$0xf]  ;;  %234 = vst [vmem:[%s5753_s24 + $0xd4] sm:$0xf] %v233_v53 }
  0x39   : > { %236 = vst [vmem:[%s5753_s24 + $0xd8] sm:$0xf] %v235_v54  ;;  %238 = vst [vmem:[%s5753_s24 + $0xdc] sm:$0xf] %v237_v55  ;;  %v239_v56 = vld [vmem:[%s5746_s23 + $0x1c0] sm:$0xf] }
  0x3a   : > { %v241_v57 = vld [vmem:[%s5746_s23 + $0x1c8] sm:$0xf]  ;;  %v243_v58 = vld [vmem:[%s5746_s23 + $0x1d0] sm:$0xf]  ;;  %240 = vst [vmem:[%s5753_s24 + $0xe0] sm:$0xf] %v239_v56 }
  0x3b   : > { %242 = vst [vmem:[%s5753_s24 + $0xe4] sm:$0xf] %v241_v57  ;;  %244 = vst [vmem:[%s5753_s24 + $0xe8] sm:$0xf] %v243_v58  ;;  %v245_v59 = vld [vmem:[%s5746_s23 + $0x1d8] sm:$0xf] }
  0x3c   : > { %v247_v60 = vld [vmem:[%s5746_s23 + $0x1e0] sm:$0xf]  ;;  %v249_v61 = vld [vmem:[%s5746_s23 + $0x1e8] sm:$0xf]  ;;  %246 = vst [vmem:[%s5753_s24 + $0xec] sm:$0xf] %v245_v59 }
  0x3d   : > { %248 = vst [vmem:[%s5753_s24 + $0xf0] sm:$0xf] %v247_v60  ;;  %250 = vst [vmem:[%s5753_s24 + $0xf4] sm:$0xf] %v249_v61  ;;  %v251_v62 = vld [vmem:[%s5746_s23 + $0x1f0] sm:$0xf] }
  0x3e   : > { %v253_v63 = vld [vmem:[%s5746_s23 + $0x1f8] sm:$0xf]  ;;  %v255_v0 = vld [vmem:[%s5746_s23 + $0x200] sm:$0xf]  ;;  %252 = vst [vmem:[%s5753_s24 + $0xf8] sm:$0xf] %v251_v62 }
  0x3f   : > { %254 = vst [vmem:[%s5753_s24 + $0xfc] sm:$0xf] %v253_v63  ;;  %256 = vst [vmem:[%s5753_s24 + $0x100] sm:$0xf] %v255_v0  ;;  %v257_v1 = vld [vmem:[%s5746_s23 + $0x208] sm:$0xf] }
  0x40   : > { %v259_v2 = vld [vmem:[%s5746_s23 + $0x210] sm:$0xf]  ;;  %v261_v3 = vld [vmem:[%s5746_s23 + $0x218] sm:$0xf]  ;;  %258 = vst [vmem:[%s5753_s24 + $0x104] sm:$0xf] %v257_v1 }
  0x41   : > { %260 = vst [vmem:[%s5753_s24 + $0x108] sm:$0xf] %v259_v2  ;;  %262 = vst [vmem:[%s5753_s24 + $0x10c] sm:$0xf] %v261_v3  ;;  %v263_v4 = vld [vmem:[%s5746_s23 + $0x220] sm:$0xf] }
  0x42   : > { %v265_v5 = vld [vmem:[%s5746_s23 + $0x228] sm:$0xf]  ;;  %v267_v6 = vld [vmem:[%s5746_s23 + $0x230] sm:$0xf]  ;;  %264 = vst [vmem:[%s5753_s24 + $0x110] sm:$0xf] %v263_v4 }
  0x43   : > { %266 = vst [vmem:[%s5753_s24 + $0x114] sm:$0xf] %v265_v5  ;;  %268 = vst [vmem:[%s5753_s24 + $0x118] sm:$0xf] %v267_v6  ;;  %v269_v7 = vld [vmem:[%s5746_s23 + $0x238] sm:$0xf] }
  0x44   : > { %v271_v8 = vld [vmem:[%s5746_s23 + $0x240] sm:$0xf]  ;;  %v273_v9 = vld [vmem:[%s5746_s23 + $0x248] sm:$0xf]  ;;  %270 = vst [vmem:[%s5753_s24 + $0x11c] sm:$0xf] %v269_v7 }
  0x45   : > { %272 = vst [vmem:[%s5753_s24 + $0x120] sm:$0xf] %v271_v8  ;;  %274 = vst [vmem:[%s5753_s24 + $0x124] sm:$0xf] %v273_v9  ;;  %v275_v10 = vld [vmem:[%s5746_s23 + $0x250] sm:$0xf] }
  0x46   : > { %v277_v11 = vld [vmem:[%s5746_s23 + $0x258] sm:$0xf]  ;;  %v279_v12 = vld [vmem:[%s5746_s23 + $0x260] sm:$0xf]  ;;  %276 = vst [vmem:[%s5753_s24 + $0x128] sm:$0xf] %v275_v10 }
  0x47   : > { %278 = vst [vmem:[%s5753_s24 + $0x12c] sm:$0xf] %v277_v11  ;;  %280 = vst [vmem:[%s5753_s24 + $0x130] sm:$0xf] %v279_v12  ;;  %v281_v13 = vld [vmem:[%s5746_s23 + $0x268] sm:$0xf] }
  0x48   : > { %v283_v14 = vld [vmem:[%s5746_s23 + $0x270] sm:$0xf]  ;;  %v285_v15 = vld [vmem:[%s5746_s23 + $0x278] sm:$0xf]  ;;  %282 = vst [vmem:[%s5753_s24 + $0x134] sm:$0xf] %v281_v13 }
  0x49   : > { %284 = vst [vmem:[%s5753_s24 + $0x138] sm:$0xf] %v283_v14  ;;  %286 = vst [vmem:[%s5753_s24 + $0x13c] sm:$0xf] %v285_v15  ;;  %v287_v16 = vld [vmem:[%s5746_s23 + $0x280] sm:$0xf] }
  0x4a   : > { %v289_v17 = vld [vmem:[%s5746_s23 + $0x288] sm:$0xf]  ;;  %v291_v18 = vld [vmem:[%s5746_s23 + $0x290] sm:$0xf]  ;;  %288 = vst [vmem:[%s5753_s24 + $0x140] sm:$0xf] %v287_v16 }
  0x4b   : > { %290 = vst [vmem:[%s5753_s24 + $0x144] sm:$0xf] %v289_v17  ;;  %292 = vst [vmem:[%s5753_s24 + $0x148] sm:$0xf] %v291_v18  ;;  %v293_v19 = vld [vmem:[%s5746_s23 + $0x298] sm:$0xf] }
  0x4c   : > { %v295_v20 = vld [vmem:[%s5746_s23 + $0x2a0] sm:$0xf]  ;;  %v297_v21 = vld [vmem:[%s5746_s23 + $0x2a8] sm:$0xf]  ;;  %294 = vst [vmem:[%s5753_s24 + $0x14c] sm:$0xf] %v293_v19 }
  0x4d   : > { %296 = vst [vmem:[%s5753_s24 + $0x150] sm:$0xf] %v295_v20  ;;  %298 = vst [vmem:[%s5753_s24 + $0x154] sm:$0xf] %v297_v21  ;;  %v299_v22 = vld [vmem:[%s5746_s23 + $0x2b0] sm:$0xf] }
  0x4e   : > { %v301_v23 = vld [vmem:[%s5746_s23 + $0x2b8] sm:$0xf]  ;;  %v303_v24 = vld [vmem:[%s5746_s23 + $0x2c0] sm:$0xf]  ;;  %300 = vst [vmem:[%s5753_s24 + $0x158] sm:$0xf] %v299_v22 }
  0x4f   : > { %302 = vst [vmem:[%s5753_s24 + $0x15c] sm:$0xf] %v301_v23  ;;  %304 = vst [vmem:[%s5753_s24 + $0x160] sm:$0xf] %v303_v24  ;;  %v305_v25 = vld [vmem:[%s5746_s23 + $0x2c8] sm:$0xf] }
  0x50   : > { %v307_v26 = vld [vmem:[%s5746_s23 + $0x2d0] sm:$0xf]  ;;  %v309_v27 = vld [vmem:[%s5746_s23 + $0x2d8] sm:$0xf]  ;;  %306 = vst [vmem:[%s5753_s24 + $0x164] sm:$0xf] %v305_v25 }
  0x51   : > { %308 = vst [vmem:[%s5753_s24 + $0x168] sm:$0xf] %v307_v26  ;;  %310 = vst [vmem:[%s5753_s24 + $0x16c] sm:$0xf] %v309_v27  ;;  %v311_v28 = vld [vmem:[%s5746_s23 + $0x2e0] sm:$0xf] }
  0x52   : > { %v313_v29 = vld [vmem:[%s5746_s23 + $0x2e8] sm:$0xf]  ;;  %v315_v30 = vld [vmem:[%s5746_s23 + $0x2f0] sm:$0xf]  ;;  %312 = vst [vmem:[%s5753_s24 + $0x170] sm:$0xf] %v311_v28 }
  0x53   : > { %314 = vst [vmem:[%s5753_s24 + $0x174] sm:$0xf] %v313_v29  ;;  %316 = vst [vmem:[%s5753_s24 + $0x178] sm:$0xf] %v315_v30  ;;  %v317_v31 = vld [vmem:[%s5746_s23 + $0x2f8] sm:$0xf] }
  0x54   : > { %v319_v32 = vld [vmem:[%s5746_s23 + $0x300] sm:$0xf]  ;;  %v321_v33 = vld [vmem:[%s5746_s23 + $0x308] sm:$0xf]  ;;  %318 = vst [vmem:[%s5753_s24 + $0x17c] sm:$0xf] %v317_v31 }
  0x55   : > { %320 = vst [vmem:[%s5753_s24 + $0x180] sm:$0xf] %v319_v32  ;;  %322 = vst [vmem:[%s5753_s24 + $0x184] sm:$0xf] %v321_v33  ;;  %v323_v34 = vld [vmem:[%s5746_s23 + $0x310] sm:$0xf] }
  0x56   : > { %v325_v35 = vld [vmem:[%s5746_s23 + $0x318] sm:$0xf]  ;;  %v327_v36 = vld [vmem:[%s5746_s23 + $0x320] sm:$0xf]  ;;  %324 = vst [vmem:[%s5753_s24 + $0x188] sm:$0xf] %v323_v34 }
  0x57   : > { %326 = vst [vmem:[%s5753_s24 + $0x18c] sm:$0xf] %v325_v35  ;;  %328 = vst [vmem:[%s5753_s24 + $0x190] sm:$0xf] %v327_v36  ;;  %v329_v37 = vld [vmem:[%s5746_s23 + $0x328] sm:$0xf] }
  0x58   : > { %v331_v38 = vld [vmem:[%s5746_s23 + $0x330] sm:$0xf]  ;;  %v333_v39 = vld [vmem:[%s5746_s23 + $0x338] sm:$0xf]  ;;  %330 = vst [vmem:[%s5753_s24 + $0x194] sm:$0xf] %v329_v37 }
  0x59   : > { %332 = vst [vmem:[%s5753_s24 + $0x198] sm:$0xf] %v331_v38  ;;  %334 = vst [vmem:[%s5753_s24 + $0x19c] sm:$0xf] %v333_v39  ;;  %v335_v40 = vld [vmem:[%s5746_s23 + $0x340] sm:$0xf] }
  0x5a   : > { %v337_v41 = vld [vmem:[%s5746_s23 + $0x348] sm:$0xf]  ;;  %v339_v42 = vld [vmem:[%s5746_s23 + $0x350] sm:$0xf]  ;;  %336 = vst [vmem:[%s5753_s24 + $0x1a0] sm:$0xf] %v335_v40 }
  0x5b   : > { %338 = vst [vmem:[%s5753_s24 + $0x1a4] sm:$0xf] %v337_v41  ;;  %340 = vst [vmem:[%s5753_s24 + $0x1a8] sm:$0xf] %v339_v42  ;;  %v341_v43 = vld [vmem:[%s5746_s23 + $0x358] sm:$0xf] }
  0x5c   : > { %v343_v44 = vld [vmem:[%s5746_s23 + $0x360] sm:$0xf]  ;;  %v345_v45 = vld [vmem:[%s5746_s23 + $0x368] sm:$0xf]  ;;  %342 = vst [vmem:[%s5753_s24 + $0x1ac] sm:$0xf] %v341_v43 }
  0x5d   : > { %344 = vst [vmem:[%s5753_s24 + $0x1b0] sm:$0xf] %v343_v44  ;;  %346 = vst [vmem:[%s5753_s24 + $0x1b4] sm:$0xf] %v345_v45  ;;  %v347_v46 = vld [vmem:[%s5746_s23 + $0x370] sm:$0xf] }
  0x5e   : > { %v349_v47 = vld [vmem:[%s5746_s23 + $0x378] sm:$0xf]  ;;  %v351_v48 = vld [vmem:[%s5746_s23 + $0x380] sm:$0xf]  ;;  %348 = vst [vmem:[%s5753_s24 + $0x1b8] sm:$0xf] %v347_v46 }
  0x5f   : > { %350 = vst [vmem:[%s5753_s24 + $0x1bc] sm:$0xf] %v349_v47  ;;  %352 = vst [vmem:[%s5753_s24 + $0x1c0] sm:$0xf] %v351_v48  ;;  %v353_v49 = vld [vmem:[%s5746_s23 + $0x388] sm:$0xf] }
  0x60   : > { %v355_v50 = vld [vmem:[%s5746_s23 + $0x390] sm:$0xf]  ;;  %v357_v51 = vld [vmem:[%s5746_s23 + $0x398] sm:$0xf]  ;;  %354 = vst [vmem:[%s5753_s24 + $0x1c4] sm:$0xf] %v353_v49 }
  0x61   : > { %356 = vst [vmem:[%s5753_s24 + $0x1c8] sm:$0xf] %v355_v50  ;;  %358 = vst [vmem:[%s5753_s24 + $0x1cc] sm:$0xf] %v357_v51  ;;  %v359_v52 = vld [vmem:[%s5746_s23 + $0x3a0] sm:$0xf] }
  0x62   : > { %v361_v53 = vld [vmem:[%s5746_s23 + $0x3a8] sm:$0xf]  ;;  %v363_v54 = vld [vmem:[%s5746_s23 + $0x3b0] sm:$0xf]  ;;  %360 = vst [vmem:[%s5753_s24 + $0x1d0] sm:$0xf] %v359_v52 }
  0x63   : > { %362 = vst [vmem:[%s5753_s24 + $0x1d4] sm:$0xf] %v361_v53  ;;  %364 = vst [vmem:[%s5753_s24 + $0x1d8] sm:$0xf] %v363_v54  ;;  %v365_v55 = vld [vmem:[%s5746_s23 + $0x3b8] sm:$0xf] }
  0x64   : > { %v367_v56 = vld [vmem:[%s5746_s23 + $0x3c0] sm:$0xf]  ;;  %v369_v57 = vld [vmem:[%s5746_s23 + $0x3c8] sm:$0xf]  ;;  %366 = vst [vmem:[%s5753_s24 + $0x1dc] sm:$0xf] %v365_v55 }
  0x65   : > { %368 = vst [vmem:[%s5753_s24 + $0x1e0] sm:$0xf] %v367_v56  ;;  %370 = vst [vmem:[%s5753_s24 + $0x1e4] sm:$0xf] %v369_v57  ;;  %v371_v58 = vld [vmem:[%s5746_s23 + $0x3d0] sm:$0xf] }
  0x66   : > { %v373_v59 = vld [vmem:[%s5746_s23 + $0x3d8] sm:$0xf]  ;;  %v375_v60 = vld [vmem:[%s5746_s23 + $0x3e0] sm:$0xf]  ;;  %372 = vst [vmem:[%s5753_s24 + $0x1e8] sm:$0xf] %v371_v58 }
  0x67   : > { %374 = vst [vmem:[%s5753_s24 + $0x1ec] sm:$0xf] %v373_v59  ;;  %376 = vst [vmem:[%s5753_s24 + $0x1f0] sm:$0xf] %v375_v60  ;;  %v377_v61 = vld [vmem:[%s5746_s23 + $0x3e8] sm:$0xf] }
  0x68   : > { %v379_v62 = vld [vmem:[%s5746_s23 + $0x3f0] sm:$0xf]  ;;  %v381_v63 = vld [vmem:[%s5746_s23 + $0x3f8] sm:$0xf]  ;;  %378 = vst [vmem:[%s5753_s24 + $0x1f4] sm:$0xf] %v377_v61 }
  0x69   : > { %380 = vst [vmem:[%s5753_s24 + $0x1f8] sm:$0xf] %v379_v62  ;;  %382 = vst [vmem:[%s5753_s24 + $0x1fc] sm:$0xf] %v381_v63  ;;  %v383_v0 = vld [vmem:[%s5746_s23 + $0x400] sm:$0xf] }
  0x6a   : > { %v385_v1 = vld [vmem:[%s5746_s23 + $0x408] sm:$0xf]  ;;  %v387_v2 = vld [vmem:[%s5746_s23 + $0x410] sm:$0xf]  ;;  %384 = vst [vmem:[%s5753_s24 + $0x200] sm:$0xf] %v383_v0 }
  0x6b   : > { %386 = vst [vmem:[%s5753_s24 + $0x204] sm:$0xf] %v385_v1  ;;  %388 = vst [vmem:[%s5753_s24 + $0x208] sm:$0xf] %v387_v2  ;;  %v389_v3 = vld [vmem:[%s5746_s23 + $0x418] sm:$0xf] }
  0x6c   : > { %v391_v4 = vld [vmem:[%s5746_s23 + $0x420] sm:$0xf]  ;;  %v393_v5 = vld [vmem:[%s5746_s23 + $0x428] sm:$0xf]  ;;  %390 = vst [vmem:[%s5753_s24 + $0x20c] sm:$0xf] %v389_v3 }
  0x6d   : > { %392 = vst [vmem:[%s5753_s24 + $0x210] sm:$0xf] %v391_v4  ;;  %394 = vst [vmem:[%s5753_s24 + $0x214] sm:$0xf] %v393_v5  ;;  %v395_v6 = vld [vmem:[%s5746_s23 + $0x430] sm:$0xf] }
  0x6e   : > { %v397_v7 = vld [vmem:[%s5746_s23 + $0x438] sm:$0xf]  ;;  %v399_v8 = vld [vmem:[%s5746_s23 + $0x440] sm:$0xf]  ;;  %396 = vst [vmem:[%s5753_s24 + $0x218] sm:$0xf] %v395_v6 }
  0x6f   : > { %398 = vst [vmem:[%s5753_s24 + $0x21c] sm:$0xf] %v397_v7  ;;  %400 = vst [vmem:[%s5753_s24 + $0x220] sm:$0xf] %v399_v8  ;;  %v401_v9 = vld [vmem:[%s5746_s23 + $0x448] sm:$0xf] }
  0x70   : > { %v403_v10 = vld [vmem:[%s5746_s23 + $0x450] sm:$0xf]  ;;  %v405_v11 = vld [vmem:[%s5746_s23 + $0x458] sm:$0xf]  ;;  %402 = vst [vmem:[%s5753_s24 + $0x224] sm:$0xf] %v401_v9 }
  0x71   : > { %404 = vst [vmem:[%s5753_s24 + $0x228] sm:$0xf] %v403_v10  ;;  %406 = vst [vmem:[%s5753_s24 + $0x22c] sm:$0xf] %v405_v11  ;;  %v407_v12 = vld [vmem:[%s5746_s23 + $0x460] sm:$0xf] }
  0x72   : > { %v409_v13 = vld [vmem:[%s5746_s23 + $0x468] sm:$0xf]  ;;  %v411_v14 = vld [vmem:[%s5746_s23 + $0x470] sm:$0xf]  ;;  %408 = vst [vmem:[%s5753_s24 + $0x230] sm:$0xf] %v407_v12 }
  0x73   : > { %410 = vst [vmem:[%s5753_s24 + $0x234] sm:$0xf] %v409_v13  ;;  %412 = vst [vmem:[%s5753_s24 + $0x238] sm:$0xf] %v411_v14  ;;  %v413_v15 = vld [vmem:[%s5746_s23 + $0x478] sm:$0xf] }
  0x74   : > { %v415_v16 = vld [vmem:[%s5746_s23 + $0x480] sm:$0xf]  ;;  %v417_v17 = vld [vmem:[%s5746_s23 + $0x488] sm:$0xf]  ;;  %414 = vst [vmem:[%s5753_s24 + $0x23c] sm:$0xf] %v413_v15 }
  0x75   : > { %416 = vst [vmem:[%s5753_s24 + $0x240] sm:$0xf] %v415_v16  ;;  %418 = vst [vmem:[%s5753_s24 + $0x244] sm:$0xf] %v417_v17  ;;  %v419_v18 = vld [vmem:[%s5746_s23 + $0x490] sm:$0xf] }
  0x76   : > { %v421_v19 = vld [vmem:[%s5746_s23 + $0x498] sm:$0xf]  ;;  %v423_v20 = vld [vmem:[%s5746_s23 + $0x4a0] sm:$0xf]  ;;  %420 = vst [vmem:[%s5753_s24 + $0x248] sm:$0xf] %v419_v18 }
  0x77   : > { %422 = vst [vmem:[%s5753_s24 + $0x24c] sm:$0xf] %v421_v19  ;;  %424 = vst [vmem:[%s5753_s24 + $0x250] sm:$0xf] %v423_v20  ;;  %v425_v21 = vld [vmem:[%s5746_s23 + $0x4a8] sm:$0xf] }
  0x78   : > { %v427_v22 = vld [vmem:[%s5746_s23 + $0x4b0] sm:$0xf]  ;;  %v429_v23 = vld [vmem:[%s5746_s23 + $0x4b8] sm:$0xf]  ;;  %426 = vst [vmem:[%s5753_s24 + $0x254] sm:$0xf] %v425_v21 }
  0x79   : > { %428 = vst [vmem:[%s5753_s24 + $0x258] sm:$0xf] %v427_v22  ;;  %430 = vst [vmem:[%s5753_s24 + $0x25c] sm:$0xf] %v429_v23  ;;  %v431_v24 = vld [vmem:[%s5746_s23 + $0x4c0] sm:$0xf] }
  0x7a   : > { %v433_v25 = vld [vmem:[%s5746_s23 + $0x4c8] sm:$0xf]  ;;  %v435_v26 = vld [vmem:[%s5746_s23 + $0x4d0] sm:$0xf]  ;;  %432 = vst [vmem:[%s5753_s24 + $0x260] sm:$0xf] %v431_v24 }
  0x7b   : > { %434 = vst [vmem:[%s5753_s24 + $0x264] sm:$0xf] %v433_v25  ;;  %436 = vst [vmem:[%s5753_s24 + $0x268] sm:$0xf] %v435_v26  ;;  %v437_v27 = vld [vmem:[%s5746_s23 + $0x4d8] sm:$0xf] }
  0x7c   : > { %v439_v28 = vld [vmem:[%s5746_s23 + $0x4e0] sm:$0xf]  ;;  %v441_v29 = vld [vmem:[%s5746_s23 + $0x4e8] sm:$0xf]  ;;  %438 = vst [vmem:[%s5753_s24 + $0x26c] sm:$0xf] %v437_v27 }
  0x7d   : > { %440 = vst [vmem:[%s5753_s24 + $0x270] sm:$0xf] %v439_v28  ;;  %442 = vst [vmem:[%s5753_s24 + $0x274] sm:$0xf] %v441_v29  ;;  %v443_v30 = vld [vmem:[%s5746_s23 + $0x4f0] sm:$0xf] }
  0x7e   : > { %v445_v31 = vld [vmem:[%s5746_s23 + $0x4f8] sm:$0xf]  ;;  %v447_v32 = vld [vmem:[%s5746_s23 + $0x500] sm:$0xf]  ;;  %444 = vst [vmem:[%s5753_s24 + $0x278] sm:$0xf] %v443_v30 }
  0x7f   : > { %446 = vst [vmem:[%s5753_s24 + $0x27c] sm:$0xf] %v445_v31  ;;  %448 = vst [vmem:[%s5753_s24 + $0x280] sm:$0xf] %v447_v32  ;;  %v449_v33 = vld [vmem:[%s5746_s23 + $0x508] sm:$0xf] }
  0x80   : > { %v451_v34 = vld [vmem:[%s5746_s23 + $0x510] sm:$0xf]  ;;  %v453_v35 = vld [vmem:[%s5746_s23 + $0x518] sm:$0xf]  ;;  %450 = vst [vmem:[%s5753_s24 + $0x284] sm:$0xf] %v449_v33 }
  0x81   : > { %452 = vst [vmem:[%s5753_s24 + $0x288] sm:$0xf] %v451_v34  ;;  %454 = vst [vmem:[%s5753_s24 + $0x28c] sm:$0xf] %v453_v35  ;;  %v455_v36 = vld [vmem:[%s5746_s23 + $0x520] sm:$0xf] }
  0x82   : > { %v457_v37 = vld [vmem:[%s5746_s23 + $0x528] sm:$0xf]  ;;  %v459_v38 = vld [vmem:[%s5746_s23 + $0x530] sm:$0xf]  ;;  %456 = vst [vmem:[%s5753_s24 + $0x290] sm:$0xf] %v455_v36 }
  0x83   : > { %458 = vst [vmem:[%s5753_s24 + $0x294] sm:$0xf] %v457_v37  ;;  %460 = vst [vmem:[%s5753_s24 + $0x298] sm:$0xf] %v459_v38  ;;  %v461_v39 = vld [vmem:[%s5746_s23 + $0x538] sm:$0xf] }
  0x84   : > { %v463_v40 = vld [vmem:[%s5746_s23 + $0x540] sm:$0xf]  ;;  %v465_v41 = vld [vmem:[%s5746_s23 + $0x548] sm:$0xf]  ;;  %462 = vst [vmem:[%s5753_s24 + $0x29c] sm:$0xf] %v461_v39 }
  0x85   : > { %464 = vst [vmem:[%s5753_s24 + $0x2a0] sm:$0xf] %v463_v40  ;;  %466 = vst [vmem:[%s5753_s24 + $0x2a4] sm:$0xf] %v465_v41  ;;  %v467_v42 = vld [vmem:[%s5746_s23 + $0x550] sm:$0xf] }
  0x86   : > { %v469_v43 = vld [vmem:[%s5746_s23 + $0x558] sm:$0xf]  ;;  %v471_v44 = vld [vmem:[%s5746_s23 + $0x560] sm:$0xf]  ;;  %468 = vst [vmem:[%s5753_s24 + $0x2a8] sm:$0xf] %v467_v42 }
  0x87   : > { %470 = vst [vmem:[%s5753_s24 + $0x2ac] sm:$0xf] %v469_v43  ;;  %472 = vst [vmem:[%s5753_s24 + $0x2b0] sm:$0xf] %v471_v44  ;;  %v473_v45 = vld [vmem:[%s5746_s23 + $0x568] sm:$0xf] }
  0x88   : > { %v475_v46 = vld [vmem:[%s5746_s23 + $0x570] sm:$0xf]  ;;  %v477_v47 = vld [vmem:[%s5746_s23 + $0x578] sm:$0xf]  ;;  %474 = vst [vmem:[%s5753_s24 + $0x2b4] sm:$0xf] %v473_v45 }
  0x89   : > { %476 = vst [vmem:[%s5753_s24 + $0x2b8] sm:$0xf] %v475_v46  ;;  %478 = vst [vmem:[%s5753_s24 + $0x2bc] sm:$0xf] %v477_v47  ;;  %v479_v48 = vld [vmem:[%s5746_s23 + $0x580] sm:$0xf] }
  0x8a   : > { %v481_v49 = vld [vmem:[%s5746_s23 + $0x588] sm:$0xf]  ;;  %v483_v50 = vld [vmem:[%s5746_s23 + $0x590] sm:$0xf]  ;;  %480 = vst [vmem:[%s5753_s24 + $0x2c0] sm:$0xf] %v479_v48 }
  0x8b   : > { %482 = vst [vmem:[%s5753_s24 + $0x2c4] sm:$0xf] %v481_v49  ;;  %484 = vst [vmem:[%s5753_s24 + $0x2c8] sm:$0xf] %v483_v50  ;;  %v485_v51 = vld [vmem:[%s5746_s23 + $0x598] sm:$0xf] }
  0x8c   : > { %v487_v52 = vld [vmem:[%s5746_s23 + $0x5a0] sm:$0xf]  ;;  %v489_v53 = vld [vmem:[%s5746_s23 + $0x5a8] sm:$0xf]  ;;  %486 = vst [vmem:[%s5753_s24 + $0x2cc] sm:$0xf] %v485_v51 }
  0x8d   : > { %488 = vst [vmem:[%s5753_s24 + $0x2d0] sm:$0xf] %v487_v52  ;;  %490 = vst [vmem:[%s5753_s24 + $0x2d4] sm:$0xf] %v489_v53  ;;  %v491_v54 = vld [vmem:[%s5746_s23 + $0x5b0] sm:$0xf] }
  0x8e   : > { %v493_v55 = vld [vmem:[%s5746_s23 + $0x5b8] sm:$0xf]  ;;  %v495_v56 = vld [vmem:[%s5746_s23 + $0x5c0] sm:$0xf]  ;;  %492 = vst [vmem:[%s5753_s24 + $0x2d8] sm:$0xf] %v491_v54 }
  0x8f   : > { %494 = vst [vmem:[%s5753_s24 + $0x2dc] sm:$0xf] %v493_v55  ;;  %496 = vst [vmem:[%s5753_s24 + $0x2e0] sm:$0xf] %v495_v56  ;;  %v497_v57 = vld [vmem:[%s5746_s23 + $0x5c8] sm:$0xf] }
  0x90   : > { %v499_v58 = vld [vmem:[%s5746_s23 + $0x5d0] sm:$0xf]  ;;  %v501_v59 = vld [vmem:[%s5746_s23 + $0x5d8] sm:$0xf]  ;;  %498 = vst [vmem:[%s5753_s24 + $0x2e4] sm:$0xf] %v497_v57 }
  0x91   : > { %500 = vst [vmem:[%s5753_s24 + $0x2e8] sm:$0xf] %v499_v58  ;;  %502 = vst [vmem:[%s5753_s24 + $0x2ec] sm:$0xf] %v501_v59  ;;  %v503_v60 = vld [vmem:[%s5746_s23 + $0x5e0] sm:$0xf] }
  0x92   : > { %v505_v61 = vld [vmem:[%s5746_s23 + $0x5e8] sm:$0xf]  ;;  %v507_v62 = vld [vmem:[%s5746_s23 + $0x5f0] sm:$0xf]  ;;  %504 = vst [vmem:[%s5753_s24 + $0x2f0] sm:$0xf] %v503_v60 }
  0x93   : > { %506 = vst [vmem:[%s5753_s24 + $0x2f4] sm:$0xf] %v505_v61  ;;  %508 = vst [vmem:[%s5753_s24 + $0x2f8] sm:$0xf] %v507_v62  ;;  %v509_v63 = vld [vmem:[%s5746_s23 + $0x5f8] sm:$0xf] }
  0x94   : > { %v511_v0 = vld [vmem:[%s5746_s23 + $0x600] sm:$0xf]  ;;  %v513_v1 = vld [vmem:[%s5746_s23 + $0x608] sm:$0xf]  ;;  %510 = vst [vmem:[%s5753_s24 + $0x2fc] sm:$0xf] %v509_v63 }
  0x95   : > { %512 = vst [vmem:[%s5753_s24 + $0x300] sm:$0xf] %v511_v0  ;;  %514 = vst [vmem:[%s5753_s24 + $0x304] sm:$0xf] %v513_v1  ;;  %v515_v2 = vld [vmem:[%s5746_s23 + $0x610] sm:$0xf] }
  0x96   : > { %v517_v3 = vld [vmem:[%s5746_s23 + $0x618] sm:$0xf]  ;;  %v519_v4 = vld [vmem:[%s5746_s23 + $0x620] sm:$0xf]  ;;  %516 = vst [vmem:[%s5753_s24 + $0x308] sm:$0xf] %v515_v2 }
  0x97   : > { %518 = vst [vmem:[%s5753_s24 + $0x30c] sm:$0xf] %v517_v3  ;;  %520 = vst [vmem:[%s5753_s24 + $0x310] sm:$0xf] %v519_v4  ;;  %v521_v5 = vld [vmem:[%s5746_s23 + $0x628] sm:$0xf] }
  0x98   : > { %v523_v6 = vld [vmem:[%s5746_s23 + $0x630] sm:$0xf]  ;;  %v525_v7 = vld [vmem:[%s5746_s23 + $0x638] sm:$0xf]  ;;  %522 = vst [vmem:[%s5753_s24 + $0x314] sm:$0xf] %v521_v5 }
  0x99   : > { %524 = vst [vmem:[%s5753_s24 + $0x318] sm:$0xf] %v523_v6  ;;  %526 = vst [vmem:[%s5753_s24 + $0x31c] sm:$0xf] %v525_v7  ;;  %v527_v8 = vld [vmem:[%s5746_s23 + $0x640] sm:$0xf] }
  0x9a   : > { %v529_v9 = vld [vmem:[%s5746_s23 + $0x648] sm:$0xf]  ;;  %v531_v10 = vld [vmem:[%s5746_s23 + $0x650] sm:$0xf]  ;;  %528 = vst [vmem:[%s5753_s24 + $0x320] sm:$0xf] %v527_v8 }
  0x9b   : > { %530 = vst [vmem:[%s5753_s24 + $0x324] sm:$0xf] %v529_v9  ;;  %532 = vst [vmem:[%s5753_s24 + $0x328] sm:$0xf] %v531_v10  ;;  %v533_v11 = vld [vmem:[%s5746_s23 + $0x658] sm:$0xf] }
  0x9c   : > { %v535_v12 = vld [vmem:[%s5746_s23 + $0x660] sm:$0xf]  ;;  %v537_v13 = vld [vmem:[%s5746_s23 + $0x668] sm:$0xf]  ;;  %534 = vst [vmem:[%s5753_s24 + $0x32c] sm:$0xf] %v533_v11 }
  0x9d   : > { %536 = vst [vmem:[%s5753_s24 + $0x330] sm:$0xf] %v535_v12  ;;  %538 = vst [vmem:[%s5753_s24 + $0x334] sm:$0xf] %v537_v13  ;;  %v539_v14 = vld [vmem:[%s5746_s23 + $0x670] sm:$0xf] }
  0x9e   : > { %v541_v15 = vld [vmem:[%s5746_s23 + $0x678] sm:$0xf]  ;;  %v543_v16 = vld [vmem:[%s5746_s23 + $0x680] sm:$0xf]  ;;  %540 = vst [vmem:[%s5753_s24 + $0x338] sm:$0xf] %v539_v14 }
  0x9f   : > { %542 = vst [vmem:[%s5753_s24 + $0x33c] sm:$0xf] %v541_v15  ;;  %544 = vst [vmem:[%s5753_s24 + $0x340] sm:$0xf] %v543_v16  ;;  %v545_v17 = vld [vmem:[%s5746_s23 + $0x688] sm:$0xf] }
  0xa0   : > { %v547_v18 = vld [vmem:[%s5746_s23 + $0x690] sm:$0xf]  ;;  %v549_v19 = vld [vmem:[%s5746_s23 + $0x698] sm:$0xf]  ;;  %546 = vst [vmem:[%s5753_s24 + $0x344] sm:$0xf] %v545_v17 }
  0xa1   : > { %548 = vst [vmem:[%s5753_s24 + $0x348] sm:$0xf] %v547_v18  ;;  %550 = vst [vmem:[%s5753_s24 + $0x34c] sm:$0xf] %v549_v19  ;;  %v551_v20 = vld [vmem:[%s5746_s23 + $0x6a0] sm:$0xf] }
  0xa2   : > { %v553_v21 = vld [vmem:[%s5746_s23 + $0x6a8] sm:$0xf]  ;;  %v555_v22 = vld [vmem:[%s5746_s23 + $0x6b0] sm:$0xf]  ;;  %552 = vst [vmem:[%s5753_s24 + $0x350] sm:$0xf] %v551_v20 }
  0xa3   : > { %554 = vst [vmem:[%s5753_s24 + $0x354] sm:$0xf] %v553_v21  ;;  %556 = vst [vmem:[%s5753_s24 + $0x358] sm:$0xf] %v555_v22  ;;  %v557_v23 = vld [vmem:[%s5746_s23 + $0x6b8] sm:$0xf] }
  0xa4   : > { %v559_v24 = vld [vmem:[%s5746_s23 + $0x6c0] sm:$0xf]  ;;  %v561_v25 = vld [vmem:[%s5746_s23 + $0x6c8] sm:$0xf]  ;;  %558 = vst [vmem:[%s5753_s24 + $0x35c] sm:$0xf] %v557_v23 }
  0xa5   : > { %560 = vst [vmem:[%s5753_s24 + $0x360] sm:$0xf] %v559_v24  ;;  %562 = vst [vmem:[%s5753_s24 + $0x364] sm:$0xf] %v561_v25  ;;  %v563_v26 = vld [vmem:[%s5746_s23 + $0x6d0] sm:$0xf] }
  0xa6   : > { %v565_v27 = vld [vmem:[%s5746_s23 + $0x6d8] sm:$0xf]  ;;  %v567_v28 = vld [vmem:[%s5746_s23 + $0x6e0] sm:$0xf]  ;;  %564 = vst [vmem:[%s5753_s24 + $0x368] sm:$0xf] %v563_v26 }
  0xa7   : > { %566 = vst [vmem:[%s5753_s24 + $0x36c] sm:$0xf] %v565_v27  ;;  %568 = vst [vmem:[%s5753_s24 + $0x370] sm:$0xf] %v567_v28  ;;  %v569_v29 = vld [vmem:[%s5746_s23 + $0x6e8] sm:$0xf] }
  0xa8   : > { %v571_v30 = vld [vmem:[%s5746_s23 + $0x6f0] sm:$0xf]  ;;  %v573_v31 = vld [vmem:[%s5746_s23 + $0x6f8] sm:$0xf]  ;;  %570 = vst [vmem:[%s5753_s24 + $0x374] sm:$0xf] %v569_v29 }
  0xa9   : > { %572 = vst [vmem:[%s5753_s24 + $0x378] sm:$0xf] %v571_v30  ;;  %574 = vst [vmem:[%s5753_s24 + $0x37c] sm:$0xf] %v573_v31  ;;  %v575_v32 = vld [vmem:[%s5746_s23 + $0x700] sm:$0xf] }
  0xaa   : > { %v577_v33 = vld [vmem:[%s5746_s23 + $0x708] sm:$0xf]  ;;  %v579_v34 = vld [vmem:[%s5746_s23 + $0x710] sm:$0xf]  ;;  %576 = vst [vmem:[%s5753_s24 + $0x380] sm:$0xf] %v575_v32 }
  0xab   : > { %578 = vst [vmem:[%s5753_s24 + $0x384] sm:$0xf] %v577_v33  ;;  %580 = vst [vmem:[%s5753_s24 + $0x388] sm:$0xf] %v579_v34  ;;  %v581_v35 = vld [vmem:[%s5746_s23 + $0x718] sm:$0xf] }
  0xac   : > { %v583_v36 = vld [vmem:[%s5746_s23 + $0x720] sm:$0xf]  ;;  %v585_v37 = vld [vmem:[%s5746_s23 + $0x728] sm:$0xf]  ;;  %582 = vst [vmem:[%s5753_s24 + $0x38c] sm:$0xf] %v581_v35 }
  0xad   : > { %584 = vst [vmem:[%s5753_s24 + $0x390] sm:$0xf] %v583_v36  ;;  %586 = vst [vmem:[%s5753_s24 + $0x394] sm:$0xf] %v585_v37  ;;  %v587_v38 = vld [vmem:[%s5746_s23 + $0x730] sm:$0xf] }
  0xae   : > { %v589_v39 = vld [vmem:[%s5746_s23 + $0x738] sm:$0xf]  ;;  %v591_v40 = vld [vmem:[%s5746_s23 + $0x740] sm:$0xf]  ;;  %588 = vst [vmem:[%s5753_s24 + $0x398] sm:$0xf] %v587_v38 }
  0xaf   : > { %590 = vst [vmem:[%s5753_s24 + $0x39c] sm:$0xf] %v589_v39  ;;  %592 = vst [vmem:[%s5753_s24 + $0x3a0] sm:$0xf] %v591_v40  ;;  %v593_v41 = vld [vmem:[%s5746_s23 + $0x748] sm:$0xf] }
  0xb0   : > { %v595_v42 = vld [vmem:[%s5746_s23 + $0x750] sm:$0xf]  ;;  %v597_v43 = vld [vmem:[%s5746_s23 + $0x758] sm:$0xf]  ;;  %594 = vst [vmem:[%s5753_s24 + $0x3a4] sm:$0xf] %v593_v41 }
  0xb1   : > { %596 = vst [vmem:[%s5753_s24 + $0x3a8] sm:$0xf] %v595_v42  ;;  %598 = vst [vmem:[%s5753_s24 + $0x3ac] sm:$0xf] %v597_v43  ;;  %v599_v44 = vld [vmem:[%s5746_s23 + $0x760] sm:$0xf] }
  0xb2   : > { %v601_v45 = vld [vmem:[%s5746_s23 + $0x768] sm:$0xf]  ;;  %v603_v46 = vld [vmem:[%s5746_s23 + $0x770] sm:$0xf]  ;;  %600 = vst [vmem:[%s5753_s24 + $0x3b0] sm:$0xf] %v599_v44 }
  0xb3   : > { %602 = vst [vmem:[%s5753_s24 + $0x3b4] sm:$0xf] %v601_v45  ;;  %604 = vst [vmem:[%s5753_s24 + $0x3b8] sm:$0xf] %v603_v46  ;;  %v605_v47 = vld [vmem:[%s5746_s23 + $0x778] sm:$0xf] }
  0xb4   : > { %v607_v48 = vld [vmem:[%s5746_s23 + $0x780] sm:$0xf]  ;;  %v609_v49 = vld [vmem:[%s5746_s23 + $0x788] sm:$0xf]  ;;  %606 = vst [vmem:[%s5753_s24 + $0x3bc] sm:$0xf] %v605_v47 }
  0xb5   : > { %608 = vst [vmem:[%s5753_s24 + $0x3c0] sm:$0xf] %v607_v48  ;;  %610 = vst [vmem:[%s5753_s24 + $0x3c4] sm:$0xf] %v609_v49  ;;  %v611_v50 = vld [vmem:[%s5746_s23 + $0x790] sm:$0xf] }
  0xb6   : > { %v613_v51 = vld [vmem:[%s5746_s23 + $0x798] sm:$0xf]  ;;  %v615_v52 = vld [vmem:[%s5746_s23 + $0x7a0] sm:$0xf]  ;;  %612 = vst [vmem:[%s5753_s24 + $0x3c8] sm:$0xf] %v611_v50 }
  0xb7   : > { %614 = vst [vmem:[%s5753_s24 + $0x3cc] sm:$0xf] %v613_v51  ;;  %616 = vst [vmem:[%s5753_s24 + $0x3d0] sm:$0xf] %v615_v52  ;;  %v617_v53 = vld [vmem:[%s5746_s23 + $0x7a8] sm:$0xf] }
  0xb8   : > { %v619_v54 = vld [vmem:[%s5746_s23 + $0x7b0] sm:$0xf]  ;;  %v621_v55 = vld [vmem:[%s5746_s23 + $0x7b8] sm:$0xf]  ;;  %618 = vst [vmem:[%s5753_s24 + $0x3d4] sm:$0xf] %v617_v53 }
  0xb9   : > { %620 = vst [vmem:[%s5753_s24 + $0x3d8] sm:$0xf] %v619_v54  ;;  %622 = vst [vmem:[%s5753_s24 + $0x3dc] sm:$0xf] %v621_v55  ;;  %v623_v56 = vld [vmem:[%s5746_s23 + $0x7c0] sm:$0xf] }
  0xba   : > { %v625_v57 = vld [vmem:[%s5746_s23 + $0x7c8] sm:$0xf]  ;;  %v627_v58 = vld [vmem:[%s5746_s23 + $0x7d0] sm:$0xf]  ;;  %624 = vst [vmem:[%s5753_s24 + $0x3e0] sm:$0xf] %v623_v56 }
  0xbb   : > { %626 = vst [vmem:[%s5753_s24 + $0x3e4] sm:$0xf] %v625_v57  ;;  %628 = vst [vmem:[%s5753_s24 + $0x3e8] sm:$0xf] %v627_v58  ;;  %v629_v59 = vld [vmem:[%s5746_s23 + $0x7d8] sm:$0xf] }
  0xbc   : > { %v631_v60 = vld [vmem:[%s5746_s23 + $0x7e0] sm:$0xf]  ;;  %v633_v61 = vld [vmem:[%s5746_s23 + $0x7e8] sm:$0xf]  ;;  %630 = vst [vmem:[%s5753_s24 + $0x3ec] sm:$0xf] %v629_v59 }
  0xbd   : > { %632 = vst [vmem:[%s5753_s24 + $0x3f0] sm:$0xf] %v631_v60  ;;  %634 = vst [vmem:[%s5753_s24 + $0x3f4] sm:$0xf] %v633_v61  ;;  %v635_v62 = vld [vmem:[%s5746_s23 + $0x7f0] sm:$0xf] }
  0xbe   : > { %v637_v63 = vld [vmem:[%s5746_s23 + $0x7f8] sm:$0xf]  ;;  %v639_v0 = vld [vmem:[%s5746_s23 + $0x800] sm:$0xf]  ;;  %636 = vst [vmem:[%s5753_s24 + $0x3f8] sm:$0xf] %v635_v62 }
  0xbf   : > { %638 = vst [vmem:[%s5753_s24 + $0x3fc] sm:$0xf] %v637_v63  ;;  %640 = vst [vmem:[%s5753_s24 + $0x400] sm:$0xf] %v639_v0  ;;  %v641_v1 = vld [vmem:[%s5746_s23 + $0x808] sm:$0xf] }
  0xc0   : > { %v643_v2 = vld [vmem:[%s5746_s23 + $0x810] sm:$0xf]  ;;  %v645_v3 = vld [vmem:[%s5746_s23 + $0x818] sm:$0xf]  ;;  %642 = vst [vmem:[%s5753_s24 + $0x404] sm:$0xf] %v641_v1 }
  0xc1   : > { %644 = vst [vmem:[%s5753_s24 + $0x408] sm:$0xf] %v643_v2  ;;  %646 = vst [vmem:[%s5753_s24 + $0x40c] sm:$0xf] %v645_v3  ;;  %v647_v4 = vld [vmem:[%s5746_s23 + $0x820] sm:$0xf] }
  0xc2   : > { %v649_v5 = vld [vmem:[%s5746_s23 + $0x828] sm:$0xf]  ;;  %v651_v6 = vld [vmem:[%s5746_s23 + $0x830] sm:$0xf]  ;;  %648 = vst [vmem:[%s5753_s24 + $0x410] sm:$0xf] %v647_v4 }
  0xc3   : > { %650 = vst [vmem:[%s5753_s24 + $0x414] sm:$0xf] %v649_v5  ;;  %652 = vst [vmem:[%s5753_s24 + $0x418] sm:$0xf] %v651_v6  ;;  %v653_v7 = vld [vmem:[%s5746_s23 + $0x838] sm:$0xf] }
  0xc4   : > { %v655_v8 = vld [vmem:[%s5746_s23 + $0x840] sm:$0xf]  ;;  %v657_v9 = vld [vmem:[%s5746_s23 + $0x848] sm:$0xf]  ;;  %654 = vst [vmem:[%s5753_s24 + $0x41c] sm:$0xf] %v653_v7 }
  0xc5   : > { %656 = vst [vmem:[%s5753_s24 + $0x420] sm:$0xf] %v655_v8  ;;  %658 = vst [vmem:[%s5753_s24 + $0x424] sm:$0xf] %v657_v9  ;;  %v659_v10 = vld [vmem:[%s5746_s23 + $0x850] sm:$0xf] }
  0xc6   : > { %v661_v11 = vld [vmem:[%s5746_s23 + $0x858] sm:$0xf]  ;;  %v663_v12 = vld [vmem:[%s5746_s23 + $0x860] sm:$0xf]  ;;  %660 = vst [vmem:[%s5753_s24 + $0x428] sm:$0xf] %v659_v10 }
  0xc7   : > { %662 = vst [vmem:[%s5753_s24 + $0x42c] sm:$0xf] %v661_v11  ;;  %664 = vst [vmem:[%s5753_s24 + $0x430] sm:$0xf] %v663_v12  ;;  %v665_v13 = vld [vmem:[%s5746_s23 + $0x868] sm:$0xf] }
  0xc8   : > { %v667_v14 = vld [vmem:[%s5746_s23 + $0x870] sm:$0xf]  ;;  %v669_v15 = vld [vmem:[%s5746_s23 + $0x878] sm:$0xf]  ;;  %666 = vst [vmem:[%s5753_s24 + $0x434] sm:$0xf] %v665_v13 }
  0xc9   : > { %668 = vst [vmem:[%s5753_s24 + $0x438] sm:$0xf] %v667_v14  ;;  %670 = vst [vmem:[%s5753_s24 + $0x43c] sm:$0xf] %v669_v15  ;;  %v671_v16 = vld [vmem:[%s5746_s23 + $0x880] sm:$0xf] }
  0xca   : > { %v673_v17 = vld [vmem:[%s5746_s23 + $0x888] sm:$0xf]  ;;  %v675_v18 = vld [vmem:[%s5746_s23 + $0x890] sm:$0xf]  ;;  %672 = vst [vmem:[%s5753_s24 + $0x440] sm:$0xf] %v671_v16 }
  0xcb   : > { %674 = vst [vmem:[%s5753_s24 + $0x444] sm:$0xf] %v673_v17  ;;  %676 = vst [vmem:[%s5753_s24 + $0x448] sm:$0xf] %v675_v18  ;;  %v677_v19 = vld [vmem:[%s5746_s23 + $0x898] sm:$0xf] }
  0xcc   : > { %v679_v20 = vld [vmem:[%s5746_s23 + $0x8a0] sm:$0xf]  ;;  %v681_v21 = vld [vmem:[%s5746_s23 + $0x8a8] sm:$0xf]  ;;  %678 = vst [vmem:[%s5753_s24 + $0x44c] sm:$0xf] %v677_v19 }
  0xcd   : > { %680 = vst [vmem:[%s5753_s24 + $0x450] sm:$0xf] %v679_v20  ;;  %682 = vst [vmem:[%s5753_s24 + $0x454] sm:$0xf] %v681_v21  ;;  %v683_v22 = vld [vmem:[%s5746_s23 + $0x8b0] sm:$0xf] }
  0xce   : > { %v685_v23 = vld [vmem:[%s5746_s23 + $0x8b8] sm:$0xf]  ;;  %v687_v24 = vld [vmem:[%s5746_s23 + $0x8c0] sm:$0xf]  ;;  %684 = vst [vmem:[%s5753_s24 + $0x458] sm:$0xf] %v683_v22 }
  0xcf   : > { %686 = vst [vmem:[%s5753_s24 + $0x45c] sm:$0xf] %v685_v23  ;;  %688 = vst [vmem:[%s5753_s24 + $0x460] sm:$0xf] %v687_v24  ;;  %v689_v25 = vld [vmem:[%s5746_s23 + $0x8c8] sm:$0xf] }
  0xd0   : > { %v691_v26 = vld [vmem:[%s5746_s23 + $0x8d0] sm:$0xf]  ;;  %v693_v27 = vld [vmem:[%s5746_s23 + $0x8d8] sm:$0xf]  ;;  %690 = vst [vmem:[%s5753_s24 + $0x464] sm:$0xf] %v689_v25 }
  0xd1   : > { %692 = vst [vmem:[%s5753_s24 + $0x468] sm:$0xf] %v691_v26  ;;  %694 = vst [vmem:[%s5753_s24 + $0x46c] sm:$0xf] %v693_v27  ;;  %v695_v28 = vld [vmem:[%s5746_s23 + $0x8e0] sm:$0xf] }
  0xd2   : > { %v697_v29 = vld [vmem:[%s5746_s23 + $0x8e8] sm:$0xf]  ;;  %v699_v30 = vld [vmem:[%s5746_s23 + $0x8f0] sm:$0xf]  ;;  %696 = vst [vmem:[%s5753_s24 + $0x470] sm:$0xf] %v695_v28 }
  0xd3   : > { %698 = vst [vmem:[%s5753_s24 + $0x474] sm:$0xf] %v697_v29  ;;  %700 = vst [vmem:[%s5753_s24 + $0x478] sm:$0xf] %v699_v30  ;;  %v701_v31 = vld [vmem:[%s5746_s23 + $0x8f8] sm:$0xf] }
  0xd4   : > { %702 = vst [vmem:[%s5753_s24 + $0x47c] sm:$0xf] %v701_v31 }
  0xd5 PF: > { %p4395_p7 = scmp.ge.s32.totalorder %s5689_s11, 1  ;;  %p1300_p8 = scmp.lt.s32.totalorder %s5689_s11, 3 }
  0xd7   : > { %p1301_p9 = pnand %p4395_p7, %p1300_p8 }
  0xd8   : > { %s1307_s25 = sand.u32 (!%p1301_p9), 1, %s5681_s9   ;;  %v5325_v32 = vld [vmem:[%s7154_s0 + $0x4] ss:$72 sps:$4 sm:$0xff] (!%p1301_p9)   ;;  %v5323_v51 = vld [vmem:[%s7154_s0] ss:$72 sps:$4 sm:$0xff] (!%p1301_p9)  }
  0xd9   : > { %1304 = sbr.rel (%p1301_p9) target bundleno = 764 (0x2fc), region = 65  ;;  %v5328_v33 = vld [vmem:[%s7154_s0 + $0x244] ss:$72 sps:$4 sm:$0xff] (!%p1301_p9)   ;;  %3376 = vmatprep.mubr.bf16.mxu0 (!%p1301_p9), %v5325_v32  ;;  %v5326_v52 = vld [vmem:[%s7154_s0 + $0x240] ss:$72 sps:$4 sm:$0xff] (!%p1301_p9)   ;;  %s4396_s24 = sshll.u32 (!%p1301_p9), %s1307_s25, 7 }
  0xda   : > { %s5282_s26 = smul.u32 (!%p1301_p9), 1152, %s1307_s25  ;;  %3408 = vmatprep.mubr.bf16.mxu1 (!%p1301_p9), %v5328_v33  ;;  %v5337_v57 = vld [vmem:[%s7154_s0 + $0x94] ss:$72 sps:$4 sm:$0xff] (!%p1301_p9)   ;;  %v5341_v63 = vld [vmem:[%s7154_s0 + $0x90] ss:$72 sps:$4 sm:$0xff] (!%p1301_p9)  }
  0xdb   : > { %v5339_v59 = vld [vmem:[%s7154_s0 + $0x2d4] ss:$72 sps:$4 sm:$0xff] (!%p1301_p9)   ;;  %v5342_v0 = vld [vmem:[%s7154_s0 + $0x2d0] ss:$72 sps:$4 sm:$0xff] (!%p1301_p9)   ;;  %v5351_v6 = vld [vmem:[%s7154_s0 + $0x124] ss:$72 sps:$4 sm:$0xff] (!%p1301_p9)  }
  0xdc   : > { %s6337_s3 = scalar_lea.vmem (!%p1301_p9), [#allocation2], %s5282_s26  ;;  %v5353_v8 = vld [vmem:[%s7154_s0 + $0x364] ss:$72 sps:$4 sm:$0xff] (!%p1301_p9)   ;;  %v5355_v11 = vld [vmem:[%s7154_s0 + $0x120] ss:$72 sps:$4 sm:$0xff] (!%p1301_p9)   ;;  %s7089_s26 = scalar_lea.vmem (!%p1301_p9), [#allocation3], %s4396_s24 }
  0xdd   : > { %v5307_v34 = vld [vmem:[%s6337_s3 + $0x40] sm:$0xff] (!%p1301_p9)   ;;  %v5309_v36 = vld [vmem:[%s6337_s3 + $0x48] sm:$0xff] (!%p1301_p9)   ;;  %v5311_v38 = vld [vmem:[%s6337_s3 + $0x50] sm:$0xff] (!%p1301_p9)  }
  0xde   : > { %v5308_v35 = vld [vmem:[%s6337_s3] sm:$0xff] (!%p1301_p9)   ;;  %4689 = vmatprep.subr.bf16.mxu0 (!%p1301_p9), %v5307_v34  ;;  %5265 = vmatprep.subr.bf16.mxu1 (!%p1301_p9), %v5307_v34  ;;  %v5310_v37 = vld [vmem:[%s6337_s3 + $0x8] sm:$0xff] (!%p1301_p9)   ;;  %v5312_v39 = vld [vmem:[%s6337_s3 + $0x10] sm:$0xff] (!%p1301_p9)  }
  0xdf   : > { %4690 = vmatpush3.bf16.msra.mxu0 (!%p1301_p9), %v5308_v35  ;;  %5273 = vmatpush3.bf16.msra.mxu1 (!%p1301_p9), %v5308_v35  ;;  %v5313_v40 = vld [vmem:[%s6337_s3 + $0x58] sm:$0xff] (!%p1301_p9)   ;;  %v5315_v42 = vld [vmem:[%s6337_s3 + $0x60] sm:$0xff] (!%p1301_p9)   ;;  %v5317_v44 = vld [vmem:[%s6337_s3 + $0x68] sm:$0xff] (!%p1301_p9)  }
  0xe0   : > { %4691 = vmatprep.subr.bf16.mxu0 %v5309_v36  ;;  %5266 = vmatprep.subr.bf16.mxu1 %v5309_v36  ;;  %v5314_v41 = vld [vmem:[%s6337_s3 + $0x18] sm:$0xff]   ;;  %v5316_v43 = vld [vmem:[%s6337_s3 + $0x20] sm:$0xff]   ;;  %v5318_v45 = vld [vmem:[%s6337_s3 + $0x28] sm:$0xff]   ;;  %s4686_s9 = sshll.u32 (%p5736_p5), %s4390_s12, 3 }
  0xe1   : > { %v5319_v46 = vld [vmem:[%s6337_s3 + $0x70] sm:$0xff]   ;;  %v5321_v48 = vld [vmem:[%s6337_s3 + $0x78] sm:$0xff]   ;;  %v5329_v50 = vld [vmem:[%s6337_s3 + $0xc0] sm:$0xff]   ;;  %s4241_s17 = scalar_lea.vmem (%p5736_p5), %s7156_s2, %s4686_s9 }
  0xe2   : > { %v5320_v47 = vld [vmem:[%s6337_s3 + $0x30] sm:$0xff]   ;;  %v5322_v49 = vld [vmem:[%s6337_s3 + $0x38] sm:$0xff]   ;;  %v5330_v53 = vld [vmem:[%s6337_s3 + $0x140] sm:$0xff]  }
  0xe3   : > { %4692 = vmatpush3.bf16.msra.mxu0 %v5310_v37  ;;  %5274 = vmatpush3.bf16.msra.mxu1 %v5310_v37  ;;  %v5331_v54 = vld [vmem:[%s6337_s3 + $0x80] sm:$0xff]   ;;  %v5333_v56 = vld [vmem:[%s6337_s3 + $0xc8] sm:$0xff]   ;;  %v5343_v62 = vld [vmem:[%s6337_s3 + $0xd0] sm:$0xff]  }
  0xe4   : > { %4693 = vmatprep.subr.bf16.mxu0 %v5311_v38  ;;  %5267 = vmatprep.subr.bf16.mxu1 %v5311_v38  ;;  %v5332_v55 = vld [vmem:[%s6337_s3 + $0x100] sm:$0xff]   ;;  %v5334_v58 = vld [vmem:[%s6337_s3 + $0x148] sm:$0xff]   ;;  %v5344_v1 = vld [vmem:[%s6337_s3 + $0x150] sm:$0xff]  }
  0xe5   : > { %v5335_v60 = vld [vmem:[%s6337_s3 + $0x88] sm:$0xff]   ;;  %v5345_v2 = vld [vmem:[%s6337_s3 + $0x90] sm:$0xff]   ;;  %v5347_v4 = vld [vmem:[%s6337_s3 + $0xd8] sm:$0xff]  }
  0xe6   : > { %v5336_v61 = vld [vmem:[%s6337_s3 + $0x108] sm:$0xff]   ;;  %v5346_v3 = vld [vmem:[%s6337_s3 + $0x110] sm:$0xff]   ;;  %v5348_v5 = vld [vmem:[%s6337_s3 + $0x158] sm:$0xff]  }
  0xe7   : > { %4694 = vmatpush3.bf16.msra.mxu0 %v5312_v39  ;;  %5275 = vmatpush3.bf16.msra.mxu1 %v5312_v39  ;;  %v5349_v7 = vld [vmem:[%s6337_s3 + $0x98] sm:$0xff]   ;;  %v5357_v10 = vld [vmem:[%s6337_s3 + $0xe0] sm:$0xff]   ;;  %v5361_v16 = vld [vmem:[%s6337_s3 + $0xe8] sm:$0xff]  }
  0xe8   : > { %4695 = vmatprep.subr.bf16.mxu0 %v5313_v40  ;;  %5268 = vmatprep.subr.bf16.mxu1 %v5313_v40  ;;  %v5350_v9 = vld [vmem:[%s6337_s3 + $0x118] sm:$0xff]   ;;  %v5356_v12 = vld [vmem:[%s7154_s0 + $0x360] ss:$72 sps:$4 sm:$0xff]   ;;  %v5371_v22 = vld [vmem:[%s6337_s3 + $0xf0] sm:$0xff]  }
  0xe9   : > { %v5358_v13 = vld [vmem:[%s6337_s3 + $0x160] sm:$0xff]   ;;  %v5362_v17 = vld [vmem:[%s6337_s3 + $0x168] sm:$0xff]   ;;  %v5365_v18 = vld [vmem:[%s7154_s0 + $0x1b4] ss:$72 sps:$4 sm:$0xff]  }
  0xea   : > { %v5359_v14 = vld [vmem:[%s6337_s3 + $0xa0] sm:$0xff]   ;;  %v5363_v19 = vld [vmem:[%s6337_s3 + $0xa8] sm:$0xff]   ;;  %v5367_v20 = vld [vmem:[%s7154_s0 + $0x3f4] ss:$72 sps:$4 sm:$0xff]  }
  0xeb   : > { %4696 = vmatpush3.bf16.msra.mxu0 %v5314_v41  ;;  %5276 = vmatpush3.bf16.msra.mxu1 %v5314_v41  ;;  %v5360_v15 = vld [vmem:[%s6337_s3 + $0x120] sm:$0xff]   ;;  %v5364_v21 = vld [vmem:[%s6337_s3 + $0x128] sm:$0xff]   ;;  %v5369_v23 = vld [vmem:[%s7154_s0 + $0x1b0] ss:$72 sps:$4 sm:$0xff]  }
  0xec   : > { %4697 = vmatprep.subr.bf16.mxu0 %v5315_v42  ;;  %5269 = vmatprep.subr.bf16.mxu1 %v5315_v42  ;;  %v5370_v24 = vld [vmem:[%s7154_s0 + $0x3f0] ss:$72 sps:$4 sm:$0xff]   ;;  %v5381_v30 = vld [vmem:[%s7154_s0 + $0xc] ss:$72 sps:$4 sm:$0xff]   ;;  %v5385_v34 = vld [vmem:[%s6337_s3 + $0x1c0] sm:$0xff]  }
  0xed   : > { %v5372_v25 = vld [vmem:[%s6337_s3 + $0x170] sm:$0xff]   ;;  %v5375_v28 = vld [vmem:[%s6337_s3 + $0xf8] sm:$0xff]   ;;  %v5387_v36 = vld [vmem:[%s6337_s3 + $0x240] sm:$0xff]  }
  0xee   : > { %v5373_v26 = vld [vmem:[%s6337_s3 + $0xb0] sm:$0xff]   ;;  %v5376_v29 = vld [vmem:[%s6337_s3 + $0x178] sm:$0xff]   ;;  %v5386_v38 = vld [vmem:[%s6337_s3 + $0x180] sm:$0xff]  }
  0xef   : > { %4698 = vmatpush3.bf16.msra.mxu0 %v5316_v43  ;;  %5277 = vmatpush3.bf16.msra.mxu1 %v5316_v43  ;;  %v5374_v27 = vld [vmem:[%s6337_s3 + $0x130] sm:$0xff]   ;;  %v5377_v31 = vld [vmem:[%s6337_s3 + $0xb8] sm:$0xff]   ;;  %v5388_v39 = vld [vmem:[%s6337_s3 + $0x200] sm:$0xff]  }
  0xf0   : > { %4699 = vmatprep.subr.bf16.mxu0 %v5317_v44  ;;  %5270 = vmatprep.subr.bf16.mxu1 %v5317_v44  ;;  %v5384_v32 = vld [vmem:[%s7154_s0 + $0x14] ss:$72 sps:$4 sm:$0xff]   ;;  %v5379_v35 = vld [vmem:[%s7154_s0 + $0x8] ss:$72 sps:$4 sm:$0xff]   ;;  %v5391_v41 = vld [vmem:[%s7154_s0 + $0xa4] ss:$72 sps:$4 sm:$0xff]  }
  0xf1   : > { %v5378_v33 = vld [vmem:[%s6337_s3 + $0x138] sm:$0xff]   ;;  %v5395_v42 = vld [vmem:[%s6337_s3 + $0x1c8] sm:$0xff]  }
  0xf2   : > { %v5382_v37 = vld [vmem:[%s7154_s0 + $0x10] ss:$72 sps:$4 sm:$0xff]   ;;  %v5389_v40 = vld [vmem:[%s7154_s0 + $0x9c] ss:$72 sps:$4 sm:$0xff]   ;;  %v5396_v43 = vld [vmem:[%s6337_s3 + $0x188] sm:$0xff]  }
  0xf3   : > { %4700 = vmatpush3.bf16.msra.mxu0 %v5318_v45  ;;  %5278 = vmatpush3.bf16.msra.mxu1 %v5318_v45  ;;  %v5397_v44 = vld [vmem:[%s6337_s3 + $0x248] sm:$0xff]  }
  0xf4   : > { %4701 = vmatprep.subr.bf16.mxu0 %v5319_v46  ;;  %5271 = vmatprep.subr.bf16.mxu1 %v5319_v46  ;;  %v5398_v45 = vld [vmem:[%s6337_s3 + $0x208] sm:$0xff]   ;;  %v5393_v46 = vld [vmem:[%s7154_s0 + $0x98] ss:$72 sps:$4 sm:$0xff]  }
  0xf7   : > { %4702 = vmatpush3.bf16.msra.mxu0 %v5320_v47  ;;  %5279 = vmatpush3.bf16.msra.mxu1 %v5320_v47  ;;  %v5394_v47 = vld [vmem:[%s7154_s0 + $0xa0] ss:$72 sps:$4 sm:$0xff]  }
  0xf8   : > { %4703 = vmatprep.subr.bf16.mxu0 %v5321_v48  ;;  %5272 = vmatprep.subr.bf16.mxu1 %v5321_v48  ;;  %v5399_v48 = vld [vmem:[%s7154_s0 + $0x12c] ss:$72 sps:$4 sm:$0xff]  }
  0xfb   : > { %4704 = vmatpush3.bf16.msra.mxu0 %v5322_v49  ;;  %5280 = vmatpush3.bf16.msra.mxu1 %v5322_v49  ;;  %v5401_v49 = vld [vmem:[%s7154_s0 + $0x134] ss:$72 sps:$4 sm:$0xff]  }
  0xfc   : > { %4753 = vmatprep.subr.bf16.mxu1 %v5329_v50  ;;  %4817 = vmatprep.subr.bf16.mxu0 %v5330_v53  ;;  %v5405_v50 = vld [vmem:[%s6337_s3 + $0x1d0] sm:$0xff]  }
  0xfd   : > { %v5408_v53 = vld [vmem:[%s6337_s3 + $0x210] sm:$0xff]  }
  0xfe   : > { %3377 = vmatmul.mubr.bf16.vlgmr.msra.gmra.mrb[0].mxu0 %v5323_v51  ;;  %3409 = vmatmul.mubr.bf16.vlgmr.msra.gmra.mrb[0].mxu1 %v5326_v52  ;;  %v5406_v51 = vld [vmem:[%s6337_s3 + $0x190] sm:$0xff]  }
  0xff   : > { %4754 = vmatpush3.bf16.msra.mxu1 %v5331_v54  ;;  %4818 = vmatpush3.bf16.msra.mxu0 %v5332_v55  ;;  %v5407_v52 = vld [vmem:[%s6337_s3 + $0x250] sm:$0xff]  }
 0x100   : > { %4755 = vmatprep.subr.bf16.mxu1 %v5333_v56  ;;  %4819 = vmatprep.subr.bf16.mxu0 %v5334_v58  ;;  %v5403_v54 = vld [vmem:[%s7154_s0 + $0x128] ss:$72 sps:$4 sm:$0xff]   ;;  %v5409_v56 = vld [vmem:[%s7154_s0 + $0x1bc] ss:$72 sps:$4 sm:$0xff]  }
 0x101   : > { %3384 = vmatprep.mubr.bf16.mxu0 %v5337_v57  ;;  %3416 = vmatprep.mubr.bf16.mxu1 %v5339_v59  ;;  %v5404_v55 = vld [vmem:[%s7154_s0 + $0x130] ss:$72 sps:$4 sm:$0xff]   ;;  %v5411_v57 = vld [vmem:[%s7154_s0 + $0x1c4] ss:$72 sps:$4 sm:$0xff]  }
 0x102   : > { %v5415_v58 = vld [vmem:[%s6337_s3 + $0x1d8] sm:$0xff]  }
 0x103   : > { %4756 = vmatpush3.bf16.msra.mxu1 %v5335_v60  ;;  %4820 = vmatpush3.bf16.msra.mxu0 %v5336_v61  ;;  %v5416_v59 = vld [vmem:[%s6337_s3 + $0x198] sm:$0xff]  }
 0x104   : > { %4757 = vmatprep.subr.bf16.mxu1 %v5343_v62  ;;  %4821 = vmatprep.subr.bf16.mxu0 %v5344_v1  ;;  %v5417_v60 = vld [vmem:[%s6337_s3 + $0x258] sm:$0xff]   ;;  %v5419_v1 = vld [vmem:[%s7154_s0 + $0x24c] ss:$72 sps:$4 sm:$0xff]  }
 0x105   : > { %v5418_v61 = vld [vmem:[%s6337_s3 + $0x218] sm:$0xff]  }
 0x106   : > { %3385 = vmatmul.mubr.bf16.gmra.mrb[4].mxu0 %v5341_v63  ;;  %3417 = vmatmul.mubr.bf16.gmra.mrb[4].mxu1 %v5342_v0  ;;  %v5413_v62 = vld [vmem:[%s7154_s0 + $0x1b8] ss:$72 sps:$4 sm:$0xff]  }
 0x107   : > { %4758 = vmatpush3.bf16.msra.mxu1 %v5345_v2  ;;  %4822 = vmatpush3.bf16.msra.mxu0 %v5346_v3  ;;  %v5414_v63 = vld [vmem:[%s7154_s0 + $0x1c0] ss:$72 sps:$4 sm:$0xff]   ;;  %v5421_v2 = vld [vmem:[%s7154_s0 + $0x254] ss:$72 sps:$4 sm:$0xff]  }
 0x108   : > { %4759 = vmatprep.subr.bf16.mxu1 %v5347_v4  ;;  %4823 = vmatprep.subr.bf16.mxu0 %v5348_v5  ;;  %v5425_v0 = vld [vmem:[%s6337_s3 + $0x1e0] sm:$0xff]  }
 0x109   : > { %3392 = vmatprep.mubr.bf16.mxu0 %v5351_v6  ;;  %3424 = vmatprep.mubr.bf16.mxu1 %v5353_v8  ;;  %v5426_v3 = vld [vmem:[%s6337_s3 + $0x1a0] sm:$0xff]   ;;  %v5435_v6 = vld [vmem:[%s6337_s3 + $0x1e8] sm:$0xff]   ;;  %v5424_v8 = vld [vmem:[%s7154_s0 + $0x250] ss:$72 sps:$4 sm:$0xff]  }
 0x10a   : > { %v5427_v4 = vld [vmem:[%s6337_s3 + $0x260] sm:$0xff]  }
 0x10b   : > { %4760 = vmatpush3.bf16.msra.mxu1 %v5349_v7  ;;  %4824 = vmatpush3.bf16.msra.mxu0 %v5350_v9  ;;  %v5428_v5 = vld [vmem:[%s6337_s3 + $0x220] sm:$0xff]   ;;  %v5423_v7 = vld [vmem:[%s7154_s0 + $0x248] ss:$72 sps:$4 sm:$0xff]  }
 0x10c   : > { %4761 = vmatprep.subr.bf16.mxu1 %v5357_v10  ;;  %4825 = vmatprep.subr.bf16.mxu0 %v5358_v13  ;;  %v5436_v9 = vld [vmem:[%s6337_s3 + $0x1a8] sm:$0xff]   ;;  %v5429_v10 = vld [vmem:[%s7154_s0 + $0x2dc] ss:$72 sps:$4 sm:$0xff]  }
 0x10d   : > { %v5431_v13 = vld [vmem:[%s7154_s0 + $0x2e4] ss:$72 sps:$4 sm:$0xff]  }
 0x10e   : > { %3393 = vmatmul.mubr.bf16.gmra.mrb[8].mxu0 %v5355_v11  ;;  %3425 = vmatmul.mubr.bf16.gmra.mrb[8].mxu1 %v5356_v12  ;;  %v5437_v11 = vld [vmem:[%s6337_s3 + $0x268] sm:$0xff]  }
 0x10f   : > { %4762 = vmatpush3.bf16.msra.mxu1 %v5359_v14  ;;  %4826 = vmatpush3.bf16.msra.mxu0 %v5360_v15  ;;  %v5438_v12 = vld [vmem:[%s6337_s3 + $0x228] sm:$0xff]   ;;  %v5445_v14 = vld [vmem:[%s6337_s3 + $0x1f0] sm:$0xff]  }
 0x110   : > { %4763 = vmatprep.subr.bf16.mxu1 %v5361_v16  ;;  %4827 = vmatprep.subr.bf16.mxu0 %v5362_v17  ;;  %v5446_v15 = vld [vmem:[%s6337_s3 + $0x1b0] sm:$0xff]   ;;  %v5433_v16 = vld [vmem:[%s7154_s0 + $0x2d8] ss:$72 sps:$4 sm:$0xff]  }
 0x111   : > { %3400 = vmatprep.mubr.bf16.mxu0 %v5365_v18  ;;  %3432 = vmatprep.mubr.bf16.mxu1 %v5367_v20  ;;  %v5447_v17 = vld [vmem:[%s6337_s3 + $0x270] sm:$0xff]  }
 0x112   : > { %v5448_v18 = vld [vmem:[%s6337_s3 + $0x230] sm:$0xff]  }
 0x113   : > { %4764 = vmatpush3.bf16.msra.mxu1 %v5363_v19  ;;  %4828 = vmatpush3.bf16.msra.mxu0 %v5364_v21  ;;  %v5434_v19 = vld [vmem:[%s7154_s0 + $0x2e0] ss:$72 sps:$4 sm:$0xff]   ;;  %v5439_v20 = vld [vmem:[%s7154_s0 + $0x36c] ss:$72 sps:$4 sm:$0xff]  }
 0x114   : > { %4765 = vmatprep.subr.bf16.mxu1 %v5371_v22  ;;  %4829 = vmatprep.subr.bf16.mxu0 %v5372_v25  ;;  %v5441_v21 = vld [vmem:[%s7154_s0 + $0x374] ss:$72 sps:$4 sm:$0xff]  }
 0x115   : > { %v5455_v22 = vld [vmem:[%s6337_s3 + $0x1f8] sm:$0xff]  }
 0x116   : > { %3401 = vmatmul.mubr.bf16.gmra.mrb[12].mxu0 %v5369_v23  ;;  %3433 = vmatmul.mubr.bf16.gmra.mrb[12].mxu1 %v5370_v24  ;;  %v5456_v23 = vld [vmem:[%s6337_s3 + $0x1b8] sm:$0xff]  }
 0x117   : > { %4766 = vmatpush3.bf16.msra.mxu1 %v5373_v26  ;;  %4830 = vmatpush3.bf16.msra.mxu0 %v5374_v27  ;;  %v5457_v24 = vld [vmem:[%s6337_s3 + $0x278] sm:$0xff]   ;;  %v5443_v26 = vld [vmem:[%s7154_s0 + $0x368] ss:$72 sps:$4 sm:$0xff]  }
 0x118   : > { %4767 = vmatprep.subr.bf16.mxu1 %v5375_v28  ;;  %4831 = vmatprep.subr.bf16.mxu0 %v5376_v29  ;;  %v5458_v25 = vld [vmem:[%s6337_s3 + $0x238] sm:$0xff]   ;;  %v5451_v29 = vld [vmem:[%s7154_s0 + $0x404] ss:$72 sps:$4 sm:$0xff]  }
 0x119   : > { %3473 = vmatprep.mubr.bf16.mxu1 %v5381_v30  ;;  %3570 = vmatprep.mubr.bf16.mxu0 %v5384_v32  ;;  %v5444_v27 = vld [vmem:[%s7154_s0 + $0x370] ss:$72 sps:$4 sm:$0xff]   ;;  %v5449_v28 = vld [vmem:[%s7154_s0 + $0x3fc] ss:$72 sps:$4 sm:$0xff]  }
 0x11a   : > { %v5465_v30 = vld [vmem:[%s6337_s3 + $0x2c0] sm:$0xff]  }
 0x11b   : > { %4768 = vmatpush3.bf16.msra.mxu1 %v5377_v31  ;;  %4832 = vmatpush3.bf16.msra.mxu0 %v5378_v33  ;;  %v5467_v31 = vld [vmem:[%s6337_s3 + $0x340] sm:$0xff]  }
 0x11c   : > { %4881 = vmatprep.subr.bf16.mxu1 %v5385_v34  ;;  %4945 = vmatprep.subr.bf16.mxu0 %v5387_v36  ;;  %v5453_v32 = vld [vmem:[%s7154_s0 + $0x3f8] ss:$72 sps:$4 sm:$0xff]   ;;  %v5461_v34 = vld [vmem:[%s7154_s0 + $0x1c] ss:$72 sps:$4 sm:$0xff]  }
 0x11d   : > { %v5454_v33 = vld [vmem:[%s7154_s0 + $0x400] ss:$72 sps:$4 sm:$0xff]  }
 0x11e   : > { %3474 = vmatmul.mubr.bf16.vlgmr.msra.gmra.mrb[16].mxu1 %v5379_v35  ;;  %3571 = vmatmul.mubr.bf16.vlgmr.msra.gmra.mrb[16].mxu0 %v5382_v37  ;;  %v5464_v35 = vld [vmem:[%s7154_s0 + $0x24] ss:$72 sps:$4 sm:$0xff]   ;;  %v5459_v36 = vld [vmem:[%s7154_s0 + $0x18] ss:$72 sps:$4 sm:$0xff]  }
 0x11f   : > { %4882 = vmatpush3.bf16.msra.mxu1 %v5386_v38  ;;  %4946 = vmatpush3.bf16.msra.mxu0 %v5388_v39  ;;  %v5462_v37 = vld [vmem:[%s7154_s0 + $0x20] ss:$72 sps:$4 sm:$0xff]  }
 0x120   : > { %3481 = vmatprep.mubr.bf16.mxu1 %v5389_v40  ;;  %3578 = vmatprep.mubr.bf16.mxu0 %v5391_v41  ;;  %v5466_v38 = vld [vmem:[%s6337_s3 + $0x280] sm:$0xff]   ;;  %v5469_v40 = vld [vmem:[%s7154_s0 + $0xac] ss:$72 sps:$4 sm:$0xff]  }
 0x121   : > { %4883 = vmatprep.subr.bf16.mxu1 %v5395_v42  ;;  %4947 = vmatprep.subr.bf16.mxu0 %v5397_v44  ;;  %v5468_v39 = vld [vmem:[%s6337_s3 + $0x300] sm:$0xff]   ;;  %v5471_v41 = vld [vmem:[%s7154_s0 + $0xb4] ss:$72 sps:$4 sm:$0xff]   ;;  %v5475_v42 = vld [vmem:[%s6337_s3 + $0x2c8] sm:$0xff]  }
 0x122   : > { %v5476_v44 = vld [vmem:[%s6337_s3 + $0x288] sm:$0xff]  }
 0x123   : > { %4884 = vmatpush3.bf16.msra.mxu1 %v5396_v43  ;;  %4948 = vmatpush3.bf16.msra.mxu0 %v5398_v45  ;;  %v5477_v43 = vld [vmem:[%s6337_s3 + $0x348] sm:$0xff]  }
 0x124   : > { %4885 = vmatprep.subr.bf16.mxu1 %v5405_v50  ;;  %4949 = vmatprep.subr.bf16.mxu0 %v5407_v52  ;;  %v5478_v45 = vld [vmem:[%s6337_s3 + $0x308] sm:$0xff]   ;;  %v5479_v50 = vld [vmem:[%s7154_s0 + $0x13c] ss:$72 sps:$4 sm:$0xff]   ;;  %v5486_v52 = vld [vmem:[%s6337_s3 + $0x290] sm:$0xff]  }
 0x126   : > { %3482 = vmatmul.mubr.bf16.gmra.mrb[20].mxu1 %v5393_v46  ;;  %3579 = vmatmul.mubr.bf16.gmra.mrb[20].mxu0 %v5394_v47  ;;  %v5485_v46 = vld [vmem:[%s6337_s3 + $0x2d0] sm:$0xff]  }
 0x127   : > { %3489 = vmatprep.mubr.bf16.mxu1 %v5399_v48  ;;  %3586 = vmatprep.mubr.bf16.mxu0 %v5401_v49  ;;  %v5473_v47 = vld [vmem:[%s7154_s0 + $0xa8] ss:$72 sps:$4 sm:$0xff]  }
 0x128   : > { %4886 = vmatpush3.bf16.msra.mxu1 %v5406_v51  ;;  %4950 = vmatpush3.bf16.msra.mxu0 %v5408_v53  ;;  %v5474_v48 = vld [vmem:[%s7154_s0 + $0xb0] ss:$72 sps:$4 sm:$0xff]   ;;  %v5481_v51 = vld [vmem:[%s7154_s0 + $0x144] ss:$72 sps:$4 sm:$0xff]  }
 0x129   : > { %4887 = vmatprep.subr.bf16.mxu1 %v5415_v58  ;;  %4951 = vmatprep.subr.bf16.mxu0 %v5417_v60  ;;  %v5487_v49 = vld [vmem:[%s6337_s3 + $0x350] sm:$0xff]   ;;  %v5483_v58 = vld [vmem:[%s7154_s0 + $0x138] ss:$72 sps:$4 sm:$0xff]  }
 0x12a   : > { %v5488_v53 = vld [vmem:[%s6337_s3 + $0x310] sm:$0xff]   ;;  %v5507_v60 = vld [vmem:[%s6337_s3 + $0x360] sm:$0xff]  }
 0x12c   : > { %4888 = vmatpush3.bf16.msra.mxu1 %v5416_v59  ;;  %4952 = vmatpush3.bf16.msra.mxu0 %v5418_v61  ;;  %v5505_v59 = vld [vmem:[%s6337_s3 + $0x2e0] sm:$0xff]  }
 0x12d   : > { %4889 = vmatprep.subr.bf16.mxu1 %v5425_v0  ;;  %4953 = vmatprep.subr.bf16.mxu0 %v5427_v4  ;;  %v5484_v61 = vld [vmem:[%s7154_s0 + $0x140] ss:$72 sps:$4 sm:$0xff]  }
 0x12e   : > { %3490 = vmatmul.mubr.bf16.gmra.mrb[24].mxu1 %v5403_v54  ;;  %3587 = vmatmul.mubr.bf16.gmra.mrb[24].mxu0 %v5404_v55  ;;  %v5495_v54 = vld [vmem:[%s6337_s3 + $0x2d8] sm:$0xff]   ;;  %v5506_v0 = vld [vmem:[%s6337_s3 + $0x2a0] sm:$0xff]   ;;  %v5516_v4 = vld [vmem:[%s6337_s3 + $0x2a8] sm:$0xff]  }
 0x12f   : > { %3497 = vmatprep.mubr.bf16.mxu1 %v5409_v56  ;;  %3594 = vmatprep.mubr.bf16.mxu0 %v5411_v57  ;;  %v5497_v55 = vld [vmem:[%s6337_s3 + $0x358] sm:$0xff]  }
 0x130   : > { %4890 = vmatpush3.bf16.msra.mxu1 %v5426_v3  ;;  %4954 = vmatpush3.bf16.msra.mxu0 %v5428_v5  ;;  %v5496_v56 = vld [vmem:[%s6337_s3 + $0x298] sm:$0xff]   ;;  %v5517_v3 = vld [vmem:[%s6337_s3 + $0x368] sm:$0xff]  }
 0x131   : > { %4891 = vmatprep.subr.bf16.mxu1 %v5435_v6  ;;  %4955 = vmatprep.subr.bf16.mxu0 %v5437_v11  ;;  %v5498_v57 = vld [vmem:[%s6337_s3 + $0x318] sm:$0xff]   ;;  %v5493_v5 = vld [vmem:[%s7154_s0 + $0x1c8] ss:$72 sps:$4 sm:$0xff]  }
 0x132   : > { %v5518_v6 = vld [vmem:[%s6337_s3 + $0x328] sm:$0xff]   ;;  %v5526_v11 = vld [vmem:[%s6337_s3 + $0x2b0] sm:$0xff]  }
 0x134   : > { %4892 = vmatpush3.bf16.msra.mxu1 %v5436_v9  ;;  %4956 = vmatpush3.bf16.msra.mxu0 %v5438_v12  ;;  %v5501_v9 = vld [vmem:[%s7154_s0 + $0x264] ss:$72 sps:$4 sm:$0xff]   ;;  %v5527_v12 = vld [vmem:[%s6337_s3 + $0x370] sm:$0xff]  }
 0x135   : > { %4893 = vmatprep.subr.bf16.mxu1 %v5445_v14  ;;  %4957 = vmatprep.subr.bf16.mxu0 %v5447_v17  ;;  %v5503_v14 = vld [vmem:[%s7154_s0 + $0x258] ss:$72 sps:$4 sm:$0xff]   ;;  %v5511_v17 = vld [vmem:[%s7154_s0 + $0x2f4] ss:$72 sps:$4 sm:$0xff]  }
 0x136   : > { %3498 = vmatmul.mubr.bf16.gmra.mrb[28].mxu1 %v5413_v62  ;;  %3595 = vmatmul.mubr.bf16.gmra.mrb[28].mxu0 %v5414_v63  ;;  %v5489_v62 = vld [vmem:[%s7154_s0 + $0x1cc] ss:$72 sps:$4 sm:$0xff]  }
 0x137   : > { %3505 = vmatprep.mubr.bf16.mxu1 %v5419_v1  ;;  %3602 = vmatprep.mubr.bf16.mxu0 %v5421_v2  ;;  %v5491_v63 = vld [vmem:[%s7154_s0 + $0x1d4] ss:$72 sps:$4 sm:$0xff]   ;;  %v5508_v1 = vld [vmem:[%s6337_s3 + $0x320] sm:$0xff]   ;;  %v5515_v2 = vld [vmem:[%s6337_s3 + $0x2e8] sm:$0xff]  }
 0x138   : > { %4894 = vmatpush3.bf16.msra.mxu1 %v5446_v15  ;;  %4958 = vmatpush3.bf16.msra.mxu0 %v5448_v18  ;;  %v5504_v15 = vld [vmem:[%s7154_s0 + $0x260] ss:$72 sps:$4 sm:$0xff]   ;;  %v5535_v18 = vld [vmem:[%s6337_s3 + $0x2f8] sm:$0xff]  }
 0x139   : > { %4895 = vmatprep.subr.bf16.mxu1 %v5455_v22  ;;  %4959 = vmatprep.subr.bf16.mxu0 %v5457_v24  ;;  %v5513_v22 = vld [vmem:[%s7154_s0 + $0x2e8] ss:$72 sps:$4 sm:$0xff]   ;;  %v5545_v24 = vld [vmem:[%s6337_s3 + $0x3c0] sm:$0xff]  }
 0x13c   : > { %4896 = vmatpush3.bf16.msra.mxu1 %v5456_v23  ;;  %4960 = vmatpush3.bf16.msra.mxu0 %v5458_v25  ;;  %v5514_v23 = vld [vmem:[%s7154_s0 + $0x2f0] ss:$72 sps:$4 sm:$0xff]   ;;  %v5519_v25 = vld [vmem:[%s7154_s0 + $0x37c] ss:$72 sps:$4 sm:$0xff]  }
 0x13d   : > { %5009 = vmatprep.subr.bf16.mxu1 %v5465_v30  ;;  %5073 = vmatprep.subr.bf16.mxu0 %v5467_v31  ;;  %v5529_v30 = vld [vmem:[%s7154_s0 + $0x40c] ss:$72 sps:$4 sm:$0xff]  }
 0x13e   : > { %3506 = vmatmul.mubr.bf16.gmra.mrb[32].mxu1 %v5423_v7  ;;  %3603 = vmatmul.mubr.bf16.gmra.mrb[32].mxu0 %v5424_v8  ;;  %v5494_v7 = vld [vmem:[%s7154_s0 + $0x1d0] ss:$72 sps:$4 sm:$0xff]   ;;  %v5499_v8 = vld [vmem:[%s7154_s0 + $0x25c] ss:$72 sps:$4 sm:$0xff]  }
 0x13f   : > { %3513 = vmatprep.mubr.bf16.mxu1 %v5429_v10  ;;  %3610 = vmatprep.mubr.bf16.mxu0 %v5431_v13  ;;  %v5525_v10 = vld [vmem:[%s6337_s3 + $0x2f0] sm:$0xff]  }
 0x140   : > { %v5528_v13 = vld [vmem:[%s6337_s3 + $0x330] sm:$0xff]  }
 0x141   : > { %v5531_v31 = vld [vmem:[%s7154_s0 + $0x414] ss:$72 sps:$4 sm:$0xff]  }
 0x146   : > { %3514 = vmatmul.mubr.bf16.gmra.mrb[36].mxu1 %v5433_v16  ;;  %3611 = vmatmul.mubr.bf16.gmra.mrb[36].mxu0 %v5434_v19  ;;  %v5509_v16 = vld [vmem:[%s7154_s0 + $0x2ec] ss:$72 sps:$4 sm:$0xff]   ;;  %v5536_v19 = vld [vmem:[%s6337_s3 + $0x2b8] sm:$0xff]  }
 0x147   : > { %3521 = vmatprep.mubr.bf16.mxu1 %v5439_v20  ;;  %3618 = vmatprep.mubr.bf16.mxu0 %v5441_v21  ;;  %v5537_v20 = vld [vmem:[%s6337_s3 + $0x378] sm:$0xff]  }
 0x148   : > { %v5538_v21 = vld [vmem:[%s6337_s3 + $0x338] sm:$0xff]  }
 0x14e   : > { %3522 = vmatmul.mubr.bf16.gmra.mrb[40].mxu1 %v5443_v26  ;;  %3619 = vmatmul.mubr.bf16.gmra.mrb[40].mxu0 %v5444_v27  ;;  %v5547_v26 = vld [vmem:[%s6337_s3 + $0x440] sm:$0xff]  }
 0x14f   : > { %3529 = vmatprep.mubr.bf16.mxu1 %v5449_v28  ;;  %3626 = vmatprep.mubr.bf16.mxu0 %v5451_v29  ;;  %v5521_v27 = vld [vmem:[%s7154_s0 + $0x384] ss:$72 sps:$4 sm:$0xff]   ;;  %v5523_v28 = vld [vmem:[%s7154_s0 + $0x378] ss:$72 sps:$4 sm:$0xff]  }
 0x150   : > { %v5524_v29 = vld [vmem:[%s7154_s0 + $0x380] ss:$72 sps:$4 sm:$0xff]  }
 0x156   : > { %3530 = vmatmul.mubr.bf16.gmra.mrb[44].mxu1 %v5453_v32  ;;  %3627 = vmatmul.mubr.bf16.gmra.mrb[44].mxu0 %v5454_v33  ;;  %v5533_v32 = vld [vmem:[%s7154_s0 + $0x408] ss:$72 sps:$4 sm:$0xff]  }
 0x157   : > { %3667 = vmatprep.mubr.bf16.mxu1 %v5461_v34  ;;  %3764 = vmatprep.mubr.bf16.mxu0 %v5464_v35  ;;  %v5534_v33 = vld [vmem:[%s7154_s0 + $0x410] ss:$72 sps:$4 sm:$0xff]   ;;  %v5541_v34 = vld [vmem:[%s7154_s0 + $0x2c] ss:$72 sps:$4 sm:$0xff]  }
 0x158   : > { %v5544_v35 = vld [vmem:[%s7154_s0 + $0x34] ss:$72 sps:$4 sm:$0xff]  }
 0x15e   : > { %3668 = vmatmul.mubr.bf16.vlgmr.msra.gmra.mrb[48].mxu1 %v5459_v36  ;;  %3765 = vmatmul.mubr.bf16.vlgmr.msra.gmra.mrb[48].mxu0 %v5462_v37  ;;  %v5539_v36 = vld [vmem:[%s7154_s0 + $0x28] ss:$72 sps:$4 sm:$0xff]  }
 0x15f   : > { %5010 = vmatpush3.bf16.msra.mxu1 %v5466_v38  ;;  %5074 = vmatpush3.bf16.msra.mxu0 %v5468_v39  ;;  %v5542_v37 = vld [vmem:[%s7154_s0 + $0x30] ss:$72 sps:$4 sm:$0xff]   ;;  %v5546_v38 = vld [vmem:[%s6337_s3 + $0x380] sm:$0xff]  }
 0x160   : > { %3675 = vmatprep.mubr.bf16.mxu1 %v5469_v40  ;;  %3772 = vmatprep.mubr.bf16.mxu0 %v5471_v41  ;;  %v5548_v39 = vld [vmem:[%s6337_s3 + $0x400] sm:$0xff]  }
 0x161   : > { %5011 = vmatprep.subr.bf16.mxu1 %v5475_v42  ;;  %5075 = vmatprep.subr.bf16.mxu0 %v5477_v43  ;;  %v5549_v40 = vld [vmem:[%s7154_s0 + $0xbc] ss:$72 sps:$4 sm:$0xff]   ;;  %v5555_v42 = vld [vmem:[%s6337_s3 + $0x3c8] sm:$0xff]  }
 0x162   : > { %v5551_v41 = vld [vmem:[%s7154_s0 + $0xc4] ss:$72 sps:$4 sm:$0xff]  }
 0x163   : > { %5012 = vmatpush3.bf16.msra.mxu1 %v5476_v44  ;;  %5076 = vmatpush3.bf16.msra.mxu0 %v5478_v45  ;;  %v5557_v43 = vld [vmem:[%s6337_s3 + $0x448] sm:$0xff]  }
 0x164   : > { %5013 = vmatprep.subr.bf16.mxu1 %v5485_v46  ;;  %5077 = vmatprep.subr.bf16.mxu0 %v5487_v49  ;;  %v5556_v44 = vld [vmem:[%s6337_s3 + $0x388] sm:$0xff]   ;;  %v5553_v46 = vld [vmem:[%s7154_s0 + $0xb8] ss:$72 sps:$4 sm:$0xff]   ;;  %v5567_v49 = vld [vmem:[%s6337_s3 + $0x450] sm:$0xff]  }
 0x165   : > { %v5558_v45 = vld [vmem:[%s6337_s3 + $0x408] sm:$0xff]  }
 0x166   : > { %3676 = vmatmul.mubr.bf16.gmra.mrb[52].mxu1 %v5473_v47  ;;  %3773 = vmatmul.mubr.bf16.gmra.mrb[52].mxu0 %v5474_v48  ;;  %v5554_v47 = vld [vmem:[%s7154_s0 + $0xc0] ss:$72 sps:$4 sm:$0xff]   ;;  %v5565_v48 = vld [vmem:[%s6337_s3 + $0x3d0] sm:$0xff]  }
 0x167   : > { %3683 = vmatprep.mubr.bf16.mxu1 %v5479_v50  ;;  %3780 = vmatprep.mubr.bf16.mxu0 %v5481_v51  ;;  %v5559_v50 = vld [vmem:[%s7154_s0 + $0x14c] ss:$72 sps:$4 sm:$0xff]  }
 0x168   : > { %5014 = vmatpush3.bf16.msra.mxu1 %v5486_v52  ;;  %5078 = vmatpush3.bf16.msra.mxu0 %v5488_v53  ;;  %v5561_v51 = vld [vmem:[%s7154_s0 + $0x154] ss:$72 sps:$4 sm:$0xff]  }
 0x169   : > { %5015 = vmatprep.subr.bf16.mxu1 %v5495_v54  ;;  %5079 = vmatprep.subr.bf16.mxu0 %v5497_v55  ;;  %v5566_v52 = vld [vmem:[%s6337_s3 + $0x390] sm:$0xff]   ;;  %v5575_v54 = vld [vmem:[%s6337_s3 + $0x3d8] sm:$0xff]  }
 0x16a   : > { %v5568_v53 = vld [vmem:[%s6337_s3 + $0x410] sm:$0xff]   ;;  %v5577_v55 = vld [vmem:[%s6337_s3 + $0x458] sm:$0xff]  }
 0x16c   : > { %5016 = vmatpush3.bf16.msra.mxu1 %v5496_v56  ;;  %5080 = vmatpush3.bf16.msra.mxu0 %v5498_v57  ;;  %v5576_v56 = vld [vmem:[%s6337_s3 + $0x398] sm:$0xff]  }
 0x16d   : > { %5017 = vmatprep.subr.bf16.mxu1 %v5505_v59  ;;  %5081 = vmatprep.subr.bf16.mxu0 %v5507_v60  ;;  %v5578_v57 = vld [vmem:[%s6337_s3 + $0x418] sm:$0xff]   ;;  %v5585_v60 = vld [vmem:[%s6337_s3 + $0x3e0] sm:$0xff]  }
 0x16e   : > { %3684 = vmatmul.mubr.bf16.gmra.mrb[56].mxu1 %v5483_v58  ;;  %3781 = vmatmul.mubr.bf16.gmra.mrb[56].mxu0 %v5484_v61  ;;  %v5563_v58 = vld [vmem:[%s7154_s0 + $0x148] ss:$72 sps:$4 sm:$0xff]   ;;  %v5569_v61 = vld [vmem:[%s7154_s0 + $0x1dc] ss:$72 sps:$4 sm:$0xff]  }
 0x16f   : > { %3691 = vmatprep.mubr.bf16.mxu1 %v5489_v62  ;;  %3788 = vmatprep.mubr.bf16.mxu0 %v5491_v63  ;;  %v5564_v59 = vld [vmem:[%s7154_s0 + $0x150] ss:$72 sps:$4 sm:$0xff]   ;;  %v5571_v62 = vld [vmem:[%s7154_s0 + $0x1e4] ss:$72 sps:$4 sm:$0xff]  }
 0x170   : > { %5018 = vmatpush3.bf16.msra.mxu1 %v5506_v0  ;;  %5082 = vmatpush3.bf16.msra.mxu0 %v5508_v1  ;;  %v5587_v63 = vld [vmem:[%s6337_s3 + $0x460] sm:$0xff]  }
 0x171   : > { %5019 = vmatprep.subr.bf16.mxu1 %v5515_v2  ;;  %5083 = vmatprep.subr.bf16.mxu0 %v5517_v3  ;;  %v5586_v0 = vld [vmem:[%s6337_s3 + $0x3a0] sm:$0xff]   ;;  %v5595_v2 = vld [vmem:[%s6337_s3 + $0x3e8] sm:$0xff]  }
 0x172   : > { %v5588_v1 = vld [vmem:[%s6337_s3 + $0x420] sm:$0xff]   ;;  %v5597_v3 = vld [vmem:[%s6337_s3 + $0x468] sm:$0xff]  }
 0x174   : > { %5020 = vmatpush3.bf16.msra.mxu1 %v5516_v4  ;;  %5084 = vmatpush3.bf16.msra.mxu0 %v5518_v6  ;;  %v5596_v4 = vld [vmem:[%s6337_s3 + $0x3a8] sm:$0xff]   ;;  %v5573_v6 = vld [vmem:[%s7154_s0 + $0x1d8] ss:$72 sps:$4 sm:$0xff]  }
 0x175   : > { %5021 = vmatprep.subr.bf16.mxu1 %v5525_v10  ;;  %5085 = vmatprep.subr.bf16.mxu0 %v5527_v12  ;;  %v5607_v10 = vld [vmem:[%s6337_s3 + $0x470] sm:$0xff]  }
 0x176   : > { %3692 = vmatmul.mubr.bf16.gmra.mrb[60].mxu1 %v5493_v5  ;;  %3789 = vmatmul.mubr.bf16.gmra.mrb[60].mxu0 %v5494_v7  ;;  %v5598_v5 = vld [vmem:[%s6337_s3 + $0x428] sm:$0xff]   ;;  %v5606_v12 = vld [vmem:[%s6337_s3 + $0x3b0] sm:$0xff]  }
 0x177   : > { %3699 = vmatprep.mubr.bf16.mxu1 %v5499_v8  ;;  %3796 = vmatprep.mubr.bf16.mxu0 %v5501_v9  ;;  %v5574_v7 = vld [vmem:[%s7154_s0 + $0x1e0] ss:$72 sps:$4 sm:$0xff]   ;;  %v5605_v8 = vld [vmem:[%s6337_s3 + $0x3f0] sm:$0xff]  }
 0x178   : > { %5022 = vmatpush3.bf16.msra.mxu1 %v5526_v11  ;;  %5086 = vmatpush3.bf16.msra.mxu0 %v5528_v13  ;;  %v5579_v9 = vld [vmem:[%s7154_s0 + $0x26c] ss:$72 sps:$4 sm:$0xff]  }
 0x179   : > { %5023 = vmatprep.subr.bf16.mxu1 %v5535_v18  ;;  %5087 = vmatprep.subr.bf16.mxu0 %v5537_v20  ;;  %v5581_v11 = vld [vmem:[%s7154_s0 + $0x274] ss:$72 sps:$4 sm:$0xff]   ;;  %v5583_v18 = vld [vmem:[%s7154_s0 + $0x268] ss:$72 sps:$4 sm:$0xff]  }
 0x17a   : > { %v5608_v13 = vld [vmem:[%s6337_s3 + $0x430] sm:$0xff]   ;;  %v5589_v20 = vld [vmem:[%s7154_s0 + $0x2fc] ss:$72 sps:$4 sm:$0xff]  }
 0x17c   : > { %5024 = vmatpush3.bf16.msra.mxu1 %v5536_v19  ;;  %5088 = vmatpush3.bf16.msra.mxu0 %v5538_v21  ;;  %v5584_v19 = vld [vmem:[%s7154_s0 + $0x270] ss:$72 sps:$4 sm:$0xff]   ;;  %v5591_v21 = vld [vmem:[%s7154_s0 + $0x304] ss:$72 sps:$4 sm:$0xff]  }
 0x17d   : > { %5137 = vmatprep.subr.bf16.mxu1 %v5545_v24  ;;  %5201 = vmatprep.subr.bf16.mxu0 %v5547_v26  ;;  %v5599_v24 = vld [vmem:[%s7154_s0 + $0x38c] ss:$72 sps:$4 sm:$0xff]   ;;  %v5603_v26 = vld [vmem:[%s7154_s0 + $0x388] ss:$72 sps:$4 sm:$0xff]  }
 0x17e   : > { %3700 = vmatmul.mubr.bf16.gmra.mrb[64].mxu1 %v5503_v14  ;;  %3797 = vmatmul.mubr.bf16.gmra.mrb[64].mxu0 %v5504_v15  ;;  %v5615_v14 = vld [vmem:[%s6337_s3 + $0x3f8] sm:$0xff]  }
 0x17f   : > { %3707 = vmatprep.mubr.bf16.mxu1 %v5509_v16  ;;  %3804 = vmatprep.mubr.bf16.mxu0 %v5511_v17  ;;  %v5617_v15 = vld [vmem:[%s6337_s3 + $0x478] sm:$0xff]  }
 0x180   : > { %v5616_v16 = vld [vmem:[%s6337_s3 + $0x3b8] sm:$0xff]  }
 0x181   : > { %v5618_v17 = vld [vmem:[%s6337_s3 + $0x438] sm:$0xff]  }
 0x186   : > { %3708 = vmatmul.mubr.bf16.gmra.mrb[68].mxu1 %v5513_v22  ;;  %3805 = vmatmul.mubr.bf16.gmra.mrb[68].mxu0 %v5514_v23  ;;  %v5593_v22 = vld [vmem:[%s7154_s0 + $0x2f8] ss:$72 sps:$4 sm:$0xff]  }
 0x187   : > { %3715 = vmatprep.mubr.bf16.mxu1 %v5519_v25  ;;  %3812 = vmatprep.mubr.bf16.mxu0 %v5521_v27  ;;  %v5594_v23 = vld [vmem:[%s7154_s0 + $0x300] ss:$72 sps:$4 sm:$0xff]   ;;  %v5601_v25 = vld [vmem:[%s7154_s0 + $0x394] ss:$72 sps:$4 sm:$0xff]   ;;  %v5604_v27 = vld [vmem:[%s7154_s0 + $0x390] ss:$72 sps:$4 sm:$0xff]  }
 0x18e   : > { %3716 = vmatmul.mubr.bf16.gmra.mrb[72].mxu1 %v5523_v28  ;;  %3813 = vmatmul.mubr.bf16.gmra.mrb[72].mxu0 %v5524_v29  ;;  %v5609_v28 = vld [vmem:[%s7154_s0 + $0x41c] ss:$72 sps:$4 sm:$0xff]  }
 0x18f   : > { %3723 = vmatprep.mubr.bf16.mxu1 %v5529_v30  ;;  %3820 = vmatprep.mubr.bf16.mxu0 %v5531_v31  ;;  %v5611_v29 = vld [vmem:[%s7154_s0 + $0x424] ss:$72 sps:$4 sm:$0xff]  }
 0x196   : > { %3724 = vmatmul.mubr.bf16.gmra.mrb[76].mxu1 %v5533_v32  ;;  %3821 = vmatmul.mubr.bf16.gmra.mrb[76].mxu0 %v5534_v33 }
 0x197   : > { %3861 = vmatprep.mubr.bf16.mxu1 %v5541_v34  ;;  %3958 = vmatprep.mubr.bf16.mxu0 %v5544_v35  ;;  %v5613_v34 = vld [vmem:[%s7154_s0 + $0x418] ss:$72 sps:$4 sm:$0xff]  }
 0x198   : > { %v5614_v35 = vld [vmem:[%s7154_s0 + $0x420] ss:$72 sps:$4 sm:$0xff]  }
 0x19e   : > { %3862 = vmatmul.mubr.bf16.vlgmr.msra.gmra.mrb[80].mxu1 %v5539_v36  ;;  %3959 = vmatmul.mubr.bf16.vlgmr.msra.gmra.mrb[80].mxu0 %v5542_v37 }
 0x19f   : > { %5138 = vmatpush3.bf16.msra.mxu1 %v5546_v38  ;;  %5202 = vmatpush3.bf16.msra.mxu0 %v5548_v39 }
 0x1a0   : > { %3869 = vmatprep.mubr.bf16.mxu1 %v5549_v40  ;;  %3966 = vmatprep.mubr.bf16.mxu0 %v5551_v41  ;;  %v5621_v40 = vld [vmem:[%s7154_s0 + $0x3c] ss:$72 sps:$4 sm:$0xff]  }
 0x1a1   : > { %5139 = vmatprep.subr.bf16.mxu1 %v5555_v42  ;;  %5203 = vmatprep.subr.bf16.mxu0 %v5557_v43  ;;  %v5624_v41 = vld [vmem:[%s7154_s0 + $0x44] ss:$72 sps:$4 sm:$0xff]  }
 0x1a3   : > { %5140 = vmatpush3.bf16.msra.mxu1 %v5556_v44  ;;  %5204 = vmatpush3.bf16.msra.mxu0 %v5558_v45 }
 0x1a4   : > { %5141 = vmatprep.subr.bf16.mxu1 %v5565_v48  ;;  %5205 = vmatprep.subr.bf16.mxu0 %v5567_v49 }
 0x1a6   : > { %3870 = vmatmul.mubr.bf16.gmra.mrb[84].mxu1 %v5553_v46  ;;  %3967 = vmatmul.mubr.bf16.gmra.mrb[84].mxu0 %v5554_v47 }
 0x1a7   : > { %3877 = vmatprep.mubr.bf16.mxu1 %v5559_v50  ;;  %3974 = vmatprep.mubr.bf16.mxu0 %v5561_v51  ;;  %v5619_v50 = vld [vmem:[%s7154_s0 + $0x38] ss:$72 sps:$4 sm:$0xff]  }
 0x1a8   : > { %5142 = vmatpush3.bf16.msra.mxu1 %v5566_v52  ;;  %5206 = vmatpush3.bf16.msra.mxu0 %v5568_v53  ;;  %v5622_v51 = vld [vmem:[%s7154_s0 + $0x40] ss:$72 sps:$4 sm:$0xff]  }
 0x1a9   : > { %5143 = vmatprep.subr.bf16.mxu1 %v5575_v54  ;;  %5207 = vmatprep.subr.bf16.mxu0 %v5577_v55 }
 0x1ac   : > { %5144 = vmatpush3.bf16.msra.mxu1 %v5576_v56  ;;  %5208 = vmatpush3.bf16.msra.mxu0 %v5578_v57  ;;  %v5625_v56 = vld [vmem:[%s7154_s0 + $0xcc] ss:$72 sps:$4 sm:$0xff]  }
 0x1ad   : > { %5145 = vmatprep.subr.bf16.mxu1 %v5585_v60  ;;  %5209 = vmatprep.subr.bf16.mxu0 %v5587_v63  ;;  %v5627_v57 = vld [vmem:[%s7154_s0 + $0xd4] ss:$72 sps:$4 sm:$0xff]  }
 0x1ae   : > { %3878 = vmatmul.mubr.bf16.gmra.mrb[88].mxu1 %v5563_v58  ;;  %3975 = vmatmul.mubr.bf16.gmra.mrb[88].mxu0 %v5564_v59 }
 0x1af   : > { %3885 = vmatprep.mubr.bf16.mxu1 %v5569_v61  ;;  %3982 = vmatprep.mubr.bf16.mxu0 %v5571_v62 }
 0x1b0   : > { %5146 = vmatpush3.bf16.msra.mxu1 %v5586_v0  ;;  %5210 = vmatpush3.bf16.msra.mxu0 %v5588_v1 }
 0x1b1   : > { %5147 = vmatprep.subr.bf16.mxu1 %v5595_v2  ;;  %5211 = vmatprep.subr.bf16.mxu0 %v5597_v3  ;;  %v5629_v2 = vld [vmem:[%s7154_s0 + $0xc8] ss:$72 sps:$4 sm:$0xff]  }
 0x1b2   : > { %v5630_v3 = vld [vmem:[%s7154_s0 + $0xd0] ss:$72 sps:$4 sm:$0xff]  }
 0x1b4   : > { %5148 = vmatpush3.bf16.msra.mxu1 %v5596_v4  ;;  %5212 = vmatpush3.bf16.msra.mxu0 %v5598_v5 }
 0x1b5   : > { %5149 = vmatprep.subr.bf16.mxu1 %v5605_v8  ;;  %5213 = vmatprep.subr.bf16.mxu0 %v5607_v10  ;;  %v5631_v8 = vld [vmem:[%s7154_s0 + $0x15c] ss:$72 sps:$4 sm:$0xff]  }
 0x1b6   : > { %3886 = vmatmul.mubr.bf16.gmra.mrb[92].mxu1 %v5573_v6  ;;  %3983 = vmatmul.mubr.bf16.gmra.mrb[92].mxu0 %v5574_v7 }
 0x1b7   : > { %3893 = vmatprep.mubr.bf16.mxu1 %v5579_v9  ;;  %3990 = vmatprep.mubr.bf16.mxu0 %v5581_v11  ;;  %v5633_v9 = vld [vmem:[%s7154_s0 + $0x164] ss:$72 sps:$4 sm:$0xff]  }
 0x1b8   : > { %5150 = vmatpush3.bf16.msra.mxu1 %v5606_v12  ;;  %5214 = vmatpush3.bf16.msra.mxu0 %v5608_v13 }
 0x1b9   : > { %5151 = vmatprep.subr.bf16.mxu1 %v5615_v14  ;;  %5215 = vmatprep.subr.bf16.mxu0 %v5617_v15 }
 0x1bc   : > { %5152 = vmatpush3.bf16.msra.mxu1 %v5616_v16  ;;  %5216 = vmatpush3.bf16.msra.mxu0 %v5618_v17 }
 0x1be   : > { %3894 = vmatmul.mubr.bf16.gmra.mrb[96].mxu1 %v5583_v18  ;;  %3991 = vmatmul.mubr.bf16.gmra.mrb[96].mxu0 %v5584_v19  ;;  %v5635_v18 = vld [vmem:[%s7154_s0 + $0x158] ss:$72 sps:$4 sm:$0xff]  }
 0x1bf   : > { %3901 = vmatprep.mubr.bf16.mxu1 %v5589_v20  ;;  %3998 = vmatprep.mubr.bf16.mxu0 %v5591_v21  ;;  %v5636_v19 = vld [vmem:[%s7154_s0 + $0x160] ss:$72 sps:$4 sm:$0xff]  }
 0x1c6   : > { %3902 = vmatmul.mubr.bf16.gmra.mrb[100].mxu1 %v5593_v22  ;;  %3999 = vmatmul.mubr.bf16.gmra.mrb[100].mxu0 %v5594_v23 }
 0x1c7   : > { %3909 = vmatprep.mubr.bf16.mxu1 %v5599_v24  ;;  %4006 = vmatprep.mubr.bf16.mxu0 %v5601_v25  ;;  %v5637_v24 = vld [vmem:[%s7154_s0 + $0x1ec] ss:$72 sps:$4 sm:$0xff]  }
 0x1c8   : > { %v5639_v25 = vld [vmem:[%s7154_s0 + $0x1f4] ss:$72 sps:$4 sm:$0xff]  }
 0x1ce   : > { %3910 = vmatmul.mubr.bf16.gmra.mrb[104].mxu1 %v5603_v26  ;;  %4007 = vmatmul.mubr.bf16.gmra.mrb[104].mxu0 %v5604_v27 }
 0x1cf   : > { %3917 = vmatprep.mubr.bf16.mxu1 %v5609_v28  ;;  %4014 = vmatprep.mubr.bf16.mxu0 %v5611_v29 }
 0x1d1   : > { %v4705_v30 = vpop.f32.mrb[0].mxu0  ;;  %v4729_v31 = vpop.f32.mrb[0].mxu1 }
 0x1d2   : > { %v4706_v32 = vpop.f32.mrb[1].mxu0  ;;  %v4730_v33 = vpop.f32.mrb[1].mxu1 }
 0x1d3   : > { %v6813_v36 = vadd.f32 %v4706_v32, %v4705_v30  ;;  %v6815_v37 = vadd.f32 %v4730_v33, %v4729_v31  ;;  %v4708_v38 = vpop.f32.mrb[2].mxu0  ;;  %v4732_v39 = vpop.f32.mrb[2].mxu1 }
 0x1d4   : > { %v4709_v42 = vpop.f32.mrb[3].mxu0  ;;  %v4733_v43 = vpop.f32.mrb[3].mxu1 }
 0x1d5   : > { %v6823_v44 = vadd.f32 %v4709_v42, %v4708_v38  ;;  %v6825_v45 = vadd.f32 %v4733_v43, %v4732_v39  ;;  %v5643_v42 = vld [vmem:[%s7154_s0 + $0x27c] ss:$72 sps:$4 sm:$0xff]  }
 0x1d6   : > { %3918 = vmatmul.mubr.bf16.gmra.mrb[108].mxu1 %v5613_v34  ;;  %4015 = vmatmul.mubr.bf16.gmra.mrb[108].mxu0 %v5614_v35  ;;  %v5641_v34 = vld [vmem:[%s7154_s0 + $0x1e8] ss:$72 sps:$4 sm:$0xff]   ;;  %v5645_v43 = vld [vmem:[%s7154_s0 + $0x284] ss:$72 sps:$4 sm:$0xff]  }
 0x1d7   : > { %4055 = vmatprep.mubr.bf16.mxu1 %v5621_v40  ;;  %4152 = vmatprep.mubr.bf16.mxu0 %v5624_v41  ;;  %v5642_v35 = vld [vmem:[%s7154_s0 + $0x1f0] ss:$72 sps:$4 sm:$0xff]  }
 0x1d9   : > { %v4711_v46 = vpop.f32.mrb[4].mxu0  ;;  %v4735_v47 = vpop.f32.mrb[4].mxu1 }
 0x1da   : > { %v4712_v48 = vpop.f32.mrb[5].mxu0  ;;  %v4736_v49 = vpop.f32.mrb[5].mxu1 }
 0x1db   : > { %v6833_v52 = vadd.f32 %v4712_v48, %v4711_v46  ;;  %v6835_v53 = vadd.f32 %v4736_v49, %v4735_v47  ;;  %v4714_v54 = vpop.f32.mrb[6].mxu0  ;;  %v4738_v55 = vpop.f32.mrb[6].mxu1 }
 0x1dc   : > { %v4715_v58 = vpop.f32.mrb[7].mxu0  ;;  %v4739_v59 = vpop.f32.mrb[7].mxu1 }
 0x1dd   : > { %v6843_v60 = vadd.f32 %v4715_v58, %v4714_v54  ;;  %v6845_v61 = vadd.f32 %v4739_v59, %v4738_v55 }
 0x1de   : > { %4056 = vmatmul.mubr.bf16.vlgmr.msra.gmra.mrb[112].mxu1 %v5619_v50  ;;  %4153 = vmatmul.mubr.bf16.vlgmr.msra.gmra.mrb[112].mxu0 %v5622_v51 }
 0x1df   : > { %4063 = vmatprep.mubr.bf16.mxu1 %v5625_v56  ;;  %4160 = vmatprep.mubr.bf16.mxu0 %v5627_v57 }
 0x1e1   : > { %v4717_v62 = vpop.f32.mrb[8].mxu0  ;;  %v4741_v63 = vpop.f32.mrb[8].mxu1 }
 0x1e2   : > { %v4718_v0 = vpop.f32.mrb[9].mxu0  ;;  %v4742_v1 = vpop.f32.mrb[9].mxu1 }
 0x1e3   : > { %v6853_v4 = vadd.f32 %v4718_v0, %v4717_v62  ;;  %v6855_v5 = vadd.f32 %v4742_v1, %v4741_v63  ;;  %v4720_v6 = vpop.f32.mrb[10].mxu0  ;;  %v4744_v7 = vpop.f32.mrb[10].mxu1  ;;  %v5648_v62 = vld [vmem:[%s7154_s0 + $0x280] ss:$72 sps:$4 sm:$0xff]  }
 0x1e4   : > { %v4721_v10 = vpop.f32.mrb[11].mxu0  ;;  %v4745_v11 = vpop.f32.mrb[11].mxu1 }
 0x1e5   : > { %v6863_v12 = vadd.f32 %v4721_v10, %v4720_v6  ;;  %v6865_v13 = vadd.f32 %v4745_v11, %v4744_v7 }
 0x1e6   : > { %4064 = vmatmul.mubr.bf16.gmra.mrb[116].mxu1 %v5629_v2  ;;  %4161 = vmatmul.mubr.bf16.gmra.mrb[116].mxu0 %v5630_v3  ;;  %v5649_v2 = vld [vmem:[%s7154_s0 + $0x30c] ss:$72 sps:$4 sm:$0xff]  }
 0x1e7   : > { %4071 = vmatprep.mubr.bf16.mxu1 %v5631_v8  ;;  %4168 = vmatprep.mubr.bf16.mxu0 %v5633_v9  ;;  %v5651_v3 = vld [vmem:[%s7154_s0 + $0x314] ss:$72 sps:$4 sm:$0xff]  }
 0x1e9   : > { %v4723_v14 = vpop.f32.mrb[12].mxu0  ;;  %v4747_v15 = vpop.f32.mrb[12].mxu1 }
 0x1ea   : > { %v4724_v16 = vpop.f32.mrb[13].mxu0  ;;  %v4748_v17 = vpop.f32.mrb[13].mxu1 }
 0x1eb   : > { %v6873_v20 = vadd.f32 %v4724_v16, %v4723_v14  ;;  %v6875_v21 = vadd.f32 %v4748_v17, %v4747_v15  ;;  %v4726_v22 = vpop.f32.mrb[14].mxu0  ;;  %v4750_v23 = vpop.f32.mrb[14].mxu1 }
 0x1ec   : > { %v4727_v26 = vpop.f32.mrb[15].mxu0  ;;  %v4751_v27 = vpop.f32.mrb[15].mxu1 }
 0x1ed   : > { %v6883_v28 = vadd.f32 %v4727_v26, %v4726_v22  ;;  %v6885_v29 = vadd.f32 %v4751_v27, %v4750_v23  ;;  %v5654_v22 = vld [vmem:[%s7154_s0 + $0x310] ss:$72 sps:$4 sm:$0xff]   ;;  %v5655_v26 = vld [vmem:[%s7154_s0 + $0x39c] ss:$72 sps:$4 sm:$0xff]  }
 0x1ee   : > { %4072 = vmatmul.mubr.bf16.gmra.mrb[120].mxu1 %v5635_v18  ;;  %4169 = vmatmul.mubr.bf16.gmra.mrb[120].mxu0 %v5636_v19  ;;  %v5657_v27 = vld [vmem:[%s7154_s0 + $0x3a4] ss:$72 sps:$4 sm:$0xff]  }
 0x1ef   : > { %4079 = vmatprep.mubr.bf16.mxu1 %v5637_v24  ;;  %4176 = vmatprep.mubr.bf16.mxu0 %v5639_v25 }
 0x1f1   : > { %v4769_v30 = vpop.f32.mrb[16].mxu1  ;;  %v4833_v31 = vpop.f32.mrb[16].mxu0 }
 0x1f2   : > { %v4770_v32 = vpop.f32.mrb[17].mxu1  ;;  %v4834_v33 = vpop.f32.mrb[17].mxu0 }
 0x1f3   : > { %v4771_v38 = vadd.f32 %v4770_v32, %v4769_v30  ;;  %v4835_v39 = vadd.f32 %v4834_v33, %v4833_v31  ;;  %v4772_v40 = vpop.f32.mrb[18].mxu1  ;;  %v4836_v41 = vpop.f32.mrb[18].mxu0 }
 0x1f4   : > { %v4773_v46 = vpop.f32.mrb[19].mxu1  ;;  %v4837_v47 = vpop.f32.mrb[19].mxu0 }
 0x1f5   : > { %v3476_v48 = vadd.f32 %v4771_v38, %v6813_v36  ;;  %v4774_v49 = vadd.f32 %v4773_v46, %v4772_v40  ;;  %v4838_v50 = vadd.f32 %v4837_v47, %v4836_v41  ;;  %v5647_v36 = vld [vmem:[%s7154_s0 + $0x278] ss:$72 sps:$4 sm:$0xff]  }
 0x1f6   : > { %4080 = vmatmul.mubr.bf16.gmra.mrb[124].mxu1 %v5641_v34  ;;  %4177 = vmatmul.mubr.bf16.gmra.mrb[124].mxu0 %v5642_v35  ;;  %v5660_v46 = vld [vmem:[%s7154_s0 + $0x3a0] ss:$72 sps:$4 sm:$0xff]  }
 0x1f7   : > { %v6900_v51 = vadd.f32 %v4835_v39, %v3476_v48  ;;  %v3479_v54 = vadd.f32 %v4774_v49, %v6823_v44  ;;  %4087 = vmatprep.mubr.bf16.mxu1 %v5643_v42  ;;  %4184 = vmatprep.mubr.bf16.mxu0 %v5645_v43 }
 0x1f9   : > { %v6903_v55 = vadd.f32 %v4838_v50, %v3479_v54  ;;  %v4775_v56 = vpop.f32.mrb[20].mxu1  ;;  %v4839_v57 = vpop.f32.mrb[20].mxu0  ;;  %v5661_v50 = vld [vmem:[%s7154_s0 + $0x42c] ss:$72 sps:$4 sm:$0xff]  }
 0x1fa   : > { %v4776_v58 = vpop.f32.mrb[21].mxu1  ;;  %v4840_v59 = vpop.f32.mrb[21].mxu0  ;;  %v5663_v54 = vld [vmem:[%s7154_s0 + $0x434] ss:$72 sps:$4 sm:$0xff]  }
 0x1fb   : > { %v4777_v63 = vadd.f32 %v4776_v58, %v4775_v56  ;;  %v4841_v0 = vadd.f32 %v4840_v59, %v4839_v57  ;;  %v4778_v1 = vpop.f32.mrb[22].mxu1  ;;  %v4842_v44 = vpop.f32.mrb[22].mxu0 }
 0x1fc   : > { %v4779_v6 = vpop.f32.mrb[23].mxu1  ;;  %v4843_v7 = vpop.f32.mrb[23].mxu0 }
 0x1fd   : > { %v3484_v8 = vadd.f32 %v4777_v63, %v6833_v52  ;;  %v4780_v9 = vadd.f32 %v4779_v6, %v4778_v1  ;;  %v4844_v10 = vadd.f32 %v4843_v7, %v4842_v44  ;;  %v5653_v52 = vld [vmem:[%s7154_s0 + $0x308] ss:$72 sps:$4 sm:$0xff]  }
 0x1fe   : > { %4088 = vmatmul.mubr.bf16.gmra.mrb[128].mxu1 %v5647_v36  ;;  %4185 = vmatmul.mubr.bf16.gmra.mrb[128].mxu0 %v5648_v62  ;;  %v5666_v6 = vld [vmem:[%s7154_s0 + $0x430] ss:$72 sps:$4 sm:$0xff]  }
 0x1ff   : > { %v6918_v11 = vadd.f32 %v4841_v0, %v3484_v8  ;;  %v3487_v14 = vadd.f32 %v4780_v9, %v6843_v60  ;;  %4095 = vmatprep.mubr.bf16.mxu1 %v5649_v2  ;;  %4192 = vmatprep.mubr.bf16.mxu0 %v5651_v3 }
 0x201   : > { %v6921_v15 = vadd.f32 %v4844_v10, %v3487_v14  ;;  %v4781_v16 = vpop.f32.mrb[24].mxu1  ;;  %v4845_v17 = vpop.f32.mrb[24].mxu0 }
 0x202   : > { %v4782_v18 = vpop.f32.mrb[25].mxu1  ;;  %v4846_v19 = vpop.f32.mrb[25].mxu0 }
 0x203   : > { %v4783_v23 = vadd.f32 %v4782_v18, %v4781_v16  ;;  %v4847_v24 = vadd.f32 %v4846_v19, %v4845_v17  ;;  %v4784_v25 = vpop.f32.mrb[26].mxu1  ;;  %v4848_v60 = vpop.f32.mrb[26].mxu0 }
 0x204   : > { %v4785_v30 = vpop.f32.mrb[27].mxu1  ;;  %v4849_v31 = vpop.f32.mrb[27].mxu0 }
 0x205   : > { %v3492_v32 = vadd.f32 %v4783_v23, %v6853_v4  ;;  %v4786_v33 = vadd.f32 %v4785_v30, %v4784_v25  ;;  %v4850_v34 = vadd.f32 %v4849_v31, %v4848_v60  ;;  %v5659_v4 = vld [vmem:[%s7154_s0 + $0x398] ss:$72 sps:$4 sm:$0xff]  }
 0x206   : > { %4096 = vmatmul.mubr.bf16.gmra.mrb[132].mxu1 %v5653_v52  ;;  %4193 = vmatmul.mubr.bf16.gmra.mrb[132].mxu0 %v5654_v22 }
 0x207   : > { %v6936_v35 = vadd.f32 %v4847_v24, %v3492_v32  ;;  %v3495_v38 = vadd.f32 %v4786_v33, %v6863_v12  ;;  %4103 = vmatprep.mubr.bf16.mxu1 %v5655_v26  ;;  %4200 = vmatprep.mubr.bf16.mxu0 %v5657_v27 }
 0x209   : > { %v6939_v39 = vadd.f32 %v4850_v34, %v3495_v38  ;;  %v4787_v40 = vpop.f32.mrb[28].mxu1  ;;  %v4851_v41 = vpop.f32.mrb[28].mxu0 }
 0x20a   : > { %v4788_v42 = vpop.f32.mrb[29].mxu1  ;;  %v4852_v43 = vpop.f32.mrb[29].mxu0 }
 0x20b   : > { %v4789_v47 = vadd.f32 %v4788_v42, %v4787_v40  ;;  %v4853_v48 = vadd.f32 %v4852_v43, %v4851_v41  ;;  %v4790_v49 = vpop.f32.mrb[30].mxu1  ;;  %v4854_v12 = vpop.f32.mrb[30].mxu0 }
 0x20c   : > { %v4791_v56 = vpop.f32.mrb[31].mxu1  ;;  %v4855_v57 = vpop.f32.mrb[31].mxu0 }
 0x20d   : > { %v3500_v58 = vadd.f32 %v4789_v47, %v6873_v20  ;;  %v4792_v59 = vadd.f32 %v4791_v56, %v4790_v49  ;;  %v4856_v36 = vadd.f32 %v4855_v57, %v4854_v12  ;;  %v5665_v20 = vld [vmem:[%s7154_s0 + $0x428] ss:$72 sps:$4 sm:$0xff]  }
 0x20e   : > { %4104 = vmatmul.mubr.bf16.gmra.mrb[136].mxu1 %v5659_v4  ;;  %4201 = vmatmul.mubr.bf16.gmra.mrb[136].mxu0 %v5660_v46 }
 0x20f   : > { %v6954_v62 = vadd.f32 %v4853_v48, %v3500_v58  ;;  %v3503_v63 = vadd.f32 %v4792_v59, %v6883_v28  ;;  %4111 = vmatprep.mubr.bf16.mxu1 %v5661_v50  ;;  %4208 = vmatprep.mubr.bf16.mxu0 %v5663_v54 }
 0x211   : > { %v6957_v0 = vadd.f32 %v4856_v36, %v3503_v63  ;;  %v4793_v1 = vpop.f32.mrb[32].mxu1  ;;  %v4857_v44 = vpop.f32.mrb[32].mxu0 }
 0x212   : > { %v4794_v2 = vpop.f32.mrb[33].mxu1  ;;  %v4858_v3 = vpop.f32.mrb[33].mxu0 }
 0x213   : > { %v4795_v7 = vadd.f32 %v4794_v2, %v4793_v1  ;;  %v4859_v8 = vadd.f32 %v4858_v3, %v4857_v44  ;;  %v4796_v9 = vpop.f32.mrb[34].mxu1  ;;  %v4860_v28 = vpop.f32.mrb[34].mxu0 }
 0x214   : > { %v4797_v10 = vpop.f32.mrb[35].mxu1  ;;  %v4861_v14 = vpop.f32.mrb[35].mxu0 }
 0x215   : > { %v3508_v16 = vadd.f32 %v4795_v7, %v6815_v37  ;;  %v4798_v17 = vadd.f32 %v4797_v10, %v4796_v9  ;;  %v4862_v18 = vadd.f32 %v4861_v14, %v4860_v28 }
 0x216   : > { %4112 = vmatmul.mubr.bf16.gmra.mrb[140].mxu1 %v5665_v20  ;;  %4209 = vmatmul.mubr.bf16.gmra.mrb[140].mxu0 %v5666_v6 }
 0x217   : > { %v6966_v19 = vadd.f32 %v4859_v8, %v3508_v16  ;;  %v3511_v52 = vadd.f32 %v4798_v17, %v6825_v45 }
 0x219   : > { %v6969_v22 = vadd.f32 %v4862_v18, %v3511_v52  ;;  %v4799_v23 = vpop.f32.mrb[36].mxu1  ;;  %v4863_v24 = vpop.f32.mrb[36].mxu0 }
 0x21a   : > { %v4800_v25 = vpop.f32.mrb[37].mxu1  ;;  %v4864_v60 = vpop.f32.mrb[37].mxu0 }
 0x21b   : > { %v4801_v26 = vadd.f32 %v4800_v25, %v4799_v23  ;;  %v4865_v27 = vadd.f32 %v4864_v60, %v4863_v24  ;;  %v4802_v30 = vpop.f32.mrb[38].mxu1  ;;  %v4866_v31 = vpop.f32.mrb[38].mxu0 }
 0x21c   : > { %v4803_v32 = vpop.f32.mrb[39].mxu1  ;;  %v4867_v37 = vpop.f32.mrb[39].mxu0 }
 0x21d   : > { %v3516_v33 = vadd.f32 %v4801_v26, %v6835_v53  ;;  %v4804_v34 = vadd.f32 %v4803_v32, %v4802_v30  ;;  %v4868_v38 = vadd.f32 %v4867_v37, %v4866_v31 }
 0x21f   : > { %v6972_v40 = vadd.f32 %v4865_v27, %v3516_v33  ;;  %v3519_v45 = vadd.f32 %v4804_v34, %v6845_v61 }
 0x221   : > { %v6975_v41 = vadd.f32 %v4868_v38, %v3519_v45  ;;  %v4805_v42 = vpop.f32.mrb[40].mxu1  ;;  %v4869_v43 = vpop.f32.mrb[40].mxu0 }
 0x222   : > { %v4806_v4 = vpop.f32.mrb[41].mxu1  ;;  %v4870_v46 = vpop.f32.mrb[41].mxu0 }
 0x223   : > { %v4807_v47 = vadd.f32 %v4806_v4, %v4805_v42  ;;  %v4871_v48 = vadd.f32 %v4870_v46, %v4869_v43  ;;  %v4808_v49 = vpop.f32.mrb[42].mxu1  ;;  %v4872_v12 = vpop.f32.mrb[42].mxu0 }
 0x224   : > { %v4809_v50 = vpop.f32.mrb[43].mxu1  ;;  %v4873_v54 = vpop.f32.mrb[43].mxu0 }
 0x225   : > { %v3524_v53 = vadd.f32 %v4807_v47, %v6855_v5  ;;  %v4810_v56 = vadd.f32 %v4809_v50, %v4808_v49  ;;  %v4874_v57 = vadd.f32 %v4873_v54, %v4872_v12 }
 0x227   : > { %v6978_v58 = vadd.f32 %v4871_v48, %v3524_v53  ;;  %v3527_v61 = vadd.f32 %v4810_v56, %v6865_v13 }
 0x229   : > { %v6981_v59 = vadd.f32 %v4874_v57, %v3527_v61  ;;  %v4811_v36 = vpop.f32.mrb[44].mxu1  ;;  %v4875_v63 = vpop.f32.mrb[44].mxu0 }
 0x22a   : > { %v4812_v1 = vpop.f32.mrb[45].mxu1  ;;  %v4876_v44 = vpop.f32.mrb[45].mxu0 }
 0x22b   : > { %v4813_v2 = vadd.f32 %v4812_v1, %v4811_v36  ;;  %v4877_v3 = vadd.f32 %v4876_v44, %v4875_v63  ;;  %v4814_v20 = vpop.f32.mrb[46].mxu1  ;;  %v4878_v6 = vpop.f32.mrb[46].mxu0 }
 0x22c   : > { %v4815_v7 = vpop.f32.mrb[47].mxu1  ;;  %v4879_v8 = vpop.f32.mrb[47].mxu0 }
 0x22d   : > { %v3532_v5 = vadd.f32 %v4813_v2, %v6875_v21  ;;  %v4816_v9 = vadd.f32 %v4815_v7, %v4814_v20  ;;  %v4880_v28 = vadd.f32 %v4879_v8, %v4878_v6 }
 0x22f   : > { %v6984_v10 = vadd.f32 %v4877_v3, %v3532_v5  ;;  %v3535_v13 = vadd.f32 %v4816_v9, %v6885_v29 }
 0x231   : > { %v6987_v14 = vadd.f32 %v4880_v28, %v3535_v13  ;;  %v4897_v16 = vpop.f32.mrb[48].mxu1  ;;  %v4961_v17 = vpop.f32.mrb[48].mxu0 }
 0x232   : > { %v4898_v18 = vpop.f32.mrb[49].mxu1  ;;  %v4962_v52 = vpop.f32.mrb[49].mxu0 }
 0x233   : > { %v4899_v23 = vadd.f32 %v4898_v18, %v4897_v16  ;;  %v4963_v24 = vadd.f32 %v4962_v52, %v4961_v17  ;;  %v4900_v25 = vpop.f32.mrb[50].mxu1  ;;  %v4964_v60 = vpop.f32.mrb[50].mxu0 }
 0x234   : > { %v4901_v26 = vpop.f32.mrb[51].mxu1  ;;  %v4965_v27 = vpop.f32.mrb[51].mxu0 }
 0x235   : > { %v3670_v21 = vadd.f32 %v4899_v23, %v6900_v51  ;;  %v4902_v30 = vadd.f32 %v4901_v26, %v4900_v25  ;;  %v4966_v31 = vadd.f32 %v4965_v27, %v4964_v60 }
 0x237   : > { %v6990_v32 = vadd.f32 %v4963_v24, %v3670_v21  ;;  %v3673_v29 = vadd.f32 %v4902_v30, %v6903_v55 }
 0x239   : > { %v6993_v37 = vadd.f32 %v4966_v31, %v3673_v29  ;;  %v4903_v33 = vpop.f32.mrb[52].mxu1  ;;  %v4967_v34 = vpop.f32.mrb[52].mxu0 }
 0x23a   : > { %v4904_v38 = vpop.f32.mrb[53].mxu1  ;;  %v4968_v45 = vpop.f32.mrb[53].mxu0 }
 0x23b   : > { %v4905_v42 = vadd.f32 %v4904_v38, %v4903_v33  ;;  %v4969_v43 = vadd.f32 %v4968_v45, %v4967_v34  ;;  %v4906_v4 = vpop.f32.mrb[54].mxu1  ;;  %v4970_v46 = vpop.f32.mrb[54].mxu0 }
 0x23c   : > { %v4907_v47 = vpop.f32.mrb[55].mxu1  ;;  %v4971_v48 = vpop.f32.mrb[55].mxu0 }
 0x23d   : > { %v3678_v51 = vadd.f32 %v4905_v42, %v6918_v11  ;;  %v4908_v49 = vadd.f32 %v4907_v47, %v4906_v4  ;;  %v4972_v12 = vadd.f32 %v4971_v48, %v4970_v46 }
 0x23f   : > { %v6996_v50 = vadd.f32 %v4969_v43, %v3678_v51  ;;  %v3681_v55 = vadd.f32 %v4908_v49, %v6921_v15 }
 0x241   : > { %v6999_v54 = vadd.f32 %v4972_v12, %v3681_v55  ;;  %v4909_v53 = vpop.f32.mrb[56].mxu1  ;;  %v4973_v56 = vpop.f32.mrb[56].mxu0 }
 0x242   : > { %v4910_v57 = vpop.f32.mrb[57].mxu1  ;;  %v4974_v61 = vpop.f32.mrb[57].mxu0 }
 0x243   : > { %v4911_v36 = vadd.f32 %v4910_v57, %v4909_v53  ;;  %v4975_v63 = vadd.f32 %v4974_v61, %v4973_v56  ;;  %v4912_v1 = vpop.f32.mrb[58].mxu1  ;;  %v4976_v44 = vpop.f32.mrb[58].mxu0 }
 0x244   : > { %v4913_v2 = vpop.f32.mrb[59].mxu1  ;;  %v4977_v3 = vpop.f32.mrb[59].mxu0 }
 0x245   : > { %v3686_v11 = vadd.f32 %v4911_v36, %v6936_v35  ;;  %v4914_v20 = vadd.f32 %v4913_v2, %v4912_v1  ;;  %v4978_v6 = vadd.f32 %v4977_v3, %v4976_v44 }
 0x247   : > { %v7002_v7 = vadd.f32 %v4975_v63, %v3686_v11  ;;  %v3689_v15 = vadd.f32 %v4914_v20, %v6939_v39 }
 0x249   : > { %v7005_v8 = vadd.f32 %v4978_v6, %v3689_v15  ;;  %v4915_v5 = vpop.f32.mrb[60].mxu1  ;;  %v4979_v9 = vpop.f32.mrb[60].mxu0 }
 0x24a   : > { %v4916_v28 = vpop.f32.mrb[61].mxu1  ;;  %v4980_v13 = vpop.f32.mrb[61].mxu0 }
 0x24b   : > { %v4917_v16 = vadd.f32 %v4916_v28, %v4915_v5  ;;  %v4981_v17 = vadd.f32 %v4980_v13, %v4979_v9  ;;  %v4918_v18 = vpop.f32.mrb[62].mxu1  ;;  %v4982_v52 = vpop.f32.mrb[62].mxu0 }
 0x24c   : > { %v4919_v23 = vpop.f32.mrb[63].mxu1  ;;  %v4983_v24 = vpop.f32.mrb[63].mxu0 }
 0x24d   : > { %v3694_v35 = vadd.f32 %v4917_v16, %v6954_v62  ;;  %v4920_v25 = vadd.f32 %v4919_v23, %v4918_v18  ;;  %v4984_v60 = vadd.f32 %v4983_v24, %v4982_v52 }
 0x24f   : > { %v7008_v26 = vadd.f32 %v4981_v17, %v3694_v35  ;;  %v3697_v39 = vadd.f32 %v4920_v25, %v6957_v0 }
 0x251   : > { %v7011_v27 = vadd.f32 %v4984_v60, %v3697_v39  ;;  %v4921_v21 = vpop.f32.mrb[64].mxu1  ;;  %v4985_v30 = vpop.f32.mrb[64].mxu0 }
 0x252   : > { %v4922_v31 = vpop.f32.mrb[65].mxu1  ;;  %v4986_v29 = vpop.f32.mrb[65].mxu0 }
 0x253   : > { %v4923_v33 = vadd.f32 %v4922_v31, %v4921_v21  ;;  %v4987_v34 = vadd.f32 %v4986_v29, %v4985_v30  ;;  %v4924_v38 = vpop.f32.mrb[66].mxu1  ;;  %v4988_v45 = vpop.f32.mrb[66].mxu0 }
 0x254   : > { %v4925_v42 = vpop.f32.mrb[67].mxu1  ;;  %v4989_v43 = vpop.f32.mrb[67].mxu0 }
 0x255   : > { %v3702_v62 = vadd.f32 %v4923_v33, %v6966_v19  ;;  %v4926_v4 = vadd.f32 %v4925_v42, %v4924_v38  ;;  %v4990_v46 = vadd.f32 %v4989_v43, %v4988_v45 }
 0x257   : > { %v7014_v47 = vadd.f32 %v4987_v34, %v3702_v62  ;;  %v3705_v0 = vadd.f32 %v4926_v4, %v6969_v22 }
 0x259   : > { %v7017_v48 = vadd.f32 %v4990_v46, %v3705_v0  ;;  %v4927_v51 = vpop.f32.mrb[68].mxu1  ;;  %v4991_v49 = vpop.f32.mrb[68].mxu0 }
 0x25a   : > { %v4928_v12 = vpop.f32.mrb[69].mxu1  ;;  %v4992_v55 = vpop.f32.mrb[69].mxu0 }
 0x25b   : > { %v4929_v53 = vadd.f32 %v4928_v12, %v4927_v51  ;;  %v4993_v56 = vadd.f32 %v4992_v55, %v4991_v49  ;;  %v4930_v57 = vpop.f32.mrb[70].mxu1  ;;  %v4994_v61 = vpop.f32.mrb[70].mxu0 }
 0x25c   : > { %v4931_v36 = vpop.f32.mrb[71].mxu1  ;;  %v4995_v63 = vpop.f32.mrb[71].mxu0 }
 0x25d   : > { %v3710_v19 = vadd.f32 %v4929_v53, %v6972_v40  ;;  %v4932_v1 = vadd.f32 %v4931_v36, %v4930_v57  ;;  %v4996_v44 = vadd.f32 %v4995_v63, %v4994_v61 }
 0x25f   : > { %v7020_v2 = vadd.f32 %v4993_v56, %v3710_v19  ;;  %v3713_v22 = vadd.f32 %v4932_v1, %v6975_v41 }
 0x261   : > { %v7023_v3 = vadd.f32 %v4996_v44, %v3713_v22  ;;  %v4933_v11 = vpop.f32.mrb[72].mxu1  ;;  %v4997_v20 = vpop.f32.mrb[72].mxu0 }
 0x262   : > { %v4934_v6 = vpop.f32.mrb[73].mxu1  ;;  %v4998_v15 = vpop.f32.mrb[73].mxu0 }
 0x263   : > { %v4935_v5 = vadd.f32 %v4934_v6, %v4933_v11  ;;  %v4999_v9 = vadd.f32 %v4998_v15, %v4997_v20  ;;  %v4936_v28 = vpop.f32.mrb[74].mxu1  ;;  %v5000_v13 = vpop.f32.mrb[74].mxu0 }
 0x264   : > { %v4937_v16 = vpop.f32.mrb[75].mxu1  ;;  %v5001_v17 = vpop.f32.mrb[75].mxu0 }
 0x265   : > { %v3718_v40 = vadd.f32 %v4935_v5, %v6978_v58  ;;  %v4938_v18 = vadd.f32 %v4937_v16, %v4936_v28  ;;  %v5002_v52 = vadd.f32 %v5001_v17, %v5000_v13 }
 0x267   : > { %v7026_v23 = vadd.f32 %v4999_v9, %v3718_v40  ;;  %v3721_v41 = vadd.f32 %v4938_v18, %v6981_v59 }
 0x269   : > { %v7029_v24 = vadd.f32 %v5002_v52, %v3721_v41  ;;  %v4939_v35 = vpop.f32.mrb[76].mxu1  ;;  %v5003_v25 = vpop.f32.mrb[76].mxu0 }
 0x26a   : > { %v4940_v60 = vpop.f32.mrb[77].mxu1  ;;  %v5004_v39 = vpop.f32.mrb[77].mxu0 }
 0x26b   : > { %v4941_v21 = vadd.f32 %v4940_v60, %v4939_v35  ;;  %v5005_v30 = vadd.f32 %v5004_v39, %v5003_v25  ;;  %v4942_v31 = vpop.f32.mrb[78].mxu1  ;;  %v5006_v29 = vpop.f32.mrb[78].mxu0 }
 0x26c   : > { %v4943_v33 = vpop.f32.mrb[79].mxu1  ;;  %v5007_v34 = vpop.f32.mrb[79].mxu0 }
 0x26d   : > { %v3726_v58 = vadd.f32 %v4941_v21, %v6984_v10  ;;  %v4944_v38 = vadd.f32 %v4943_v33, %v4942_v31  ;;  %v5008_v45 = vadd.f32 %v5007_v34, %v5006_v29 }
 0x26f   : > { %v7032_v42 = vadd.f32 %v5005_v30, %v3726_v58  ;;  %v3729_v59 = vadd.f32 %v4944_v38, %v6987_v14 }
 0x271   : > { %v7035_v43 = vadd.f32 %v5008_v45, %v3729_v59  ;;  %v5025_v62 = vpop.f32.mrb[80].mxu1  ;;  %v5089_v4 = vpop.f32.mrb[80].mxu0 }
 0x272   : > { %v5026_v46 = vpop.f32.mrb[81].mxu1  ;;  %v5090_v0 = vpop.f32.mrb[81].mxu0 }
 0x273   : > { %v5027_v51 = vadd.f32 %v5026_v46, %v5025_v62  ;;  %v5091_v49 = vadd.f32 %v5090_v0, %v5089_v4  ;;  %v5028_v12 = vpop.f32.mrb[82].mxu1  ;;  %v5092_v55 = vpop.f32.mrb[82].mxu0 }
 0x274   : > { %v5029_v53 = vpop.f32.mrb[83].mxu1  ;;  %v5093_v56 = vpop.f32.mrb[83].mxu0 }
 0x275   : > { %v3864_v10 = vadd.f32 %v5027_v51, %v6990_v32  ;;  %v5030_v57 = vadd.f32 %v5029_v53, %v5028_v12  ;;  %v5094_v61 = vadd.f32 %v5093_v56, %v5092_v55 }
 0x277   : > { %v7038_v36 = vadd.f32 %v5091_v49, %v3864_v10  ;;  %v3867_v14 = vadd.f32 %v5030_v57, %v6993_v37 }
 0x279   : > { %v7041_v63 = vadd.f32 %v5094_v61, %v3867_v14  ;;  %v5031_v19 = vpop.f32.mrb[84].mxu1  ;;  %v5095_v1 = vpop.f32.mrb[84].mxu0 }
 0x27a   : > { %v5032_v44 = vpop.f32.mrb[85].mxu1  ;;  %v5096_v22 = vpop.f32.mrb[85].mxu0 }
 0x27b   : > { %v5033_v11 = vadd.f32 %v5032_v44, %v5031_v19  ;;  %v5097_v20 = vadd.f32 %v5096_v22, %v5095_v1  ;;  %v5034_v6 = vpop.f32.mrb[86].mxu1  ;;  %v5098_v15 = vpop.f32.mrb[86].mxu0 }
 0x27c   : > { %v5035_v5 = vpop.f32.mrb[87].mxu1  ;;  %v5099_v9 = vpop.f32.mrb[87].mxu0 }
 0x27d   : > { %v3872_v32 = vadd.f32 %v5033_v11, %v6996_v50  ;;  %v5036_v28 = vadd.f32 %v5035_v5, %v5034_v6  ;;  %v5100_v13 = vadd.f32 %v5099_v9, %v5098_v15 }
 0x27f   : > { %v7044_v16 = vadd.f32 %v5097_v20, %v3872_v32  ;;  %v3875_v37 = vadd.f32 %v5036_v28, %v6999_v54 }
 0x281   : > { %v7047_v17 = vadd.f32 %v5100_v13, %v3875_v37  ;;  %v5037_v40 = vpop.f32.mrb[88].mxu1  ;;  %v5101_v18 = vpop.f32.mrb[88].mxu0 }
 0x282   : > { %v5038_v52 = vpop.f32.mrb[89].mxu1  ;;  %v5102_v41 = vpop.f32.mrb[89].mxu0 }
 0x283   : > { %v5039_v35 = vadd.f32 %v5038_v52, %v5037_v40  ;;  %v5103_v25 = vadd.f32 %v5102_v41, %v5101_v18  ;;  %v5040_v60 = vpop.f32.mrb[90].mxu1  ;;  %v5104_v39 = vpop.f32.mrb[90].mxu0 }
 0x284   : > { %v5041_v21 = vpop.f32.mrb[91].mxu1  ;;  %v5105_v30 = vpop.f32.mrb[91].mxu0 }
 0x285   : > { %v3880_v50 = vadd.f32 %v5039_v35, %v7002_v7  ;;  %v5042_v31 = vadd.f32 %v5041_v21, %v5040_v60  ;;  %v5106_v29 = vadd.f32 %v5105_v30, %v5104_v39 }
 0x287   : > { %v7050_v33 = vadd.f32 %v5103_v25, %v3880_v50  ;;  %v3883_v54 = vadd.f32 %v5042_v31, %v7005_v8 }
 0x289   : > { %v7053_v34 = vadd.f32 %v5106_v29, %v3883_v54  ;;  %v5043_v58 = vpop.f32.mrb[92].mxu1  ;;  %v5107_v38 = vpop.f32.mrb[92].mxu0 }
 0x28a   : > { %v5044_v45 = vpop.f32.mrb[93].mxu1  ;;  %v5108_v59 = vpop.f32.mrb[93].mxu0 }
 0x28b   : > { %v5045_v62 = vadd.f32 %v5044_v45, %v5043_v58  ;;  %v5109_v4 = vadd.f32 %v5108_v59, %v5107_v38  ;;  %v5046_v46 = vpop.f32.mrb[94].mxu1  ;;  %v5110_v0 = vpop.f32.mrb[94].mxu0 }
 0x28c   : > { %v5047_v51 = vpop.f32.mrb[95].mxu1  ;;  %v5111_v49 = vpop.f32.mrb[95].mxu0 }
 0x28d   : > { %v3888_v7 = vadd.f32 %v5045_v62, %v7008_v26  ;;  %v5048_v12 = vadd.f32 %v5047_v51, %v5046_v46  ;;  %v5112_v55 = vadd.f32 %v5111_v49, %v5110_v0 }
 0x28f   : > { %v7056_v53 = vadd.f32 %v5109_v4, %v3888_v7  ;;  %v3891_v8 = vadd.f32 %v5048_v12, %v7011_v27 }
 0x291   : > { %v7059_v56 = vadd.f32 %v5112_v55, %v3891_v8  ;;  %v5049_v10 = vpop.f32.mrb[96].mxu1  ;;  %v5113_v57 = vpop.f32.mrb[96].mxu0 }
 0x292   : > { %v5050_v61 = vpop.f32.mrb[97].mxu1  ;;  %v5114_v14 = vpop.f32.mrb[97].mxu0 }
 0x293   : > { %v5051_v19 = vadd.f32 %v5050_v61, %v5049_v10  ;;  %v5115_v1 = vadd.f32 %v5114_v14, %v5113_v57  ;;  %v5052_v44 = vpop.f32.mrb[98].mxu1  ;;  %v5116_v22 = vpop.f32.mrb[98].mxu0 }
 0x294   : > { %v5053_v11 = vpop.f32.mrb[99].mxu1  ;;  %v5117_v20 = vpop.f32.mrb[99].mxu0 }
 0x295   : > { %v3896_v26 = vadd.f32 %v5051_v19, %v7014_v47  ;;  %v5054_v6 = vadd.f32 %v5053_v11, %v5052_v44  ;;  %v5118_v15 = vadd.f32 %v5117_v20, %v5116_v22 }
 0x297   : > { %v7062_v5 = vadd.f32 %v5115_v1, %v3896_v26  ;;  %v3899_v27 = vadd.f32 %v5054_v6, %v7017_v48 }
 0x299   : > { %v7065_v9 = vadd.f32 %v5118_v15, %v3899_v27  ;;  %v5055_v32 = vpop.f32.mrb[100].mxu1  ;;  %v5119_v28 = vpop.f32.mrb[100].mxu0 }
 0x29a   : > { %v5056_v13 = vpop.f32.mrb[101].mxu1  ;;  %v5120_v37 = vpop.f32.mrb[101].mxu0 }
 0x29b   : > { %v5057_v40 = vadd.f32 %v5056_v13, %v5055_v32  ;;  %v5121_v18 = vadd.f32 %v5120_v37, %v5119_v28  ;;  %v5058_v52 = vpop.f32.mrb[102].mxu1  ;;  %v5122_v41 = vpop.f32.mrb[102].mxu0 }
 0x29c   : > { %v5059_v35 = vpop.f32.mrb[103].mxu1  ;;  %v5123_v25 = vpop.f32.mrb[103].mxu0 }
 0x29d   : > { %v3904_v47 = vadd.f32 %v5057_v40, %v7020_v2  ;;  %v5060_v60 = vadd.f32 %v5059_v35, %v5058_v52  ;;  %v5124_v39 = vadd.f32 %v5123_v25, %v5122_v41 }
 0x29f   : > { %v7068_v21 = vadd.f32 %v5121_v18, %v3904_v47  ;;  %v3907_v48 = vadd.f32 %v5060_v60, %v7023_v3 }
 0x2a1   : > { %v7071_v30 = vadd.f32 %v5124_v39, %v3907_v48  ;;  %v5061_v50 = vpop.f32.mrb[104].mxu1  ;;  %v5125_v31 = vpop.f32.mrb[104].mxu0 }
 0x2a2   : > { %v5062_v29 = vpop.f32.mrb[105].mxu1  ;;  %v5126_v54 = vpop.f32.mrb[105].mxu0 }
 0x2a3   : > { %v5063_v58 = vadd.f32 %v5062_v29, %v5061_v50  ;;  %v5127_v38 = vadd.f32 %v5126_v54, %v5125_v31  ;;  %v5064_v45 = vpop.f32.mrb[106].mxu1  ;;  %v5128_v59 = vpop.f32.mrb[106].mxu0 }
 0x2a4   : > { %v5065_v62 = vpop.f32.mrb[107].mxu1  ;;  %v5129_v4 = vpop.f32.mrb[107].mxu0 }
 0x2a5   : > { %v3912_v2 = vadd.f32 %v5063_v58, %v7026_v23  ;;  %v5066_v46 = vadd.f32 %v5065_v62, %v5064_v45  ;;  %v5130_v0 = vadd.f32 %v5129_v4, %v5128_v59 }
 0x2a7   : > { %v7074_v51 = vadd.f32 %v5127_v38, %v3912_v2  ;;  %v3915_v3 = vadd.f32 %v5066_v46, %v7029_v24 }
 0x2a9   : > { %v7077_v49 = vadd.f32 %v5130_v0, %v3915_v3  ;;  %v5067_v7 = vpop.f32.mrb[108].mxu1  ;;  %v5131_v12 = vpop.f32.mrb[108].mxu0 }
 0x2aa   : > { %v5068_v55 = vpop.f32.mrb[109].mxu1  ;;  %v5132_v8 = vpop.f32.mrb[109].mxu0 }
 0x2ab   : > { %v5069_v10 = vadd.f32 %v5068_v55, %v5067_v7  ;;  %v5133_v57 = vadd.f32 %v5132_v8, %v5131_v12  ;;  %v5070_v61 = vpop.f32.mrb[110].mxu1  ;;  %v5134_v14 = vpop.f32.mrb[110].mxu0 }
 0x2ac   : > { %v5071_v19 = vpop.f32.mrb[111].mxu1  ;;  %v5135_v1 = vpop.f32.mrb[111].mxu0 }
 0x2ad   : > { %v3920_v23 = vadd.f32 %v5069_v10, %v7032_v42  ;;  %v5072_v44 = vadd.f32 %v5071_v19, %v5070_v61  ;;  %v5136_v22 = vadd.f32 %v5135_v1, %v5134_v14 }
 0x2af   : > { %v7080_v11 = vadd.f32 %v5133_v57, %v3920_v23  ;;  %v3923_v24 = vadd.f32 %v5072_v44, %v7035_v43 }
 0x2b1   : > { %v7083_v20 = vadd.f32 %v5136_v22, %v3923_v24  ;;  %v5153_v26 = vpop.f32.mrb[112].mxu1  ;;  %v5217_v6 = vpop.f32.mrb[112].mxu0 }
 0x2b2   : > { %v5154_v15 = vpop.f32.mrb[113].mxu1  ;;  %v5218_v27 = vpop.f32.mrb[113].mxu0 }
 0x2b3   : > { %v5155_v32 = vadd.f32 %v5154_v15, %v5153_v26  ;;  %v5219_v28 = vadd.f32 %v5218_v27, %v5217_v6  ;;  %v5156_v13 = vpop.f32.mrb[114].mxu1  ;;  %v5220_v37 = vpop.f32.mrb[114].mxu0 }
 0x2b4   : > { %v5157_v40 = vpop.f32.mrb[115].mxu1  ;;  %v5221_v42 = vpop.f32.mrb[115].mxu0 }
 0x2b5   : > { %v4058_v18 = vadd.f32 %v5155_v32, %v7038_v36  ;;  %v5158_v52 = vadd.f32 %v5157_v40, %v5156_v13  ;;  %v5222_v41 = vadd.f32 %v5221_v42, %v5220_v37 }
 0x2b7   : > { %v4155_v35 = vadd.f32 %v5219_v28, %v4058_v18  ;;  %v4061_v43 = vadd.f32 %v5158_v52, %v7041_v63 }
 0x2b9   : > { %4217 = vst [vmem:[%s7089_s26] sm:$0xff] %v4155_v35  ;;  %v4158_v25 = vadd.f32 %v5222_v41, %v4061_v43  ;;  %v5159_v47 = vpop.f32.mrb[116].mxu1  ;;  %v5223_v60 = vpop.f32.mrb[116].mxu0 }
 0x2ba   : > { %v5160_v39 = vpop.f32.mrb[117].mxu1  ;;  %v5224_v48 = vpop.f32.mrb[117].mxu0 }
 0x2bb   : > { %4218 = vst [vmem:[%s7089_s26 + $0x8] sm:$0xff] %v4158_v25  ;;  %v5161_v50 = vadd.f32 %v5160_v39, %v5159_v47  ;;  %v5225_v31 = vadd.f32 %v5224_v48, %v5223_v60  ;;  %v5162_v36 = vpop.f32.mrb[118].mxu1  ;;  %v5226_v29 = vpop.f32.mrb[118].mxu0 }
 0x2bc   : > { %v5163_v54 = vpop.f32.mrb[119].mxu1  ;;  %v5227_v58 = vpop.f32.mrb[119].mxu0 }
 0x2bd   : > { %v4066_v63 = vadd.f32 %v5161_v50, %v7044_v16  ;;  %v5164_v38 = vadd.f32 %v5163_v54, %v5162_v36  ;;  %v5228_v45 = vadd.f32 %v5227_v58, %v5226_v29 }
 0x2bf   : > { %v4163_v59 = vadd.f32 %v5225_v31, %v4066_v63  ;;  %v4069_v62 = vadd.f32 %v5164_v38, %v7047_v17 }
 0x2c1   : > { %4219 = vst [vmem:[%s7089_s26 + $0x10] sm:$0xff] %v4163_v59  ;;  %v4166_v4 = vadd.f32 %v5228_v45, %v4069_v62  ;;  %v5165_v2 = vpop.f32.mrb[120].mxu1  ;;  %v5229_v46 = vpop.f32.mrb[120].mxu0 }
 0x2c2   : > { %v5166_v0 = vpop.f32.mrb[121].mxu1  ;;  %v5230_v3 = vpop.f32.mrb[121].mxu0 }
 0x2c3   : > { %4220 = vst [vmem:[%s7089_s26 + $0x18] sm:$0xff] %v4166_v4  ;;  %v5167_v7 = vadd.f32 %v5166_v0, %v5165_v2  ;;  %v5231_v12 = vadd.f32 %v5230_v3, %v5229_v46  ;;  %v5168_v55 = vpop.f32.mrb[122].mxu1  ;;  %v5232_v8 = vpop.f32.mrb[122].mxu0 }
 0x2c4   : > { %v5169_v10 = vpop.f32.mrb[123].mxu1  ;;  %v5233_v16 = vpop.f32.mrb[123].mxu0 }
 0x2c5   : > { %v4074_v57 = vadd.f32 %v5167_v7, %v7050_v33  ;;  %v5170_v61 = vadd.f32 %v5169_v10, %v5168_v55  ;;  %v5234_v14 = vadd.f32 %v5233_v16, %v5232_v8 }
 0x2c7   : > { %v4171_v17 = vadd.f32 %v5231_v12, %v4074_v57  ;;  %v4077_v19 = vadd.f32 %v5170_v61, %v7053_v34 }
 0x2c9   : > { %4221 = vst [vmem:[%s7089_s26 + $0x20] sm:$0xff] %v4171_v17  ;;  %v4174_v1 = vadd.f32 %v5234_v14, %v4077_v19  ;;  %v5171_v23 = vpop.f32.mrb[124].mxu1  ;;  %v5235_v44 = vpop.f32.mrb[124].mxu0 }
 0x2ca   : > { %v5172_v22 = vpop.f32.mrb[125].mxu1  ;;  %v5236_v24 = vpop.f32.mrb[125].mxu0 }
 0x2cb   : > { %4222 = vst [vmem:[%s7089_s26 + $0x28] sm:$0xff] %v4174_v1  ;;  %v5173_v26 = vadd.f32 %v5172_v22, %v5171_v23  ;;  %v5237_v6 = vadd.f32 %v5236_v24, %v5235_v44  ;;  %v5174_v15 = vpop.f32.mrb[126].mxu1  ;;  %v5238_v27 = vpop.f32.mrb[126].mxu0 }
 0x2cc   : > { %v5175_v32 = vpop.f32.mrb[127].mxu1  ;;  %v5239_v33 = vpop.f32.mrb[127].mxu0 }
 0x2cd   : > { %v4082_v28 = vadd.f32 %v5173_v26, %v7056_v53  ;;  %v5176_v13 = vadd.f32 %v5175_v32, %v5174_v15  ;;  %v5240_v37 = vadd.f32 %v5239_v33, %v5238_v27 }
 0x2cf   : > { %v4179_v34 = vadd.f32 %v5237_v6, %v4082_v28  ;;  %v4085_v40 = vadd.f32 %v5176_v13, %v7059_v56 }
 0x2d1   : > { %4223 = vst [vmem:[%s7089_s26 + $0x30] sm:$0xff] %v4179_v34  ;;  %v4182_v42 = vadd.f32 %v5240_v37, %v4085_v40  ;;  %v5177_v18 = vpop.f32.mrb[128].mxu1  ;;  %v5241_v52 = vpop.f32.mrb[128].mxu0 }
 0x2d2   : > { %v5178_v41 = vpop.f32.mrb[129].mxu1  ;;  %v5242_v35 = vpop.f32.mrb[129].mxu0 }
 0x2d3   : > { %4224 = vst [vmem:[%s7089_s26 + $0x38] sm:$0xff] %v4182_v42  ;;  %v5179_v43 = vadd.f32 %v5178_v41, %v5177_v18  ;;  %v5243_v25 = vadd.f32 %v5242_v35, %v5241_v52  ;;  %v5180_v47 = vpop.f32.mrb[130].mxu1  ;;  %v5244_v60 = vpop.f32.mrb[130].mxu0  ;;  %v4303_v41 = vld [vmem:[%s7089_s26 + $0x10] sm:$0xff] (%p5736_p5)  ;;  %v4305_v35 = vld [vmem:[%s7089_s26 + $0x18] sm:$0xff] (%p5736_p5) }
 0x2d4   : > { %v5181_v39 = vpop.f32.mrb[131].mxu1  ;;  %v5245_v53 = vpop.f32.mrb[131].mxu0  ;;  %4304 = vst [vmem:[%s4241_s17 + $0x20] sm:$0xff] (%p5736_p5), %v4303_v41  ;;  %4306 = vst [vmem:[%s4241_s17 + $0x30] sm:$0xff] (%p5736_p5), %v4305_v35 }
 0x2d5   : > { %v4090_v48 = vadd.f32 %v5179_v43, %v7062_v5  ;;  %v5182_v50 = vadd.f32 %v5181_v39, %v5180_v47  ;;  %v5246_v31 = vadd.f32 %v5245_v53, %v5244_v60  ;;  %v4307_v43 = vld [vmem:[%s7089_s26 + $0x20] sm:$0xff] (%p5736_p5) }
 0x2d6   : > { %4308 = vst [vmem:[%s4241_s17 + $0x40] sm:$0xff] (%p5736_p5), %v4307_v43 }
 0x2d7   : > { %v4187_v56 = vadd.f32 %v5243_v25, %v4090_v48  ;;  %v4093_v36 = vadd.f32 %v5182_v50, %v7065_v9  ;;  %v4309_v25 = vld [vmem:[%s7089_s26 + $0x28] sm:$0xff] (%p5736_p5) }
 0x2d8   : > { %4310 = vst [vmem:[%s4241_s17 + $0x50] sm:$0xff] (%p5736_p5), %v4309_v25  ;;  %v4311_v47 = vld [vmem:[%s7089_s26 + $0x30] sm:$0xff] (%p5736_p5) }
 0x2d9   : > { %4225 = vst [vmem:[%s7089_s26 + $0x40] sm:$0xff] %v4187_v56  ;;  %v4190_v29 = vadd.f32 %v5246_v31, %v4093_v36  ;;  %v5183_v54 = vpop.f32.mrb[132].mxu1  ;;  %v5247_v58 = vpop.f32.mrb[132].mxu0  ;;  %4312 = vst [vmem:[%s4241_s17 + $0x60] sm:$0xff] (%p5736_p5), %v4311_v47 }
 0x2da   : > { %v5184_v63 = vpop.f32.mrb[133].mxu1  ;;  %v5248_v38 = vpop.f32.mrb[133].mxu0  ;;  %v4313_v60 = vld [vmem:[%s7089_s26 + $0x38] sm:$0xff] (%p5736_p5) }
 0x2db   : > { %4226 = vst [vmem:[%s7089_s26 + $0x48] sm:$0xff] %v4190_v29  ;;  %v5185_v45 = vadd.f32 %v5184_v63, %v5183_v54  ;;  %v5249_v59 = vadd.f32 %v5248_v38, %v5247_v58  ;;  %v5186_v62 = vpop.f32.mrb[134].mxu1  ;;  %v5250_v4 = vpop.f32.mrb[134].mxu0  ;;  %4314 = vst [vmem:[%s4241_s17 + $0x70] sm:$0xff] (%p5736_p5), %v4313_v60 }
 0x2dc   : > { %v5187_v2 = vpop.f32.mrb[135].mxu1  ;;  %v5251_v5 = vpop.f32.mrb[135].mxu0 }
 0x2dd   : > { %v4098_v46 = vadd.f32 %v5185_v45, %v7068_v21  ;;  %v5188_v0 = vadd.f32 %v5187_v2, %v5186_v62  ;;  %v5252_v3 = vadd.f32 %v5251_v5, %v5250_v4 }
 0x2df   : > { %v4195_v9 = vadd.f32 %v5249_v59, %v4098_v46  ;;  %v4101_v7 = vadd.f32 %v5188_v0, %v7071_v30 }
 0x2e0   : > { %v4315_v39 = vld [vmem:[%s7089_s26 + $0x40] sm:$0xff] (%p5736_p5) }
 0x2e1   : > { %4227 = vst [vmem:[%s7089_s26 + $0x50] sm:$0xff] %v4195_v9  ;;  %v4198_v12 = vadd.f32 %v5252_v3, %v4101_v7  ;;  %v5189_v55 = vpop.f32.mrb[136].mxu1  ;;  %v5253_v8 = vpop.f32.mrb[136].mxu0  ;;  %4316 = vst [vmem:[%s4241_s17 + $0x80] sm:$0xff] (%p5736_p5), %v4315_v39 }
 0x2e2   : > { %v5190_v10 = vpop.f32.mrb[137].mxu1  ;;  %v5254_v16 = vpop.f32.mrb[137].mxu0  ;;  %v4317_v53 = vld [vmem:[%s7089_s26 + $0x48] sm:$0xff] (%p5736_p5) }
 0x2e3   : > { %4228 = vst [vmem:[%s7089_s26 + $0x58] sm:$0xff] %v4198_v12  ;;  %v5191_v57 = vadd.f32 %v5190_v10, %v5189_v55  ;;  %v5255_v61 = vadd.f32 %v5254_v16, %v5253_v8  ;;  %v5192_v14 = vpop.f32.mrb[138].mxu1  ;;  %v5256_v17 = vpop.f32.mrb[138].mxu0  ;;  %4318 = vst [vmem:[%s4241_s17 + $0x90] sm:$0xff] (%p5736_p5), %v4317_v53 }
 0x2e4   : > { %v5193_v19 = vpop.f32.mrb[139].mxu1  ;;  %v5257_v21 = vpop.f32.mrb[139].mxu0 }
 0x2e5   : > { %v4106_v1 = vadd.f32 %v5191_v57, %v7074_v51  ;;  %v5194_v23 = vadd.f32 %v5193_v19, %v5192_v14  ;;  %v5258_v44 = vadd.f32 %v5257_v21, %v5256_v17 }
 0x2e7   : > { %v4203_v30 = vadd.f32 %v5255_v61, %v4106_v1  ;;  %v4109_v22 = vadd.f32 %v5194_v23, %v7077_v49 }
 0x2e8   : > { %v4319_v48 = vld [vmem:[%s7089_s26 + $0x50] sm:$0xff] (%p5736_p5) }
 0x2e9   : > { %4229 = vst [vmem:[%s7089_s26 + $0x60] sm:$0xff] %v4203_v30  ;;  %v4206_v24 = vadd.f32 %v5258_v44, %v4109_v22  ;;  %v5195_v26 = vpop.f32.mrb[140].mxu1  ;;  %v5259_v6 = vpop.f32.mrb[140].mxu0  ;;  %4320 = vst [vmem:[%s4241_s17 + $0xa0] sm:$0xff] (%p5736_p5), %v4319_v48 }
 0x2ea   : > { %v5196_v15 = vpop.f32.mrb[141].mxu1  ;;  %v5260_v27 = vpop.f32.mrb[141].mxu0  ;;  %v4321_v50 = vld [vmem:[%s7089_s26 + $0x58] sm:$0xff] (%p5736_p5) }
 0x2eb   : > { %4230 = vst [vmem:[%s7089_s26 + $0x68] sm:$0xff] %v4206_v24  ;;  %v5197_v32 = vadd.f32 %v5196_v15, %v5195_v26  ;;  %v5261_v33 = vadd.f32 %v5260_v27, %v5259_v6  ;;  %v5198_v28 = vpop.f32.mrb[142].mxu1  ;;  %v5262_v13 = vpop.f32.mrb[142].mxu0  ;;  %4322 = vst [vmem:[%s4241_s17 + $0xb0] sm:$0xff] (%p5736_p5), %v4321_v50 }
 0x2ec   : > { %v5199_v37 = vpop.f32.mrb[143].mxu1  ;;  %v5263_v51 = vpop.f32.mrb[143].mxu0 }
 0x2ed   : > { %v4114_v34 = vadd.f32 %v5197_v32, %v7080_v11  ;;  %v5200_v40 = vadd.f32 %v5199_v37, %v5198_v28  ;;  %v5264_v42 = vadd.f32 %v5263_v51, %v5262_v13  ;;  %4239 = sbr.rel (!%p5736_p5) target bundleno = 764 (0x2fc), region = 73  ;;  %v4299_v11 = vld [vmem:[%s7089_s26] sm:$0xff] (%p5736_p5) }
 0x2ee   : > { %4300 = vst [vmem:[%s4241_s17] sm:$0xff] (%p5736_p5), %v4299_v11 }
 0x2ef   : > { %v4211_v49 = vadd.f32 %v5261_v33, %v4114_v34  ;;  %v4117_v18 = vadd.f32 %v5200_v40, %v7083_v20  ;;  %v4301_v20 = vld [vmem:[%s7089_s26 + $0x8] sm:$0xff] (%p5736_p5) }
 0x2f0   : > { %4302 = vst [vmem:[%s4241_s17 + $0x10] sm:$0xff] (%p5736_p5), %v4301_v20  ;;  %v4323_v31 = vld [vmem:[%s7089_s26 + $0x60] sm:$0xff] (%p5736_p5) }
 0x2f1   : > { %4231 = vst [vmem:[%s7089_s26 + $0x70] sm:$0xff] %v4211_v49  ;;  %v4214_v52 = vadd.f32 %v5264_v42, %v4117_v18  ;;  %4324 = vst [vmem:[%s4241_s17 + $0xc0] sm:$0xff] (%p5736_p5), %v4323_v31 }
 0x2f2   : > { %v4325_v56 = vld [vmem:[%s7089_s26 + $0x68] sm:$0xff] (%p5736_p5) }
 0x2f3   : > { %4232 = vst [vmem:[%s7089_s26 + $0x78] sm:$0xff] %v4214_v52  ;;  %4326 = vst [vmem:[%s4241_s17 + $0xd0] sm:$0xff] (%p5736_p5), %v4325_v56 }
 0x2f8   : > { %v4327_v36 = vld [vmem:[%s7089_s26 + $0x70] sm:$0xff] }
 0x2f9   : > { %4328 = vst [vmem:[%s4241_s17 + $0xe0] sm:$0xff] %v4327_v36 }
 0x2fa   : > { %v4329_v29 = vld [vmem:[%s7089_s26 + $0x78] sm:$0xff] }
 0x2fb   : > { %4330 = vst [vmem:[%s4241_s17 + $0xf0] sm:$0xff] %v4329_v29 }
 0x2fc PF: > { %p9_p10 = scmp.ge.s32.totalorder %s5723_s13, 4   ;;  %s7158_s9 = smov %s5685_s10 }
 0x2fd   : > { %s7159_s10 = smov %s5734_s16  ;;  %s7160_s11 = smov %s5723_s13 }
 0x2fe   :  { %11 = sbr.rel (!%p9_p10) target bundleno = 2 (0x2), region = 142 }

// kernel: decoder_forward.13
= control target key start
LH: loop header
LB: loop body
LE: loop exit
PB: predicated region body
PF: predicated region fallthrough
CT: control target
= control target key end

     0   :  { %v3052_v0 = vmov 0   ;;  %s4214_s1 = inlined_call_operand.vmem [shape: bf16[640,128], index: 1, kind: input, shape index: {}]   ;;  %s4215_s0 = inlined_call_operand.vmem [shape: bf16[512,640], index: 0, kind: input, shape index: {}]   ;;  %s4216_s2 = inlined_call_operand.vmem [shape: f32[512,128], index: 2, kind: output, shape index: {}]  }
   0x1   :  { %1356 = vmatprep.subr.bf16.mxu0 %v3052_v0  ;;  %2675 = vmatprep.subr.bf16.mxu1 %v3052_v0  ;;  %v2788_v1 = vld [vmem:[%s4214_s1] sm:$0xff]   ;;  %v2789_v2 = vld [vmem:[%s4214_s1 + $0x8] sm:$0xff]   ;;  %v2790_v3 = vld [vmem:[%s4214_s1 + $0x10] sm:$0xff]  }
   0x2   :  { %1357 = vmatpush1.bf16.msra.mxu0 %v2788_v1  ;;  %2691 = vmatpush1.bf16.msra.mxu1 %v2788_v1  ;;  %v2791_v4 = vld [vmem:[%s4214_s1 + $0x18] sm:$0xff]   ;;  %v2792_v5 = vld [vmem:[%s4214_s1 + $0x20] sm:$0xff]   ;;  %v2793_v7 = vld [vmem:[%s4214_s1 + $0x28] sm:$0xff]  }
   0x3   :  { %1358 = vmatprep.subr.bf16.mxu0 %v3052_v0  ;;  %2676 = vmatprep.subr.bf16.mxu1 %v3052_v0  ;;  %v2806_v6 = vld [vmem:[%s4215_s0 + $0x4] ss:$20 sps:$4 sm:$0xff]   ;;  %v2794_v9 = vld [vmem:[%s4214_s1 + $0x30] sm:$0xff]   ;;  %v2797_v12 = vld [vmem:[%s4214_s1 + $0x48] sm:$0xff]  }
   0x4   :  { %v2809_v8 = vld [vmem:[%s4215_s0 + $0x144] ss:$20 sps:$4 sm:$0xff]   ;;  %1388 = vmatprep.mubr.bf16.mxu0 %v2806_v6  ;;  %v2798_v13 = vld [vmem:[%s4214_s1 + $0x50] sm:$0xff]   ;;  %v2801_v16 = vld [vmem:[%s4214_s1 + $0x68] sm:$0xff]  }
   0x5   :  { %1452 = vmatprep.mubr.bf16.mxu1 %v2809_v8  ;;  %v2795_v10 = vld [vmem:[%s4214_s1 + $0x38] sm:$0xff]   ;;  %v2796_v11 = vld [vmem:[%s4214_s1 + $0x40] sm:$0xff]   ;;  %v2802_v17 = vld [vmem:[%s4214_s1 + $0x70] sm:$0xff]  }
   0x6   :  { %1359 = vmatpush1.bf16.msra.mxu0 %v2789_v2  ;;  %2692 = vmatpush1.bf16.msra.mxu1 %v2789_v2  ;;  %v2799_v14 = vld [vmem:[%s4214_s1 + $0x58] sm:$0xff]   ;;  %v2800_v15 = vld [vmem:[%s4214_s1 + $0x60] sm:$0xff]   ;;  %v2836_v25 = vld [vmem:[%s4214_s1 + $0x108] sm:$0xff]  }
   0x7   :  { %1360 = vmatprep.subr.bf16.mxu0 %v3052_v0  ;;  %2677 = vmatprep.subr.bf16.mxu1 %v3052_v0  ;;  %v2803_v18 = vld [vmem:[%s4214_s1 + $0x78] sm:$0xff]   ;;  %v2811_v19 = vld [vmem:[%s4214_s1 + $0x100] sm:$0xff]   ;;  %v2812_v26 = vld [vmem:[%s4214_s1 + $0x88] sm:$0xff]  }
   0x8   :  { %v2804_v20 = vld [vmem:[%s4215_s0] ss:$20 sps:$4 sm:$0xff]   ;;  %v2817_v28 = vld [vmem:[%s4215_s0 + $0x28] ss:$20 sps:$4 sm:$0xff]   ;;  %v2825_v35 = vld [vmem:[%s4215_s0 + $0x50] ss:$20 sps:$4 sm:$0xff]  }
   0x9   :  { %v2807_v21 = vld [vmem:[%s4215_s0 + $0x140] ss:$20 sps:$4 sm:$0xff]   ;;  %v2818_v29 = vld [vmem:[%s4215_s0 + $0x168] ss:$20 sps:$4 sm:$0xff]   ;;  %v2826_v36 = vld [vmem:[%s4215_s0 + $0x190] ss:$20 sps:$4 sm:$0xff]  }
   0xa   :  { %1361 = vmatpush1.bf16.msra.mxu0 %v2790_v3  ;;  %2693 = vmatpush1.bf16.msra.mxu1 %v2790_v3  ;;  %v2810_v22 = vld [vmem:[%s4214_s1 + $0x80] sm:$0xff]   ;;  %v2861_v27 = vld [vmem:[%s4214_s1 + $0x110] sm:$0xff]   ;;  %v2883_v33 = vld [vmem:[%s4214_s1 + $0x118] sm:$0xff]  }
   0xb   :  { %1362 = vmatprep.subr.bf16.mxu0 %v3052_v0  ;;  %2678 = vmatprep.subr.bf16.mxu1 %v3052_v0  ;;  %v2813_v23 = vld [vmem:[%s4215_s0 + $0x2c] ss:$20 sps:$4 sm:$0xff]   ;;  %v2819_v30 = vld [vmem:[%s4214_s1 + $0x90] sm:$0xff]   ;;  %v2820_v34 = vld [vmem:[%s4214_s1 + $0x98] sm:$0xff]  }
   0xc   :  { %v2815_v24 = vld [vmem:[%s4215_s0 + $0x16c] ss:$20 sps:$4 sm:$0xff]   ;;  %v2821_v31 = vld [vmem:[%s4215_s0 + $0x54] ss:$20 sps:$4 sm:$0xff]   ;;  %v2829_v38 = vld [vmem:[%s4215_s0 + $0x7c] ss:$20 sps:$4 sm:$0xff]  }
   0xd   :  { %v2823_v32 = vld [vmem:[%s4215_s0 + $0x194] ss:$20 sps:$4 sm:$0xff]   ;;  %v2827_v37 = vld [vmem:[%s4214_s1 + $0xa0] sm:$0xff]   ;;  %v2831_v39 = vld [vmem:[%s4215_s0 + $0x1bc] ss:$20 sps:$4 sm:$0xff]  }
   0xe   :  { %1363 = vmatpush1.bf16.msra.mxu0 %v2791_v4  ;;  %2694 = vmatpush1.bf16.msra.mxu1 %v2791_v4  ;;  %v2902_v40 = vld [vmem:[%s4214_s1 + $0x120] sm:$0xff]   ;;  %v2828_v41 = vld [vmem:[%s4214_s1 + $0xa8] sm:$0xff]   ;;  %v2835_v45 = vld [vmem:[%s4214_s1 + $0xb0] sm:$0xff]  }
   0xf   :  { %1364 = vmatprep.subr.bf16.mxu0 %v3052_v0  ;;  %2679 = vmatprep.subr.bf16.mxu1 %v3052_v0  ;;  %v2921_v42 = vld [vmem:[%s4214_s1 + $0x128] sm:$0xff]   ;;  %v2838_v46 = vld [vmem:[%s4215_s0 + $0xa4] ss:$20 sps:$4 sm:$0xff]   ;;  %v2940_v48 = vld [vmem:[%s4214_s1 + $0x130] sm:$0xff]  }
  0x10   :  { %v2833_v43 = vld [vmem:[%s4215_s0 + $0x78] ss:$20 sps:$4 sm:$0xff]   ;;  %v2842_v50 = vld [vmem:[%s4215_s0 + $0xa0] ss:$20 sps:$4 sm:$0xff]   ;;  %v2850_v56 = vld [vmem:[%s4215_s0 + $0xc8] ss:$20 sps:$4 sm:$0xff]  }
  0x11   :  { %v2834_v44 = vld [vmem:[%s4215_s0 + $0x1b8] ss:$20 sps:$4 sm:$0xff]   ;;  %v2843_v51 = vld [vmem:[%s4215_s0 + $0x1e0] ss:$20 sps:$4 sm:$0xff]   ;;  %v2851_v57 = vld [vmem:[%s4215_s0 + $0x208] ss:$20 sps:$4 sm:$0xff]  }
  0x12   :  { %1365 = vmatpush1.bf16.msra.mxu0 %v2792_v5  ;;  %2695 = vmatpush1.bf16.msra.mxu1 %v2792_v5  ;;  %v2840_v47 = vld [vmem:[%s4215_s0 + $0x1e4] ss:$20 sps:$4 sm:$0xff]   ;;  %v2846_v53 = vld [vmem:[%s4215_s0 + $0xcc] ss:$20 sps:$4 sm:$0xff]   ;;  %v2852_v58 = vld [vmem:[%s4214_s1 + $0xd0] sm:$0xff]  }
  0x13   :  { %1366 = vmatprep.subr.bf16.mxu0 %v3052_v0  ;;  %2680 = vmatprep.subr.bf16.mxu1 %v3052_v0  ;;  %v2837_v49 = vld [vmem:[%s4214_s1 + $0xb8] sm:$0xff]   ;;  %v2844_v52 = vld [vmem:[%s4214_s1 + $0xc0] sm:$0xff]   ;;  %v2845_v55 = vld [vmem:[%s4214_s1 + $0xc8] sm:$0xff]  }
  0x14   :  { %v2848_v54 = vld [vmem:[%s4215_s0 + $0x20c] ss:$20 sps:$4 sm:$0xff]   ;;  %v2854_v59 = vld [vmem:[%s4215_s0 + $0xf4] ss:$20 sps:$4 sm:$0xff]   ;;  %v2959_v61 = vld [vmem:[%s4214_s1 + $0x138] sm:$0xff]  }
  0x15   :  { %v2856_v60 = vld [vmem:[%s4215_s0 + $0x234] ss:$20 sps:$4 sm:$0xff]   ;;  %v2853_v62 = vld [vmem:[%s4214_s1 + $0xd8] sm:$0xff]   ;;  %v2858_v63 = vld [vmem:[%s4215_s0 + $0xf0] ss:$20 sps:$4 sm:$0xff]  }
  0x16   :  { %1367 = vmatpush1.bf16.msra.mxu0 %v2793_v7  ;;  %2696 = vmatpush1.bf16.msra.mxu1 %v2793_v7  ;;  %v2859_v1 = vld [vmem:[%s4215_s0 + $0x230] ss:$20 sps:$4 sm:$0xff]   ;;  %v2862_v5 = vld [vmem:[%s4214_s1 + $0xe8] sm:$0xff]  }
  0x17   :  { %1368 = vmatprep.subr.bf16.mxu0 %v3052_v0  ;;  %2681 = vmatprep.subr.bf16.mxu1 %v3052_v0  ;;  %v2860_v2 = vld [vmem:[%s4214_s1 + $0xe0] sm:$0xff]   ;;  %v2863_v3 = vld [vmem:[%s4215_s0 + $0x11c] ss:$20 sps:$4 sm:$0xff]   ;;  %v2867_v6 = vld [vmem:[%s4215_s0 + $0x118] ss:$20 sps:$4 sm:$0xff]  }
  0x18   :  { %v2865_v4 = vld [vmem:[%s4215_s0 + $0x25c] ss:$20 sps:$4 sm:$0xff]   ;;  %v2868_v7 = vld [vmem:[%s4215_s0 + $0x258] ss:$20 sps:$4 sm:$0xff]  }
  0x19   :  { %v2869_v8 = vld [vmem:[%s4214_s1 + $0xf0] sm:$0xff]  }
  0x1a   :  { %1369 = vmatpush1.bf16.msra.mxu0 %v2794_v9  ;;  %2697 = vmatpush1.bf16.msra.mxu1 %v2794_v9  ;;  %v2871_v9 = vld [vmem:[%s4215_s0 + $0x284] ss:$20 sps:$4 sm:$0xff]  }
  0x1b   :  { %1370 = vmatprep.subr.bf16.mxu0 %v3052_v0  ;;  %2682 = vmatprep.subr.bf16.mxu1 %v3052_v0 }
  0x1e   :  { %1371 = vmatpush1.bf16.msra.mxu0 %v2795_v10  ;;  %2698 = vmatpush1.bf16.msra.mxu1 %v2795_v10  ;;  %v2875_v10 = vld [vmem:[%s4215_s0 + $0xc] ss:$20 sps:$4 sm:$0xff]  }
  0x1f   :  { %1372 = vmatprep.subr.bf16.mxu0 %v3052_v0  ;;  %2683 = vmatprep.subr.bf16.mxu1 %v3052_v0 }
  0x22   :  { %1373 = vmatpush1.bf16.msra.mxu0 %v2796_v11  ;;  %2699 = vmatpush1.bf16.msra.mxu1 %v2796_v11  ;;  %v2870_v11 = vld [vmem:[%s4214_s1 + $0xf8] sm:$0xff]  }
  0x23   :  { %1374 = vmatprep.subr.bf16.mxu0 %v3052_v0  ;;  %2684 = vmatprep.subr.bf16.mxu1 %v3052_v0 }
  0x26   :  { %1375 = vmatpush1.bf16.msra.mxu0 %v2797_v12  ;;  %2700 = vmatpush1.bf16.msra.mxu1 %v2797_v12  ;;  %v2873_v12 = vld [vmem:[%s4215_s0 + $0x8] ss:$20 sps:$4 sm:$0xff]  }
  0x27   :  { %1376 = vmatprep.subr.bf16.mxu0 %v3052_v0  ;;  %2685 = vmatprep.subr.bf16.mxu1 %v3052_v0 }
  0x2a   :  { %1377 = vmatpush1.bf16.msra.mxu0 %v2798_v13  ;;  %2701 = vmatpush1.bf16.msra.mxu1 %v2798_v13  ;;  %v2876_v13 = vld [vmem:[%s4215_s0 + $0x280] ss:$20 sps:$4 sm:$0xff]  }
  0x2b   :  { %1378 = vmatprep.subr.bf16.mxu0 %v3052_v0  ;;  %2686 = vmatprep.subr.bf16.mxu1 %v3052_v0 }
  0x2e   :  { %1379 = vmatpush1.bf16.msra.mxu0 %v2799_v14  ;;  %2702 = vmatpush1.bf16.msra.mxu1 %v2799_v14  ;;  %v2877_v14 = vld [vmem:[%s4215_s0 + $0x2ac] ss:$20 sps:$4 sm:$0xff]  }
  0x2f   :  { %1380 = vmatprep.subr.bf16.mxu0 %v3052_v0  ;;  %2687 = vmatprep.subr.bf16.mxu1 %v3052_v0 }
  0x32   :  { %1381 = vmatpush1.bf16.msra.mxu0 %v2800_v15  ;;  %2703 = vmatpush1.bf16.msra.mxu1 %v2800_v15  ;;  %v2879_v15 = vld [vmem:[%s4215_s0 + $0x34] ss:$20 sps:$4 sm:$0xff]  }
  0x33   :  { %1382 = vmatprep.subr.bf16.mxu0 %v3052_v0  ;;  %2688 = vmatprep.subr.bf16.mxu1 %v3052_v0 }
  0x36   :  { %1383 = vmatpush1.bf16.msra.mxu0 %v2801_v16  ;;  %2704 = vmatpush1.bf16.msra.mxu1 %v2801_v16  ;;  %v2882_v16 = vld [vmem:[%s4215_s0 + $0x30] ss:$20 sps:$4 sm:$0xff]  }
  0x37   :  { %1384 = vmatprep.subr.bf16.mxu0 %v3052_v0  ;;  %2689 = vmatprep.subr.bf16.mxu1 %v3052_v0 }
  0x3a   :  { %1385 = vmatpush1.bf16.msra.mxu0 %v2802_v17  ;;  %2705 = vmatpush1.bf16.msra.mxu1 %v2802_v17  ;;  %v2884_v17 = vld [vmem:[%s4215_s0 + $0x2d4] ss:$20 sps:$4 sm:$0xff]  }
  0x3b   :  { %1386 = vmatprep.subr.bf16.mxu0 %v3052_v0  ;;  %2690 = vmatprep.subr.bf16.mxu1 %v3052_v0 }
  0x3e   :  { %1387 = vmatpush1.bf16.msra.mxu0 %v2803_v18  ;;  %2706 = vmatpush1.bf16.msra.mxu1 %v2803_v18  ;;  %v2886_v18 = vld [vmem:[%s4215_s0 + $0x5c] ss:$20 sps:$4 sm:$0xff]  }
  0x3f   :  { %1645 = vmatprep.subr.bf16.mxu0 %v3052_v0  ;;  %2595 = vmatprep.subr.bf16.mxu1 %v2811_v19 }
  0x41   :  { %1389 = vmatmul.mubr.bf16.vlgmr.msra.gmra.mrb[0].mxu0 %v2804_v20  ;;  %1453 = vmatmul.mubr.bf16.vlgmr.msra.gmra.mrb[0].mxu1 %v2807_v21  ;;  %v2889_v20 = vld [vmem:[%s4215_s0 + $0x58] ss:$20 sps:$4 sm:$0xff]   ;;  %v2890_v21 = vld [vmem:[%s4215_s0 + $0x2fc] ss:$20 sps:$4 sm:$0xff]  }
  0x42   :  { %1646 = vmatpush1.bf16.msra.mxu0 %v2810_v22  ;;  %2596 = vmatpush3.bf16.msra.mxu1 %v2811_v19  ;;  %v2888_v19 = vld [vmem:[%s4215_s0 + $0x2d0] ss:$20 sps:$4 sm:$0xff]  }
  0x43   :  { %1647 = vmatprep.subr.bf16.mxu0 %v3052_v0  ;;  %1396 = vmatprep.mubr.bf16.mxu0 %v2813_v23  ;;  %v2892_v22 = vld [vmem:[%s4215_s0 + $0x84] ss:$20 sps:$4 sm:$0xff]  }
  0x44   :  { %1460 = vmatprep.mubr.bf16.mxu1 %v2815_v24  ;;  %2597 = vmatprep.subr.bf16.mxu1 %v2836_v25  ;;  %v2894_v23 = vld [vmem:[%s4215_s0 + $0x2f8] ss:$20 sps:$4 sm:$0xff]   ;;  %v2895_v24 = vld [vmem:[%s4215_s0 + $0x80] ss:$20 sps:$4 sm:$0xff]  }
  0x46   :  { %1648 = vmatpush1.bf16.msra.mxu0 %v2812_v26  ;;  %2598 = vmatpush3.bf16.msra.mxu1 %v2836_v25  ;;  %v2896_v25 = vld [vmem:[%s4215_s0 + $0x324] ss:$20 sps:$4 sm:$0xff]   ;;  %v2898_v26 = vld [vmem:[%s4215_s0 + $0xac] ss:$20 sps:$4 sm:$0xff]  }
  0x47   :  { %1649 = vmatprep.subr.bf16.mxu0 %v3052_v0  ;;  %2599 = vmatprep.subr.bf16.mxu1 %v2861_v27 }
  0x49   :  { %1397 = vmatmul.mubr.bf16.gmra.mrb[4].mxu0 %v2817_v28  ;;  %1461 = vmatmul.mubr.bf16.gmra.mrb[4].mxu1 %v2818_v29  ;;  %v2901_v28 = vld [vmem:[%s4215_s0 + $0xa8] ss:$20 sps:$4 sm:$0xff]   ;;  %v2903_v29 = vld [vmem:[%s4215_s0 + $0x34c] ss:$20 sps:$4 sm:$0xff]  }
  0x4a   :  { %1650 = vmatpush1.bf16.msra.mxu0 %v2819_v30  ;;  %1404 = vmatprep.mubr.bf16.mxu0 %v2821_v31  ;;  %v2905_v30 = vld [vmem:[%s4215_s0 + $0xd4] ss:$20 sps:$4 sm:$0xff]  }
  0x4b   :  { %1651 = vmatprep.subr.bf16.mxu0 %v3052_v0  ;;  %1468 = vmatprep.mubr.bf16.mxu1 %v2823_v32  ;;  %v2907_v31 = vld [vmem:[%s4215_s0 + $0x348] ss:$20 sps:$4 sm:$0xff]   ;;  %v2908_v32 = vld [vmem:[%s4215_s0 + $0xd0] ss:$20 sps:$4 sm:$0xff]  }
  0x4c   :  { %2600 = vmatpush3.bf16.msra.mxu1 %v2861_v27  ;;  %v2900_v27 = vld [vmem:[%s4215_s0 + $0x320] ss:$20 sps:$4 sm:$0xff]  }
  0x4d   :  { %2601 = vmatprep.subr.bf16.mxu1 %v2883_v33 }
  0x4e   :  { %1652 = vmatpush1.bf16.msra.mxu0 %v2820_v34  ;;  %v2911_v34 = vld [vmem:[%s4215_s0 + $0xfc] ss:$20 sps:$4 sm:$0xff]  }
  0x4f   :  { %1653 = vmatprep.subr.bf16.mxu0 %v3052_v0 }
  0x50   :  { %2602 = vmatpush3.bf16.msra.mxu1 %v2883_v33  ;;  %v2909_v33 = vld [vmem:[%s4215_s0 + $0x374] ss:$20 sps:$4 sm:$0xff]  }
  0x51   :  { %1405 = vmatmul.mubr.bf16.gmra.mrb[8].mxu0 %v2825_v35  ;;  %1469 = vmatmul.mubr.bf16.gmra.mrb[8].mxu1 %v2826_v36  ;;  %v2913_v35 = vld [vmem:[%s4215_s0 + $0x370] ss:$20 sps:$4 sm:$0xff]   ;;  %v2914_v36 = vld [vmem:[%s4215_s0 + $0xf8] ss:$20 sps:$4 sm:$0xff]  }
  0x52   :  { %1654 = vmatpush1.bf16.msra.mxu0 %v2827_v37  ;;  %1412 = vmatprep.mubr.bf16.mxu0 %v2829_v38  ;;  %v2915_v37 = vld [vmem:[%s4215_s0 + $0x39c] ss:$20 sps:$4 sm:$0xff]   ;;  %v2917_v38 = vld [vmem:[%s4215_s0 + $0x124] ss:$20 sps:$4 sm:$0xff]  }
  0x53   :  { %1655 = vmatprep.subr.bf16.mxu0 %v3052_v0  ;;  %1476 = vmatprep.mubr.bf16.mxu1 %v2831_v39  ;;  %v2919_v39 = vld [vmem:[%s4215_s0 + $0x398] ss:$20 sps:$4 sm:$0xff]  }
  0x54   :  { %2603 = vmatprep.subr.bf16.mxu1 %v2902_v40 }
  0x55   :  { %2604 = vmatpush3.bf16.msra.mxu1 %v2902_v40  ;;  %v2920_v40 = vld [vmem:[%s4215_s0 + $0x120] ss:$20 sps:$4 sm:$0xff]  }
  0x56   :  { %1656 = vmatpush1.bf16.msra.mxu0 %v2828_v41  ;;  %2605 = vmatprep.subr.bf16.mxu1 %v2921_v42  ;;  %v2922_v41 = vld [vmem:[%s4215_s0 + $0x3c4] ss:$20 sps:$4 sm:$0xff]  }
  0x57   :  { %1657 = vmatprep.subr.bf16.mxu0 %v3052_v0 }
  0x59   :  { %1413 = vmatmul.mubr.bf16.gmra.mrb[12].mxu0 %v2833_v43  ;;  %1477 = vmatmul.mubr.bf16.gmra.mrb[12].mxu1 %v2834_v44  ;;  %v2926_v43 = vld [vmem:[%s4215_s0 + $0x3c0] ss:$20 sps:$4 sm:$0xff]   ;;  %v2927_v44 = vld [vmem:[%s4215_s0 + $0x148] ss:$20 sps:$4 sm:$0xff]  }
  0x5a   :  { %1658 = vmatpush1.bf16.msra.mxu0 %v2835_v45  ;;  %1420 = vmatprep.mubr.bf16.mxu0 %v2838_v46  ;;  %v2928_v45 = vld [vmem:[%s4215_s0 + $0x3ec] ss:$20 sps:$4 sm:$0xff]   ;;  %v2930_v46 = vld [vmem:[%s4215_s0 + $0x174] ss:$20 sps:$4 sm:$0xff]  }
  0x5b   :  { %1659 = vmatprep.subr.bf16.mxu0 %v3052_v0  ;;  %1484 = vmatprep.mubr.bf16.mxu1 %v2840_v47  ;;  %v2932_v47 = vld [vmem:[%s4215_s0 + $0x3e8] ss:$20 sps:$4 sm:$0xff]  }
  0x5c   :  { %2606 = vmatpush3.bf16.msra.mxu1 %v2921_v42  ;;  %v2924_v42 = vld [vmem:[%s4215_s0 + $0x14c] ss:$20 sps:$4 sm:$0xff]  }
  0x5d   :  { %2607 = vmatprep.subr.bf16.mxu1 %v2940_v48 }
  0x5e   :  { %1660 = vmatpush1.bf16.msra.mxu0 %v2837_v49  ;;  %v2934_v49 = vld [vmem:[%s4215_s0 + $0x414] ss:$20 sps:$4 sm:$0xff]  }
  0x5f   :  { %1661 = vmatprep.subr.bf16.mxu0 %v3052_v0 }
  0x60   :  { %2608 = vmatpush3.bf16.msra.mxu1 %v2940_v48  ;;  %v2933_v48 = vld [vmem:[%s4215_s0 + $0x170] ss:$20 sps:$4 sm:$0xff]  }
  0x61   :  { %1421 = vmatmul.mubr.bf16.gmra.mrb[16].mxu0 %v2842_v50  ;;  %1485 = vmatmul.mubr.bf16.gmra.mrb[16].mxu1 %v2843_v51  ;;  %v2936_v50 = vld [vmem:[%s4215_s0 + $0x19c] ss:$20 sps:$4 sm:$0xff]  }
  0x62   :  { %1662 = vmatpush1.bf16.msra.mxu0 %v2844_v52  ;;  %1428 = vmatprep.mubr.bf16.mxu0 %v2846_v53  ;;  %v2938_v51 = vld [vmem:[%s4215_s0 + $0x410] ss:$20 sps:$4 sm:$0xff]   ;;  %v2939_v52 = vld [vmem:[%s4215_s0 + $0x198] ss:$20 sps:$4 sm:$0xff]  }
  0x63   :  { %1663 = vmatprep.subr.bf16.mxu0 %v3052_v0  ;;  %1492 = vmatprep.mubr.bf16.mxu1 %v2848_v54  ;;  %v2941_v53 = vld [vmem:[%s4215_s0 + $0x43c] ss:$20 sps:$4 sm:$0xff]   ;;  %v2943_v54 = vld [vmem:[%s4215_s0 + $0x1c4] ss:$20 sps:$4 sm:$0xff]  }
  0x64   :  { %2609 = vmatprep.subr.bf16.mxu1 %v2959_v61 }
  0x65   :  { %2610 = vmatpush3.bf16.msra.mxu1 %v2959_v61  ;;  %v2953_v61 = vld [vmem:[%s4215_s0 + $0x48c] ss:$20 sps:$4 sm:$0xff]  }
  0x66   :  { %1664 = vmatpush1.bf16.msra.mxu0 %v2845_v55  ;;  %v2945_v55 = vld [vmem:[%s4215_s0 + $0x438] ss:$20 sps:$4 sm:$0xff]  }
  0x67   :  { %1665 = vmatprep.subr.bf16.mxu0 %v3052_v0 }
  0x69   :  { %1429 = vmatmul.mubr.bf16.gmra.mrb[20].mxu0 %v2850_v56  ;;  %1493 = vmatmul.mubr.bf16.gmra.mrb[20].mxu1 %v2851_v57  ;;  %v2946_v56 = vld [vmem:[%s4215_s0 + $0x1c0] ss:$20 sps:$4 sm:$0xff]   ;;  %v2947_v57 = vld [vmem:[%s4215_s0 + $0x464] ss:$20 sps:$4 sm:$0xff]  }
  0x6a   :  { %1666 = vmatpush1.bf16.msra.mxu0 %v2852_v58  ;;  %1436 = vmatprep.mubr.bf16.mxu0 %v2854_v59  ;;  %v2949_v58 = vld [vmem:[%s4215_s0 + $0x1ec] ss:$20 sps:$4 sm:$0xff]  }
  0x6b   :  { %1667 = vmatprep.subr.bf16.mxu0 %v3052_v0  ;;  %1500 = vmatprep.mubr.bf16.mxu1 %v2856_v60  ;;  %v2951_v59 = vld [vmem:[%s4215_s0 + $0x460] ss:$20 sps:$4 sm:$0xff]   ;;  %v2952_v60 = vld [vmem:[%s4215_s0 + $0x1e8] ss:$20 sps:$4 sm:$0xff]  }
  0x6e   :  { %1668 = vmatpush1.bf16.msra.mxu0 %v2853_v62  ;;  %v2955_v62 = vld [vmem:[%s4215_s0 + $0x214] ss:$20 sps:$4 sm:$0xff]  }
  0x6f   :  { %1669 = vmatprep.subr.bf16.mxu0 %v3052_v0 }
  0x71   :  { %1437 = vmatmul.mubr.bf16.gmra.mrb[24].mxu0 %v2858_v63  ;;  %1501 = vmatmul.mubr.bf16.gmra.mrb[24].mxu1 %v2859_v1  ;;  %v2957_v63 = vld [vmem:[%s4215_s0 + $0x488] ss:$20 sps:$4 sm:$0xff]   ;;  %v2958_v1 = vld [vmem:[%s4215_s0 + $0x210] ss:$20 sps:$4 sm:$0xff]  }
  0x72   :  { %1670 = vmatpush1.bf16.msra.mxu0 %v2860_v2  ;;  %1444 = vmatprep.mubr.bf16.mxu0 %v2863_v3  ;;  %v2960_v2 = vld [vmem:[%s4215_s0 + $0x4b4] ss:$20 sps:$4 sm:$0xff]   ;;  %v2962_v3 = vld [vmem:[%s4215_s0 + $0x23c] ss:$20 sps:$4 sm:$0xff]  }
  0x73   :  { %1671 = vmatprep.subr.bf16.mxu0 %v3052_v0  ;;  %1508 = vmatprep.mubr.bf16.mxu1 %v2865_v4  ;;  %v2964_v4 = vld [vmem:[%s4215_s0 + $0x4b0] ss:$20 sps:$4 sm:$0xff]  }
  0x76   :  { %1672 = vmatpush1.bf16.msra.mxu0 %v2862_v5  ;;  %v2965_v5 = vld [vmem:[%s4215_s0 + $0x238] ss:$20 sps:$4 sm:$0xff]  }
  0x77   :  { %1673 = vmatprep.subr.bf16.mxu0 %v3052_v0 }
  0x79   :  { %1445 = vmatmul.mubr.bf16.gmra.mrb[28].mxu0 %v2867_v6  ;;  %1509 = vmatmul.mubr.bf16.gmra.mrb[28].mxu1 %v2868_v7  ;;  %v2966_v6 = vld [vmem:[%s4215_s0 + $0x4dc] ss:$20 sps:$4 sm:$0xff]   ;;  %v2968_v7 = vld [vmem:[%s4215_s0 + $0x264] ss:$20 sps:$4 sm:$0xff]  }
  0x7a   :  { %1674 = vmatpush1.bf16.msra.mxu0 %v2869_v8  ;;  %1516 = vmatprep.mubr.bf16.mxu1 %v2871_v9  ;;  %v2970_v8 = vld [vmem:[%s4215_s0 + $0x4d8] ss:$20 sps:$4 sm:$0xff]   ;;  %v2971_v9 = vld [vmem:[%s4215_s0 + $0x260] ss:$20 sps:$4 sm:$0xff]  }
  0x7b   :  { %1675 = vmatprep.subr.bf16.mxu0 %v3052_v0  ;;  %1677 = vmatprep.mubr.bf16.mxu0 %v2875_v10  ;;  %v2881_v0 = vld [vmem:[%s4215_s0 + $0x2a8] ss:$20 sps:$4 sm:$0xff]   ;;  %v2972_v10 = vld [vmem:[%s4215_s0 + $0x28c] ss:$20 sps:$4 sm:$0xff]  }
  0x7e   :  { %1676 = vmatpush1.bf16.msra.mxu0 %v2870_v11  ;;  %v2974_v11 = vld [vmem:[%s4215_s0 + $0x10] ss:$20 sps:$4 sm:$0xff]  }
  0x81   :  { %1517 = vmatmul.mubr.bf16.gmra.mrb[32].mxu1 %v2876_v13  ;;  %1678 = vmatmul.mubr.bf16.vlgmr.msra.gmra.mrb[0].mxu0 %v2873_v12  ;;  %v2975_v12 = vld [vmem:[%s4215_s0 + $0x288] ss:$20 sps:$4 sm:$0xff]   ;;  %v2976_v13 = vld [vmem:[%s4215_s0 + $0x38] ss:$20 sps:$4 sm:$0xff]  }
  0x82   :  { %1524 = vmatprep.mubr.bf16.mxu1 %v2877_v14  ;;  %1685 = vmatprep.mubr.bf16.mxu0 %v2879_v15  ;;  %v2977_v14 = vld [vmem:[%s4215_s0 + $0x2b4] ss:$20 sps:$4 sm:$0xff]  }
  0x83   :  { %v2979_v15 = vld [vmem:[%s4215_s0 + $0x60] ss:$20 sps:$4 sm:$0xff]  }
  0x89   :  { %1525 = vmatmul.mubr.bf16.gmra.mrb[36].mxu1 %v2881_v0  ;;  %1686 = vmatmul.mubr.bf16.gmra.mrb[4].mxu0 %v2882_v16  ;;  %v2980_v0 = vld [vmem:[%s4215_s0 + $0x2b0] ss:$20 sps:$4 sm:$0xff]   ;;  %v2981_v16 = vld [vmem:[%s4215_s0 + $0x88] ss:$20 sps:$4 sm:$0xff]  }
  0x8a   :  { %1532 = vmatprep.mubr.bf16.mxu1 %v2884_v17  ;;  %1693 = vmatprep.mubr.bf16.mxu0 %v2886_v18  ;;  %v2982_v17 = vld [vmem:[%s4215_s0 + $0x2dc] ss:$20 sps:$4 sm:$0xff]  }
  0x8b   :  { %v2984_v18 = vld [vmem:[%s4215_s0 + $0xb0] ss:$20 sps:$4 sm:$0xff]  }
  0x91   :  { %1533 = vmatmul.mubr.bf16.gmra.mrb[40].mxu1 %v2888_v19  ;;  %1694 = vmatmul.mubr.bf16.gmra.mrb[8].mxu0 %v2889_v20  ;;  %v2985_v19 = vld [vmem:[%s4215_s0 + $0x2d8] ss:$20 sps:$4 sm:$0xff]  }
  0x92   :  { %1540 = vmatprep.mubr.bf16.mxu1 %v2890_v21  ;;  %1701 = vmatprep.mubr.bf16.mxu0 %v2892_v22  ;;  %v2986_v20 = vld [vmem:[%s4215_s0 + $0xd8] ss:$20 sps:$4 sm:$0xff]   ;;  %v2989_v22 = vld [vmem:[%s4215_s0 + $0x100] ss:$20 sps:$4 sm:$0xff]  }
  0x93   :  { %v2987_v21 = vld [vmem:[%s4215_s0 + $0x304] ss:$20 sps:$4 sm:$0xff]  }
  0x99   :  { %1541 = vmatmul.mubr.bf16.gmra.mrb[44].mxu1 %v2894_v23  ;;  %1702 = vmatmul.mubr.bf16.gmra.mrb[12].mxu0 %v2895_v24 }
  0x9a   :  { %1548 = vmatprep.mubr.bf16.mxu1 %v2896_v25  ;;  %1709 = vmatprep.mubr.bf16.mxu0 %v2898_v26  ;;  %v2990_v25 = vld [vmem:[%s4215_s0 + $0x300] ss:$20 sps:$4 sm:$0xff]   ;;  %v2991_v26 = vld [vmem:[%s4215_s0 + $0x128] ss:$20 sps:$4 sm:$0xff]  }
  0xa1   :  { %1549 = vmatmul.mubr.bf16.gmra.mrb[48].mxu1 %v2900_v27  ;;  %1710 = vmatmul.mubr.bf16.gmra.mrb[16].mxu0 %v2901_v28  ;;  %v2992_v28 = vld [vmem:[%s4215_s0 + $0x32c] ss:$20 sps:$4 sm:$0xff]  }
  0xa2   :  { %1556 = vmatprep.mubr.bf16.mxu1 %v2903_v29  ;;  %1717 = vmatprep.mubr.bf16.mxu0 %v2905_v30  ;;  %v2994_v29 = vld [vmem:[%s4215_s0 + $0x150] ss:$20 sps:$4 sm:$0xff]  }
  0xa9   :  { %1557 = vmatmul.mubr.bf16.gmra.mrb[52].mxu1 %v2907_v31  ;;  %1718 = vmatmul.mubr.bf16.gmra.mrb[20].mxu0 %v2908_v32 }
  0xaa   :  { %1564 = vmatprep.mubr.bf16.mxu1 %v2909_v33  ;;  %1725 = vmatprep.mubr.bf16.mxu0 %v2911_v34  ;;  %v2995_v33 = vld [vmem:[%s4215_s0 + $0x328] ss:$20 sps:$4 sm:$0xff]   ;;  %v2996_v34 = vld [vmem:[%s4215_s0 + $0x178] ss:$20 sps:$4 sm:$0xff]  }
  0xb1   :  { %1565 = vmatmul.mubr.bf16.gmra.mrb[56].mxu1 %v2913_v35  ;;  %1726 = vmatmul.mubr.bf16.gmra.mrb[24].mxu0 %v2914_v36  ;;  %v2997_v36 = vld [vmem:[%s4215_s0 + $0x354] ss:$20 sps:$4 sm:$0xff]  }
  0xb2   :  { %1572 = vmatprep.mubr.bf16.mxu1 %v2915_v37  ;;  %1733 = vmatprep.mubr.bf16.mxu0 %v2917_v38  ;;  %v2999_v37 = vld [vmem:[%s4215_s0 + $0x1a0] ss:$20 sps:$4 sm:$0xff]  }
  0xb9   :  { %1573 = vmatmul.mubr.bf16.gmra.mrb[60].mxu1 %v2919_v39  ;;  %1734 = vmatmul.mubr.bf16.gmra.mrb[28].mxu0 %v2920_v40 }
  0xba   :  { %1580 = vmatprep.mubr.bf16.mxu1 %v2922_v41  ;;  %1741 = vmatprep.mubr.bf16.mxu0 %v2924_v42  ;;  %v3000_v41 = vld [vmem:[%s4215_s0 + $0x350] ss:$20 sps:$4 sm:$0xff]   ;;  %v3001_v42 = vld [vmem:[%s4215_s0 + $0x1c8] ss:$20 sps:$4 sm:$0xff]  }
  0xc1   :  { %1581 = vmatmul.mubr.bf16.gmra.mrb[64].mxu1 %v2926_v43  ;;  %1742 = vmatmul.mubr.bf16.gmra.mrb[32].mxu0 %v2927_v44  ;;  %v3002_v44 = vld [vmem:[%s4215_s0 + $0x37c] ss:$20 sps:$4 sm:$0xff]  }
  0xc2   :  { %1588 = vmatprep.mubr.bf16.mxu1 %v2928_v45  ;;  %1749 = vmatprep.mubr.bf16.mxu0 %v2930_v46  ;;  %v3004_v45 = vld [vmem:[%s4215_s0 + $0x1f0] ss:$20 sps:$4 sm:$0xff]  }
  0xc9   :  { %1589 = vmatmul.mubr.bf16.gmra.mrb[68].mxu1 %v2932_v47  ;;  %1750 = vmatmul.mubr.bf16.gmra.mrb[36].mxu0 %v2933_v48 }
  0xca   :  { %1596 = vmatprep.mubr.bf16.mxu1 %v2934_v49  ;;  %1757 = vmatprep.mubr.bf16.mxu0 %v2936_v50  ;;  %v3005_v49 = vld [vmem:[%s4215_s0 + $0x378] ss:$20 sps:$4 sm:$0xff]  }
  0xcb   :  { %v3006_v50 = vld [vmem:[%s4215_s0 + $0x218] ss:$20 sps:$4 sm:$0xff]  }
  0xd1   :  { %1597 = vmatmul.mubr.bf16.gmra.mrb[72].mxu1 %v2938_v51  ;;  %1758 = vmatmul.mubr.bf16.gmra.mrb[40].mxu0 %v2939_v52  ;;  %v3007_v52 = vld [vmem:[%s4215_s0 + $0x3a4] ss:$20 sps:$4 sm:$0xff]  }
  0xd2   :  { %1604 = vmatprep.mubr.bf16.mxu1 %v2941_v53  ;;  %1765 = vmatprep.mubr.bf16.mxu0 %v2943_v54  ;;  %v3009_v53 = vld [vmem:[%s4215_s0 + $0x240] ss:$20 sps:$4 sm:$0xff]  }
  0xd9   :  { %1605 = vmatmul.mubr.bf16.gmra.mrb[76].mxu1 %v2945_v55  ;;  %1766 = vmatmul.mubr.bf16.gmra.mrb[44].mxu0 %v2946_v56 }
  0xda   :  { %1612 = vmatprep.mubr.bf16.mxu1 %v2947_v57  ;;  %1773 = vmatprep.mubr.bf16.mxu0 %v2949_v58  ;;  %v3010_v57 = vld [vmem:[%s4215_s0 + $0x3a0] ss:$20 sps:$4 sm:$0xff]   ;;  %v3011_v58 = vld [vmem:[%s4215_s0 + $0x268] ss:$20 sps:$4 sm:$0xff]  }
  0xe1   :  { %1613 = vmatmul.mubr.bf16.gmra.mrb[80].mxu1 %v2951_v59  ;;  %1774 = vmatmul.mubr.bf16.gmra.mrb[48].mxu0 %v2952_v60  ;;  %v3012_v60 = vld [vmem:[%s4215_s0 + $0x3cc] ss:$20 sps:$4 sm:$0xff]  }
  0xe2   :  { %1620 = vmatprep.mubr.bf16.mxu1 %v2953_v61  ;;  %1781 = vmatprep.mubr.bf16.mxu0 %v2955_v62  ;;  %v3014_v61 = vld [vmem:[%s4215_s0 + $0x290] ss:$20 sps:$4 sm:$0xff]  }
  0xe9   :  { %1621 = vmatmul.mubr.bf16.gmra.mrb[84].mxu1 %v2957_v63  ;;  %1782 = vmatmul.mubr.bf16.gmra.mrb[52].mxu0 %v2958_v1 }
  0xea   :  { %1628 = vmatprep.mubr.bf16.mxu1 %v2960_v2  ;;  %1789 = vmatprep.mubr.bf16.mxu0 %v2962_v3  ;;  %v3015_v2 = vld [vmem:[%s4215_s0 + $0x3c8] ss:$20 sps:$4 sm:$0xff]   ;;  %v3016_v3 = vld [vmem:[%s4215_s0 + $0x2b8] ss:$20 sps:$4 sm:$0xff]  }
  0xf1   :  { %1629 = vmatmul.mubr.bf16.gmra.mrb[88].mxu1 %v2964_v4  ;;  %1790 = vmatmul.mubr.bf16.gmra.mrb[56].mxu0 %v2965_v5  ;;  %v3017_v5 = vld [vmem:[%s4215_s0 + $0x3f4] ss:$20 sps:$4 sm:$0xff]  }
  0xf2   :  { %1636 = vmatprep.mubr.bf16.mxu1 %v2966_v6  ;;  %1797 = vmatprep.mubr.bf16.mxu0 %v2968_v7  ;;  %v3019_v6 = vld [vmem:[%s4215_s0 + $0x2e0] ss:$20 sps:$4 sm:$0xff]  }
  0xf9   :  { %1637 = vmatmul.mubr.bf16.gmra.mrb[92].mxu1 %v2970_v8  ;;  %1798 = vmatmul.mubr.bf16.gmra.mrb[60].mxu0 %v2971_v9 }
  0xfa   :  { %1805 = vmatprep.mubr.bf16.mxu0 %v2972_v10  ;;  %2611 = vmatprep.mubr.bf16.mxu1 %v2974_v11  ;;  %v3020_v10 = vld [vmem:[%s4215_s0 + $0x3f0] ss:$20 sps:$4 sm:$0xff]   ;;  %v3021_v11 = vld [vmem:[%s4215_s0 + $0x308] ss:$20 sps:$4 sm:$0xff]  }
 0x101   :  { %1806 = vmatmul.mubr.bf16.gmra.mrb[64].mxu0 %v2975_v12  ;;  %2612 = vmatmul.mubr.bf16.vlgmr.msra.gmra.mrb[96].mxu1 %v2976_v13  ;;  %v3022_v13 = vld [vmem:[%s4215_s0 + $0x41c] ss:$20 sps:$4 sm:$0xff]  }
 0x102   :  { %1813 = vmatprep.mubr.bf16.mxu0 %v2977_v14  ;;  %2615 = vmatprep.mubr.bf16.mxu1 %v2979_v15  ;;  %v3024_v14 = vld [vmem:[%s4215_s0 + $0x330] ss:$20 sps:$4 sm:$0xff]  }
 0x109   :  { %1814 = vmatmul.mubr.bf16.gmra.mrb[68].mxu0 %v2980_v0  ;;  %2616 = vmatmul.mubr.bf16.gmra.mrb[100].mxu1 %v2981_v16 }
 0x10a   :  { %1821 = vmatprep.mubr.bf16.mxu0 %v2982_v17  ;;  %2619 = vmatprep.mubr.bf16.mxu1 %v2984_v18  ;;  %v3025_v17 = vld [vmem:[%s4215_s0 + $0x418] ss:$20 sps:$4 sm:$0xff]  }
 0x10b   :  { %v3026_v18 = vld [vmem:[%s4215_s0 + $0x358] ss:$20 sps:$4 sm:$0xff]  }
 0x111   :  { %1822 = vmatmul.mubr.bf16.gmra.mrb[72].mxu0 %v2985_v19  ;;  %2620 = vmatmul.mubr.bf16.gmra.mrb[104].mxu1 %v2986_v20  ;;  %v3027_v20 = vld [vmem:[%s4215_s0 + $0x444] ss:$20 sps:$4 sm:$0xff]  }
 0x112   :  { %1829 = vmatprep.mubr.bf16.mxu0 %v2987_v21  ;;  %2623 = vmatprep.mubr.bf16.mxu1 %v2989_v22  ;;  %v3029_v21 = vld [vmem:[%s4215_s0 + $0x380] ss:$20 sps:$4 sm:$0xff]  }
 0x114   :  { %v3566_v23 = vpop.f32.mrb[0].mxu1 }
 0x115   :  { %v1456_v24 = vpop.f32.mrb[1].mxu1 }
 0x116   :  { %v3574_v27 = vpop.f32.mrb[2].mxu1 }
 0x117   :  { %v1459_v30 = vpop.f32.mrb[3].mxu1 }
 0x118   :  { %v3031_v30 = vld [vmem:[%s4215_s0 + $0x3a8] ss:$20 sps:$4 sm:$0xff]  }
 0x119   :  { %1830 = vmatmul.mubr.bf16.gmra.mrb[76].mxu0 %v2990_v25  ;;  %2624 = vmatmul.mubr.bf16.gmra.mrb[108].mxu1 %v2991_v26 }
 0x11a   :  { %1837 = vmatprep.mubr.bf16.mxu0 %v2992_v28  ;;  %2627 = vmatprep.mubr.bf16.mxu1 %v2994_v29  ;;  %v3030_v29 = vld [vmem:[%s4215_s0 + $0x440] ss:$20 sps:$4 sm:$0xff]  }
 0x11c   :  { %v3582_v31 = vpop.f32.mrb[4].mxu1 }
 0x11d   :  { %v1464_v32 = vpop.f32.mrb[5].mxu1 }
 0x11e   :  { %v3590_v35 = vpop.f32.mrb[6].mxu1 }
 0x11f   :  { %v1467_v38 = vpop.f32.mrb[7].mxu1 }
 0x121   :  { %1838 = vmatmul.mubr.bf16.gmra.mrb[80].mxu0 %v2995_v33  ;;  %2628 = vmatmul.mubr.bf16.gmra.mrb[112].mxu1 %v2996_v34  ;;  %v3032_v34 = vld [vmem:[%s4215_s0 + $0x46c] ss:$20 sps:$4 sm:$0xff]  }
 0x122   :  { %1845 = vmatprep.mubr.bf16.mxu0 %v2997_v36  ;;  %2631 = vmatprep.mubr.bf16.mxu1 %v2999_v37  ;;  %v3034_v36 = vld [vmem:[%s4215_s0 + $0x3d0] ss:$20 sps:$4 sm:$0xff]  }
 0x124   :  { %v3598_v39 = vpop.f32.mrb[8].mxu1 }
 0x125   :  { %v1472_v40 = vpop.f32.mrb[9].mxu1 }
 0x126   :  { %v3606_v43 = vpop.f32.mrb[10].mxu1 }
 0x127   :  { %v1475_v46 = vpop.f32.mrb[11].mxu1 }
 0x128   :  { %v3036_v46 = vld [vmem:[%s4215_s0 + $0x3f8] ss:$20 sps:$4 sm:$0xff]  }
 0x129   :  { %1846 = vmatmul.mubr.bf16.gmra.mrb[84].mxu0 %v3000_v41  ;;  %2632 = vmatmul.mubr.bf16.gmra.mrb[116].mxu1 %v3001_v42 }
 0x12a   :  { %1853 = vmatprep.mubr.bf16.mxu0 %v3002_v44  ;;  %2635 = vmatprep.mubr.bf16.mxu1 %v3004_v45  ;;  %v3035_v45 = vld [vmem:[%s4215_s0 + $0x468] ss:$20 sps:$4 sm:$0xff]  }
 0x12c   :  { %v3614_v47 = vpop.f32.mrb[12].mxu1 }
 0x12d   :  { %v1480_v48 = vpop.f32.mrb[13].mxu1 }
 0x12e   :  { %v3622_v51 = vpop.f32.mrb[14].mxu1 }
 0x12f   :  { %v1483_v54 = vpop.f32.mrb[15].mxu1 }
 0x131   :  { %1854 = vmatmul.mubr.bf16.gmra.mrb[88].mxu0 %v3005_v49  ;;  %2636 = vmatmul.mubr.bf16.gmra.mrb[120].mxu1 %v3006_v50  ;;  %v3037_v50 = vld [vmem:[%s4215_s0 + $0x494] ss:$20 sps:$4 sm:$0xff]  }
 0x132   :  { %1861 = vmatprep.mubr.bf16.mxu0 %v3007_v52  ;;  %2639 = vmatprep.mubr.bf16.mxu1 %v3009_v53  ;;  %v3039_v52 = vld [vmem:[%s4215_s0 + $0x420] ss:$20 sps:$4 sm:$0xff]  }
 0x134   :  { %v3630_v55 = vpop.f32.mrb[16].mxu1 }
 0x135   :  { %v1488_v56 = vpop.f32.mrb[17].mxu1 }
 0x136   :  { %v3638_v59 = vpop.f32.mrb[18].mxu1 }
 0x137   :  { %v1491_v62 = vpop.f32.mrb[19].mxu1 }
 0x138   :  { %v3041_v62 = vld [vmem:[%s4215_s0 + $0x448] ss:$20 sps:$4 sm:$0xff]  }
 0x139   :  { %1862 = vmatmul.mubr.bf16.gmra.mrb[92].mxu0 %v3010_v57  ;;  %2640 = vmatmul.mubr.bf16.gmra.mrb[124].mxu1 %v3011_v58 }
 0x13a   :  { %1869 = vmatprep.mubr.bf16.mxu0 %v3012_v60  ;;  %2643 = vmatprep.mubr.bf16.mxu1 %v3014_v61  ;;  %v3040_v61 = vld [vmem:[%s4215_s0 + $0x490] ss:$20 sps:$4 sm:$0xff]  }
 0x13c   :  { %v3646_v63 = vpop.f32.mrb[20].mxu1 }
 0x13d   :  { %v1496_v1 = vpop.f32.mrb[21].mxu1 }
 0x13e   :  { %v3654_v4 = vpop.f32.mrb[22].mxu1 }
 0x13f   :  { %v1499_v7 = vpop.f32.mrb[23].mxu1 }
 0x141   :  { %1870 = vmatmul.mubr.bf16.gmra.mrb[96].mxu0 %v3015_v2  ;;  %2644 = vmatmul.mubr.bf16.gmra.mrb[128].mxu1 %v3016_v3  ;;  %v3042_v3 = vld [vmem:[%s4215_s0 + $0x4bc] ss:$20 sps:$4 sm:$0xff]  }
 0x142   :  { %1877 = vmatprep.mubr.bf16.mxu0 %v3017_v5  ;;  %2647 = vmatprep.mubr.bf16.mxu1 %v3019_v6  ;;  %v3044_v5 = vld [vmem:[%s4215_s0 + $0x470] ss:$20 sps:$4 sm:$0xff]  }
 0x144   :  { %v3662_v8 = vpop.f32.mrb[24].mxu1 }
 0x145   :  { %v1504_v9 = vpop.f32.mrb[25].mxu1 }
 0x146   :  { %v3670_v12 = vpop.f32.mrb[26].mxu1 }
 0x147   :  { %v1507_v15 = vpop.f32.mrb[27].mxu1 }
 0x148   :  { %v3046_v15 = vld [vmem:[%s4215_s0 + $0x498] ss:$20 sps:$4 sm:$0xff]  }
 0x149   :  { %1878 = vmatmul.mubr.bf16.gmra.mrb[100].mxu0 %v3020_v10  ;;  %2648 = vmatmul.mubr.bf16.gmra.mrb[132].mxu1 %v3021_v11 }
 0x14a   :  { %1885 = vmatprep.mubr.bf16.mxu0 %v3022_v13  ;;  %2651 = vmatprep.mubr.bf16.mxu1 %v3024_v14  ;;  %v3045_v14 = vld [vmem:[%s4215_s0 + $0x4b8] ss:$20 sps:$4 sm:$0xff]  }
 0x14c   :  { %v3678_v0 = vpop.f32.mrb[28].mxu1 }
 0x14d   :  { %v1512_v16 = vpop.f32.mrb[29].mxu1 }
 0x14e   :  { %v3686_v19 = vpop.f32.mrb[30].mxu1 }
 0x14f   :  { %v1515_v22 = vpop.f32.mrb[31].mxu1 }
 0x151   :  { %1886 = vmatmul.mubr.bf16.gmra.mrb[104].mxu0 %v3025_v17  ;;  %2652 = vmatmul.mubr.bf16.gmra.mrb[136].mxu1 %v3026_v18  ;;  %v3047_v18 = vld [vmem:[%s4215_s0 + $0x4e4] ss:$20 sps:$4 sm:$0xff]  }
 0x152   :  { %1893 = vmatprep.mubr.bf16.mxu0 %v3027_v20  ;;  %2655 = vmatprep.mubr.bf16.mxu1 %v3029_v21  ;;  %v3049_v20 = vld [vmem:[%s4215_s0 + $0x4c0] ss:$20 sps:$4 sm:$0xff]  }
 0x154   :  { %v3694_v24 = vpop.f32.mrb[32].mxu1  ;;  %v3696_v25 = vpop.f32.mrb[0].mxu0 }
 0x155   :  { %v1520_v26 = vpop.f32.mrb[33].mxu1  ;;  %v1681_v28 = vpop.f32.mrb[1].mxu0 }
 0x156   :  { %v3704_v32 = vpop.f32.mrb[34].mxu1  ;;  %v3706_v33 = vpop.f32.mrb[2].mxu0 }
 0x157   :  { %v1523_v37 = vpop.f32.mrb[35].mxu1  ;;  %v1684_v38 = vpop.f32.mrb[3].mxu0 }
 0x159   :  { %1894 = vmatmul.mubr.bf16.gmra.mrb[108].mxu0 %v3030_v29  ;;  %2656 = vmatmul.mubr.bf16.gmra.mrb[140].mxu1 %v3031_v30 }
 0x15a   :  { %1901 = vmatprep.mubr.bf16.mxu0 %v3032_v34  ;;  %2659 = vmatprep.mubr.bf16.mxu1 %v3034_v36  ;;  %v3050_v34 = vld [vmem:[%s4215_s0 + $0x4e0] ss:$20 sps:$4 sm:$0xff]   ;;  %v3051_v36 = vld [vmem:[%s4215_s0 + $0x4e8] ss:$20 sps:$4 sm:$0xff]  }
 0x15c   :  { %v3714_v40 = vpop.f32.mrb[36].mxu1  ;;  %v3716_v41 = vpop.f32.mrb[4].mxu0 }
 0x15d   :  { %v1528_v42 = vpop.f32.mrb[37].mxu1  ;;  %v1689_v44 = vpop.f32.mrb[5].mxu0 }
 0x15e   :  { %v3724_v48 = vpop.f32.mrb[38].mxu1  ;;  %v3726_v49 = vpop.f32.mrb[6].mxu0 }
 0x15f   :  { %v1531_v53 = vpop.f32.mrb[39].mxu1  ;;  %v1692_v54 = vpop.f32.mrb[7].mxu0 }
 0x161   :  { %1902 = vmatmul.mubr.bf16.gmra.mrb[112].mxu0 %v3035_v45  ;;  %2660 = vmatmul.mubr.bf16.gmra.mrb[144].mxu1 %v3036_v46 }
 0x162   :  { %1909 = vmatprep.mubr.bf16.mxu0 %v3037_v50  ;;  %2663 = vmatprep.mubr.bf16.mxu1 %v3039_v52 }
 0x164   :  { %v3734_v56 = vpop.f32.mrb[40].mxu1  ;;  %v3736_v57 = vpop.f32.mrb[8].mxu0 }
 0x165   :  { %v1536_v58 = vpop.f32.mrb[41].mxu1  ;;  %v1697_v60 = vpop.f32.mrb[9].mxu0 }
 0x166   :  { %v3744_v1 = vpop.f32.mrb[42].mxu1  ;;  %v3746_v2 = vpop.f32.mrb[10].mxu0 }
 0x167   :  { %v1539_v6 = vpop.f32.mrb[43].mxu1  ;;  %v1700_v7 = vpop.f32.mrb[11].mxu0 }
 0x169   :  { %1910 = vmatmul.mubr.bf16.gmra.mrb[116].mxu0 %v3040_v61  ;;  %2664 = vmatmul.mubr.bf16.gmra.mrb[148].mxu1 %v3041_v62 }
 0x16a   :  { %1917 = vmatprep.mubr.bf16.mxu0 %v3042_v3  ;;  %2667 = vmatprep.mubr.bf16.mxu1 %v3044_v5 }
 0x16c   :  { %v3754_v9 = vpop.f32.mrb[44].mxu1  ;;  %v3756_v10 = vpop.f32.mrb[12].mxu0 }
 0x16d   :  { %v1544_v11 = vpop.f32.mrb[45].mxu1  ;;  %v1705_v13 = vpop.f32.mrb[13].mxu0 }
 0x16e   :  { %v3764_v16 = vpop.f32.mrb[46].mxu1  ;;  %v3766_v17 = vpop.f32.mrb[14].mxu0 }
 0x16f   :  { %v1547_v21 = vpop.f32.mrb[47].mxu1  ;;  %v1708_v22 = vpop.f32.mrb[15].mxu0 }
 0x171   :  { %1918 = vmatmul.mubr.bf16.gmra.mrb[120].mxu0 %v3045_v14  ;;  %2668 = vmatmul.mubr.bf16.gmra.mrb[152].mxu1 %v3046_v15 }
 0x172   :  { %1925 = vmatprep.mubr.bf16.mxu0 %v3047_v18  ;;  %2671 = vmatprep.mubr.bf16.mxu1 %v3049_v20 }
 0x174   :  { %v3774_v26 = vpop.f32.mrb[48].mxu1  ;;  %v3776_v28 = vpop.f32.mrb[16].mxu0 }
 0x175   :  { %v1552_v29 = vpop.f32.mrb[49].mxu1  ;;  %v1713_v30 = vpop.f32.mrb[17].mxu0 }
 0x176   :  { %v3784_v37 = vpop.f32.mrb[50].mxu1  ;;  %v3786_v38 = vpop.f32.mrb[18].mxu0 }
 0x177   :  { %v1555_v42 = vpop.f32.mrb[51].mxu1  ;;  %v1716_v44 = vpop.f32.mrb[19].mxu0 }
 0x179   :  { %1926 = vmatmul.mubr.bf16.gmra.mrb[124].mxu0 %v3050_v34  ;;  %2672 = vmatmul.mubr.bf16.gmra.mrb[156].mxu1 %v3051_v36 }
 0x17c   :  { %v3788_v45 = vpop.f32.mrb[52].mxu1  ;;  %v3790_v46 = vpop.f32.mrb[20].mxu0 }
 0x17d   :  { %v1560_v50 = vpop.f32.mrb[53].mxu1  ;;  %v1721_v52 = vpop.f32.mrb[21].mxu0 }
 0x17e   :  { %v3792_v53 = vpop.f32.mrb[54].mxu1  ;;  %v3794_v54 = vpop.f32.mrb[22].mxu0 }
 0x17f   :  { %v1563_v58 = vpop.f32.mrb[55].mxu1  ;;  %v1724_v60 = vpop.f32.mrb[23].mxu0 }
 0x184   :  { %v3796_v61 = vpop.f32.mrb[56].mxu1  ;;  %v3798_v62 = vpop.f32.mrb[24].mxu0 }
 0x185   :  { %v1568_v3 = vpop.f32.mrb[57].mxu1  ;;  %v1729_v5 = vpop.f32.mrb[25].mxu0 }
 0x186   :  { %v3800_v6 = vpop.f32.mrb[58].mxu1  ;;  %v3802_v7 = vpop.f32.mrb[26].mxu0 }
 0x187   :  { %v1571_v11 = vpop.f32.mrb[59].mxu1  ;;  %v1732_v13 = vpop.f32.mrb[27].mxu0 }
 0x18c   :  { %v3804_v14 = vpop.f32.mrb[60].mxu1  ;;  %v3806_v15 = vpop.f32.mrb[28].mxu0 }
 0x18d   :  { %v1576_v18 = vpop.f32.mrb[61].mxu1  ;;  %v1737_v20 = vpop.f32.mrb[29].mxu0 }
 0x18e   :  { %v3808_v21 = vpop.f32.mrb[62].mxu1  ;;  %v3810_v22 = vpop.f32.mrb[30].mxu0 }
 0x18f   :  { %v1579_v29 = vpop.f32.mrb[63].mxu1  ;;  %v1740_v30 = vpop.f32.mrb[31].mxu0 }
 0x194   :  { %v3812_v34 = vpop.f32.mrb[64].mxu1  ;;  %v1743_v36 = vpop.f32.mrb[32].mxu0 }
 0x195   :  { %v3815_v42 = vadd.f32 %v1743_v36, %v3566_v23  ;;  %v1584_v44 = vpop.f32.mrb[65].mxu1  ;;  %v1745_v50 = vpop.f32.mrb[33].mxu0 }
 0x196   :  { %v3817_v52 = vpop.f32.mrb[66].mxu1  ;;  %v1746_v58 = vpop.f32.mrb[34].mxu0 }
 0x197   :  { %4217 = vst [vmem:[#allocation2_spill] sm:$0xff] %v3817_v52  ;;  %v3820_v60 = vadd.f32 %v1746_v58, %v3574_v27  ;;  %v1587_v3 = vpop.f32.mrb[67].mxu1  ;;  %v1748_v5 = vpop.f32.mrb[35].mxu0 }
 0x19c   :  { %v3822_v11 = vpop.f32.mrb[68].mxu1  ;;  %v1751_v13 = vpop.f32.mrb[36].mxu0 }
 0x19d   :  { %4218 = vst [vmem:[#allocation3_spill] sm:$0xff] %v3822_v11  ;;  %v3825_v18 = vadd.f32 %v1751_v13, %v3582_v31  ;;  %v1592_v20 = vpop.f32.mrb[69].mxu1  ;;  %v1753_v29 = vpop.f32.mrb[37].mxu0 }
 0x19e   :  { %v3827_v23 = vpop.f32.mrb[70].mxu1  ;;  %v1754_v30 = vpop.f32.mrb[38].mxu0 }
 0x19f   :  { %4219 = vst [vmem:[#allocation4_spill] sm:$0xff] %v3827_v23  ;;  %v3830_v36 = vadd.f32 %v1754_v30, %v3590_v35  ;;  %v1595_v44 = vpop.f32.mrb[71].mxu1  ;;  %v1756_v50 = vpop.f32.mrb[39].mxu0 }
 0x1a4   :  { %v3832_v27 = vpop.f32.mrb[72].mxu1  ;;  %v1759_v58 = vpop.f32.mrb[40].mxu0 }
 0x1a5   :  { %4220 = vst [vmem:[#allocation5_spill] sm:$0xff] %v3832_v27  ;;  %v3835_v3 = vadd.f32 %v1759_v58, %v3598_v39  ;;  %v1600_v5 = vpop.f32.mrb[73].mxu1  ;;  %v1761_v11 = vpop.f32.mrb[41].mxu0 }
 0x1a6   :  { %v3837_v31 = vpop.f32.mrb[74].mxu1  ;;  %v1762_v13 = vpop.f32.mrb[42].mxu0 }
 0x1a7   :  { %4221 = vst [vmem:[#allocation6_spill] sm:$0xff] %v3837_v31  ;;  %v3840_v20 = vadd.f32 %v1762_v13, %v3606_v43  ;;  %v1603_v29 = vpop.f32.mrb[75].mxu1  ;;  %v1764_v23 = vpop.f32.mrb[43].mxu0 }
 0x1ac   :  { %v3842_v35 = vpop.f32.mrb[76].mxu1  ;;  %v1767_v30 = vpop.f32.mrb[44].mxu0 }
 0x1ad   :  { %4222 = vst [vmem:[#allocation7_spill] sm:$0xff] %v3842_v35  ;;  %v3845_v44 = vadd.f32 %v1767_v30, %v3614_v47  ;;  %v1608_v50 = vpop.f32.mrb[77].mxu1  ;;  %v1769_v27 = vpop.f32.mrb[45].mxu0 }
 0x1ae   :  { %v3847_v39 = vpop.f32.mrb[78].mxu1  ;;  %v1770_v58 = vpop.f32.mrb[46].mxu0 }
 0x1af   :  { %4223 = vst [vmem:[#allocation8_spill] sm:$0xff] %v3847_v39  ;;  %v3850_v11 = vadd.f32 %v1770_v58, %v3622_v51  ;;  %v1611_v5 = vpop.f32.mrb[79].mxu1  ;;  %v1772_v31 = vpop.f32.mrb[47].mxu0 }
 0x1b4   :  { %v3852_v43 = vpop.f32.mrb[80].mxu1  ;;  %v1775_v13 = vpop.f32.mrb[48].mxu0 }
 0x1b5   :  { %4224 = vst [vmem:[#allocation9_spill] sm:$0xff] %v3852_v43  ;;  %v3855_v23 = vadd.f32 %v1775_v13, %v3630_v55  ;;  %v1616_v29 = vpop.f32.mrb[81].mxu1  ;;  %v1777_v35 = vpop.f32.mrb[49].mxu0 }
 0x1b6   :  { %v3857_v47 = vpop.f32.mrb[82].mxu1  ;;  %v1778_v30 = vpop.f32.mrb[50].mxu0 }
 0x1b7   :  { %4225 = vst [vmem:[#allocation10_spill] sm:$0xff] %v3857_v47  ;;  %v3860_v27 = vadd.f32 %v1778_v30, %v3638_v59  ;;  %v1619_v50 = vpop.f32.mrb[83].mxu1  ;;  %v1780_v39 = vpop.f32.mrb[51].mxu0 }
 0x1bc   :  { %v3862_v51 = vpop.f32.mrb[84].mxu1  ;;  %v1783_v58 = vpop.f32.mrb[52].mxu0 }
 0x1bd   :  { %4226 = vst [vmem:[#allocation11_spill] sm:$0xff] %v3862_v51  ;;  %v3865_v31 = vadd.f32 %v1783_v58, %v3646_v63  ;;  %v1624_v5 = vpop.f32.mrb[85].mxu1  ;;  %v1785_v43 = vpop.f32.mrb[53].mxu0 }
 0x1be   :  { %v3867_v55 = vpop.f32.mrb[86].mxu1  ;;  %v1786_v13 = vpop.f32.mrb[54].mxu0 }
 0x1bf   :  { %4227 = vst [vmem:[#allocation12_spill] sm:$0xff] %v3867_v55  ;;  %v3870_v35 = vadd.f32 %v1786_v13, %v3654_v4  ;;  %v1627_v29 = vpop.f32.mrb[87].mxu1  ;;  %v1788_v47 = vpop.f32.mrb[55].mxu0 }
 0x1c4   :  { %v3872_v59 = vpop.f32.mrb[88].mxu1  ;;  %v1791_v30 = vpop.f32.mrb[56].mxu0 }
 0x1c5   :  { %4228 = vst [vmem:[#allocation13_spill] sm:$0xff] %v3872_v59  ;;  %v3875_v39 = vadd.f32 %v1791_v30, %v3662_v8  ;;  %v1632_v50 = vpop.f32.mrb[89].mxu1  ;;  %v1793_v51 = vpop.f32.mrb[57].mxu0 }
 0x1c6   :  { %v3877_v63 = vpop.f32.mrb[90].mxu1  ;;  %v1794_v58 = vpop.f32.mrb[58].mxu0 }
 0x1c7   :  { %4229 = vst [vmem:[#allocation14_spill] sm:$0xff] %v3877_v63  ;;  %v3880_v43 = vadd.f32 %v1794_v58, %v3670_v12  ;;  %v1635_v5 = vpop.f32.mrb[91].mxu1  ;;  %v1796_v55 = vpop.f32.mrb[59].mxu0 }
 0x1cc   :  { %v3882_v4 = vpop.f32.mrb[92].mxu1  ;;  %v1799_v13 = vpop.f32.mrb[60].mxu0 }
 0x1cd   :  { %4230 = vst [vmem:[#allocation15_spill] sm:$0xff] %v3882_v4  ;;  %v3885_v47 = vadd.f32 %v1799_v13, %v3678_v0  ;;  %v1640_v29 = vpop.f32.mrb[93].mxu1  ;;  %v1801_v59 = vpop.f32.mrb[61].mxu0 }
 0x1ce   :  { %v3887_v8 = vpop.f32.mrb[94].mxu1  ;;  %v1802_v30 = vpop.f32.mrb[62].mxu0 }
 0x1cf   :  { %4231 = vst [vmem:[#allocation16_spill] sm:$0xff] %v3887_v8  ;;  %v3890_v51 = vadd.f32 %v1802_v30, %v3686_v19  ;;  %v1643_v50 = vpop.f32.mrb[95].mxu1  ;;  %v1804_v63 = vpop.f32.mrb[63].mxu0 }
 0x1d4   :  { %v1807_v12 = vpop.f32.mrb[64].mxu0  ;;  %v2613_v58 = vpop.f32.mrb[96].mxu1 }
 0x1d5   :  { %v3893_v55 = vadd.f32 %v1807_v12, %v3694_v24  ;;  %v1977_v5 = vadd.f32 %v2613_v58, %v3716_v41  ;;  %v1809_v4 = vpop.f32.mrb[65].mxu0  ;;  %v1968_v0 = vpop.f32.mrb[97].mxu1 }
 0x1d6   :  { %v1969_v13 = vadd.f32 %v1968_v0, %v3696_v25  ;;  %v1810_v59 = vpop.f32.mrb[66].mxu0  ;;  %v2614_v29 = vpop.f32.mrb[98].mxu1 }
 0x1d7   :  { %v2225_v8 = vmax.f32 %v1977_v5, 0.0  ;;  %v3898_v52 = vadd.f32 %v1810_v59, %v3704_v32  ;;  %v1980_v19 = vadd.f32 %v2614_v29, %v3726_v49  ;;  %v1812_v63 = vpop.f32.mrb[67].mxu0  ;;  %v1971_v30 = vpop.f32.mrb[99].mxu1 }
 0x1d8   :  { %v2223_v50 = vmax.f32 %v1969_v13, 0.0  ;;  %v1972_v24 = vadd.f32 %v1971_v30, %v3706_v33 }
 0x1d9   :  { %2289 = vst [vmem:[%s4216_s2 + $0x10] sm:$0xff] %v2225_v8  ;;  %v2226_v41 = vmax.f32 %v1980_v19, 0.0 }
 0x1da   :  { %2287 = vst [vmem:[%s4216_s2] sm:$0xff] %v2223_v50  ;;  %v2224_v25 = vmax.f32 %v1972_v24, 0.0 }
 0x1db   :  { %2290 = vst [vmem:[%s4216_s2 + $0x18] sm:$0xff] %v2226_v41 }
 0x1dc   :  { %2288 = vst [vmem:[%s4216_s2 + $0x8] sm:$0xff] %v2224_v25  ;;  %v1815_v32 = vpop.f32.mrb[68].mxu0  ;;  %v2617_v33 = vpop.f32.mrb[100].mxu1 }
 0x1dd   :  { %v3915_v49 = vadd.f32 %v1815_v32, %v3714_v40  ;;  %v1993_v4 = vadd.f32 %v2617_v33, %v3756_v10  ;;  %v1817_v8 = vpop.f32.mrb[69].mxu0  ;;  %v1984_v12 = vpop.f32.mrb[101].mxu1 }
 0x1de   :  { %v1985_v58 = vadd.f32 %v1984_v12, %v3736_v57  ;;  %v1818_v5 = vpop.f32.mrb[70].mxu0  ;;  %v2618_v0 = vpop.f32.mrb[102].mxu1 }
 0x1df   :  { %v2229_v13 = vmax.f32 %v1993_v4, 0.0  ;;  %v3920_v59 = vadd.f32 %v1818_v5, %v3724_v48  ;;  %v1996_v29 = vadd.f32 %v2618_v0, %v3766_v17  ;;  %v1820_v19 = vpop.f32.mrb[71].mxu0  ;;  %v1987_v63 = vpop.f32.mrb[103].mxu1 }
 0x1e0   :  { %v2227_v30 = vmax.f32 %v1985_v58, 0.0  ;;  %v1988_v40 = vadd.f32 %v1987_v63, %v3746_v2 }
 0x1e1   :  { %2293 = vst [vmem:[%s4216_s2 + $0x30] sm:$0xff] %v2229_v13  ;;  %v2230_v10 = vmax.f32 %v1996_v29, 0.0 }
 0x1e2   :  { %2291 = vst [vmem:[%s4216_s2 + $0x20] sm:$0xff] %v2227_v30  ;;  %v2228_v57 = vmax.f32 %v1988_v40, 0.0 }
 0x1e3   :  { %2294 = vst [vmem:[%s4216_s2 + $0x38] sm:$0xff] %v2230_v10 }
 0x1e4   :  { %2292 = vst [vmem:[%s4216_s2 + $0x28] sm:$0xff] %v2228_v57  ;;  %v1823_v48 = vpop.f32.mrb[72].mxu0  ;;  %v2621_v2 = vpop.f32.mrb[104].mxu1 }
 0x1e5   :  { %v3937_v17 = vadd.f32 %v1823_v48, %v3734_v56  ;;  %v2009_v50 = vadd.f32 %v2621_v2, %v3790_v46  ;;  %v1825_v24 = vpop.f32.mrb[73].mxu0  ;;  %v2000_v41 = vpop.f32.mrb[105].mxu1 }
 0x1e6   :  { %v2001_v25 = vadd.f32 %v2000_v41, %v3776_v28  ;;  %v1826_v32 = vpop.f32.mrb[74].mxu0  ;;  %v2622_v33 = vpop.f32.mrb[106].mxu1 }
 0x1e7   :  { %v2233_v4 = vmax.f32 %v2009_v50, 0.0  ;;  %v3942_v8 = vadd.f32 %v1826_v32, %v3744_v1  ;;  %v2012_v12 = vadd.f32 %v2622_v33, %v3794_v54  ;;  %v1828_v58 = vpop.f32.mrb[75].mxu0  ;;  %v2003_v5 = vpop.f32.mrb[107].mxu1 }
 0x1e8   :  { %v2231_v0 = vmax.f32 %v2001_v25, 0.0  ;;  %v2004_v56 = vadd.f32 %v2003_v5, %v3786_v38 }
 0x1e9   :  { %2297 = vst [vmem:[%s4216_s2 + $0x50] sm:$0xff] %v2233_v4  ;;  %v2234_v46 = vmax.f32 %v2012_v12, 0.0 }
 0x1ea   :  { %2295 = vst [vmem:[%s4216_s2 + $0x40] sm:$0xff] %v2231_v0  ;;  %v2232_v28 = vmax.f32 %v2004_v56, 0.0 }
 0x1eb   :  { %2298 = vst [vmem:[%s4216_s2 + $0x58] sm:$0xff] %v2234_v46 }
 0x1ec   :  { %2296 = vst [vmem:[%s4216_s2 + $0x48] sm:$0xff] %v2232_v28  ;;  %v1831_v1 = vpop.f32.mrb[76].mxu0  ;;  %v2625_v38 = vpop.f32.mrb[108].mxu1 }
 0x1ed   :  { %v3959_v54 = vadd.f32 %v1831_v1, %v3754_v9  ;;  %v2025_v13 = vadd.f32 %v2625_v38, %v3806_v15  ;;  %v1833_v29 = vpop.f32.mrb[77].mxu0  ;;  %v2016_v19 = vpop.f32.mrb[109].mxu1 }
 0x1ee   :  { %v2017_v63 = vadd.f32 %v2016_v19, %v3798_v62  ;;  %v1834_v30 = vpop.f32.mrb[78].mxu0  ;;  %v2626_v40 = vpop.f32.mrb[110].mxu1 }
 0x1ef   :  { %v2237_v10 = vmax.f32 %v2025_v13, 0.0  ;;  %v3964_v57 = vadd.f32 %v1834_v30, %v3764_v16  ;;  %v2028_v48 = vadd.f32 %v2626_v40, %v3810_v22  ;;  %v1836_v2 = vpop.f32.mrb[79].mxu0  ;;  %v2019_v50 = vpop.f32.mrb[111].mxu1 }
 0x1f0   :  { %v2235_v24 = vmax.f32 %v2017_v63, 0.0  ;;  %v2020_v9 = vadd.f32 %v2019_v50, %v3802_v7 }
 0x1f1   :  { %2301 = vst [vmem:[%s4216_s2 + $0x70] sm:$0xff] %v2237_v10  ;;  %v2238_v15 = vmax.f32 %v2028_v48, 0.0 }
 0x1f2   :  { %2299 = vst [vmem:[%s4216_s2 + $0x60] sm:$0xff] %v2235_v24  ;;  %v2236_v62 = vmax.f32 %v2020_v9, 0.0 }
 0x1f3   :  { %2302 = vst [vmem:[%s4216_s2 + $0x78] sm:$0xff] %v2238_v15 }
 0x1f4   :  { %2300 = vst [vmem:[%s4216_s2 + $0x68] sm:$0xff] %v2236_v62  ;;  %v1839_v16 = vpop.f32.mrb[80].mxu0  ;;  %v2629_v7 = vpop.f32.mrb[112].mxu1 }
 0x1f5   :  { %v3981_v22 = vadd.f32 %v1839_v16, %v3774_v26  ;;  %v2041_v41 = vadd.f32 %v2629_v7, %v3825_v18  ;;  %v1841_v25 = vpop.f32.mrb[81].mxu0  ;;  %v2032_v32 = vpop.f32.mrb[113].mxu1 }
 0x1f6   :  { %v2033_v33 = vadd.f32 %v2032_v32, %v3815_v42  ;;  %v1842_v4 = vpop.f32.mrb[82].mxu0  ;;  %v2630_v12 = vpop.f32.mrb[114].mxu1 }
 0x1f7   :  { %v2241_v58 = vmax.f32 %v2041_v41, 0.0  ;;  %v3986_v5 = vadd.f32 %v1842_v4, %v3784_v37  ;;  %v2044_v0 = vadd.f32 %v2630_v12, %v3830_v36  ;;  %v1844_v56 = vpop.f32.mrb[83].mxu0  ;;  %v2035_v46 = vpop.f32.mrb[115].mxu1 }
 0x1f8   :  { %v2239_v28 = vmax.f32 %v2033_v33, 0.0  ;;  %v2036_v26 = vadd.f32 %v2035_v46, %v3820_v60 }
 0x1f9   :  { %2305 = vst [vmem:[%s4216_s2 + $0x90] sm:$0xff] %v2241_v58  ;;  %v2242_v18 = vmax.f32 %v2044_v0, 0.0 }
 0x1fa   :  { %2303 = vst [vmem:[%s4216_s2 + $0x80] sm:$0xff] %v2239_v28  ;;  %v2240_v42 = vmax.f32 %v2036_v26, 0.0 }
 0x1fb   :  { %2306 = vst [vmem:[%s4216_s2 + $0x98] sm:$0xff] %v2242_v18 }
 0x1fc   :  { %2304 = vst [vmem:[%s4216_s2 + $0x88] sm:$0xff] %v2240_v42  ;;  %v1847_v37 = vpop.f32.mrb[84].mxu0  ;;  %v2633_v60 = vpop.f32.mrb[116].mxu1 }
 0x1fd   :  { %v4003_v36 = vadd.f32 %v1847_v37, %v3788_v45  ;;  %v2057_v1 = vadd.f32 %v2633_v60, %v3845_v44  ;;  %v1849_v38 = vpop.f32.mrb[85].mxu0  ;;  %v2048_v13 = vpop.f32.mrb[117].mxu1 }
 0x1fe   :  { %v2049_v29 = vadd.f32 %v2048_v13, %v3835_v3  ;;  %v1850_v19 = vpop.f32.mrb[86].mxu0  ;;  %v2634_v63 = vpop.f32.mrb[118].mxu1 }
 0x1ff   :  { %v2245_v30 = vmax.f32 %v2057_v1, 0.0  ;;  %v4008_v40 = vadd.f32 %v1850_v19, %v3792_v53  ;;  %v2060_v10 = vadd.f32 %v2634_v63, %v3850_v11  ;;  %v1852_v48 = vpop.f32.mrb[87].mxu0  ;;  %v2051_v2 = vpop.f32.mrb[119].mxu1 }
 0x200   :  { %v2243_v50 = vmax.f32 %v2049_v29, 0.0  ;;  %v2052_v45 = vadd.f32 %v2051_v2, %v3840_v20  ;;  %v4232_v2 = vld [vmem:[#allocation2_spill] sm:$0xff] }
 0x201   :  { %2309 = vst [vmem:[%s4216_s2 + $0xb0] sm:$0xff] %v2245_v30  ;;  %v2246_v44 = vmax.f32 %v2060_v10, 0.0 }
 0x202   :  { %2307 = vst [vmem:[%s4216_s2 + $0xa0] sm:$0xff] %v2243_v50  ;;  %v2244_v3 = vmax.f32 %v2052_v45, 0.0 }
 0x203   :  { %2310 = vst [vmem:[%s4216_s2 + $0xb8] sm:$0xff] %v2246_v44 }
 0x204   :  { %2308 = vst [vmem:[%s4216_s2 + $0xa8] sm:$0xff] %v2244_v3  ;;  %v1855_v53 = vpop.f32.mrb[88].mxu0  ;;  %v2637_v20 = vpop.f32.mrb[120].mxu1 }
 0x205   :  { %v4025_v11 = vadd.f32 %v1855_v53, %v3796_v61  ;;  %v2073_v24 = vadd.f32 %v2637_v20, %v3865_v31  ;;  %v1857_v9 = vpop.f32.mrb[89].mxu0  ;;  %v2064_v15 = vpop.f32.mrb[121].mxu1  ;;  %v4233_v20 = vld [vmem:[#allocation3_spill] sm:$0xff] }
 0x206   :  { %v2065_v62 = vadd.f32 %v2064_v15, %v3855_v23  ;;  %v1858_v16 = vpop.f32.mrb[90].mxu0  ;;  %v2638_v7 = vpop.f32.mrb[122].mxu1 }
 0x207   :  { %v2249_v41 = vmax.f32 %v2073_v24, 0.0  ;;  %v4030_v25 = vadd.f32 %v1858_v16, %v3800_v6  ;;  %v2076_v32 = vadd.f32 %v2638_v7, %v3870_v35  ;;  %v1860_v33 = vpop.f32.mrb[91].mxu0  ;;  %v2067_v4 = vpop.f32.mrb[123].mxu1 }
 0x208   :  { %v2247_v12 = vmax.f32 %v2065_v62, 0.0  ;;  %v2068_v61 = vadd.f32 %v2067_v4, %v3860_v27  ;;  %v4234_v33 = vld [vmem:[#allocation4_spill] sm:$0xff] }
 0x209   :  { %2313 = vst [vmem:[%s4216_s2 + $0xd0] sm:$0xff] %v2249_v41  ;;  %v2250_v31 = vmax.f32 %v2076_v32, 0.0 }
 0x20a   :  { %2311 = vst [vmem:[%s4216_s2 + $0xc0] sm:$0xff] %v2247_v12  ;;  %v2248_v23 = vmax.f32 %v2068_v61, 0.0 }
 0x20b   :  { %2314 = vst [vmem:[%s4216_s2 + $0xd8] sm:$0xff] %v2250_v31 }
 0x20c   :  { %2312 = vst [vmem:[%s4216_s2 + $0xc8] sm:$0xff] %v2248_v23  ;;  %v1863_v6 = vpop.f32.mrb[92].mxu0  ;;  %v2641_v27 = vpop.f32.mrb[124].mxu1 }
 0x20d   :  { %v4047_v35 = vadd.f32 %v1863_v6, %v3804_v14  ;;  %v2089_v58 = vadd.f32 %v2641_v27, %v3885_v47  ;;  %v1865_v0 = vpop.f32.mrb[93].mxu0  ;;  %v2080_v56 = vpop.f32.mrb[125].mxu1  ;;  %v4235_v27 = vld [vmem:[#allocation5_spill] sm:$0xff] }
 0x20e   :  { %v2081_v46 = vadd.f32 %v2080_v56, %v3875_v39  ;;  %v1866_v28 = vpop.f32.mrb[94].mxu0  ;;  %v2642_v26 = vpop.f32.mrb[126].mxu1 }
 0x20f   :  { %v2253_v18 = vmax.f32 %v2089_v58, 0.0  ;;  %v4052_v42 = vadd.f32 %v1866_v28, %v3808_v21  ;;  %v2092_v37 = vadd.f32 %v2642_v26, %v3890_v51  ;;  %v1868_v60 = vpop.f32.mrb[95].mxu0  ;;  %v2083_v1 = vpop.f32.mrb[127].mxu1 }
 0x210   :  { %v2251_v38 = vmax.f32 %v2081_v46, 0.0  ;;  %v2084_v14 = vadd.f32 %v2083_v1, %v3880_v43  ;;  %v4236_v60 = vld [vmem:[#allocation6_spill] sm:$0xff] }
 0x211   :  { %2317 = vst [vmem:[%s4216_s2 + $0xf0] sm:$0xff] %v2253_v18  ;;  %v2254_v47 = vmax.f32 %v2092_v37, 0.0 }
 0x212   :  { %2315 = vst [vmem:[%s4216_s2 + $0xe0] sm:$0xff] %v2251_v38  ;;  %v2252_v39 = vmax.f32 %v2084_v14, 0.0 }
 0x213   :  { %2318 = vst [vmem:[%s4216_s2 + $0xf8] sm:$0xff] %v2254_v47 }
 0x214   :  { %2316 = vst [vmem:[%s4216_s2 + $0xe8] sm:$0xff] %v2252_v39  ;;  %v1871_v21 = vpop.f32.mrb[96].mxu0  ;;  %v2645_v43 = vpop.f32.mrb[128].mxu1 }
 0x215   :  { %v4069_v51 = vadd.f32 %v1871_v21, %v3812_v34  ;;  %v2105_v13 = vadd.f32 %v2645_v43, %v3915_v49  ;;  %v1873_v29 = vpop.f32.mrb[97].mxu0  ;;  %v2096_v19 = vpop.f32.mrb[129].mxu1  ;;  %v4237_v43 = vld [vmem:[#allocation7_spill] sm:$0xff] }
 0x216   :  { %v2097_v63 = vadd.f32 %v2096_v19, %v3893_v55  ;;  %v1874_v30 = vpop.f32.mrb[98].mxu0  ;;  %v2646_v10 = vpop.f32.mrb[130].mxu1 }
 0x217   :  { %v2257_v48 = vmax.f32 %v2105_v13, 0.0  ;;  %v4074_v50 = vadd.f32 %v1874_v30, %v4232_v2  ;;  %v2108_v45 = vadd.f32 %v2646_v10, %v3920_v59  ;;  %v1876_v44 = vpop.f32.mrb[99].mxu0  ;;  %v2099_v3 = vpop.f32.mrb[131].mxu1 }
 0x218   :  { %v2255_v53 = vmax.f32 %v2097_v63, 0.0  ;;  %v2100_v34 = vadd.f32 %v2099_v3, %v3898_v52 }
 0x219   :  { %2321 = vst [vmem:[%s4216_s2 + $0x110] sm:$0xff] %v2257_v48  ;;  %v2258_v49 = vmax.f32 %v2108_v45, 0.0  ;;  %v4238_v45 = vld [vmem:[#allocation8_spill] sm:$0xff] }
 0x21a   :  { %2319 = vst [vmem:[%s4216_s2 + $0x100] sm:$0xff] %v2255_v53  ;;  %v2256_v55 = vmax.f32 %v2100_v34, 0.0 }
 0x21b   :  { %2322 = vst [vmem:[%s4216_s2 + $0x118] sm:$0xff] %v2258_v49 }
 0x21c   :  { %2320 = vst [vmem:[%s4216_s2 + $0x108] sm:$0xff] %v2256_v55  ;;  %v1879_v59 = vpop.f32.mrb[100].mxu0  ;;  %v2649_v52 = vpop.f32.mrb[132].mxu1 }
 0x21d   :  { %v4091_v24 = vadd.f32 %v1879_v59, %v4233_v20  ;;  %v2121_v9 = vadd.f32 %v2649_v52, %v3959_v54  ;;  %v1881_v15 = vpop.f32.mrb[101].mxu0  ;;  %v2112_v62 = vpop.f32.mrb[133].mxu1  ;;  %v4239_v59 = vld [vmem:[#allocation9_spill] sm:$0xff] }
 0x21e   :  { %v2113_v16 = vadd.f32 %v2112_v62, %v3937_v17  ;;  %v1882_v7 = vpop.f32.mrb[102].mxu0  ;;  %v2650_v41 = vpop.f32.mrb[134].mxu1 }
 0x21f   :  { %v2261_v32 = vmax.f32 %v2121_v9, 0.0  ;;  %v4096_v4 = vadd.f32 %v1882_v7, %v4234_v33  ;;  %v2124_v12 = vadd.f32 %v2650_v41, %v3964_v57  ;;  %v1884_v61 = vpop.f32.mrb[103].mxu0  ;;  %v2115_v31 = vpop.f32.mrb[135].mxu1 }
 0x220   :  { %v2259_v23 = vmax.f32 %v2113_v16, 0.0  ;;  %v2116_v6 = vadd.f32 %v2115_v31, %v3942_v8 }
 0x221   :  { %2325 = vst [vmem:[%s4216_s2 + $0x130] sm:$0xff] %v2261_v32  ;;  %v2262_v54 = vmax.f32 %v2124_v12, 0.0  ;;  %v4240_v32 = vld [vmem:[#allocation10_spill] sm:$0xff] }
 0x222   :  { %2323 = vst [vmem:[%s4216_s2 + $0x120] sm:$0xff] %v2259_v23  ;;  %v2260_v17 = vmax.f32 %v2116_v6, 0.0 }
 0x223   :  { %2326 = vst [vmem:[%s4216_s2 + $0x138] sm:$0xff] %v2262_v54  ;;  %v4241_v54 = vld [vmem:[#allocation11_spill] sm:$0xff] }
 0x224   :  { %2324 = vst [vmem:[%s4216_s2 + $0x128] sm:$0xff] %v2260_v17  ;;  %v1887_v57 = vpop.f32.mrb[104].mxu0  ;;  %v2653_v8 = vpop.f32.mrb[136].mxu1 }
 0x225   :  { %v4113_v58 = vadd.f32 %v1887_v57, %v4235_v27  ;;  %v2137_v0 = vadd.f32 %v2653_v8, %v4003_v36  ;;  %v1889_v56 = vpop.f32.mrb[105].mxu0  ;;  %v2128_v46 = vpop.f32.mrb[137].mxu1 }
 0x226   :  { %v2129_v28 = vadd.f32 %v2128_v46, %v3981_v22  ;;  %v1890_v26 = vpop.f32.mrb[106].mxu0  ;;  %v2654_v18 = vpop.f32.mrb[138].mxu1 }
 0x227   :  { %v2265_v37 = vmax.f32 %v2137_v0, 0.0  ;;  %v4118_v1 = vadd.f32 %v1890_v26, %v4236_v60  ;;  %v2140_v38 = vadd.f32 %v2654_v18, %v4008_v40  ;;  %v1892_v14 = vpop.f32.mrb[107].mxu0  ;;  %v2131_v47 = vpop.f32.mrb[139].mxu1  ;;  %v4242_v26 = vld [vmem:[#allocation12_spill] sm:$0xff] }
 0x228   :  { %v2263_v39 = vmax.f32 %v2129_v28, 0.0  ;;  %v2132_v21 = vadd.f32 %v2131_v47, %v3986_v5 }
 0x229   :  { %2329 = vst [vmem:[%s4216_s2 + $0x150] sm:$0xff] %v2265_v37  ;;  %v2266_v36 = vmax.f32 %v2140_v38, 0.0 }
 0x22a   :  { %2327 = vst [vmem:[%s4216_s2 + $0x140] sm:$0xff] %v2263_v39  ;;  %v2264_v22 = vmax.f32 %v2132_v21, 0.0 }
 0x22b   :  { %2330 = vst [vmem:[%s4216_s2 + $0x158] sm:$0xff] %v2266_v36  ;;  %v4243_v36 = vld [vmem:[#allocation13_spill] sm:$0xff] }
 0x22c   :  { %2328 = vst [vmem:[%s4216_s2 + $0x148] sm:$0xff] %v2264_v22  ;;  %v1895_v40 = vpop.f32.mrb[108].mxu0  ;;  %v2657_v5 = vpop.f32.mrb[140].mxu1 }
 0x22d   :  { %v1896_v13 = vadd.f32 %v1895_v40, %v4237_v43  ;;  %v2153_v29 = vadd.f32 %v2657_v5, %v4047_v35  ;;  %v1897_v19 = vpop.f32.mrb[109].mxu0  ;;  %v2144_v63 = vpop.f32.mrb[141].mxu1 }
 0x22e   :  { %v2145_v30 = vadd.f32 %v2144_v63, %v4025_v11  ;;  %v1898_v10 = vpop.f32.mrb[110].mxu0  ;;  %v2658_v48 = vpop.f32.mrb[142].mxu1 }
 0x22f   :  { %v2269_v2 = vmax.f32 %v2153_v29, 0.0  ;;  %v1899_v44 = vadd.f32 %v1898_v10, %v4238_v45  ;;  %v2156_v3 = vadd.f32 %v2658_v48, %v4052_v42  ;;  %v1900_v53 = vpop.f32.mrb[111].mxu0  ;;  %v2147_v34 = vpop.f32.mrb[143].mxu1 }
 0x230   :  { %v2267_v49 = vmax.f32 %v2145_v30, 0.0  ;;  %v2148_v55 = vadd.f32 %v2147_v34, %v4030_v25  ;;  %v4244_v30 = vld [vmem:[#allocation14_spill] sm:$0xff] }
 0x231   :  { %2333 = vst [vmem:[%s4216_s2 + $0x170] sm:$0xff] %v2269_v2  ;;  %v2270_v35 = vmax.f32 %v2156_v3, 0.0 }
 0x232   :  { %2331 = vst [vmem:[%s4216_s2 + $0x160] sm:$0xff] %v2267_v49  ;;  %v2268_v11 = vmax.f32 %v2148_v55, 0.0 }
 0x233   :  { %2334 = vst [vmem:[%s4216_s2 + $0x178] sm:$0xff] %v2270_v35  ;;  %v4245_v35 = vld [vmem:[#allocation15_spill] sm:$0xff] }
 0x234   :  { %2332 = vst [vmem:[%s4216_s2 + $0x168] sm:$0xff] %v2268_v11  ;;  %v1903_v42 = vpop.f32.mrb[112].mxu0  ;;  %v2661_v25 = vpop.f32.mrb[144].mxu1 }
 0x235   :  { %v1904_v52 = vadd.f32 %v1903_v42, %v4239_v59  ;;  %v2169_v20 = vadd.f32 %v2661_v25, %v4091_v24  ;;  %v1905_v9 = vpop.f32.mrb[113].mxu0  ;;  %v2160_v15 = vpop.f32.mrb[145].mxu1 }
 0x236   :  { %v2161_v62 = vadd.f32 %v2160_v15, %v4069_v51  ;;  %v1906_v16 = vpop.f32.mrb[114].mxu0  ;;  %v2662_v7 = vpop.f32.mrb[146].mxu1  ;;  %v4246_v15 = vld [vmem:[#allocation16_spill] sm:$0xff] }
 0x237   :  { %v2273_v41 = vmax.f32 %v2169_v20, 0.0  ;;  %v1907_v33 = vadd.f32 %v1906_v16, %v4240_v32  ;;  %v2172_v12 = vadd.f32 %v2662_v7, %v4096_v4  ;;  %v1908_v61 = vpop.f32.mrb[115].mxu0  ;;  %v2163_v31 = vpop.f32.mrb[147].mxu1 }
 0x238   :  { %v2271_v23 = vmax.f32 %v2161_v62, 0.0  ;;  %v2164_v6 = vadd.f32 %v2163_v31, %v4074_v50 }
 0x239   :  { %2337 = vst [vmem:[%s4216_s2 + $0x190] sm:$0xff] %v2273_v41  ;;  %v2274_v24 = vmax.f32 %v2172_v12, 0.0 }
 0x23a   :  { %2335 = vst [vmem:[%s4216_s2 + $0x180] sm:$0xff] %v2271_v23  ;;  %v2272_v51 = vmax.f32 %v2164_v6, 0.0 }
 0x23b   :  { %2338 = vst [vmem:[%s4216_s2 + $0x198] sm:$0xff] %v2274_v24 }
 0x23c   :  { %2336 = vst [vmem:[%s4216_s2 + $0x188] sm:$0xff] %v2272_v51  ;;  %v1911_v4 = vpop.f32.mrb[116].mxu0  ;;  %v2665_v50 = vpop.f32.mrb[148].mxu1 }
 0x23d   :  { %v1912_v17 = vadd.f32 %v1911_v4, %v4241_v54  ;;  %v2185_v57 = vadd.f32 %v2665_v50, %v1896_v13  ;;  %v1913_v8 = vpop.f32.mrb[117].mxu0  ;;  %v2176_v27 = vpop.f32.mrb[149].mxu1 }
 0x23e   :  { %v2177_v0 = vadd.f32 %v2176_v27, %v4113_v58  ;;  %v1914_v56 = vpop.f32.mrb[118].mxu0  ;;  %v2666_v46 = vpop.f32.mrb[150].mxu1 }
 0x23f   :  { %v2277_v28 = vmax.f32 %v2185_v57, 0.0  ;;  %v1915_v18 = vadd.f32 %v1914_v56, %v4242_v26  ;;  %v2188_v37 = vadd.f32 %v2666_v46, %v1899_v44  ;;  %v1916_v60 = vpop.f32.mrb[119].mxu0  ;;  %v2179_v38 = vpop.f32.mrb[151].mxu1 }
 0x240   :  { %v2275_v14 = vmax.f32 %v2177_v0, 0.0  ;;  %v2180_v47 = vadd.f32 %v2179_v38, %v4118_v1 }
 0x241   :  { %2341 = vst [vmem:[%s4216_s2 + $0x1b0] sm:$0xff] %v2277_v28  ;;  %v2278_v39 = vmax.f32 %v2188_v37, 0.0 }
 0x242   :  { %2339 = vst [vmem:[%s4216_s2 + $0x1a0] sm:$0xff] %v2275_v14  ;;  %v2276_v58 = vmax.f32 %v2180_v47, 0.0 }
 0x243   :  { %2342 = vst [vmem:[%s4216_s2 + $0x1b8] sm:$0xff] %v2278_v39 }
 0x244   :  { %2340 = vst [vmem:[%s4216_s2 + $0x1a8] sm:$0xff] %v2276_v58  ;;  %v1919_v21 = vpop.f32.mrb[120].mxu0  ;;  %v2669_v1 = vpop.f32.mrb[152].mxu1 }
 0x245   :  { %v1920_v22 = vadd.f32 %v1919_v21, %v4243_v36  ;;  %v2201_v40 = vadd.f32 %v2669_v1, %v1912_v17  ;;  %v1921_v5 = vpop.f32.mrb[121].mxu0  ;;  %v2192_v43 = vpop.f32.mrb[153].mxu1 }
 0x246   :  { %v2193_v13 = vadd.f32 %v2192_v43, %v1904_v52  ;;  %v1922_v29 = vpop.f32.mrb[122].mxu0  ;;  %v2670_v19 = vpop.f32.mrb[154].mxu1 }
 0x247   :  { %v2281_v63 = vmax.f32 %v2201_v40, 0.0  ;;  %v1923_v10 = vadd.f32 %v1922_v29, %v4244_v30  ;;  %v2204_v48 = vadd.f32 %v2670_v19, %v1915_v18  ;;  %v1924_v2 = vpop.f32.mrb[123].mxu0  ;;  %v2195_v45 = vpop.f32.mrb[155].mxu1 }
 0x248   :  { %v2279_v44 = vmax.f32 %v2193_v13, 0.0  ;;  %v2196_v3 = vadd.f32 %v2195_v45, %v1907_v33 }
 0x249   :  { %2345 = vst [vmem:[%s4216_s2 + $0x1d0] sm:$0xff] %v2281_v63  ;;  %v2282_v53 = vmax.f32 %v2204_v48, 0.0 }
 0x24a   :  { %2343 = vst [vmem:[%s4216_s2 + $0x1c0] sm:$0xff] %v2279_v44  ;;  %v2280_v34 = vmax.f32 %v2196_v3, 0.0 }
 0x24b   :  { %2346 = vst [vmem:[%s4216_s2 + $0x1d8] sm:$0xff] %v2282_v53 }
 0x24c   :  { %2344 = vst [vmem:[%s4216_s2 + $0x1c8] sm:$0xff] %v2280_v34  ;;  %v1927_v49 = vpop.f32.mrb[124].mxu0  ;;  %v2673_v55 = vpop.f32.mrb[156].mxu1 }
 0x24d   :  { %v1928_v11 = vadd.f32 %v1927_v49, %v4245_v35  ;;  %v1929_v42 = vpop.f32.mrb[125].mxu0  ;;  %v2208_v25 = vpop.f32.mrb[157].mxu1 }
 0x24e   :  { %v2209_v59 = vadd.f32 %v2208_v25, %v1920_v22  ;;  %v1930_v52 = vpop.f32.mrb[126].mxu0  ;;  %v2674_v20 = vpop.f32.mrb[158].mxu1 }
 0x24f   :  { %v2217_v9 = vadd.f32 %v2673_v55, %v1928_v11  ;;  %v1931_v62 = vadd.f32 %v1930_v52, %v4246_v15  ;;  %v1932_v16 = vpop.f32.mrb[127].mxu0  ;;  %v2211_v7 = vpop.f32.mrb[159].mxu1 }
 0x250   :  { %v2283_v41 = vmax.f32 %v2209_v59, 0.0  ;;  %v2212_v32 = vadd.f32 %v2211_v7, %v1923_v10 }
 0x251   :  { %v2285_v33 = vmax.f32 %v2217_v9, 0.0  ;;  %v2220_v12 = vadd.f32 %v2674_v20, %v1931_v62 }
 0x252   :  { %2347 = vst [vmem:[%s4216_s2 + $0x1e0] sm:$0xff] %v2283_v41  ;;  %v2284_v61 = vmax.f32 %v2212_v32, 0.0 }
 0x253   :  { %2349 = vst [vmem:[%s4216_s2 + $0x1f0] sm:$0xff] %v2285_v33  ;;  %v2286_v31 = vmax.f32 %v2220_v12, 0.0 }
 0x254   :  { %2348 = vst [vmem:[%s4216_s2 + $0x1e8] sm:$0xff] %v2284_v61 }
 0x255   :  { %2350 = vst [vmem:[%s4216_s2 + $0x1f8] sm:$0xff] %v2286_v31 }

</bundles_post_ra>
